<compile_context>
chip_gen: v7x
topology: tpu7x:2x2x1
jax: 0.10.0
libtpu: 0.0.40
codegen_flags: <defaults>
</compile_context>

<pallas_src>
import jax
import jax.numpy as jnp
from jax import lax
from jax.experimental import pallas as pl
from jax.experimental.pallas import tpu as pltpu


# ----------------------------- fused Pallas kernel -----------------------------

def _convnet_kernel(patches_ref, w1_ref, b1_ref, w2_ref, b2_ref,
                    wfc1_ref, bfc1_ref, wfc2_ref, bfc2_ref, out_ref, a2_ref):
    """ConvNet forward for a block of M images; all activations stay in VMEM.

    Layouts (channels zero-padded to 128, living in the lane dimension):
      patches_ref : (M, 32, 1024) bf16  rows = conv1 tap i*5+j (25 padded to 32);
                                        lanes = 4 pool-quadrant blocks of 256, each
                                        holding output position p*12+q (0..143 valid)
      w1_ref      : (128, 32)     bf16  [cout, tap]
      b1_ref      : (128, 1)      f32
      w2_ref      : (9, 128, 128) bf16  [i*3+j, cout, cin]
      b2_ref      : (128, 1)      f32
      wfc1_ref    : (20, 128, 512) bf16 [c, u*12+v, out]  (torch .view order folded)
      bfc1_ref    : (1, 512)      f32
      wfc2_ref    : (512, 128)    bf16
      bfc2_ref    : (1, 128)      f32
      out_ref     : (1, M, 128)   f32   lanes 0..9 = log_softmax, rest zero
      a2_ref      : (M*128, 128)  f32   VMEM scratch, row = m*128 + cout, lane = pos
    """
    f32 = jnp.float32
    bf16 = jnp.bfloat16
    m_block = patches_ref.shape[0]

    # Hoisted loads / broadcasts (JAX does not CSE broadcast_in_dim inside loops).
    w1 = w1_ref[...]                                               # (128, 32) bf16
    b1 = b1_ref[...]                                               # (128, 1)  f32
    b2 = b2_ref[...]                                               # (128, 1)  f32
    pos_ok = lax.broadcasted_iota(jnp.int32, (128, 256), 1) < 144  # valid p*12+q

    # -------- per-image conv stage (conv1 + pool -> conv2), results into VMEM ----
    def conv_one_image(m, carry):
        p1 = patches_ref[m]                                        # (32, 1024) bf16

        # conv1 as ONE (128,32)@(32,1024) MXU pass; the 2x2 max-pool is the max
        # over the four 256-lane pool-quadrant blocks of the result.
        c1 = jnp.dot(w1, p1, preferred_element_type=f32)           # (128, 1024)
        pooled = jnp.maximum(jnp.maximum(c1[:, 0:256], c1[:, 256:512]),
                             jnp.maximum(c1[:, 512:768], c1[:, 768:1024]))
        # bias + ReLU commute with the max-pool; zero the 112 padding lanes so the
        # bias cannot leak into conv2's shifted reads.
        pooled = jnp.where(pos_ok, jnp.maximum(pooled + b1, 0.0), 0.0)
        pooled = pooled.astype(bf16)                               # (128, 256)

        # conv2: 3x3 implicit GEMM -- 9 lane-shifted (128,128)@(128,128) matmuls.
        acc2 = jnp.zeros((128, 128), f32)
        for i in range(3):
            for j in range(3):
                shift = i * 12 + j
                acc2 = acc2 + jnp.dot(w2_ref[i * 3 + j],
                                      pooled[:, shift:shift + 128],
                                      preferred_element_type=f32)
        # TODO(synk): nn.Dropout2d() train-mode stochastic channel masking is not
        # reproduced; treated as eval-mode identity (deterministic forward).
        a2 = jnp.maximum(acc2 + b2, 0.0)          # (128, 128) f32, [cout, u*12+v]

        row0 = pl.multiple_of(m * 128, 128)
        a2_ref[pl.ds(row0, 128), :] = a2          # contiguous per-image tile store
        return carry

    lax.fori_loop(0, m_block, conv_one_image, 0)

    # -------- batched fc1 + ReLU: f32 sum of 20 (M,128)@(128,512) matmuls --------
    acc1 = jnp.zeros((m_block, 512), f32)
    for c in range(20):
        # rows {c, c+128, ...}: image-major (M,128) LHS for channel c, no relayout.
        lhs_c = a2_ref[pl.ds(c, m_block, stride=128), :]
        acc1 = acc1 + jnp.dot(lhs_c.astype(bf16), wfc1_ref[c],
                              preferred_element_type=f32)
    h1 = jnp.maximum(acc1 + bfc1_ref[...], 0.0)                    # (M, 512) f32

    # -------- batched fc2 + log_softmax over the 10 valid lanes ------------------
    logits = jnp.dot(h1.astype(bf16), wfc2_ref[...],
                     preferred_element_type=f32) + bfc2_ref[...]   # (M, 128)
    lane = lax.broadcasted_iota(jnp.int32, (m_block, 128), 1)
    logits = jnp.where(lane < 10, logits, -jnp.inf)
    mx = jnp.max(logits, axis=-1, keepdims=True)
    z = logits - mx
    lse = jnp.log(jnp.sum(jnp.exp(z), axis=-1, keepdims=True))
    out_ref[0] = jnp.where(lane < 10, z - lse, 0.0)


# ------------------------------- JAX wrappers -----------------------------------

def _conv1_patches(x):
    """im2col for conv1 (5x5, Cin=1), pre-arranged for the fused kernel.

    Output (B, 32, 1024) bf16: rows = tap i*5+j (padded 25->32); lanes = 4 pool
    quadrants (a,b) of 256 lanes each, holding output position p*12+q (0..143),
    i.e. patch value x[2p+a+i, 2q+b+j].
    """
    B = x.shape[0]
    xs = x[:, 0]                                             # (B, 28, 28)
    taps = [xs[:, i:i + 24, j:j + 24] for i in range(5) for j in range(5)]
    pat = jnp.stack(taps, axis=1)                            # (B, 25, 24, 24)
    pat = pat.reshape(B, 25, 12, 2, 12, 2)                   # ho = 2p+a, wo = 2q+b
    pat = pat.transpose(0, 1, 3, 5, 2, 4)                    # (B, 25, a, b, p, q)
    pat = pat.reshape(B, 25, 4, 144)
    pat = jnp.pad(pat, ((0, 0), (0, 7), (0, 0), (0, 112)))   # (B, 32, 4, 256)
    return pat.reshape(B, 32, 1024).astype(jnp.bfloat16)


def prep_params(p):
    """One-time weight packing: pad channels to 128, bf16 GEMM weights, and fold all
    layout permutations (incl. torch's NCHW flatten for fc1) into the weights."""
    f32, bf16 = jnp.float32, jnp.bfloat16

    # conv1 (10,1,5,5) -> (128, 32): [cout, i*5+j]
    w1 = p["conv1_w"].reshape(10, 25)
    w1T = jnp.zeros((128, 32), f32).at[:10, :25].set(w1).astype(bf16)
    b1 = jnp.zeros((128, 1), f32).at[:10, 0].set(p["conv1_b"])

    # conv2 (20,10,3,3) -> (9, 128, 128): [i*3+j, cout, cin]
    w2 = p["conv2_w"].transpose(2, 3, 0, 1).reshape(9, 20, 10)
    w2T = jnp.zeros((9, 128, 128), f32).at[:, :20, :10].set(w2).astype(bf16)
    b2 = jnp.zeros((128, 1), f32).at[:20, 0].set(p["conv2_b"])

    # fc1 (500, 2000) -> (20, 128, 512): [c, u*12+v, out]; torch NCHW .view order.
    wfc1 = p["fc1_w"].reshape(500, 20, 10, 10).transpose(1, 2, 3, 0)   # (20,10,10,500)
    wfc1 = jnp.pad(wfc1, ((0, 0), (0, 0), (0, 2), (0, 0)))             # pad v: 10->12
    wfc1 = wfc1.reshape(20, 120, 500)
    wfc1 = jnp.pad(wfc1, ((0, 0), (0, 8), (0, 12)))                    # (20,128,512)
    wfc1 = wfc1.astype(bf16)
    bfc1 = jnp.zeros((1, 512), f32).at[0, :500].set(p["fc1_b"])

    # fc2 (10, 500) -> (512, 128)
    wfc2 = jnp.zeros((512, 128), f32).at[:500, :10].set(p["fc2_w"].T).astype(bf16)
    bfc2 = jnp.zeros((1, 128), f32).at[0, :10].set(p["fc2_b"])

    return {"w1": w1T, "b1": b1, "w2": w2T, "b2": b2,
            "wfc1": wfc1, "bfc1": bfc1, "wfc2": wfc2, "bfc2": bfc2}


def _block_size(batch, block_m):
    """Images per grid step: largest block within the VMEM budget that still leaves
    >=2 grid steps (so both v7x TensorCores get work)."""
    if batch <= 1:
        return 1
    return max(1, min(block_m, batch // 2))


def convnet_forward(prepped, x, *, block_m=64):
    """x: (B, 1, 28, 28) float32 -> (B, 10) log-probabilities."""
    B = x.shape[0]
    m = _block_size(B, block_m)
    nb = -(-B // m)                          # cdiv
    b_pad = nb * m

    patches = _conv1_patches(x)              # (B, 32, 1024) bf16
    if b_pad != B:
        patches = jnp.pad(patches, ((0, b_pad - B), (0, 0), (0, 0)))

    flops_per_img = (2 * 128 * 32 * 1024          # conv1 GEMM
                     + 2 * 9 * 128 * 128 * 128    # conv2 implicit GEMM
                     + 2 * 20 * 128 * 512         # fc1
                     + 2 * 512 * 128)             # fc2
    weight_bytes = (128 * 32 * 2 + 9 * 128 * 128 * 2 + 20 * 128 * 512 * 2
                    + 512 * 128 * 2 + (128 + 128 + 512 + 128) * 4)
    cost = pl.CostEstimate(
        flops=flops_per_img * b_pad,
        transcendentals=130 * b_pad,
        bytes_accessed=b_pad * (32 * 1024 * 2 + 128 * 4) + weight_bytes,
    )

    out = pl.pallas_call(
        _convnet_kernel,
        out_shape=jax.ShapeDtypeStruct((nb, m, 128), jnp.float32),
        grid=(nb,),
        in_specs=[
            pl.BlockSpec((m, 32, 1024), lambda b: (b, 0, 0)),      # per-block patches
            pl.BlockSpec((128, 32), lambda b: (0, 0)),             # conv1 weight
            pl.BlockSpec((128, 1), lambda b: (0, 0)),              # conv1 bias
            pl.BlockSpec((9, 128, 128), lambda b: (0, 0, 0)),      # conv2 taps
            pl.BlockSpec((128, 1), lambda b: (0, 0)),              # conv2 bias
            pl.BlockSpec((20, 128, 512), lambda b: (0, 0, 0)),     # fc1 weight
            pl.BlockSpec((1, 512), lambda b: (0, 0)),              # fc1 bias
            pl.BlockSpec((512, 128), lambda b: (0, 0)),            # fc2 weight
            pl.BlockSpec((1, 128), lambda b: (0, 0)),              # fc2 bias
        ],
        out_specs=pl.BlockSpec((1, m, 128), lambda b: (b, 0, 0)),
        scratch_shapes=[pltpu.VMEM((m * 128, 128), jnp.float32)],  # per-block a2
        compiler_params=pltpu.CompilerParams(
            dimension_semantics=("parallel",),      # batch blocks across TensorCores
            vmem_limit_bytes=48 * 1024 * 1024,      # v7x-safe (<64 MiB physical)
        ),
        cost_estimate=cost,
    )(patches, prepped["w1"], prepped["b1"], prepped["w2"], prepped["b2"],
      prepped["wfc1"], prepped["bfc1"], prepped["wfc2"], prepped["bfc2"])

    return out.reshape(b_pad, 128)[:B, :10]


# ------------------------------- reference & init -------------------------------

def init_params(key):
    ks = jax.random.split(key, 8)

    def u(k, shape, fan_in):
        bound = 1.0 / jnp.sqrt(float(fan_in))
        return jax.random.uniform(k, shape, jnp.float32, -bound, bound)

    return {
        "conv1_w": u(ks[0], (10, 1, 5, 5), 1 * 5 * 5),
        "conv1_b": u(ks[1], (10,), 1 * 5 * 5),
        "conv2_w": u(ks[2], (20, 10, 3, 3), 10 * 3 * 3),
        "conv2_b": u(ks[3], (20,), 10 * 3 * 3),
        "fc1_w": u(ks[4], (500, 20 * 10 * 10), 20 * 10 * 10),   # torch (out, in)
        "fc1_b": u(ks[5], (500,), 20 * 10 * 10),
        "fc2_w": u(ks[6], (10, 500), 500),
        "fc2_b": u(ks[7], (10,), 500),
    }


def reference_forward(p, x):
    """Plain-XLA f32 reference of the PyTorch module (eval mode)."""
    dn = ("NCHW", "OIHW", "NCHW")
    y = lax.conv_general_dilated(x, p["conv1_w"], (1, 1), "VALID",
                                 dimension_numbers=dn)
    y = jnp.maximum(y + p["conv1_b"][None, :, None, None], 0.0)
    y = lax.reduce_window(y, -jnp.inf, lax.max, (1, 1, 2, 2), (1, 1, 2, 2), "VALID")
    y = lax.conv_general_dilated(y, p["conv2_w"], (1, 1), "VALID",
                                 dimension_numbers=dn)
    y = jnp.maximum(y + p["conv2_b"][None, :, None, None], 0.0)
    y = y.reshape(x.shape[0], -1)
    y = jnp.maximum(y @ p["fc1_w"].T + p["fc1_b"], 0.0)
    y = y @ p["fc2_w"].T + p["fc2_b"]
    return jax.nn.log_softmax(y, axis=1)


if __name__ == "__main__":
    key = jax.random.PRNGKey(0)
    pkey, xkey = jax.random.split(key)
    params = init_params(pkey)
    # Input size is fixed by fc1 (20*10*10 features => 28x28 single-channel input).
    # Batch of 8 -> 2 grid steps of 4 images each (exercises batched blocking).
    x = jax.random.normal(xkey, (8, 1, 28, 28), jnp.float32)

    prepped = prep_params(params)            # one-time weight packing (off hot path)
    fwd = jax.jit(convnet_forward)
    out = jax.block_until_ready(fwd(prepped, x))

    assert out.shape == (8, 10), out.shape
    # log_softmax rows must sum to ~1 in probability space
    assert bool(jnp.all(jnp.abs(jnp.sum(jnp.exp(out), axis=1) - 1.0) < 1e-3))
    # compare against the plain-XLA f32 reference (bf16 MXU inputs -> loose tol)
    ref = jax.jit(reference_forward)(params, x)
    err = float(jnp.max(jnp.abs(out - ref)))
    assert err < 1e-1, err
    print("KERNEL_OK")
</pallas_src>

<mosaic_0001>
module attributes {stable_mosaic.version = 11 : i64} {
  func.func @_convnet_kernel(%arg0: i32, %arg1: memref<4x32x1024xbf16, #tpu.memory_space<vmem>>, %arg2: memref<128x32xbf16, #tpu.memory_space<vmem>>, %arg3: memref<128x1xf32, #tpu.memory_space<vmem>>, %arg4: memref<9x128x128xbf16, #tpu.memory_space<vmem>>, %arg5: memref<128x1xf32, #tpu.memory_space<vmem>>, %arg6: memref<20x128x512xbf16, #tpu.memory_space<vmem>>, %arg7: memref<1x512xf32, #tpu.memory_space<vmem>>, %arg8: memref<512x128xbf16, #tpu.memory_space<vmem>>, %arg9: memref<1x128xf32, #tpu.memory_space<vmem>>, %arg10: memref<1x4x128xf32, #tpu.memory_space<vmem>>, %arg11: memref<512x128xf32, #tpu.memory_space<vmem>>) attributes {dimension_semantics = [#tpu.dimension_semantics<parallel>], iteration_bounds = array<i64: 2>, scalar_prefetch = 0 : i64, scratch_operands = 1 : i64, tpu.core_type = #tpu.core_type<tc>, window_params = [{transform_indices = @transform_0, window_bounds = array<i64: 4, 32, 1024>}, {pipeline_mode = #tpu.pipeline_mode<synchronous>, transform_indices = @transform_1, window_bounds = array<i64: 128, 32>}, {pipeline_mode = #tpu.pipeline_mode<synchronous>, transform_indices = @transform_2, window_bounds = array<i64: 128, 1>}, {pipeline_mode = #tpu.pipeline_mode<synchronous>, transform_indices = @transform_3, window_bounds = array<i64: 9, 128, 128>}, {pipeline_mode = #tpu.pipeline_mode<synchronous>, transform_indices = @transform_4, window_bounds = array<i64: 128, 1>}, {pipeline_mode = #tpu.pipeline_mode<synchronous>, transform_indices = @transform_5, window_bounds = array<i64: 20, 128, 512>}, {pipeline_mode = #tpu.pipeline_mode<synchronous>, transform_indices = @transform_6, window_bounds = array<i64: 1, 512>}, {pipeline_mode = #tpu.pipeline_mode<synchronous>, transform_indices = @transform_7, window_bounds = array<i64: 512, 128>}, {pipeline_mode = #tpu.pipeline_mode<synchronous>, transform_indices = @transform_8, window_bounds = array<i64: 1, 128>}, {transform_indices = @transform_9, window_bounds = array<i64: 1, 4, 128>}]} {
    %c0 = arith.constant 0 : index
    %c0_0 = arith.constant 0 : index
    %0 = vector.load %arg2[%c0, %c0_0] : memref<128x32xbf16, #tpu.memory_space<vmem>>, vector<128x32xbf16>
    %c0_1 = arith.constant 0 : index
    %c0_2 = arith.constant 0 : index
    %1 = vector.load %arg3[%c0_1, %c0_2] : memref<128x1xf32, #tpu.memory_space<vmem>>, vector<128x1xf32>
    %c0_3 = arith.constant 0 : index
    %c0_4 = arith.constant 0 : index
    %2 = vector.load %arg5[%c0_3, %c0_4] : memref<128x1xf32, #tpu.memory_space<vmem>>, vector<128x1xf32>
    %3 = tpu.iota {dimensions = array<i32: 1>} : vector<128x256xi32>
    %c144_i32 = arith.constant 144 : i32
    %4 = vector.broadcast %c144_i32 : i32 to vector<128x256xi32>
    %5 = arith.cmpi slt, %3, %4 : vector<128x256xi32>
    %c0_i32 = arith.constant 0 : i32
    %c4_i32 = arith.constant 4 : i32
    %6 = arith.addi %c0_i32, %c4_i32 : i32
    %c1_i32 = arith.constant 1 : i32
    scf.for %arg12 = %c0_i32 to %6 step %c1_i32  : i32 {
      %161 = arith.index_cast %arg12 : i32 to index
      %c0_123 = arith.constant 0 : index
      %c0_124 = arith.constant 0 : index
      %162 = vector.load %arg1[%161, %c0_123, %c0_124] : memref<4x32x1024xbf16, #tpu.memory_space<vmem>>, vector<1x32x1024xbf16>
      %163 = vector.shape_cast %162 : vector<1x32x1024xbf16> to vector<32x1024xbf16>
      %cst_125 = arith.constant dense<0.000000e+00> : vector<128x1024xf32>
      %164 = tpu.matmul %0, %163, %cst_125 {dimension_numbers = #tpu.dot_dimension_numbers<[1], [0], [0], [1], [0, 0, 1, 1], [], []>} : vector<128x32xbf16>, vector<32x1024xbf16>, vector<128x1024xf32> -> vector<128x1024xf32>
      %165 = vector.extract_strided_slice %164 {offsets = [0, 0], sizes = [128, 256], strides = [1, 1]} : vector<128x1024xf32> to vector<128x256xf32>
      %166 = vector.extract_strided_slice %164 {offsets = [0, 256], sizes = [128, 256], strides = [1, 1]} : vector<128x1024xf32> to vector<128x256xf32>
      %167 = arith.maximumf %165, %166 : vector<128x256xf32>
      %168 = vector.extract_strided_slice %164 {offsets = [0, 512], sizes = [128, 256], strides = [1, 1]} : vector<128x1024xf32> to vector<128x256xf32>
      %169 = vector.extract_strided_slice %164 {offsets = [0, 768], sizes = [128, 256], strides = [1, 1]} : vector<128x1024xf32> to vector<128x256xf32>
      %170 = arith.maximumf %168, %169 : vector<128x256xf32>
      %171 = arith.maximumf %167, %170 : vector<128x256xf32>
      %172 = vector.broadcast %1 : vector<128x1xf32> to vector<128x256xf32>
      %173 = arith.addf %171, %172 : vector<128x256xf32>
      %cst_126 = arith.constant 0.000000e+00 : f32
      %174 = vector.broadcast %cst_126 : f32 to vector<128x256xf32>
      %175 = arith.maximumf %173, %174 : vector<128x256xf32>
      %cst_127 = arith.constant 0.000000e+00 : f32
      %176 = vector.broadcast %cst_127 : f32 to vector<128x256xf32>
      %177 = arith.select %5, %175, %176 : vector<128x256xi1>, vector<128x256xf32>
      %178 = arith.truncf %177 : vector<128x256xf32> to vector<128x256xbf16>
      %cst_128 = arith.constant 0.000000e+00 : f32
      %179 = vector.broadcast %cst_128 : f32 to vector<128x128xf32>
      %c0_129 = arith.constant 0 : index
      %c0_130 = arith.constant 0 : index
      %c0_131 = arith.constant 0 : index
      %180 = vector.load %arg4[%c0_129, %c0_130, %c0_131] : memref<9x128x128xbf16, #tpu.memory_space<vmem>>, vector<1x128x128xbf16>
      %181 = vector.shape_cast %180 : vector<1x128x128xbf16> to vector<128x128xbf16>
      %182 = vector.extract_strided_slice %178 {offsets = [0, 0], sizes = [128, 128], strides = [1, 1]} : vector<128x256xbf16> to vector<128x128xbf16>
      %cst_132 = arith.constant dense<0.000000e+00> : vector<128x128xf32>
      %183 = tpu.matmul %181, %182, %cst_132 {dimension_numbers = #tpu.dot_dimension_numbers<[1], [0], [0], [1], [0, 0, 1, 1], [], []>} : vector<128x128xbf16>, vector<128x128xbf16>, vector<128x128xf32> -> vector<128x128xf32>
      %184 = arith.addf %179, %183 : vector<128x128xf32>
      %c1_133 = arith.constant 1 : index
      %c0_134 = arith.constant 0 : index
      %c0_135 = arith.constant 0 : index
      %185 = vector.load %arg4[%c1_133, %c0_134, %c0_135] : memref<9x128x128xbf16, #tpu.memory_space<vmem>>, vector<1x128x128xbf16>
      %186 = vector.shape_cast %185 : vector<1x128x128xbf16> to vector<128x128xbf16>
      %187 = vector.extract_strided_slice %178 {offsets = [0, 1], sizes = [128, 128], strides = [1, 1]} : vector<128x256xbf16> to vector<128x128xbf16>
      %cst_136 = arith.constant dense<0.000000e+00> : vector<128x128xf32>
      %188 = tpu.matmul %186, %187, %cst_136 {dimension_numbers = #tpu.dot_dimension_numbers<[1], [0], [0], [1], [0, 0, 1, 1], [], []>} : vector<128x128xbf16>, vector<128x128xbf16>, vector<128x128xf32> -> vector<128x128xf32>
      %189 = arith.addf %184, %188 : vector<128x128xf32>
      %c2_137 = arith.constant 2 : index
      %c0_138 = arith.constant 0 : index
      %c0_139 = arith.constant 0 : index
      %190 = vector.load %arg4[%c2_137, %c0_138, %c0_139] : memref<9x128x128xbf16, #tpu.memory_space<vmem>>, vector<1x128x128xbf16>
      %191 = vector.shape_cast %190 : vector<1x128x128xbf16> to vector<128x128xbf16>
      %192 = vector.extract_strided_slice %178 {offsets = [0, 2], sizes = [128, 128], strides = [1, 1]} : vector<128x256xbf16> to vector<128x128xbf16>
      %cst_140 = arith.constant dense<0.000000e+00> : vector<128x128xf32>
      %193 = tpu.matmul %191, %192, %cst_140 {dimension_numbers = #tpu.dot_dimension_numbers<[1], [0], [0], [1], [0, 0, 1, 1], [], []>} : vector<128x128xbf16>, vector<128x128xbf16>, vector<128x128xf32> -> vector<128x128xf32>
      %194 = arith.addf %189, %193 : vector<128x128xf32>
      %c3_141 = arith.constant 3 : index
      %c0_142 = arith.constant 0 : index
      %c0_143 = arith.constant 0 : index
      %195 = vector.load %arg4[%c3_141, %c0_142, %c0_143] : memref<9x128x128xbf16, #tpu.memory_space<vmem>>, vector<1x128x128xbf16>
      %196 = vector.shape_cast %195 : vector<1x128x128xbf16> to vector<128x128xbf16>
      %197 = vector.extract_strided_slice %178 {offsets = [0, 12], sizes = [128, 128], strides = [1, 1]} : vector<128x256xbf16> to vector<128x128xbf16>
      %cst_144 = arith.constant dense<0.000000e+00> : vector<128x128xf32>
      %198 = tpu.matmul %196, %197, %cst_144 {dimension_numbers = #tpu.dot_dimension_numbers<[1], [0], [0], [1], [0, 0, 1, 1], [], []>} : vector<128x128xbf16>, vector<128x128xbf16>, vector<128x128xf32> -> vector<128x128xf32>
      %199 = arith.addf %194, %198 : vector<128x128xf32>
      %c4_145 = arith.constant 4 : index
      %c0_146 = arith.constant 0 : index
      %c0_147 = arith.constant 0 : index
      %200 = vector.load %arg4[%c4_145, %c0_146, %c0_147] : memref<9x128x128xbf16, #tpu.memory_space<vmem>>, vector<1x128x128xbf16>
      %201 = vector.shape_cast %200 : vector<1x128x128xbf16> to vector<128x128xbf16>
      %202 = vector.extract_strided_slice %178 {offsets = [0, 13], sizes = [128, 128], strides = [1, 1]} : vector<128x256xbf16> to vector<128x128xbf16>
      %cst_148 = arith.constant dense<0.000000e+00> : vector<128x128xf32>
      %203 = tpu.matmul %201, %202, %cst_148 {dimension_numbers = #tpu.dot_dimension_numbers<[1], [0], [0], [1], [0, 0, 1, 1], [], []>} : vector<128x128xbf16>, vector<128x128xbf16>, vector<128x128xf32> -> vector<128x128xf32>
      %204 = arith.addf %199, %203 : vector<128x128xf32>
      %c5_149 = arith.constant 5 : index
      %c0_150 = arith.constant 0 : index
      %c0_151 = arith.constant 0 : index
      %205 = vector.load %arg4[%c5_149, %c0_150, %c0_151] : memref<9x128x128xbf16, #tpu.memory_space<vmem>>, vector<1x128x128xbf16>
      %206 = vector.shape_cast %205 : vector<1x128x128xbf16> to vector<128x128xbf16>
      %207 = vector.extract_strided_slice %178 {offsets = [0, 14], sizes = [128, 128], strides = [1, 1]} : vector<128x256xbf16> to vector<128x128xbf16>
      %cst_152 = arith.constant dense<0.000000e+00> : vector<128x128xf32>
      %208 = tpu.matmul %206, %207, %cst_152 {dimension_numbers = #tpu.dot_dimension_numbers<[1], [0], [0], [1], [0, 0, 1, 1], [], []>} : vector<128x128xbf16>, vector<128x128xbf16>, vector<128x128xf32> -> vector<128x128xf32>
      %209 = arith.addf %204, %208 : vector<128x128xf32>
      %c6_153 = arith.constant 6 : index
      %c0_154 = arith.constant 0 : index
      %c0_155 = arith.constant 0 : index
      %210 = vector.load %arg4[%c6_153, %c0_154, %c0_155] : memref<9x128x128xbf16, #tpu.memory_space<vmem>>, vector<1x128x128xbf16>
      %211 = vector.shape_cast %210 : vector<1x128x128xbf16> to vector<128x128xbf16>
      %212 = vector.extract_strided_slice %178 {offsets = [0, 24], sizes = [128, 128], strides = [1, 1]} : vector<128x256xbf16> to vector<128x128xbf16>
      %cst_156 = arith.constant dense<0.000000e+00> : vector<128x128xf32>
      %213 = tpu.matmul %211, %212, %cst_156 {dimension_numbers = #tpu.dot_dimension_numbers<[1], [0], [0], [1], [0, 0, 1, 1], [], []>} : vector<128x128xbf16>, vector<128x128xbf16>, vector<128x128xf32> -> vector<128x128xf32>
      %214 = arith.addf %209, %213 : vector<128x128xf32>
      %c7_157 = arith.constant 7 : index
      %c0_158 = arith.constant 0 : index
      %c0_159 = arith.constant 0 : index
      %215 = vector.load %arg4[%c7_157, %c0_158, %c0_159] : memref<9x128x128xbf16, #tpu.memory_space<vmem>>, vector<1x128x128xbf16>
      %216 = vector.shape_cast %215 : vector<1x128x128xbf16> to vector<128x128xbf16>
      %217 = vector.extract_strided_slice %178 {offsets = [0, 25], sizes = [128, 128], strides = [1, 1]} : vector<128x256xbf16> to vector<128x128xbf16>
      %cst_160 = arith.constant dense<0.000000e+00> : vector<128x128xf32>
      %218 = tpu.matmul %216, %217, %cst_160 {dimension_numbers = #tpu.dot_dimension_numbers<[1], [0], [0], [1], [0, 0, 1, 1], [], []>} : vector<128x128xbf16>, vector<128x128xbf16>, vector<128x128xf32> -> vector<128x128xf32>
      %219 = arith.addf %214, %218 : vector<128x128xf32>
      %c8_161 = arith.constant 8 : index
      %c0_162 = arith.constant 0 : index
      %c0_163 = arith.constant 0 : index
      %220 = vector.load %arg4[%c8_161, %c0_162, %c0_163] : memref<9x128x128xbf16, #tpu.memory_space<vmem>>, vector<1x128x128xbf16>
      %221 = vector.shape_cast %220 : vector<1x128x128xbf16> to vector<128x128xbf16>
      %222 = vector.extract_strided_slice %178 {offsets = [0, 26], sizes = [128, 128], strides = [1, 1]} : vector<128x256xbf16> to vector<128x128xbf16>
      %cst_164 = arith.constant dense<0.000000e+00> : vector<128x128xf32>
      %223 = tpu.matmul %221, %222, %cst_164 {dimension_numbers = #tpu.dot_dimension_numbers<[1], [0], [0], [1], [0, 0, 1, 1], [], []>} : vector<128x128xbf16>, vector<128x128xbf16>, vector<128x128xf32> -> vector<128x128xf32>
      %224 = arith.addf %219, %223 : vector<128x128xf32>
      %225 = vector.broadcast %2 : vector<128x1xf32> to vector<128x128xf32>
      %226 = arith.addf %224, %225 : vector<128x128xf32>
      %cst_165 = arith.constant 0.000000e+00 : f32
      %227 = vector.broadcast %cst_165 : f32 to vector<128x128xf32>
      %228 = arith.maximumf %226, %227 : vector<128x128xf32>
      %c128_i32 = arith.constant 128 : i32
      %229 = arith.muli %arg12, %c128_i32 : i32
      %230 = tpu.assume_multiple %229, 128 : i32
      %231 = arith.index_cast %230 : i32 to index
      %c0_166 = arith.constant 0 : index
      %232 = vector.load %arg11[%231, %c0_166] : memref<512x128xf32, #tpu.memory_space<vmem>>, vector<128x128xf32>
      tpu.vector_store %arg11[%231, %c0_166], %228 {strides = array<i32>} : memref<512x128xf32, #tpu.memory_space<vmem>>, vector<128x128xf32>,
    }
    %c4_i32_5 = arith.constant 4 : i32
    %cst = arith.constant 0.000000e+00 : f32
    %7 = vector.broadcast %cst : f32 to vector<4x512xf32>
    %c0_6 = arith.constant 0 : index
    %c0_7 = arith.constant 0 : index
    %8 = tpu.strided_load %arg11[%c0_6, %c0_7] {strides = array<i32: 128, 1>} : memref<512x128xf32, #tpu.memory_space<vmem>>, vector<4x128xf32>
    %9 = arith.truncf %8 : vector<4x128xf32> to vector<4x128xbf16>
    %c0_8 = arith.constant 0 : index
    %c0_9 = arith.constant 0 : index
    %c0_10 = arith.constant 0 : index
    %10 = vector.load %arg6[%c0_8, %c0_9, %c0_10] : memref<20x128x512xbf16, #tpu.memory_space<vmem>>, vector<1x128x512xbf16>
    %11 = vector.shape_cast %10 : vector<1x128x512xbf16> to vector<128x512xbf16>
    %cst_11 = arith.constant dense<0.000000e+00> : vector<4x512xf32>
    %12 = tpu.matmul %9, %11, %cst_11 {dimension_numbers = #tpu.dot_dimension_numbers<[1], [0], [0], [1], [0, 0, 1, 1], [], []>} : vector<4x128xbf16>, vector<128x512xbf16>, vector<4x512xf32> -> vector<4x512xf32>
    %13 = arith.addf %7, %12 : vector<4x512xf32>
    %c1 = arith.constant 1 : index
    %c0_12 = arith.constant 0 : index
    %14 = tpu.strided_load %arg11[%c1, %c0_12] {strides = array<i32: 128, 1>} : memref<512x128xf32, #tpu.memory_space<vmem>>, vector<4x128xf32>
    %15 = arith.truncf %14 : vector<4x128xf32> to vector<4x128xbf16>
    %c1_13 = arith.constant 1 : index
    %c0_14 = arith.constant 0 : index
    %c0_15 = arith.constant 0 : index
    %16 = vector.load %arg6[%c1_13, %c0_14, %c0_15] : memref<20x128x512xbf16, #tpu.memory_space<vmem>>, vector<1x128x512xbf16>
    %17 = vector.shape_cast %16 : vector<1x128x512xbf16> to vector<128x512xbf16>
    %cst_16 = arith.constant dense<0.000000e+00> : vector<4x512xf32>
    %18 = tpu.matmul %15, %17, %cst_16 {dimension_numbers = #tpu.dot_dimension_numbers<[1], [0], [0], [1], [0, 0, 1, 1], [], []>} : vector<4x128xbf16>, vector<128x512xbf16>, vector<4x512xf32> -> vector<4x512xf32>
    %19 = arith.addf %13, %18 : vector<4x512xf32>
    %c2 = arith.constant 2 : index
    %c0_17 = arith.constant 0 : index
    %20 = tpu.strided_load %arg11[%c2, %c0_17] {strides = array<i32: 128, 1>} : memref<512x128xf32, #tpu.memory_space<vmem>>, vector<4x128xf32>
    %21 = arith.truncf %20 : vector<4x128xf32> to vector<4x128xbf16>
    %c2_18 = arith.constant 2 : index
    %c0_19 = arith.constant 0 : index
    %c0_20 = arith.constant 0 : index
    %22 = vector.load %arg6[%c2_18, %c0_19, %c0_20] : memref<20x128x512xbf16, #tpu.memory_space<vmem>>, vector<1x128x512xbf16>
    %23 = vector.shape_cast %22 : vector<1x128x512xbf16> to vector<128x512xbf16>
    %cst_21 = arith.constant dense<0.000000e+00> : vector<4x512xf32>
    %24 = tpu.matmul %21, %23, %cst_21 {dimension_numbers = #tpu.dot_dimension_numbers<[1], [0], [0], [1], [0, 0, 1, 1], [], []>} : vector<4x128xbf16>, vector<128x512xbf16>, vector<4x512xf32> -> vector<4x512xf32>
    %25 = arith.addf %19, %24 : vector<4x512xf32>
    %c3 = arith.constant 3 : index
    %c0_22 = arith.constant 0 : index
    %26 = tpu.strided_load %arg11[%c3, %c0_22] {strides = array<i32: 128, 1>} : memref<512x128xf32, #tpu.memory_space<vmem>>, vector<4x128xf32>
    %27 = arith.truncf %26 : vector<4x128xf32> to vector<4x128xbf16>
    %c3_23 = arith.constant 3 : index
    %c0_24 = arith.constant 0 : index
    %c0_25 = arith.constant 0 : index
    %28 = vector.load %arg6[%c3_23, %c0_24, %c0_25] : memref<20x128x512xbf16, #tpu.memory_space<vmem>>, vector<1x128x512xbf16>
    %29 = vector.shape_cast %28 : vector<1x128x512xbf16> to vector<128x512xbf16>
    %cst_26 = arith.constant dense<0.000000e+00> : vector<4x512xf32>
    %30 = tpu.matmul %27, %29, %cst_26 {dimension_numbers = #tpu.dot_dimension_numbers<[1], [0], [0], [1], [0, 0, 1, 1], [], []>} : vector<4x128xbf16>, vector<128x512xbf16>, vector<4x512xf32> -> vector<4x512xf32>
    %31 = arith.addf %25, %30 : vector<4x512xf32>
    %c4 = arith.constant 4 : index
    %c0_27 = arith.constant 0 : index
    %32 = tpu.strided_load %arg11[%c4, %c0_27] {strides = array<i32: 128, 1>} : memref<512x128xf32, #tpu.memory_space<vmem>>, vector<4x128xf32>
    %33 = arith.truncf %32 : vector<4x128xf32> to vector<4x128xbf16>
    %c4_28 = arith.constant 4 : index
    %c0_29 = arith.constant 0 : index
    %c0_30 = arith.constant 0 : index
    %34 = vector.load %arg6[%c4_28, %c0_29, %c0_30] : memref<20x128x512xbf16, #tpu.memory_space<vmem>>, vector<1x128x512xbf16>
    %35 = vector.shape_cast %34 : vector<1x128x512xbf16> to vector<128x512xbf16>
    %cst_31 = arith.constant dense<0.000000e+00> : vector<4x512xf32>
    %36 = tpu.matmul %33, %35, %cst_31 {dimension_numbers = #tpu.dot_dimension_numbers<[1], [0], [0], [1], [0, 0, 1, 1], [], []>} : vector<4x128xbf16>, vector<128x512xbf16>, vector<4x512xf32> -> vector<4x512xf32>
    %37 = arith.addf %31, %36 : vector<4x512xf32>
    %c5 = arith.constant 5 : index
    %c0_32 = arith.constant 0 : index
    %38 = tpu.strided_load %arg11[%c5, %c0_32] {strides = array<i32: 128, 1>} : memref<512x128xf32, #tpu.memory_space<vmem>>, vector<4x128xf32>
    %39 = arith.truncf %38 : vector<4x128xf32> to vector<4x128xbf16>
    %c5_33 = arith.constant 5 : index
    %c0_34 = arith.constant 0 : index
    %c0_35 = arith.constant 0 : index
    %40 = vector.load %arg6[%c5_33, %c0_34, %c0_35] : memref<20x128x512xbf16, #tpu.memory_space<vmem>>, vector<1x128x512xbf16>
    %41 = vector.shape_cast %40 : vector<1x128x512xbf16> to vector<128x512xbf16>
    %cst_36 = arith.constant dense<0.000000e+00> : vector<4x512xf32>
    %42 = tpu.matmul %39, %41, %cst_36 {dimension_numbers = #tpu.dot_dimension_numbers<[1], [0], [0], [1], [0, 0, 1, 1], [], []>} : vector<4x128xbf16>, vector<128x512xbf16>, vector<4x512xf32> -> vector<4x512xf32>
    %43 = arith.addf %37, %42 : vector<4x512xf32>
    %c6 = arith.constant 6 : index
    %c0_37 = arith.constant 0 : index
    %44 = tpu.strided_load %arg11[%c6, %c0_37] {strides = array<i32: 128, 1>} : memref<512x128xf32, #tpu.memory_space<vmem>>, vector<4x128xf32>
    %45 = arith.truncf %44 : vector<4x128xf32> to vector<4x128xbf16>
    %c6_38 = arith.constant 6 : index
    %c0_39 = arith.constant 0 : index
    %c0_40 = arith.constant 0 : index
    %46 = vector.load %arg6[%c6_38, %c0_39, %c0_40] : memref<20x128x512xbf16, #tpu.memory_space<vmem>>, vector<1x128x512xbf16>
    %47 = vector.shape_cast %46 : vector<1x128x512xbf16> to vector<128x512xbf16>
    %cst_41 = arith.constant dense<0.000000e+00> : vector<4x512xf32>
    %48 = tpu.matmul %45, %47, %cst_41 {dimension_numbers = #tpu.dot_dimension_numbers<[1], [0], [0], [1], [0, 0, 1, 1], [], []>} : vector<4x128xbf16>, vector<128x512xbf16>, vector<4x512xf32> -> vector<4x512xf32>
    %49 = arith.addf %43, %48 : vector<4x512xf32>
    %c7 = arith.constant 7 : index
    %c0_42 = arith.constant 0 : index
    %50 = tpu.strided_load %arg11[%c7, %c0_42] {strides = array<i32: 128, 1>} : memref<512x128xf32, #tpu.memory_space<vmem>>, vector<4x128xf32>
    %51 = arith.truncf %50 : vector<4x128xf32> to vector<4x128xbf16>
    %c7_43 = arith.constant 7 : index
    %c0_44 = arith.constant 0 : index
    %c0_45 = arith.constant 0 : index
    %52 = vector.load %arg6[%c7_43, %c0_44, %c0_45] : memref<20x128x512xbf16, #tpu.memory_space<vmem>>, vector<1x128x512xbf16>
    %53 = vector.shape_cast %52 : vector<1x128x512xbf16> to vector<128x512xbf16>
    %cst_46 = arith.constant dense<0.000000e+00> : vector<4x512xf32>
    %54 = tpu.matmul %51, %53, %cst_46 {dimension_numbers = #tpu.dot_dimension_numbers<[1], [0], [0], [1], [0, 0, 1, 1], [], []>} : vector<4x128xbf16>, vector<128x512xbf16>, vector<4x512xf32> -> vector<4x512xf32>
    %55 = arith.addf %49, %54 : vector<4x512xf32>
    %c8 = arith.constant 8 : index
    %c0_47 = arith.constant 0 : index
    %56 = tpu.strided_load %arg11[%c8, %c0_47] {strides = array<i32: 128, 1>} : memref<512x128xf32, #tpu.memory_space<vmem>>, vector<4x128xf32>
    %57 = arith.truncf %56 : vector<4x128xf32> to vector<4x128xbf16>
    %c8_48 = arith.constant 8 : index
    %c0_49 = arith.constant 0 : index
    %c0_50 = arith.constant 0 : index
    %58 = vector.load %arg6[%c8_48, %c0_49, %c0_50] : memref<20x128x512xbf16, #tpu.memory_space<vmem>>, vector<1x128x512xbf16>
    %59 = vector.shape_cast %58 : vector<1x128x512xbf16> to vector<128x512xbf16>
    %cst_51 = arith.constant dense<0.000000e+00> : vector<4x512xf32>
    %60 = tpu.matmul %57, %59, %cst_51 {dimension_numbers = #tpu.dot_dimension_numbers<[1], [0], [0], [1], [0, 0, 1, 1], [], []>} : vector<4x128xbf16>, vector<128x512xbf16>, vector<4x512xf32> -> vector<4x512xf32>
    %61 = arith.addf %55, %60 : vector<4x512xf32>
    %c9 = arith.constant 9 : index
    %c0_52 = arith.constant 0 : index
    %62 = tpu.strided_load %arg11[%c9, %c0_52] {strides = array<i32: 128, 1>} : memref<512x128xf32, #tpu.memory_space<vmem>>, vector<4x128xf32>
    %63 = arith.truncf %62 : vector<4x128xf32> to vector<4x128xbf16>
    %c9_53 = arith.constant 9 : index
    %c0_54 = arith.constant 0 : index
    %c0_55 = arith.constant 0 : index
    %64 = vector.load %arg6[%c9_53, %c0_54, %c0_55] : memref<20x128x512xbf16, #tpu.memory_space<vmem>>, vector<1x128x512xbf16>
    %65 = vector.shape_cast %64 : vector<1x128x512xbf16> to vector<128x512xbf16>
    %cst_56 = arith.constant dense<0.000000e+00> : vector<4x512xf32>
    %66 = tpu.matmul %63, %65, %cst_56 {dimension_numbers = #tpu.dot_dimension_numbers<[1], [0], [0], [1], [0, 0, 1, 1], [], []>} : vector<4x128xbf16>, vector<128x512xbf16>, vector<4x512xf32> -> vector<4x512xf32>
    %67 = arith.addf %61, %66 : vector<4x512xf32>
    %c10 = arith.constant 10 : index
    %c0_57 = arith.constant 0 : index
    %68 = tpu.strided_load %arg11[%c10, %c0_57] {strides = array<i32: 128, 1>} : memref<512x128xf32, #tpu.memory_space<vmem>>, vector<4x128xf32>
    %69 = arith.truncf %68 : vector<4x128xf32> to vector<4x128xbf16>
    %c10_58 = arith.constant 10 : index
    %c0_59 = arith.constant 0 : index
    %c0_60 = arith.constant 0 : index
    %70 = vector.load %arg6[%c10_58, %c0_59, %c0_60] : memref<20x128x512xbf16, #tpu.memory_space<vmem>>, vector<1x128x512xbf16>
    %71 = vector.shape_cast %70 : vector<1x128x512xbf16> to vector<128x512xbf16>
    %cst_61 = arith.constant dense<0.000000e+00> : vector<4x512xf32>
    %72 = tpu.matmul %69, %71, %cst_61 {dimension_numbers = #tpu.dot_dimension_numbers<[1], [0], [0], [1], [0, 0, 1, 1], [], []>} : vector<4x128xbf16>, vector<128x512xbf16>, vector<4x512xf32> -> vector<4x512xf32>
    %73 = arith.addf %67, %72 : vector<4x512xf32>
    %c11 = arith.constant 11 : index
    %c0_62 = arith.constant 0 : index
    %74 = tpu.strided_load %arg11[%c11, %c0_62] {strides = array<i32: 128, 1>} : memref<512x128xf32, #tpu.memory_space<vmem>>, vector<4x128xf32>
    %75 = arith.truncf %74 : vector<4x128xf32> to vector<4x128xbf16>
    %c11_63 = arith.constant 11 : index
    %c0_64 = arith.constant 0 : index
    %c0_65 = arith.constant 0 : index
    %76 = vector.load %arg6[%c11_63, %c0_64, %c0_65] : memref<20x128x512xbf16, #tpu.memory_space<vmem>>, vector<1x128x512xbf16>
    %77 = vector.shape_cast %76 : vector<1x128x512xbf16> to vector<128x512xbf16>
    %cst_66 = arith.constant dense<0.000000e+00> : vector<4x512xf32>
    %78 = tpu.matmul %75, %77, %cst_66 {dimension_numbers = #tpu.dot_dimension_numbers<[1], [0], [0], [1], [0, 0, 1, 1], [], []>} : vector<4x128xbf16>, vector<128x512xbf16>, vector<4x512xf32> -> vector<4x512xf32>
    %79 = arith.addf %73, %78 : vector<4x512xf32>
    %c12 = arith.constant 12 : index
    %c0_67 = arith.constant 0 : index
    %80 = tpu.strided_load %arg11[%c12, %c0_67] {strides = array<i32: 128, 1>} : memref<512x128xf32, #tpu.memory_space<vmem>>, vector<4x128xf32>
    %81 = arith.truncf %80 : vector<4x128xf32> to vector<4x128xbf16>
    %c12_68 = arith.constant 12 : index
    %c0_69 = arith.constant 0 : index
    %c0_70 = arith.constant 0 : index
    %82 = vector.load %arg6[%c12_68, %c0_69, %c0_70] : memref<20x128x512xbf16, #tpu.memory_space<vmem>>, vector<1x128x512xbf16>
    %83 = vector.shape_cast %82 : vector<1x128x512xbf16> to vector<128x512xbf16>
    %cst_71 = arith.constant dense<0.000000e+00> : vector<4x512xf32>
    %84 = tpu.matmul %81, %83, %cst_71 {dimension_numbers = #tpu.dot_dimension_numbers<[1], [0], [0], [1], [0, 0, 1, 1], [], []>} : vector<4x128xbf16>, vector<128x512xbf16>, vector<4x512xf32> -> vector<4x512xf32>
    %85 = arith.addf %79, %84 : vector<4x512xf32>
    %c13 = arith.constant 13 : index
    %c0_72 = arith.constant 0 : index
    %86 = tpu.strided_load %arg11[%c13, %c0_72] {strides = array<i32: 128, 1>} : memref<512x128xf32, #tpu.memory_space<vmem>>, vector<4x128xf32>
    %87 = arith.truncf %86 : vector<4x128xf32> to vector<4x128xbf16>
    %c13_73 = arith.constant 13 : index
    %c0_74 = arith.constant 0 : index
    %c0_75 = arith.constant 0 : index
    %88 = vector.load %arg6[%c13_73, %c0_74, %c0_75] : memref<20x128x512xbf16, #tpu.memory_space<vmem>>, vector<1x128x512xbf16>
    %89 = vector.shape_cast %88 : vector<1x128x512xbf16> to vector<128x512xbf16>
    %cst_76 = arith.constant dense<0.000000e+00> : vector<4x512xf32>
    %90 = tpu.matmul %87, %89, %cst_76 {dimension_numbers = #tpu.dot_dimension_numbers<[1], [0], [0], [1], [0, 0, 1, 1], [], []>} : vector<4x128xbf16>, vector<128x512xbf16>, vector<4x512xf32> -> vector<4x512xf32>
    %91 = arith.addf %85, %90 : vector<4x512xf32>
    %c14 = arith.constant 14 : index
    %c0_77 = arith.constant 0 : index
    %92 = tpu.strided_load %arg11[%c14, %c0_77] {strides = array<i32: 128, 1>} : memref<512x128xf32, #tpu.memory_space<vmem>>, vector<4x128xf32>
    %93 = arith.truncf %92 : vector<4x128xf32> to vector<4x128xbf16>
    %c14_78 = arith.constant 14 : index
    %c0_79 = arith.constant 0 : index
    %c0_80 = arith.constant 0 : index
    %94 = vector.load %arg6[%c14_78, %c0_79, %c0_80] : memref<20x128x512xbf16, #tpu.memory_space<vmem>>, vector<1x128x512xbf16>
    %95 = vector.shape_cast %94 : vector<1x128x512xbf16> to vector<128x512xbf16>
    %cst_81 = arith.constant dense<0.000000e+00> : vector<4x512xf32>
    %96 = tpu.matmul %93, %95, %cst_81 {dimension_numbers = #tpu.dot_dimension_numbers<[1], [0], [0], [1], [0, 0, 1, 1], [], []>} : vector<4x128xbf16>, vector<128x512xbf16>, vector<4x512xf32> -> vector<4x512xf32>
    %97 = arith.addf %91, %96 : vector<4x512xf32>
    %c15 = arith.constant 15 : index
    %c0_82 = arith.constant 0 : index
    %98 = tpu.strided_load %arg11[%c15, %c0_82] {strides = array<i32: 128, 1>} : memref<512x128xf32, #tpu.memory_space<vmem>>, vector<4x128xf32>
    %99 = arith.truncf %98 : vector<4x128xf32> to vector<4x128xbf16>
    %c15_83 = arith.constant 15 : index
    %c0_84 = arith.constant 0 : index
    %c0_85 = arith.constant 0 : index
    %100 = vector.load %arg6[%c15_83, %c0_84, %c0_85] : memref<20x128x512xbf16, #tpu.memory_space<vmem>>, vector<1x128x512xbf16>
    %101 = vector.shape_cast %100 : vector<1x128x512xbf16> to vector<128x512xbf16>
    %cst_86 = arith.constant dense<0.000000e+00> : vector<4x512xf32>
    %102 = tpu.matmul %99, %101, %cst_86 {dimension_numbers = #tpu.dot_dimension_numbers<[1], [0], [0], [1], [0, 0, 1, 1], [], []>} : vector<4x128xbf16>, vector<128x512xbf16>, vector<4x512xf32> -> vector<4x512xf32>
    %103 = arith.addf %97, %102 : vector<4x512xf32>
    %c16 = arith.constant 16 : index
    %c0_87 = arith.constant 0 : index
    %104 = tpu.strided_load %arg11[%c16, %c0_87] {strides = array<i32: 128, 1>} : memref<512x128xf32, #tpu.memory_space<vmem>>, vector<4x128xf32>
    %105 = arith.truncf %104 : vector<4x128xf32> to vector<4x128xbf16>
    %c16_88 = arith.constant 16 : index
    %c0_89 = arith.constant 0 : index
    %c0_90 = arith.constant 0 : index
    %106 = vector.load %arg6[%c16_88, %c0_89, %c0_90] : memref<20x128x512xbf16, #tpu.memory_space<vmem>>, vector<1x128x512xbf16>
    %107 = vector.shape_cast %106 : vector<1x128x512xbf16> to vector<128x512xbf16>
    %cst_91 = arith.constant dense<0.000000e+00> : vector<4x512xf32>
    %108 = tpu.matmul %105, %107, %cst_91 {dimension_numbers = #tpu.dot_dimension_numbers<[1], [0], [0], [1], [0, 0, 1, 1], [], []>} : vector<4x128xbf16>, vector<128x512xbf16>, vector<4x512xf32> -> vector<4x512xf32>
    %109 = arith.addf %103, %108 : vector<4x512xf32>
    %c17 = arith.constant 17 : index
    %c0_92 = arith.constant 0 : index
    %110 = tpu.strided_load %arg11[%c17, %c0_92] {strides = array<i32: 128, 1>} : memref<512x128xf32, #tpu.memory_space<vmem>>, vector<4x128xf32>
    %111 = arith.truncf %110 : vector<4x128xf32> to vector<4x128xbf16>
    %c17_93 = arith.constant 17 : index
    %c0_94 = arith.constant 0 : index
    %c0_95 = arith.constant 0 : index
    %112 = vector.load %arg6[%c17_93, %c0_94, %c0_95] : memref<20x128x512xbf16, #tpu.memory_space<vmem>>, vector<1x128x512xbf16>
    %113 = vector.shape_cast %112 : vector<1x128x512xbf16> to vector<128x512xbf16>
    %cst_96 = arith.constant dense<0.000000e+00> : vector<4x512xf32>
    %114 = tpu.matmul %111, %113, %cst_96 {dimension_numbers = #tpu.dot_dimension_numbers<[1], [0], [0], [1], [0, 0, 1, 1], [], []>} : vector<4x128xbf16>, vector<128x512xbf16>, vector<4x512xf32> -> vector<4x512xf32>
    %115 = arith.addf %109, %114 : vector<4x512xf32>
    %c18 = arith.constant 18 : index
    %c0_97 = arith.constant 0 : index
    %116 = tpu.strided_load %arg11[%c18, %c0_97] {strides = array<i32: 128, 1>} : memref<512x128xf32, #tpu.memory_space<vmem>>, vector<4x128xf32>
    %117 = arith.truncf %116 : vector<4x128xf32> to vector<4x128xbf16>
    %c18_98 = arith.constant 18 : index
    %c0_99 = arith.constant 0 : index
    %c0_100 = arith.constant 0 : index
    %118 = vector.load %arg6[%c18_98, %c0_99, %c0_100] : memref<20x128x512xbf16, #tpu.memory_space<vmem>>, vector<1x128x512xbf16>
    %119 = vector.shape_cast %118 : vector<1x128x512xbf16> to vector<128x512xbf16>
    %cst_101 = arith.constant dense<0.000000e+00> : vector<4x512xf32>
    %120 = tpu.matmul %117, %119, %cst_101 {dimension_numbers = #tpu.dot_dimension_numbers<[1], [0], [0], [1], [0, 0, 1, 1], [], []>} : vector<4x128xbf16>, vector<128x512xbf16>, vector<4x512xf32> -> vector<4x512xf32>
    %121 = arith.addf %115, %120 : vector<4x512xf32>
    %c19 = arith.constant 19 : index
    %c0_102 = arith.constant 0 : index
    %122 = tpu.strided_load %arg11[%c19, %c0_102] {strides = array<i32: 128, 1>} : memref<512x128xf32, #tpu.memory_space<vmem>>, vector<4x128xf32>
    %123 = arith.truncf %122 : vector<4x128xf32> to vector<4x128xbf16>
    %c19_103 = arith.constant 19 : index
    %c0_104 = arith.constant 0 : index
    %c0_105 = arith.constant 0 : index
    %124 = vector.load %arg6[%c19_103, %c0_104, %c0_105] : memref<20x128x512xbf16, #tpu.memory_space<vmem>>, vector<1x128x512xbf16>
    %125 = vector.shape_cast %124 : vector<1x128x512xbf16> to vector<128x512xbf16>
    %cst_106 = arith.constant dense<0.000000e+00> : vector<4x512xf32>
    %126 = tpu.matmul %123, %125, %cst_106 {dimension_numbers = #tpu.dot_dimension_numbers<[1], [0], [0], [1], [0, 0, 1, 1], [], []>} : vector<4x128xbf16>, vector<128x512xbf16>, vector<4x512xf32> -> vector<4x512xf32>
    %127 = arith.addf %121, %126 : vector<4x512xf32>
    %c0_107 = arith.constant 0 : index
    %c0_108 = arith.constant 0 : index
    %128 = vector.load %arg7[%c0_107, %c0_108] : memref<1x512xf32, #tpu.memory_space<vmem>>, vector<1x512xf32>
    %129 = vector.broadcast %128 : vector<1x512xf32> to vector<4x512xf32>
    %130 = arith.addf %127, %129 : vector<4x512xf32>
    %cst_109 = arith.constant 0.000000e+00 : f32
    %131 = vector.broadcast %cst_109 : f32 to vector<4x512xf32>
    %132 = arith.maximumf %130, %131 : vector<4x512xf32>
    %133 = arith.truncf %132 : vector<4x512xf32> to vector<4x512xbf16>
    %c0_110 = arith.constant 0 : index
    %c0_111 = arith.constant 0 : index
    %134 = vector.load %arg8[%c0_110, %c0_111] : memref<512x128xbf16, #tpu.memory_space<vmem>>, vector<512x128xbf16>
    %cst_112 = arith.constant dense<0.000000e+00> : vector<4x128xf32>
    %135 = tpu.matmul %133, %134, %cst_112 {dimension_numbers = #tpu.dot_dimension_numbers<[1], [0], [0], [1], [0, 0, 1, 1], [], []>} : vector<4x512xbf16>, vector<512x128xbf16>, vector<4x128xf32> -> vector<4x128xf32>
    %c0_113 = arith.constant 0 : index
    %c0_114 = arith.constant 0 : index
    %136 = vector.load %arg9[%c0_113, %c0_114] : memref<1x128xf32, #tpu.memory_space<vmem>>, vector<1x128xf32>
    %137 = vector.broadcast %136 : vector<1x128xf32> to vector<4x128xf32>
    %138 = arith.addf %135, %137 : vector<4x128xf32>
    %139 = tpu.iota {dimensions = array<i32: 1>} : vector<4x128xi32>
    %c10_i32 = arith.constant 10 : i32
    %140 = vector.broadcast %c10_i32 : i32 to vector<4x128xi32>
    %141 = arith.cmpi slt, %139, %140 : vector<4x128xi32>
    %cst_115 = arith.constant 0xFF800000 : f32
    %142 = vector.broadcast %cst_115 : f32 to vector<4x128xf32>
    %143 = arith.select %141, %138, %142 : vector<4x128xi1>, vector<4x128xf32>
    %cst_116 = arith.constant dense<0xFF800000> : vector<4xf32>
    %144 = vector.multi_reduction <maximumf>, %143, %cst_116 [1] : vector<4x128xf32> to vector<4xf32>
    %145 = vector.shape_cast %144 : vector<4xf32> to vector<4x1xf32>
    %146 = vector.broadcast %145 : vector<4x1xf32> to vector<4x128xf32>
    %147 = arith.subf %143, %146 : vector<4x128xf32>
    %148 = math.exp %147 : vector<4x128xf32>
    %cst_117 = arith.constant dense<0.000000e+00> : vector<4xf32>
    %149 = vector.multi_reduction <add>, %148, %cst_117 [1] : vector<4x128xf32> to vector<4xf32>
    %150 = vector.shape_cast %149 : vector<4xf32> to vector<4x1xf32>
    %151 = math.log %150 : vector<4x1xf32>
    %c10_i32_118 = arith.constant 10 : i32
    %152 = vector.broadcast %c10_i32_118 : i32 to vector<4x128xi32>
    %153 = arith.cmpi slt, %139, %152 : vector<4x128xi32>
    %154 = vector.broadcast %151 : vector<4x1xf32> to vector<4x128xf32>
    %155 = arith.subf %147, %154 : vector<4x128xf32>
    %cst_119 = arith.constant 0.000000e+00 : f32
    %156 = vector.broadcast %cst_119 : f32 to vector<4x128xf32>
    %157 = arith.select %153, %155, %156 : vector<4x128xi1>, vector<4x128xf32>
    %c0_120 = arith.constant 0 : index
    %c0_121 = arith.constant 0 : index
    %c0_122 = arith.constant 0 : index
    %158 = vector.load %arg10[%c0_120, %c0_121, %c0_122] : memref<1x4x128xf32, #tpu.memory_space<vmem>>, vector<1x4x128xf32>
    %159 = vector.shape_cast %158 : vector<1x4x128xf32> to vector<4x128xf32>
    %160 = vector.shape_cast %157 : vector<4x128xf32> to vector<1x4x128xf32>
    tpu.vector_store %arg10[%c0_120, %c0_121, %c0_122], %160 {strides = array<i32>} : memref<1x4x128xf32, #tpu.memory_space<vmem>>, vector<1x4x128xf32>,
    return
  }
  func.func @transform_0(%arg0: i32) -> (i32, i32, i32) {
    %c0_i32 = arith.constant 0 : i32
    %c0_i32_0 = arith.constant 0 : i32
    %c0_i32_1 = arith.constant 0 : i32
    return %arg0, %c0_i32, %c0_i32_0 : i32, i32, i32
  }
  func.func @transform_1(%arg0: i32) -> (i32, i32) {
    %c0_i32 = arith.constant 0 : i32
    %c0_i32_0 = arith.constant 0 : i32
    %c0_i32_1 = arith.constant 0 : i32
    return %c0_i32, %c0_i32_0 : i32, i32
  }
  func.func @transform_2(%arg0: i32) -> (i32, i32) {
    %c0_i32 = arith.constant 0 : i32
    %c0_i32_0 = arith.constant 0 : i32
    %c0_i32_1 = arith.constant 0 : i32
    return %c0_i32, %c0_i32_0 : i32, i32
  }
  func.func @transform_3(%arg0: i32) -> (i32, i32, i32) {
    %c0_i32 = arith.constant 0 : i32
    %c0_i32_0 = arith.constant 0 : i32
    %c0_i32_1 = arith.constant 0 : i32
    %c0_i32_2 = arith.constant 0 : i32
    return %c0_i32, %c0_i32_0, %c0_i32_1 : i32, i32, i32
  }
  func.func @transform_4(%arg0: i32) -> (i32, i32) {
    %c0_i32 = arith.constant 0 : i32
    %c0_i32_0 = arith.constant 0 : i32
    %c0_i32_1 = arith.constant 0 : i32
    return %c0_i32, %c0_i32_0 : i32, i32
  }
  func.func @transform_5(%arg0: i32) -> (i32, i32, i32) {
    %c0_i32 = arith.constant 0 : i32
    %c0_i32_0 = arith.constant 0 : i32
    %c0_i32_1 = arith.constant 0 : i32
    %c0_i32_2 = arith.constant 0 : i32
    return %c0_i32, %c0_i32_0, %c0_i32_1 : i32, i32, i32
  }
  func.func @transform_6(%arg0: i32) -> (i32, i32) {
    %c0_i32 = arith.constant 0 : i32
    %c0_i32_0 = arith.constant 0 : i32
    %c0_i32_1 = arith.constant 0 : i32
    return %c0_i32, %c0_i32_0 : i32, i32
  }
  func.func @transform_7(%arg0: i32) -> (i32, i32) {
    %c0_i32 = arith.constant 0 : i32
    %c0_i32_0 = arith.constant 0 : i32
    %c0_i32_1 = arith.constant 0 : i32
    return %c0_i32, %c0_i32_0 : i32, i32
  }
  func.func @transform_8(%arg0: i32) -> (i32, i32) {
    %c0_i32 = arith.constant 0 : i32
    %c0_i32_0 = arith.constant 0 : i32
    %c0_i32_1 = arith.constant 0 : i32
    return %c0_i32, %c0_i32_0 : i32, i32
  }
  func.func @transform_9(%arg0: i32) -> (i32, i32, i32) {
    %c0_i32 = arith.constant 0 : i32
    %c0_i32_0 = arith.constant 0 : i32
    %c0_i32_1 = arith.constant 0 : i32
    return %arg0, %c0_i32, %c0_i32_0 : i32, i32, i32
  }
}

</mosaic_0001>

<bundles_post_ra>
// kernel: convnet_forward.1
= control target key start
LH: loop header
LB: loop body
LE: loop exit
PB: predicated region body
PF: predicated region fallthrough
CT: control target
= control target key end

     0   :  { %14 = vsyncpa [#allocation4], 0  ;;  %s17050_s0 = inlined_call_operand.vmem [shape: bf16[8,32,1024], index: 0, kind: input, shape index: {}]   ;;  %s17051_s1 = inlined_call_operand.vmem [shape: bf16[128,32], index: 1, kind: input, shape index: {}]   ;;  %s17052_s2 = inlined_call_operand.vmem [shape: f32[128,1], index: 2, kind: input, shape index: {}]   ;;  %s17053_s3 = inlined_call_operand.vmem [shape: bf16[9,128,128], index: 3, kind: input, shape index: {}]   ;;  %s17054_s4 = inlined_call_operand.vmem [shape: f32[128,1], index: 4, kind: input, shape index: {}]   ;;  %s17055_s5 = inlined_call_operand.vmem [shape: bf16[20,128,512], index: 5, kind: input, shape index: {}]   ;;  %s17056_s6 = inlined_call_operand.vmem [shape: f32[1,512], index: 6, kind: input, shape index: {}]   ;;  %s17057_s7 = inlined_call_operand.vmem [shape: bf16[512,128], index: 7, kind: input, shape index: {}]   ;;  %s17058_s8 = inlined_call_operand.vmem [shape: f32[1,128], index: 8, kind: input, shape index: {}]   ;;  %s17059_s9 = inlined_call_operand.hbm [shape: f32[2,4,128], index: 9, kind: output, shape index: {}]  }
   0x1   :  { %16 = vsyncpa [#allocation4 + $0x1], 0  ;;  %s13051_s30 = smov 0   ;;  %s13053_s10 = smov 0  }
   0x2   :  { %s13055_s11 = smov 0   ;;  %s13057_s12 = smov 0  }
   0x3 LB: > { %s13072_s13 = sadd.s32 4294967295, %s12984_s12   ;;  %s9633_s14 = sadd.s32 4294967294, %s12984_s12   ;;  %s12984_s12 = sphi %s13057_s12, %s17341_s12   ;;  %s12980_s11 = sphi %s13055_s11, %s17340_s11   ;;  %s12976_s10 = sphi %s13053_s10, %s17339_s10   ;;  %s12972_s30 = sphi %s13051_s30, %s17338_s30  }
   0x4   : > { %s13076_s15 = sadd.s32 1, %s12984_s12   ;;  %s223_s16 = sadd.s32 1, %s12980_s11 }
   0x5   : > { %s220_s17 = ssub.s32 %s12984_s12, %s13076_s15  ;;  %p233_p0 = scmp.ne.s32.totalorder %s12980_s11, %s12976_s10 }
   0x6   : > { %p221_p1 = scmp.eq.s32.totalorder %s220_s17, 0  ;;  %p234_p2 = scmp.eq.s32.totalorder %s13072_s13, 1 }
   0x7   : > { %p239_p3 = scmp.ne.s32.totalorder %s12976_s10, %s12972_s30  ;;  %p240_p4 = scmp.eq.s32.totalorder %s9633_s14, 1 }
   0x8   : > { %s13087_s18 = scalar_select %p221_p1, %s12980_s11, %s223_s16  }
   0x9   : > { %p13089_p5 = por %p234_p2, %p233_p0  ;;  %p13093_p6 = por %p240_p4, %p239_p3 }
   0xa   : > { %17100 = sst [smem:[#allocation6_spill]] %s13087_s18  ;;  %p9636_p7 = scmp.ge.s32.totalorder %s12984_s12, 1 }
   0xb   : > { %p292_p8 = scmp.lt.s32.totalorder %s12984_s12, 3 }
   0xd   : > { %p293_p9 = pnand %p9636_p7, %p292_p8 }
   0xf   : > { %296 = sbr.rel (%p293_p9) target bundleno = 2498 (0x9c2), region = 56 }
  0x16   : > { %s17060_s21 = sand.u32 1, %s12976_s10   ;;  %s9638_s22 = sshll.u32 %s13072_s13, 2  ;;  %v13104_v0 = vld [vmem:[%s17051_s1] sm:$0xf]  ;;  %v13109_v1 = vld [vmem:[%s17051_s1 + $0x4] sm:$0xf]  ;;  %v17061_v10 = vlaneseq }
  0x17   : > { %17103 = vst [vmem:[#allocation7_spill] sm:$0xff] %v13104_v0  ;;  %17104 = vst [vmem:[#allocation8_spill] sm:$0xff] %v13109_v1  ;;  %s13113_s27 = sshll.u32 %s17060_s21, 2  ;;  %p330_p10 = scmp.lt.s32.totalorder %s9638_s22, 7  ;;  %v13118_v2 = vld [vmem:[%s17051_s1 + $0x8] sm:$0xf] }
  0x18   : > { %17105 = vst [vmem:[#allocation9_spill] sm:$0xff] %v13118_v2  ;;  %v13123_v3 = vld [vmem:[%s17051_s1 + $0xc] sm:$0xf]  ;;  %v13128_v4 = vld [vmem:[%s17051_s1 + $0x10] sm:$0xf]  ;;  %v13138_v6 = vld [vmem:[%s17052_s2] sm:$0xff] }
  0x19   : > { %17106 = vst [vmem:[#allocation10_spill] sm:$0xff] %v13123_v3  ;;  %17107 = vst [vmem:[#allocation11_spill] sm:$0xff] %v13128_v4  ;;  %v13133_v5 = vld [vmem:[%s17051_s1 + $0x14] sm:$0xf]  ;;  %s17343_s22 = smov (!%p330_p10, %s9638_s22), 7  ;;  %v13153_v9 = vld [vmem:[%s17052_s2 + $0x8] sm:$0xff] }
  0x1a   : > { %17108 = vst [vmem:[#allocation12_spill] sm:$0xff] %v13133_v5  ;;  %17109 = vst [vmem:[#allocation13_spill] sm:$0xff] %v13138_v6  ;;  %v13143_v7 = vld [vmem:[%s17051_s1 + $0x18] sm:$0xf]  ;;  %v13148_v8 = vld [vmem:[%s17051_s1 + $0x1c] sm:$0xf] }
  0x1b   : > { %17110 = vst [vmem:[#allocation14_spill] sm:$0xff] %v13143_v7  ;;  %17111 = vst [vmem:[#allocation15_spill] sm:$0xff] %v13148_v8  ;;  %v13158_v11 = vld [vmem:[%s17051_s1 + $0x20] sm:$0xf]  ;;  %v13163_v12 = vld [vmem:[%s17051_s1 + $0x24] sm:$0xf] }
  0x1c   : > { %17112 = vst [vmem:[#allocation16_spill] sm:$0xff] %v13153_v9  ;;  %17113 = vst [vmem:[#allocation17_spill] sm:$0xff] %v13158_v11  ;;  %v13168_v13 = vld [vmem:[%s17051_s1 + $0x28] sm:$0xf]  ;;  %s11185_s14 = sshll.u32 %s17343_s22, 7  ;;  %v13183_v16 = vld [vmem:[%s17052_s2 + $0x10] sm:$0xff] }
  0x1d   : > { %17114 = vst [vmem:[#allocation18_spill] sm:$0xff] %v13163_v12  ;;  %17115 = vst [vmem:[#allocation19_spill] sm:$0xff] %v13168_v13  ;;  %v13173_v14 = vld [vmem:[%s17051_s1 + $0x2c] sm:$0xf]  ;;  %v13178_v15 = vld [vmem:[%s17051_s1 + $0x30] sm:$0xf]  ;;  %s13188_s29 = scalar_lea.vmem %s17050_s0, %s11185_s14 }
  0x1e   : > { %17116 = vst [vmem:[#allocation20_spill] sm:$0xff] %v13173_v14  ;;  %17117 = vst [vmem:[#allocation21_spill] sm:$0xff] %v13178_v15  ;;  %v13193_v17 = vld [vmem:[%s17051_s1 + $0x34] sm:$0xf]  ;;  %v13198_v18 = vld [vmem:[%s17051_s1 + $0x38] sm:$0xf] }
  0x1f   : > { %17118 = vst [vmem:[#allocation22_spill] sm:$0xff] %v13183_v16  ;;  %17119 = vst [vmem:[#allocation23_spill] sm:$0xff] %v13193_v17  ;;  %v13203_v19 = vld [vmem:[%s17051_s1 + $0x3c] sm:$0xf]  ;;  %v13213_v21 = vld [vmem:[%s17052_s2 + $0x20] sm:$0xff]  ;;  %v13221_v23 = vand.u32 127, %v17061_v10 }
  0x20   : > { %17120 = vst [vmem:[#allocation24_spill] sm:$0xff] %v13198_v18  ;;  %17121 = vst [vmem:[#allocation25_spill] sm:$0xff] %v13203_v19  ;;  %v13208_v20 = vld [vmem:[%s17052_s2 + $0x18] sm:$0xff]  ;;  %v13218_v22 = vld [vmem:[%s17052_s2 + $0x28] sm:$0xff]  ;;  %s13358_s18 = smov 0  }
  0x21   : > { %17122 = vst [vmem:[#allocation26_spill] sm:$0xff] %v13208_v20  ;;  %17123 = vst [vmem:[#allocation27_spill] sm:$0xff] %v13213_v21  ;;  %v13226_v24 = vld [vmem:[%s17052_s2 + $0x30] sm:$0xff]  ;;  %v13231_v25 = vld [vmem:[%s17052_s2 + $0x38] sm:$0xff]  ;;  %v13254_v30 = vadd.s32 128, %v13221_v23 }
  0x22   : > { %17124 = vst [vmem:[#allocation28_spill] sm:$0xff] %v13218_v22  ;;  %17125 = vst [vmem:[#allocation29_spill] sm:$0xff] %v13221_v23  ;;  %v13236_v26 = vld [vmem:[%s17052_s2 + $0x40] sm:$0xff]  ;;  %v13241_v27 = vld [vmem:[%s17052_s2 + $0x48] sm:$0xff] }
  0x23   : > { %17126 = vst [vmem:[#allocation30_spill] sm:$0xff] %v13226_v24  ;;  %17127 = vst [vmem:[#allocation31_spill] sm:$0xff] %v13231_v25  ;;  %v13246_v28 = vld [vmem:[%s17052_s2 + $0x50] sm:$0xff]  ;;  %v13251_v29 = vld [vmem:[%s17052_s2 + $0x58] sm:$0xff]  ;;  %vm389_vm0 = vcmp.lt.s32.totalorder %v13254_v30, 144 }
  0x24   : > { %17128 = vst [vmem:[#allocation32_spill] sm:$0xff] %v13236_v26  ;;  %17129 = vst [vmem:[#allocation33_spill] sm:$0xff] %v13241_v27  ;;  %v13259_v31 = vld [vmem:[%s17052_s2 + $0x60] sm:$0xff]  ;;  %v13264_v32 = vld [vmem:[%s17052_s2 + $0x68] sm:$0xff] }
  0x25   : > { %17130 = vst [vmem:[#allocation34_spill] sm:$0xff] %v13246_v28  ;;  %17131 = vst [vmem:[#allocation35_spill] sm:$0xff] %v13251_v29  ;;  %v13269_v33 = vld [vmem:[%s17052_s2 + $0x70] sm:$0xff]  ;;  %v13274_v34 = vld [vmem:[%s17052_s2 + $0x78] sm:$0xff] }
  0x26   : > { %17132 = vst [vmem:[#allocation36_spill] sm:$0xff] %v13259_v31  ;;  %17133 = vst [vmem:[#allocation37_spill] sm:$0xff] %v13264_v32  ;;  %v13279_v35 = vld [vmem:[%s17054_s4] sm:$0xff]  ;;  %v13284_v36 = vld [vmem:[%s17054_s4 + $0x8] sm:$0xff] }
  0x27   : > { %17134 = vst [vmem:[#allocation38_spill] sm:$0xff] %v13269_v33  ;;  %17135 = vst [vmem:[#allocation39_spill] sm:$0xff] %v13274_v34  ;;  %v13290_v37 = vld [vmem:[%s17054_s4 + $0x10] sm:$0xff]  ;;  %v13295_v38 = vld [vmem:[%s17054_s4 + $0x18] sm:$0xff] }
  0x28   : > { %17136 = vst [vmem:[#allocation40_spill] sm:$0xff] %v13279_v35  ;;  %17137 = vst [vmem:[#allocation41_spill] sm:$0xff] %v13284_v36  ;;  %v13300_v39 = vld [vmem:[%s17054_s4 + $0x20] sm:$0xff]  ;;  %v13305_v40 = vld [vmem:[%s17054_s4 + $0x28] sm:$0xff] }
  0x29   : > { %17138 = vst [vmem:[#allocation42_spill] sm:$0xff] %v13290_v37  ;;  %17139 = vst [vmem:[#allocation43_spill] sm:$0xff] %v13295_v38  ;;  %v13310_v41 = vld [vmem:[%s17054_s4 + $0x30] sm:$0xff]  ;;  %v13315_v42 = vld [vmem:[%s17054_s4 + $0x38] sm:$0xff] }
  0x2a   : > { %17140 = vst [vmem:[#allocation44_spill] sm:$0xff] %v13300_v39  ;;  %17141 = vst [vmem:[#allocation45_spill] sm:$0xff] %v13305_v40  ;;  %v13320_v43 = vld [vmem:[%s17054_s4 + $0x40] sm:$0xff]  ;;  %v13325_v44 = vld [vmem:[%s17054_s4 + $0x48] sm:$0xff] }
  0x2b   : > { %17142 = vst [vmem:[#allocation46_spill] sm:$0xff] %v13310_v41  ;;  %17143 = vst [vmem:[#allocation47_spill] sm:$0xff] %v13315_v42  ;;  %v13330_v45 = vld [vmem:[%s17054_s4 + $0x50] sm:$0xff]  ;;  %v13335_v46 = vld [vmem:[%s17054_s4 + $0x58] sm:$0xff] }
  0x2c   : > { %17144 = vst [vmem:[#allocation48_spill] sm:$0xff] %v13320_v43  ;;  %17145 = vst [vmem:[#allocation49_spill] sm:$0xff] %v13325_v44  ;;  %v13340_v47 = vld [vmem:[%s17054_s4 + $0x60] sm:$0xff]  ;;  %v13345_v48 = vld [vmem:[%s17054_s4 + $0x68] sm:$0xff] }
  0x2d   : > { %17146 = vst [vmem:[#allocation50_spill] sm:$0xff] %v13330_v45  ;;  %17147 = vst [vmem:[#allocation51_spill] sm:$0xff] %v13335_v46  ;;  %v13350_v49 = vld [vmem:[%s17054_s4 + $0x70] sm:$0xff]  ;;  %v13355_v50 = vld [vmem:[%s17054_s4 + $0x78] sm:$0xff] }
  0x2e   : > { %17148 = vst [vmem:[#allocation52_spill] sm:$0xff] %v13340_v47  ;;  %17149 = vst [vmem:[#allocation53_spill] sm:$0xff] %v13345_v48 }
  0x2f   : > { %17150 = vst [vmem:[#allocation54_spill] sm:$0xff] %v13350_v49  ;;  %17151 = vst [vmem:[#allocation55_spill] sm:$0xff] %v13355_v50 }
  0x30 LB: >> { %v17062_v51 = vmov 0   ;;  %s17099_s28 = sshll.u32 %s12988_s18, 7  ;;  %v17152_v6 = vld [vmem:[#allocation13_spill] sm:$0xff]  ;;  %v17153_v16 = vld [vmem:[#allocation22_spill] sm:$0xff]  ;;  %vm535_vm1 = vcmask 261120   ;;  %v17154_v9 = vld [vmem:[#allocation16_spill] sm:$0xff]  ;;  %s12988_s18 = sphi %s13358_s18, %s395_s18  }
  0x31   : >> { %592 = vmatprep.mubr.bf16.mxu1 %v17062_v51  ;;  %11848 = vset.pattern.permute.xlu0 %v17062_v51  ;;  %s13370_s22 = scalar_lea.vmem %s13188_s29, %s17099_s28  ;;  %v17155_v20 = vld [vmem:[#allocation26_spill] sm:$0xff]  ;;  %v17156_v1 = vld [vmem:[#allocation8_spill] sm:$0xff]  ;;  %v17157_v0 = vld [vmem:[#allocation7_spill] sm:$0xff]  ;;  %s12991_s23 = smov 126   ;;  %vm1785_vm2 = vcmask 1031168   ;;  %vm2012_vm3 = vcmask 949248  }
  0x32   : >> { %11849 = vset.pattern.permute.xlu1 %v17062_v51  ;;  %1110 = vperm.xlu0 %11848, %v17152_v6   ;;  %v399_v52 = vld [vmem:[%s13370_s22] sm:$0xff]  ;;  %v400_v59 = vld [vmem:[%s13370_s22 + $0x8] sm:$0xff]  ;;  %v405_v51 = vld [vmem:[%s13370_s22 + $0x30] sm:$0xff]  ;;  %s12992_s21 = smov 116   ;;  %s12993_s24 = smov 115   ;;  %vm2239_vm4 = vcmask 941056  }
  0x33   : >> { %1120 = vperm.xlu1 %11849, %v17153_v16   ;;  %v403_v53 = vld [vmem:[%s13370_s22 + $0x20] sm:$0xff]  ;;  %v404_v60 = vld [vmem:[%s13370_s22 + $0x28] sm:$0xff]  ;;  %v17159_v22 = vld [vmem:[#allocation28_spill] sm:$0xff]  ;;  %s12994_s17 = smov 114   ;;  %s12997_s16 = smov 127   ;;  %vm2466_vm5 = vcmask 932864  }
  0x34   : >> { %v407_v54 = vld [vmem:[%s13370_s22 + $0x40] sm:$0xff]  ;;  %v9652_v55 = vcombine.high %v399_v52, %v403_v53  ;;  %v9651_v56 = vcombine.low %v399_v52, %v403_v53  ;;  %v408_v62 = vld [vmem:[%s13370_s22 + $0x48] sm:$0xff]  ;;  %v9654_v10 = vcombine.high %v400_v59, %v404_v60  ;;  %v13386_v52 = vcombine.low %v17157_v0, %v17156_v1  ;;  %v17164_v2 = vld [vmem:[#allocation9_spill] sm:$0xff] }
  0x35   : >> { %v411_v57 = vld [vmem:[%s13370_s22 + $0x60] sm:$0xff]  ;;  %v412_v63 = vld [vmem:[%s13370_s22 + $0x68] sm:$0xff]  ;;  %v9653_v53 = vcombine.low %v400_v59, %v404_v60  ;;  %v17165_v26 = vld [vmem:[#allocation32_spill] sm:$0xff]  ;;  %vm2693_vm6 = vcmask 850944   ;;  %vm1429_vm7 = vcmask 1039360   ;;  %vm2920_vm8 = vcmask 842752  }
  0x36   : >> { %v9660_v58 = vcombine.high %v407_v54, %v411_v57  ;;  %560 = vmatprep.subr.bf16.mxu1 %v9652_v55  ;;  %1115 = vperm.xlu0 %11848, %v17154_v9   ;;  %v9659_v61 = vcombine.low %v407_v54, %v411_v57  ;;  %v17158_v21 = vld [vmem:[#allocation27_spill] sm:$0xff]  ;;  %v401_v55 = vld [vmem:[%s13370_s22 + $0x10] sm:$0xff]  ;;  %v9662_v6 = vcombine.high %v408_v62, %v412_v63  ;;  %v17160_v24 = vld [vmem:[#allocation30_spill] sm:$0xff]  ;;  %v17161_v54 = vmov 0  }
  0x37   : >> { %561 = vmatpush1.bf16.msra.mxu1 %v9651_v56  ;;  %1125 = vperm.xlu1 %11849, %v17155_v20   ;;  %v9661_v56 = vcombine.low %v408_v62, %v412_v63  ;;  %v9656_v57 = vcombine.high %v401_v55, %v405_v51  ;;  %v17162_v25 = vld [vmem:[#allocation31_spill] sm:$0xff]  ;;  %v17163_v3 = vld [vmem:[#allocation10_spill] sm:$0xff]  ;;  %v17166_v27 = vld [vmem:[#allocation33_spill] sm:$0xff]  ;;  %vm3147_vm9 = vcmask 834560  }
  0x38   : >> { %562 = vmatprep.subr.bf16.mxu1 %v9660_v58  ;;  %v13399_v58 = vcombine.low %v17164_v2, %v17163_v3  ;;  %v17167_v28 = vld [vmem:[#allocation34_spill] sm:$0xff]  ;;  %v17168_v29 = vld [vmem:[#allocation35_spill] sm:$0xff]  ;;  %v17169_v5 = vld [vmem:[#allocation12_spill] sm:$0xff] }
  0x39   : >> { %v17170_v4 = vld [vmem:[#allocation11_spill] sm:$0xff]  ;;  %v17171_v31 = vld [vmem:[#allocation36_spill] sm:$0xff]  ;;  %v17172_v32 = vld [vmem:[#allocation37_spill] sm:$0xff] }
  0x3a   : >> { %1130 = vperm.xlu0 %11848, %v17158_v21   ;;  %v17173_v33 = vld [vmem:[#allocation38_spill] sm:$0xff]  ;;  %v17174_v34 = vld [vmem:[#allocation39_spill] sm:$0xff]  ;;  %v17178_v11 = vld [vmem:[#allocation17_spill] sm:$0xff] }
  0x3b   : >> { %563 = vmatpush1.bf16.msra.mxu1 %v9659_v61  ;;  %1135 = vperm.xlu1 %11849, %v17159_v22   ;;  %v17175_v8 = vld [vmem:[#allocation15_spill] sm:$0xff]  ;;  %v17176_v7 = vld [vmem:[#allocation14_spill] sm:$0xff]  ;;  %v17179_v14 = vld [vmem:[#allocation20_spill] sm:$0xff] }
  0x3c   : >> { %673 = vmatprep.subr.bf16.mxu1 %v9654_v10  ;;  %v13421_v10 = vcombine.low %v17176_v7, %v17175_v8  ;;  %v17177_v12 = vld [vmem:[#allocation18_spill] sm:$0xff]  ;;  %v17180_v13 = vld [vmem:[#allocation19_spill] sm:$0xff]  ;;  %v17182_v15 = vld [vmem:[#allocation21_spill] sm:$0xff] }
  0x3d   : >> { %v13428_v59 = vcombine.low %v17178_v11, %v17177_v12  ;;  %v13435_v60 = vcombine.low %v17180_v13, %v17179_v14  ;;  %v17181_v17 = vld [vmem:[#allocation23_spill] sm:$0xff]  ;;  %v17183_v19 = vld [vmem:[#allocation25_spill] sm:$0xff]  ;;  %v17184_v18 = vld [vmem:[#allocation24_spill] sm:$0xff] }
  0x3e   : >> { %9667 = vmatmul.mubr.msk.bf16.vlgmr.msra.gmra.mrb[0].mxu1 %vm535_vm1, %v13386_v52  ;;  %1140 = vperm.xlu0 %11848, %v17160_v24   ;;  %v13442_v61 = vcombine.low %v17182_v15, %v17181_v17  ;;  %v13449_v62 = vcombine.low %v17184_v18, %v17183_v19  ;;  %v409_v63 = vld [vmem:[%s13370_s22 + $0x50] sm:$0xff]  ;;  %v402_v0 = vld [vmem:[%s13370_s22 + $0x18] sm:$0xff] }
  0x3f   : >> { %674 = vmatpush1.bf16.msra.mxu1 %v9653_v53  ;;  %602 = vmatprep.mubr.bf16.mxu1 %v17161_v54  ;;  %v413_v53 = vld [vmem:[%s13370_s22 + $0x70] sm:$0xff]  ;;  %v406_v1 = vld [vmem:[%s13370_s22 + $0x38] sm:$0xff] }
  0x40   : >> { %675 = vmatprep.subr.bf16.mxu1 %v9662_v6  ;;  %1145 = vperm.xlu1 %11849, %v17162_v25   ;;  %v13410_v6 = vcombine.low %v17170_v4, %v17169_v5  ;;  %v9663_v2 = vcombine.low %v409_v63, %v413_v53  ;;  %v9658_v3 = vcombine.high %v402_v0, %v406_v1 }
  0x42   : >> { %1150 = vperm.xlu0 %11848, %v17165_v26  }
  0x43   : >> { %676 = vmatpush1.bf16.msra.mxu1 %v9661_v56  ;;  %v9655_v56 = vcombine.low %v401_v55, %v405_v51  ;;  %v9657_v51 = vcombine.low %v402_v0, %v406_v1 }
  0x44   : >> { %786 = vmatprep.subr.bf16.mxu1 %v9656_v57  ;;  %1155 = vperm.xlu1 %11849, %v17166_v27   ;;  %v9664_v57 = vcombine.high %v409_v63, %v413_v53 }
  0x46   : >> { %9668 = vmatmul.mubr.msk.bf16.gmra.mrb[4].mxu1 %vm535_vm1, %v13399_v58  ;;  %1160 = vperm.xlu0 %11848, %v17167_v28  }
  0x47   : >> { %612 = vmatprep.mubr.bf16.mxu1 %v17161_v54 }
  0x48   : >> { %1165 = vperm.xlu1 %11849, %v17168_v29  }
  0x4a   : >> { %1170 = vperm.xlu0 %11848, %v17171_v31  }
  0x4c   : >> { %1175 = vperm.xlu1 %11849, %v17172_v32  }
  0x4e   : >> { %9669 = vmatmul.mubr.msk.bf16.gmra.mrb[8].mxu1 %vm535_vm1, %v13410_v6  ;;  %1180 = vperm.xlu0 %11848, %v17173_v33  }
  0x4f   : >> { %622 = vmatprep.mubr.bf16.mxu1 %v17161_v54 }
  0x50   : >> { %1185 = vperm.xlu1 %11849, %v17174_v34  }
  0x56   : >> { %9670 = vmatmul.mubr.msk.bf16.gmra.mrb[12].mxu1 %vm535_vm1, %v13421_v10 }
  0x57   : >> { %632 = vmatprep.mubr.bf16.mxu1 %v17161_v54 }
  0x5e   : >> { %9671 = vmatmul.mubr.msk.bf16.gmra.mrb[16].mxu1 %vm535_vm1, %v13428_v59 }
  0x5f   : >> { %642 = vmatprep.mubr.bf16.mxu1 %v17161_v54 }
  0x66   : >> { %9672 = vmatmul.mubr.msk.bf16.gmra.mrb[20].mxu1 %vm535_vm1, %v13435_v60 }
  0x67   : >> { %652 = vmatprep.mubr.bf16.mxu1 %v17161_v54 }
  0x6e   : >> { %9673 = vmatmul.mubr.msk.bf16.gmra.mrb[24].mxu1 %vm535_vm1, %v13442_v61 }
  0x6f   : >> { %662 = vmatprep.mubr.bf16.mxu1 %v17161_v54 }
  0x76   : >> { %9674 = vmatmul.mubr.msk.bf16.gmra.mrb[28].mxu1 %vm535_vm1, %v13449_v62 }
  0x77   : >> { %705 = vmatprep.mubr.bf16.mxu1 %v17161_v54 }
  0x7e   : >> { %9675 = vmatmul.mubr.msk.bf16.vlgmr.msra.gmra.mrb[32].mxu1 %vm535_vm1, %v13386_v52 }
  0x7f   : >> { %787 = vmatpush1.bf16.msra.mxu1 %v9655_v56  ;;  %715 = vmatprep.mubr.bf16.mxu1 %v17161_v54 }
  0x80   : >> { %788 = vmatprep.subr.bf16.mxu1 %v9664_v57 }
  0x83   : >> { %789 = vmatpush1.bf16.msra.mxu1 %v9663_v2  ;;  %v410_v2 = vld [vmem:[%s13370_s22 + $0x58] sm:$0xff] }
  0x84   : >> { %899 = vmatprep.subr.bf16.mxu1 %v9658_v3  ;;  %v414_v3 = vld [vmem:[%s13370_s22 + $0x78] sm:$0xff] }
  0x85   : >> { %v9666_v55 = vcombine.high %v410_v2, %v414_v3  ;;  %v9665_v63 = vcombine.low %v410_v2, %v414_v3 }
  0x86   : >> { %9676 = vmatmul.mubr.msk.bf16.gmra.mrb[36].mxu1 %vm535_vm1, %v13399_v58 }
  0x87   : >> { %725 = vmatprep.mubr.bf16.mxu1 %v17161_v54 }
  0x8e   : >> { %9677 = vmatmul.mubr.msk.bf16.gmra.mrb[40].mxu1 %vm535_vm1, %v13410_v6 }
  0x8f   : >> { %735 = vmatprep.mubr.bf16.mxu1 %v17161_v54 }
  0x96   : >> { %9678 = vmatmul.mubr.msk.bf16.gmra.mrb[44].mxu1 %vm535_vm1, %v13421_v10 }
  0x97   : >> { %745 = vmatprep.mubr.bf16.mxu1 %v17161_v54 }
  0x9e   : >> { %9679 = vmatmul.mubr.msk.bf16.gmra.mrb[48].mxu1 %vm535_vm1, %v13428_v59 }
  0x9f   : >> { %755 = vmatprep.mubr.bf16.mxu1 %v17161_v54 }
  0xa6   : >> { %9680 = vmatmul.mubr.msk.bf16.gmra.mrb[52].mxu1 %vm535_vm1, %v13435_v60 }
  0xa7   : >> { %765 = vmatprep.mubr.bf16.mxu1 %v17161_v54 }
  0xae   : >> { %9681 = vmatmul.mubr.msk.bf16.gmra.mrb[56].mxu1 %vm535_vm1, %v13442_v61 }
  0xaf   : >> { %775 = vmatprep.mubr.bf16.mxu1 %v17161_v54 }
  0xb6   : >> { %9682 = vmatmul.mubr.msk.bf16.gmra.mrb[60].mxu1 %vm535_vm1, %v13449_v62 }
  0xb7   : >> { %818 = vmatprep.mubr.bf16.mxu1 %v17161_v54 }
  0xbe   : >> { %9683 = vmatmul.mubr.msk.bf16.vlgmr.msra.gmra.mrb[64].mxu1 %vm535_vm1, %v13386_v52 }
  0xbf   : >> { %900 = vmatpush1.bf16.msra.mxu1 %v9657_v51  ;;  %828 = vmatprep.mubr.bf16.mxu1 %v17161_v54 }
  0xc0   : >> { %901 = vmatprep.subr.bf16.mxu1 %v9666_v55 }
  0xc3   : >> { %902 = vmatpush1.bf16.msra.mxu1 %v9665_v63 }
  0xc6   : >> { %9684 = vmatmul.mubr.msk.bf16.gmra.mrb[68].mxu1 %vm535_vm1, %v13399_v58 }
  0xc7   : >> { %838 = vmatprep.mubr.bf16.mxu1 %v17161_v54 }
  0xce   : >> { %9685 = vmatmul.mubr.msk.bf16.gmra.mrb[72].mxu1 %vm535_vm1, %v13410_v6 }
  0xcf   : >> { %848 = vmatprep.mubr.bf16.mxu1 %v17161_v54 }
  0xd6   : >> { %9686 = vmatmul.mubr.msk.bf16.gmra.mrb[76].mxu1 %vm535_vm1, %v13421_v10 }
  0xd7   : >> { %858 = vmatprep.mubr.bf16.mxu1 %v17161_v54 }
  0xde   : >> { %9687 = vmatmul.mubr.msk.bf16.gmra.mrb[80].mxu1 %vm535_vm1, %v13428_v59 }
  0xdf   : >> { %868 = vmatprep.mubr.bf16.mxu1 %v17161_v54 }
  0xe6   : >> { %9688 = vmatmul.mubr.msk.bf16.gmra.mrb[84].mxu1 %vm535_vm1, %v13435_v60 }
  0xe7   : >> { %878 = vmatprep.mubr.bf16.mxu1 %v17161_v54 }
  0xee   : >> { %9689 = vmatmul.mubr.msk.bf16.gmra.mrb[88].mxu1 %vm535_vm1, %v13442_v61 }
  0xef   : >> { %888 = vmatprep.mubr.bf16.mxu1 %v17161_v54 }
  0xf6   : >> { %9690 = vmatmul.mubr.msk.bf16.gmra.mrb[92].mxu1 %vm535_vm1, %v13449_v62 }
  0xf7   : >> { %931 = vmatprep.mubr.bf16.mxu1 %v17161_v54 }
  0xfe   : >> { %9691 = vmatmul.mubr.msk.bf16.vlgmr.msra.gmra.mrb[96].mxu1 %vm535_vm1, %v13386_v52 }
  0xff   : >> { %941 = vmatprep.mubr.bf16.mxu1 %v17161_v54 }
 0x106   : >> { %9692 = vmatmul.mubr.msk.bf16.gmra.mrb[100].mxu1 %vm535_vm1, %v13399_v58 }
 0x107   : >> { %951 = vmatprep.mubr.bf16.mxu1 %v17161_v54 }
 0x10e   : >> { %9693 = vmatmul.mubr.msk.bf16.gmra.mrb[104].mxu1 %vm535_vm1, %v13410_v6 }
 0x10f   : >> { %961 = vmatprep.mubr.bf16.mxu1 %v17161_v54 }
 0x111   : >> { %v13517_v0 = vpop.f32.mrb[0].mxu1 }
 0x112   : >> { %v13519_v1 = vpop.f32.mrb[1].mxu1 }
 0x113   : >> { %v13521_v53 = vpop.f32.mrb[2].mxu1 }
 0x114   : >> { %v13523_v56 = vpop.f32.mrb[3].mxu1 }
 0x116   : >> { %9694 = vmatmul.mubr.msk.bf16.gmra.mrb[108].mxu1 %vm535_vm1, %v13421_v10 }
 0x117   : >> { %971 = vmatprep.mubr.bf16.mxu1 %v17161_v54 }
 0x119   : >> { %v13528_v52 = vpop.f32.mrb[4].mxu1 }
 0x11a   : >> { %v13530_v58 = vpop.f32.mrb[5].mxu1 }
 0x11b   : >> { %v13532_v6 = vpop.f32.mrb[6].mxu1 }
 0x11c   : >> { %v13534_v57 = vpop.f32.mrb[7].mxu1 }
 0x11e   : >> { %9695 = vmatmul.mubr.msk.bf16.gmra.mrb[112].mxu1 %vm535_vm1, %v13428_v59 }
 0x11f   : >> { %981 = vmatprep.mubr.bf16.mxu1 %v17161_v54 }
 0x121   : >> { %v13539_v2 = vpop.f32.mrb[8].mxu1 }
 0x122   : >> { %v13541_v3 = vpop.f32.mrb[9].mxu1 }
 0x123   : >> { %v13543_v10 = vpop.f32.mrb[10].mxu1 }
 0x124   : >> { %v13545_v51 = vpop.f32.mrb[11].mxu1 }
 0x126   : >> { %9696 = vmatmul.mubr.msk.bf16.gmra.mrb[116].mxu1 %vm535_vm1, %v13435_v60 }
 0x127   : >> { %991 = vmatprep.mubr.bf16.mxu1 %v17161_v54 }
 0x129   : >> { %v13550_v55 = vpop.f32.mrb[12].mxu1 }
 0x12a   : >> { %v13552_v63 = vpop.f32.mrb[13].mxu1 }
 0x12b   : >> { %v13554_v59 = vpop.f32.mrb[14].mxu1 }
 0x12c   : >> { %v13556_v4 = vpop.f32.mrb[15].mxu1 }
 0x12e   : >> { %9697 = vmatmul.mubr.msk.bf16.gmra.mrb[120].mxu1 %vm535_vm1, %v13442_v61 }
 0x12f   : >> { %1001 = vmatprep.mubr.bf16.mxu1 %v17161_v54 }
 0x131   : >> { %v13561_v5 = vpop.f32.mrb[16].mxu1 }
 0x132   : >> { %17185 = vst [vmem:[#allocation56_spill] sm:$0xff] %v13561_v5  ;;  %v13563_v7 = vpop.f32.mrb[17].mxu1 }
 0x133   : >> { %17186 = vst [vmem:[#allocation57_spill] sm:$0xff] %v13563_v7  ;;  %v13565_v60 = vpop.f32.mrb[18].mxu1 }
 0x134   : >> { %17187 = vst [vmem:[#allocation58_spill] sm:$0xff] %v13565_v60  ;;  %v13567_v8 = vpop.f32.mrb[19].mxu1 }
 0x135   : >> { %17188 = vst [vmem:[#allocation59_spill] sm:$0xff] %v13567_v8 }
 0x136   : >> { %9698 = vmatmul.mubr.msk.bf16.gmra.mrb[124].mxu1 %vm535_vm1, %v13449_v62 }
 0x139   : >> { %v13571_v9 = vpop.f32.mrb[20].mxu1 }
 0x13a   : >> { %17189 = vst [vmem:[#allocation60_spill] sm:$0xff] %v13571_v9  ;;  %v13573_v11 = vpop.f32.mrb[21].mxu1 }
 0x13b   : >> { %17190 = vst [vmem:[#allocation61_spill] sm:$0xff] %v13573_v11  ;;  %v13575_v12 = vpop.f32.mrb[22].mxu1 }
 0x13c   : >> { %17191 = vst [vmem:[#allocation62_spill] sm:$0xff] %v13575_v12  ;;  %v13577_v61 = vpop.f32.mrb[23].mxu1 }
 0x13d   : >> { %17192 = vst [vmem:[#allocation63_spill] sm:$0xff] %v13577_v61 }
 0x141   : >> { %v13579_v54 = vpop.f32.mrb[24].mxu1 }
 0x142   : >> { %17193 = vst [vmem:[#allocation64_spill] sm:$0xff] %v13579_v54  ;;  %v13581_v13 = vpop.f32.mrb[25].mxu1 }
 0x143   : >> { %17194 = vst [vmem:[#allocation65_spill] sm:$0xff] %v13581_v13  ;;  %v13583_v14 = vpop.f32.mrb[26].mxu1 }
 0x144   : >> { %17195 = vst [vmem:[#allocation66_spill] sm:$0xff] %v13583_v14  ;;  %v13585_v15 = vpop.f32.mrb[27].mxu1 }
 0x145   : >> { %17196 = vst [vmem:[#allocation67_spill] sm:$0xff] %v13585_v15 }
 0x149   : >> { %v13587_v16 = vpop.f32.mrb[28].mxu1 }
 0x14a   : >> { %17197 = vst [vmem:[#allocation68_spill] sm:$0xff] %v13587_v16  ;;  %v13589_v17 = vpop.f32.mrb[29].mxu1 }
 0x14b   : >> { %17198 = vst [vmem:[#allocation69_spill] sm:$0xff] %v13589_v17  ;;  %v13591_v62 = vpop.f32.mrb[30].mxu1 }
 0x14c   : >> { %17199 = vst [vmem:[#allocation70_spill] sm:$0xff] %v13591_v62  ;;  %v13593_v18 = vpop.f32.mrb[31].mxu1 }
 0x14d   : >> { %17200 = vst [vmem:[#allocation71_spill] sm:$0xff] %v13593_v18 }
 0x151   : >> { %v13595_v19 = vpop.f32.mrb[32].mxu1 }
 0x152   : >> { %v13599_v21 = vpop.f32.mrb[33].mxu1 }
 0x153   : >> { %v13603_v24 = vpop.f32.mrb[34].mxu1 }
 0x154   : >> { %v13607_v26 = vpop.f32.mrb[35].mxu1 }
 0x159   : >> { %v13611_v28 = vpop.f32.mrb[36].mxu1 }
 0x15a   : >> { %v13615_v29 = vpop.f32.mrb[37].mxu1 }
 0x15b   : >> { %v13619_v31 = vpop.f32.mrb[38].mxu1 }
 0x15c   : >> { %v13623_v32 = vpop.f32.mrb[39].mxu1 }
 0x161   : >> { %v13627_v33 = vpop.f32.mrb[40].mxu1 }
 0x162   : >> { %v13631_v34 = vpop.f32.mrb[41].mxu1 }
 0x163   : >> { %v13635_v23 = vpop.f32.mrb[42].mxu1 }
 0x164   : >> { %v13639_v50 = vpop.f32.mrb[43].mxu1 }
 0x169   : >> { %v13643_v49 = vpop.f32.mrb[44].mxu1 }
 0x16a   : >> { %v13647_v48 = vpop.f32.mrb[45].mxu1 }
 0x16b   : >> { %v13651_v47 = vpop.f32.mrb[46].mxu1 }
 0x16c   : >> { %v13655_v46 = vpop.f32.mrb[47].mxu1 }
 0x16d   : >> { %17201 = vst [vmem:[#allocation72_spill] sm:$0xff] %v13655_v46 }
 0x171   : >> { %v13659_v45 = vpop.f32.mrb[48].mxu1 }
 0x172   : >> { %17202 = vst [vmem:[#allocation73_spill] sm:$0xff] %v13659_v45  ;;  %v13663_v44 = vpop.f32.mrb[49].mxu1 }
 0x173   : >> { %17203 = vst [vmem:[#allocation74_spill] sm:$0xff] %v13663_v44  ;;  %v13667_v43 = vpop.f32.mrb[50].mxu1 }
 0x174   : >> { %17204 = vst [vmem:[#allocation75_spill] sm:$0xff] %v13667_v43  ;;  %v13671_v42 = vpop.f32.mrb[51].mxu1 }
 0x175   : >> { %17205 = vst [vmem:[#allocation76_spill] sm:$0xff] %v13671_v42 }
 0x179   : >> { %v13675_v41 = vpop.f32.mrb[52].mxu1 }
 0x17a   : >> { %17206 = vst [vmem:[#allocation77_spill] sm:$0xff] %v13675_v41  ;;  %v13679_v40 = vpop.f32.mrb[53].mxu1 }
 0x17b   : >> { %17207 = vst [vmem:[#allocation78_spill] sm:$0xff] %v13679_v40  ;;  %v13683_v39 = vpop.f32.mrb[54].mxu1 }
 0x17c   : >> { %17208 = vst [vmem:[#allocation79_spill] sm:$0xff] %v13683_v39  ;;  %v13687_v38 = vpop.f32.mrb[55].mxu1 }
 0x17d   : >> { %17209 = vst [vmem:[#allocation80_spill] sm:$0xff] %v13687_v38 }
 0x181   : >> { %v13691_v37 = vpop.f32.mrb[56].mxu1 }
 0x182   : >> { %17210 = vst [vmem:[#allocation81_spill] sm:$0xff] %v13691_v37  ;;  %v13695_v36 = vpop.f32.mrb[57].mxu1 }
 0x183   : >> { %17211 = vst [vmem:[#allocation82_spill] sm:$0xff] %v13695_v36  ;;  %v13699_v35 = vpop.f32.mrb[58].mxu1 }
 0x184   : >> { %17212 = vst [vmem:[#allocation83_spill] sm:$0xff] %v13699_v35  ;;  %v13703_v39 = vpop.f32.mrb[59].mxu1 }
 0x185   : >> { %17213 = vst [vmem:[#allocation84_spill] sm:$0xff] %v13703_v39 }
 0x189   : >> { %v13707_v38 = vpop.f32.mrb[60].mxu1 }
 0x18a   : >> { %17214 = vst [vmem:[#allocation85_spill] sm:$0xff] %v13707_v38  ;;  %v13711_v37 = vpop.f32.mrb[61].mxu1 }
 0x18b   : >> { %17215 = vst [vmem:[#allocation86_spill] sm:$0xff] %v13711_v37  ;;  %v13715_v36 = vpop.f32.mrb[62].mxu1 }
 0x18c   : >> { %17216 = vst [vmem:[#allocation87_spill] sm:$0xff] %v13715_v36  ;;  %v13719_v35 = vpop.f32.mrb[63].mxu1 }
 0x18d   : >> { %17217 = vst [vmem:[#allocation88_spill] sm:$0xff] %v13719_v35 }
 0x191   : >> { %v820_v39 = vpop.f32.mrb[64].mxu1 }
 0x192   : >> { %v822_v15 = vpop.f32.mrb[65].mxu1 }
 0x193   : >> { %v824_v14 = vpop.f32.mrb[66].mxu1 }
 0x194   : >> { %v826_v13 = vpop.f32.mrb[67].mxu1 }
 0x199   : >> { %v830_v20 = vpop.f32.mrb[68].mxu1 }
 0x19a   : >> { %v13723_v38 = vpop.f32.mrb[69].mxu1 }
 0x19b   : >> { %v13725_v16 = vpop.f32.mrb[70].mxu1 }
 0x19c   : >> { %v13727_v22 = vpop.f32.mrb[71].mxu1 }
 0x1a1   : >> { %v13729_v37 = vpop.f32.mrb[72].mxu1 }
 0x1a2   : >> { %v13731_v17 = vpop.f32.mrb[73].mxu1 }
 0x1a3   : >> { %v13733_v25 = vpop.f32.mrb[74].mxu1 }
 0x1a4   : >> { %v13735_v36 = vpop.f32.mrb[75].mxu1 }
 0x1a9   : >> { %v13737_v27 = vpop.f32.mrb[76].mxu1 }
 0x1aa   : >> { %v13739_v35 = vpop.f32.mrb[77].mxu1 }
 0x1ab   : >> { %v13741_v18 = vpop.f32.mrb[78].mxu1 }
 0x1ac   : >> { %v13743_v62 = vpop.f32.mrb[79].mxu1 }
 0x1b1   : >> { %v13745_v54 = vpop.f32.mrb[80].mxu1 }
 0x1b2   : >> { %17218 = vst [vmem:[#allocation89_spill] sm:$0xff] %v13745_v54  ;;  %v13747_v61 = vpop.f32.mrb[81].mxu1 }
 0x1b3   : >> { %17219 = vst [vmem:[#allocation90_spill] sm:$0xff] %v13747_v61  ;;  %v13749_v12 = vpop.f32.mrb[82].mxu1 }
 0x1b4   : >> { %17220 = vst [vmem:[#allocation91_spill] sm:$0xff] %v13749_v12  ;;  %v13751_v40 = vpop.f32.mrb[83].mxu1 }
 0x1b5   : >> { %17221 = vst [vmem:[#allocation92_spill] sm:$0xff] %v13751_v40 }
 0x1b9   : >> { %v13753_v11 = vpop.f32.mrb[84].mxu1 }
 0x1ba   : >> { %17222 = vst [vmem:[#allocation93_spill] sm:$0xff] %v13753_v11  ;;  %v13755_v41 = vpop.f32.mrb[85].mxu1 }
 0x1bb   : >> { %17223 = vst [vmem:[#allocation94_spill] sm:$0xff] %v13755_v41  ;;  %v13757_v9 = vpop.f32.mrb[86].mxu1  ;;  %v1111_v41 = vpop.permute.xlu0 %1110 }
 0x1bc   : >> { %17224 = vst [vmem:[#allocation95_spill] sm:$0xff] %v13757_v9  ;;  %v13759_v42 = vpop.f32.mrb[87].mxu1 }
 0x1bd   : >> { %17225 = vst [vmem:[#allocation96_spill] sm:$0xff] %v13759_v42 }
 0x1bf   : >> { %v1116_v46 = vpop.permute.xlu0 %1115 }
 0x1c1   : >> { %v13761_v8 = vpop.f32.mrb[88].mxu1 }
 0x1c2   : >> { %17226 = vst [vmem:[#allocation97_spill] sm:$0xff] %v13761_v8  ;;  %v13763_v43 = vpop.f32.mrb[89].mxu1 }
 0x1c3   : >> { %17227 = vst [vmem:[#allocation98_spill] sm:$0xff] %v13763_v43  ;;  %v13765_v60 = vpop.f32.mrb[90].mxu1  ;;  %v11850_v43 = vld [vmem:[%s17053_s3] sm:$0xff]  }
 0x1c4   : >> { %17228 = vst [vmem:[#allocation99_spill] sm:$0xff] %v13765_v60  ;;  %v13767_v44 = vpop.f32.mrb[91].mxu1  ;;  %11423 = vmatprep.mubr.bf16.mxu0 %v11850_v43 }
 0x1c5   : >> { %17229 = vst [vmem:[#allocation100_spill] sm:$0xff] %v13767_v44  ;;  %v17234_v44 = vmax.f32 %v13517_v0, %v13595_v19 }
 0x1c9   : >> { %v13769_v7 = vpop.f32.mrb[92].mxu1 }
 0x1ca   : >> { %17230 = vst [vmem:[#allocation101_spill] sm:$0xff] %v13769_v7  ;;  %v13771_v12 = vpop.f32.mrb[93].mxu1 }
 0x1cb   : >> { %17231 = vst [vmem:[#allocation102_spill] sm:$0xff] %v13771_v12  ;;  %v13773_v40 = vpop.f32.mrb[94].mxu1 }
 0x1cc   : >> { %17232 = vst [vmem:[#allocation103_spill] sm:$0xff] %v13773_v40  ;;  %v13775_v11 = vpop.f32.mrb[95].mxu1 }
 0x1cd   : >> { %17233 = vst [vmem:[#allocation104_spill] sm:$0xff] %v13775_v11  ;;  %v17235_v11 = vmax.f32 %v13519_v1, %v13599_v21  ;;  %v17239_v1 = vmax.f32 %v13530_v58, %v13615_v29  ;;  %v17241_v29 = vmax.f32 %v13534_v57, %v13623_v32 }
 0x1d1   : >> { %v933_v9 = vpop.f32.mrb[96].mxu1 }
 0x1d2   : >> { %v1044_v45 = vmax.f32 %v820_v39, %v933_v9  ;;  %v935_v42 = vpop.f32.mrb[97].mxu1  ;;  %v17236_v39 = vmax.f32 %v13521_v53, %v13603_v24  ;;  %v17238_v24 = vmax.f32 %v13528_v52, %v13611_v28  ;;  %v17240_v28 = vmax.f32 %v13532_v6, %v13619_v31 }
 0x1d3   : >> { %v1045_v8 = vmax.f32 %v822_v15, %v935_v42  ;;  %v937_v60 = vpop.f32.mrb[98].mxu1  ;;  %v17237_v42 = vmax.f32 %v13523_v56, %v13607_v26 }
 0x1d4   : >> { %v1076_v7 = vmax.f32 %v17234_v44, %v1044_v45  ;;  %v1046_v5 = vmax.f32 %v824_v14, %v937_v60  ;;  %v939_v12 = vpop.f32.mrb[99].mxu1  ;;  %v1121_v14 = vpop.permute.xlu1 %1120 }
 0x1d5   : >> { %v1077_v40 = vmax.f32 %v17235_v11, %v1045_v8  ;;  %v1047_v61 = vmax.f32 %v826_v13, %v939_v12 }
 0x1d6   : >> { %v1188_v9 = vadd.f32 %v1111_v41, %v1076_v7  ;;  %v1078_v54 = vmax.f32 %v17236_v39, %v1046_v5 }
 0x1d7   : >> { %v1189_v15 = vadd.f32 %v1111_v41, %v1077_v40  ;;  %v1079_v19 = vmax.f32 %v17237_v42, %v1047_v61 }
 0x1d8   : >> { %v1190_v44 = vadd.f32 %v1116_v46, %v1078_v54  ;;  %v1220_v60 = vmax.f32 %v1188_v9, 0.0  ;;  %v1126_v52 = vpop.permute.xlu1 %1125 }
 0x1d9   : >> { %v1221_v45 = vmax.f32 %v1189_v15, 0.0  ;;  %v1191_v43 = vadd.f32 %v1116_v46, %v1079_v19  ;;  %v943_v0 = vpop.f32.mrb[100].mxu1 }
 0x1da   : >> { %v1222_v21 = vmax.f32 %v1190_v44, 0.0  ;;  %v1048_v8 = vmax.f32 %v830_v20, %v943_v0  ;;  %v945_v11 = vpop.f32.mrb[101].mxu1 }
 0x1db   : >> { %v1223_v7 = vmax.f32 %v1191_v43, 0.0  ;;  %v1049_v12 = vmax.f32 %v13723_v38, %v945_v11  ;;  %v947_v13 = vpop.f32.mrb[102].mxu1  ;;  %v1253_v46 = vsel %vm389_vm0, %v1221_v45, 0.0  ;;  %v17242_v45 = vmax.f32 %v13539_v2, %v13627_v33 }
 0x1dc   : >> { %v13793_v5 = vpack.c.bf16 %v1222_v21, %v1220_v60  ;;  %v1080_v26 = vmax.f32 %v17238_v24, %v1048_v8  ;;  %v1050_v40 = vmax.f32 %v13725_v16, %v947_v13  ;;  %v949_v41 = vpop.f32.mrb[103].mxu1  ;;  %v1131_v60 = vpop.permute.xlu0 %1130  ;;  %v17243_v8 = vmax.f32 %v13541_v3, %v13631_v34 }
 0x1dd   : >> { %v1255_v20 = vsel %vm389_vm0, %v1223_v7, 0.0  ;;  %v1081_v38 = vmax.f32 %v17239_v1, %v1049_v12  ;;  %v1051_v53 = vmax.f32 %v13727_v22, %v949_v41  ;;  %v17244_v7 = vmax.f32 %v13543_v10, %v13635_v23  ;;  %v1136_v13 = vpop.permute.xlu1 %1135 }
 0x1de   : >> { %v13807_v56 = vpack.c.bf16 %v1255_v20, %v1253_v46  ;;  %v1192_v61 = vadd.f32 %v1121_v14, %v1080_v26  ;;  %v1082_v16 = vmax.f32 %v17240_v28, %v1050_v40  ;;  %1753 = vrot.lane.b32.xlu0 %v13793_v5, %s12991_s23  ;;  %11407 = vmatprep.subr.bf16.mxu0 %v13793_v5 }
 0x1df   : >> { %v1193_v54 = vadd.f32 %v1121_v14, %v1081_v38  ;;  %v1083_v58 = vmax.f32 %v17241_v29, %v1051_v53  ;;  %11408 = vmatpush3.bf16.msra.mxu0 %v13793_v5  ;;  %v17245_v34 = vmax.f32 %v13545_v51, %v13639_v50  ;;  %v17246_v53 = vmax.f32 %v13550_v55, %v13643_v49 }
 0x1e0   : >> { %v1194_v22 = vadd.f32 %v1126_v52, %v1082_v16  ;;  %1755 = vrot.lane.b32.xlu1 %v13807_v56, %s12991_s23  ;;  %v1224_v39 = vmax.f32 %v1192_v61, 0.0  ;;  %v1141_v16 = vpop.permute.xlu0 %1140 }
 0x1e1   : >> { %v1225_v31 = vmax.f32 %v1193_v54, 0.0  ;;  %v1195_v6 = vadd.f32 %v1126_v52, %v1083_v58  ;;  %v953_v9 = vpop.f32.mrb[104].mxu1  ;;  %v17247_v54 = vmax.f32 %v13552_v63, %v13647_v48  ;;  %v17248_v58 = vmax.f32 %v13554_v59, %v13651_v47 }
 0x1e2   : >> { %v1226_v15 = vmax.f32 %v1194_v22, 0.0  ;;  %v1052_v42 = vmax.f32 %v13729_v37, %v953_v9  ;;  %1980 = vrot.lane.b32.xlu0 %v13793_v5, %s12992_s21  ;;  %v955_v19 = vpop.f32.mrb[105].mxu1  ;;  %v17249_v9 = vld [vmem:[#allocation72_spill] sm:$0xff] }
 0x1e3   : >> { %v1227_v32 = vmax.f32 %v1195_v6, 0.0  ;;  %v1053_v57 = vmax.f32 %v13731_v17, %v955_v19  ;;  %v957_v44 = vpop.f32.mrb[106].mxu1  ;;  %v1257_v21 = vsel %vm389_vm0, %v1225_v31, 0.0  ;;  %v1146_v31 = vpop.permute.xlu1 %1145  ;;  %v17250_v48 = vmax.f32 %v13556_v4, %v17249_v9  ;;  %v17251_v19 = vld [vmem:[#allocation89_spill] sm:$0xff]  ;;  %v17252_v4 = vld [vmem:[#allocation90_spill] sm:$0xff] }
 0x1e4   : >> { %v13825_v14 = vpack.c.bf16 %v1226_v15, %v1224_v39  ;;  %v1084_v43 = vmax.f32 %v17242_v45, %v1052_v42  ;;  %v1054_v0 = vmax.f32 %v13733_v25, %v957_v44  ;;  %1982 = vrot.lane.b32.xlu1 %v13807_v56, %s12992_s21  ;;  %v959_v37 = vpop.f32.mrb[107].mxu1 }
 0x1e5   : >> { %v1259_v17 = vsel %vm389_vm0, %v1227_v32, 0.0  ;;  %v1085_v11 = vmax.f32 %v17243_v8, %v1053_v57  ;;  %v1055_v33 = vmax.f32 %v13735_v36, %v959_v37  ;;  %v17253_v37 = vld [vmem:[#allocation56_spill] sm:$0xff]  ;;  %v17256_v8 = vld [vmem:[#allocation91_spill] sm:$0xff] }
 0x1e6   : >> { %v13841_v2 = vpack.c.bf16 %v1259_v17, %v1257_v21  ;;  %v1196_v25 = vadd.f32 %v1131_v60, %v1084_v43  ;;  %v1086_v12 = vmax.f32 %v17244_v7, %v1054_v0  ;;  %2207 = vrot.lane.b32.xlu0 %v13793_v5, %s12993_s24  ;;  %11409 = vmatprep.subr.bf16.mxu0 %v13825_v14 }
 0x1e7   : >> { %v1197_v24 = vadd.f32 %v1131_v60, %v1085_v11  ;;  %v1087_v3 = vmax.f32 %v17245_v34, %v1055_v33  ;;  %11410 = vmatpush3.bf16.msra.mxu0 %v13825_v14  ;;  %v17254_v60 = vld [vmem:[#allocation73_spill] sm:$0xff] }
 0x1e8   : >> { %v1198_v36 = vadd.f32 %v1136_v13, %v1086_v12  ;;  %2209 = vrot.lane.b32.xlu1 %v13807_v56, %s12993_s24  ;;  %v1228_v40 = vmax.f32 %v1196_v25, 0.0  ;;  %v17255_v21 = vmax.f32 %v17253_v37, %v17254_v60  ;;  %v1151_v25 = vpop.permute.xlu0 %1150  ;;  %v17276_v37 = vld [vmem:[#allocation96_spill] sm:$0xff] }
 0x1e9   : >> { %v1229_v23 = vmax.f32 %v1197_v24, 0.0  ;;  %v1199_v10 = vadd.f32 %v1136_v13, %v1087_v3  ;;  %v963_v26 = vpop.f32.mrb[108].mxu1  ;;  %v17257_v13 = vld [vmem:[#allocation57_spill] sm:$0xff]  ;;  %v17258_v24 = vld [vmem:[#allocation74_spill] sm:$0xff] }
 0x1ea   : >> { %v1230_v41 = vmax.f32 %v1198_v36, 0.0  ;;  %v1056_v46 = vmax.f32 %v13737_v27, %v963_v26  ;;  %1757 = vrot.lane.b32.xlu0 %v13825_v14, %s12991_s23  ;;  %v965_v20 = vpop.f32.mrb[109].mxu1  ;;  %v17259_v34 = vmax.f32 %v17257_v13, %v17258_v24  ;;  %v17260_v36 = vld [vmem:[#allocation92_spill] sm:$0xff]  ;;  %v17280_v13 = vld [vmem:[#allocation63_spill] sm:$0xff] }
 0x1eb   : >> { %v1231_v1 = vmax.f32 %v1199_v10, 0.0  ;;  %v1057_v50 = vmax.f32 %v13739_v35, %v965_v20  ;;  %v967_v51 = vpop.f32.mrb[110].mxu1  ;;  %v1261_v52 = vsel %vm389_vm0, %v1229_v23, 0.0  ;;  %v17281_v24 = vld [vmem:[#allocation80_spill] sm:$0xff] }
 0x1ec   : >> { %v13859_v38 = vpack.c.bf16 %v1230_v41, %v1228_v40  ;;  %v1088_v61 = vmax.f32 %v17246_v53, %v1056_v46  ;;  %v1058_v28 = vmax.f32 %v13741_v18, %v967_v51  ;;  %1759 = vrot.lane.b32.xlu1 %v13841_v2, %s12991_s23  ;;  %v969_v27 = vpop.f32.mrb[111].mxu1  ;;  %v17261_v40 = vld [vmem:[#allocation58_spill] sm:$0xff]  ;;  %v17262_v41 = vld [vmem:[#allocation75_spill] sm:$0xff]  ;;  %v17265_v53 = vld [vmem:[#allocation76_spill] sm:$0xff] }
 0x1ed   : >> { %v1263_v35 = vsel %vm389_vm0, %v1231_v1, 0.0  ;;  %v1089_v29 = vmax.f32 %v17247_v54, %v1057_v50  ;;  %v1059_v49 = vmax.f32 %v13743_v62, %v969_v27  ;;  %v17263_v46 = vmax.f32 %v17261_v40, %v17262_v41  ;;  %v1156_v1 = vpop.permute.xlu1 %1155  ;;  %v17264_v51 = vld [vmem:[#allocation59_spill] sm:$0xff] }
 0x1ee   : >> { %v13875_v55 = vpack.c.bf16 %v1263_v35, %v1261_v52  ;;  %v1200_v18 = vadd.f32 %v1141_v16, %v1088_v61  ;;  %v1090_v22 = vmax.f32 %v17248_v58, %v1058_v28  ;;  %1984 = vrot.lane.b32.xlu0 %v13825_v14, %s12992_s21  ;;  %11411 = vmatprep.subr.bf16.mxu0 %v13859_v38 }
 0x1ef   : >> { %v1201_v6 = vadd.f32 %v1141_v16, %v1089_v29  ;;  %v1091_v63 = vmax.f32 %v17250_v48, %v1059_v49  ;;  %11412 = vmatpush3.bf16.msra.mxu0 %v13859_v38  ;;  %v17266_v61 = vmax.f32 %v17264_v51, %v17265_v53  ;;  %v17267_v49 = vld [vmem:[#allocation93_spill] sm:$0xff]  ;;  %v17284_v53 = vld [vmem:[#allocation98_spill] sm:$0xff] }
 0x1f0   : >> { %v1202_v62 = vadd.f32 %v1146_v31, %v1090_v22  ;;  %1986 = vrot.lane.b32.xlu1 %v13841_v2, %s12992_s21  ;;  %v1232_v15 = vmax.f32 %v1200_v18, 0.0 }
 0x1f1   : >> { %v1233_v39 = vmax.f32 %v1201_v6, 0.0  ;;  %v1203_v47 = vadd.f32 %v1146_v31, %v1091_v63  ;;  %v973_v59 = vpop.f32.mrb[112].mxu1  ;;  %v17268_v31 = vld [vmem:[#allocation94_spill] sm:$0xff]  ;;  %v17269_v63 = vld [vmem:[#allocation60_spill] sm:$0xff] }
 0x1f2   : >> { %v1234_v42 = vmax.f32 %v1202_v62, 0.0  ;;  %v1060_v32 = vmax.f32 %v17251_v19, %v973_v59  ;;  %1761 = vrot.lane.b32.xlu0 %v13859_v38, %s12991_s23  ;;  %v975_v57 = vpop.f32.mrb[113].mxu1  ;;  %v17270_v62 = vld [vmem:[#allocation77_spill] sm:$0xff]  ;;  %v17272_v59 = vld [vmem:[#allocation95_spill] sm:$0xff]  ;;  %v1161_v19 = vpop.permute.xlu0 %1160 }
 0x1f3   : >> { %v1235_v44 = vmax.f32 %v1203_v47, 0.0  ;;  %v1061_v45 = vmax.f32 %v17252_v4, %v975_v57  ;;  %v977_v43 = vpop.f32.mrb[114].mxu1  ;;  %v1265_v7 = vsel %vm389_vm0, %v1233_v39, 0.0  ;;  %v17271_v39 = vmax.f32 %v17269_v63, %v17270_v62  ;;  %v17274_v4 = vld [vmem:[#allocation78_spill] sm:$0xff] }
 0x1f4   : >> { %v13893_v0 = vpack.c.bf16 %v1234_v42, %v1232_v15  ;;  %v1092_v17 = vmax.f32 %v17255_v21, %v1060_v32  ;;  %v1062_v11 = vmax.f32 %v17256_v8, %v977_v43  ;;  %1763 = vrot.lane.b32.xlu1 %v13875_v55, %s12991_s23  ;;  %v979_v33 = vpop.f32.mrb[115].mxu1  ;;  %v17277_v8 = vld [vmem:[#allocation62_spill] sm:$0xff] }
 0x1f5   : >> { %v1267_v12 = vsel %vm389_vm0, %v1235_v44, 0.0  ;;  %v1093_v3 = vmax.f32 %v17259_v34, %v1061_v45  ;;  %v1063_v23 = vmax.f32 %v17260_v36, %v979_v33  ;;  %v17273_v44 = vld [vmem:[#allocation61_spill] sm:$0xff]  ;;  %v17282_v34 = vmax.f32 %v17280_v13, %v17281_v24 }
 0x1f6   : >> { %v13909_v10 = vpack.c.bf16 %v1267_v12, %v1265_v7  ;;  %v1204_v26 = vadd.f32 %v1151_v25, %v1092_v17  ;;  %v1094_v20 = vmax.f32 %v17263_v46, %v1062_v11  ;;  %1988 = vrot.lane.b32.xlu0 %v13859_v38, %s12992_s21  ;;  %11413 = vmatprep.subr.bf16.mxu0 %v13893_v0  ;;  %v17278_v11 = vld [vmem:[#allocation79_spill] sm:$0xff]  ;;  %v1166_v7 = vpop.permute.xlu1 %1165 }
 0x1f7   : >> { %v1205_v50 = vadd.f32 %v1151_v25, %v1093_v3  ;;  %v1095_v28 = vmax.f32 %v17266_v61, %v1063_v23  ;;  %11414 = vmatpush3.bf16.msra.mxu0 %v13893_v0  ;;  %v17275_v45 = vmax.f32 %v17273_v44, %v17274_v4  ;;  %v17279_v33 = vmax.f32 %v17277_v8, %v17278_v11 }
 0x1f8   : >> { %v1206_v27 = vadd.f32 %v1156_v1, %v1094_v20  ;;  %1990 = vrot.lane.b32.xlu1 %v13875_v55, %s12992_s21  ;;  %v1236_v54 = vmax.f32 %v1204_v26, 0.0  ;;  %v17283_v20 = vld [vmem:[#allocation97_spill] sm:$0xff] }
 0x1f9   : >> { %v1237_v16 = vmax.f32 %v1205_v50, 0.0  ;;  %v1207_v52 = vadd.f32 %v1156_v1, %v1095_v28  ;;  %v983_v35 = vpop.f32.mrb[116].mxu1 }
 0x1fa   : >> { %v1238_v29 = vmax.f32 %v1206_v27, 0.0  ;;  %v1064_v18 = vmax.f32 %v17267_v49, %v983_v35  ;;  %1765 = vrot.lane.b32.xlu0 %v13893_v0, %s12991_s23  ;;  %v985_v58 = vpop.f32.mrb[117].mxu1  ;;  %v1176_v44 = vpop.permute.xlu1 %1175 }
 0x1fb   : >> { %v1239_v22 = vmax.f32 %v1207_v52, 0.0  ;;  %v1065_v6 = vmax.f32 %v17268_v31, %v985_v58  ;;  %v987_v9 = vpop.f32.mrb[118].mxu1  ;;  %v1269_v32 = vsel %vm389_vm0, %v1237_v16, 0.0  ;;  %v17285_v16 = vld [vmem:[#allocation64_spill] sm:$0xff]  ;;  %v17286_v52 = vld [vmem:[#allocation81_spill] sm:$0xff]  ;;  %v1171_v58 = vpop.permute.xlu0 %1170 }
 0x1fc   : >> { %v13927_v48 = vpack.c.bf16 %v1238_v29, %v1236_v54  ;;  %v1096_v47 = vmax.f32 %v17271_v39, %v1064_v18  ;;  %v1066_v15 = vmax.f32 %v17272_v59, %v987_v9  ;;  %1767 = vrot.lane.b32.xlu1 %v13909_v10, %s12991_s23  ;;  %v989_v42 = vpop.f32.mrb[119].mxu1  ;;  %v17287_v35 = vmax.f32 %v17285_v16, %v17286_v52  ;;  %v17288_v29 = vld [vmem:[#allocation99_spill] sm:$0xff]  ;;  %v17290_v9 = vld [vmem:[#allocation82_spill] sm:$0xff]  ;;  %v17292_v39 = vld [vmem:[#allocation100_spill] sm:$0xff] }
 0x1fd   : >> { %v1271_v57 = vsel %vm389_vm0, %v1239_v22, 0.0  ;;  %v1097_v43 = vmax.f32 %v17275_v45, %v1065_v6  ;;  %v1067_v60 = vmax.f32 %v17276_v37, %v989_v42  ;;  %v17289_v6 = vld [vmem:[#allocation65_spill] sm:$0xff]  ;;  %v17293_v42 = vld [vmem:[#allocation66_spill] sm:$0xff]  ;;  %v17296_v45 = vld [vmem:[#allocation67_spill] sm:$0xff] }
 0x1fe   : >> { %v13943_v21 = vpack.c.bf16 %v1271_v57, %v1269_v32  ;;  %v1208_v17 = vadd.f32 %v1161_v19, %v1096_v47  ;;  %v1098_v25 = vmax.f32 %v17279_v33, %v1066_v15  ;;  %1992 = vrot.lane.b32.xlu0 %v13893_v0, %s12992_s21  ;;  %11415 = vmatprep.subr.bf16.mxu0 %v13927_v48  ;;  %v17305_v16 = vld [vmem:[#allocation69_spill] sm:$0xff]  ;;  %v17306_v52 = vld [vmem:[#allocation86_spill] sm:$0xff] }
 0x1ff   : >> { %v1209_v12 = vadd.f32 %v1161_v19, %v1097_v43  ;;  %v1099_v3 = vmax.f32 %v17282_v34, %v1067_v60  ;;  %11416 = vmatpush3.bf16.msra.mxu0 %v13927_v48  ;;  %v17291_v63 = vmax.f32 %v17289_v6, %v17290_v9  ;;  %v17294_v19 = vld [vmem:[#allocation83_spill] sm:$0xff]  ;;  %v17297_v43 = vld [vmem:[#allocation84_spill] sm:$0xff] }
 0x200   : >> { %v1210_v36 = vadd.f32 %v1166_v7, %v1098_v25  ;;  %1994 = vrot.lane.b32.xlu1 %v13909_v10, %s12992_s21  ;;  %v1240_v41 = vmax.f32 %v1208_v17, 0.0  ;;  %v17295_v32 = vmax.f32 %v17293_v42, %v17294_v19  ;;  %v17298_v37 = vmax.f32 %v17296_v45, %v17297_v43 }
 0x201   : >> { %v1241_v23 = vmax.f32 %v1209_v12, 0.0  ;;  %v1211_v26 = vadd.f32 %v1166_v7, %v1099_v3  ;;  %v993_v40 = vpop.f32.mrb[120].mxu1  ;;  %v17299_v12 = vld [vmem:[#allocation101_spill] sm:$0xff]  ;;  %v17300_v3 = vld [vmem:[#allocation102_spill] sm:$0xff] }
 0x202   : >> { %v1242_v46 = vmax.f32 %v1210_v36, 0.0  ;;  %v1068_v1 = vmax.f32 %v17283_v20, %v993_v40  ;;  %1769 = vrot.lane.b32.xlu0 %v13927_v48, %s12991_s23  ;;  %v995_v50 = vpop.f32.mrb[121].mxu1  ;;  %v17301_v40 = vld [vmem:[#allocation68_spill] sm:$0xff] }
 0x203   : >> { %v1243_v51 = vmax.f32 %v1211_v26, 0.0  ;;  %v1069_v61 = vmax.f32 %v17284_v53, %v995_v50  ;;  %v997_v28 = vpop.f32.mrb[122].mxu1  ;;  %v1273_v22 = vsel %vm389_vm0, %v1241_v23, 0.0  ;;  %v1181_v53 = vpop.permute.xlu0 %1180 }
 0x204   : >> { %v13961_v27 = vpack.c.bf16 %v1242_v46, %v1240_v41  ;;  %v1100_v54 = vmax.f32 %v17287_v35, %v1068_v1  ;;  %v1070_v49 = vmax.f32 %v17288_v29, %v997_v28  ;;  %1771 = vrot.lane.b32.xlu1 %v13943_v21, %s12991_s23  ;;  %v999_v18 = vpop.f32.mrb[123].mxu1  ;;  %v17302_v41 = vld [vmem:[#allocation85_spill] sm:$0xff]  ;;  %v17304_v1 = vld [vmem:[#allocation103_spill] sm:$0xff]  ;;  %v17307_v35 = vmax.f32 %v17305_v16, %v17306_v52  ;;  %v17308_v29 = vld [vmem:[#allocation104_spill] sm:$0xff] }
 0x205   : >> { %v1275_v31 = vsel %vm389_vm0, %v1243_v51, 0.0  ;;  %v1101_v62 = vmax.f32 %v17291_v63, %v1069_v61  ;;  %v1071_v47 = vmax.f32 %v17292_v39, %v999_v18  ;;  %v17303_v46 = vmax.f32 %v17301_v40, %v17302_v41  ;;  %v1186_v63 = vpop.permute.xlu1 %1185  ;;  %v17312_v39 = vld [vmem:[#allocation71_spill] sm:$0xff] }
 0x206   : >> { %v13977_v59 = vpack.c.bf16 %v1275_v31, %v1273_v22  ;;  %v1212_v15 = vadd.f32 %v1171_v58, %v1100_v54  ;;  %v1102_v57 = vmax.f32 %v17295_v32, %v1070_v49  ;;  %1996 = vrot.lane.b32.xlu0 %v13927_v48, %s12992_s21  ;;  %11417 = vmatprep.subr.bf16.mxu0 %v13961_v27  ;;  %v17309_v22 = vld [vmem:[#allocation70_spill] sm:$0xff]  ;;  %v17310_v31 = vld [vmem:[#allocation87_spill] sm:$0xff] }
 0x207   : >> { %v1213_v4 = vadd.f32 %v1171_v58, %v1101_v62  ;;  %v1103_v60 = vmax.f32 %v17298_v37, %v1071_v47  ;;  %11418 = vmatpush3.bf16.msra.mxu0 %v13961_v27  ;;  %v17311_v6 = vmax.f32 %v17309_v22, %v17310_v31  ;;  %v17313_v47 = vld [vmem:[#allocation88_spill] sm:$0xff] }
 0x208   : >> { %v1214_v17 = vadd.f32 %v1176_v44, %v1102_v57  ;;  %1998 = vrot.lane.b32.xlu1 %v13943_v21, %s12992_s21  ;;  %v1244_v25 = vmax.f32 %v1212_v15, 0.0  ;;  %v17314_v15 = vmax.f32 %v17312_v39, %v17313_v47 }
 0x209   : >> { %v1245_v8 = vmax.f32 %v1213_v4, 0.0  ;;  %v1215_v11 = vadd.f32 %v1176_v44, %v1103_v60  ;;  %v1003_v33 = vpop.f32.mrb[124].mxu1 }
 0x20a   : >> { %v1246_v7 = vmax.f32 %v1214_v17, 0.0  ;;  %v1072_v13 = vmax.f32 %v17299_v12, %v1003_v33  ;;  %1773 = vrot.lane.b32.xlu0 %v13961_v27, %s12991_s23  ;;  %v1005_v24 = vpop.f32.mrb[125].mxu1  ;;  %v11853_v33 = vld [vmem:[%s17053_s3 + $0x18] sm:$0xff]   ;;  %v11856_v12 = vld [vmem:[%s17053_s3 + $0x30] sm:$0xff]  }
 0x20b   : >> { %v1247_v34 = vmax.f32 %v1215_v11, 0.0  ;;  %v1073_v36 = vmax.f32 %v17300_v3, %v1005_v24  ;;  %v1007_v23 = vpop.f32.mrb[126].mxu1  ;;  %v1277_v61 = vsel %vm389_vm0, %v1245_v8, 0.0  ;;  %v11851_v8 = vld [vmem:[%s17053_s3 + $0x8] sm:$0xff]   ;;  %v11852_v11 = vld [vmem:[%s17053_s3 + $0x10] sm:$0xff]   ;;  %v11858_v24 = vld [vmem:[%s17053_s3 + $0x80] sm:$0xff]  }
 0x20c   : >> { %v13995_v26 = vpack.c.bf16 %v1246_v7, %v1244_v25  ;;  %v1104_v20 = vmax.f32 %v17303_v46, %v1072_v13  ;;  %v1074_v50 = vmax.f32 %v17304_v1, %v1007_v23  ;;  %1775 = vrot.lane.b32.xlu1 %v13977_v59, %s12991_s23  ;;  %v1009_v51 = vpop.f32.mrb[127].mxu1  ;;  %v11854_v25 = vld [vmem:[%s17053_s3 + $0x20] sm:$0xff]   ;;  %v11855_v7 = vld [vmem:[%s17053_s3 + $0x28] sm:$0xff]   ;;  %v11857_v13 = vld [vmem:[%s17053_s3 + $0x38] sm:$0xff]  }
 0x20d   : >> { %v1279_v28 = vsel %vm389_vm0, %v1247_v34, 0.0  ;;  %v1105_v54 = vmax.f32 %v17307_v35, %v1073_v36  ;;  %v1075_v49 = vmax.f32 %v17308_v29, %v1009_v51 }
 0x20e   : >> { %v14011_v18 = vpack.c.bf16 %v1279_v28, %v1277_v61  ;;  %v1216_v58 = vadd.f32 %v1181_v53, %v1104_v20  ;;  %v1106_v9 = vmax.f32 %v17311_v6, %v1074_v50  ;;  %2000 = vrot.lane.b32.xlu0 %v13961_v27, %s12992_s21  ;;  %11419 = vmatprep.subr.bf16.mxu0 %v13995_v26 }
 0x20f   : >> { %v1217_v62 = vadd.f32 %v1181_v53, %v1105_v54  ;;  %v1107_v42 = vmax.f32 %v17314_v15, %v1075_v49  ;;  %11420 = vmatpush3.bf16.msra.mxu0 %v13995_v26 }
 0x210   : >> { %v1218_v19 = vadd.f32 %v1186_v63, %v1106_v9  ;;  %2002 = vrot.lane.b32.xlu1 %v13977_v59, %s12992_s21  ;;  %v1248_v44 = vmax.f32 %v1216_v58, 0.0 }
 0x211   : >> { %v1249_v32 = vmax.f32 %v1217_v62, 0.0  ;;  %v1219_v57 = vadd.f32 %v1186_v63, %v1107_v42 }
 0x212   : >> { %v1250_v4 = vmax.f32 %v1218_v19, 0.0  ;;  %1777 = vrot.lane.b32.xlu0 %v13995_v26, %s12991_s23 }
 0x213   : >> { %v1251_v45 = vmax.f32 %v1219_v57, 0.0  ;;  %v1281_v37 = vsel %vm389_vm0, %v1249_v32, 0.0 }
 0x214   : >> { %v14027_v43 = vpack.c.bf16 %v1250_v4, %v1248_v44  ;;  %1779 = vrot.lane.b32.xlu1 %v14011_v18, %s12991_s23 }
 0x215   : >> { %v1283_v60 = vsel %vm389_vm0, %v1251_v45, 0.0 }
 0x216   : >> { %v14035_v17 = vpack.c.bf16 %v1283_v60, %v1281_v37  ;;  %2004 = vrot.lane.b32.xlu0 %v13995_v26, %s12992_s21  ;;  %11421 = vmatprep.subr.bf16.mxu0 %v14027_v43 }
 0x217   : >> { %11422 = vmatpush3.bf16.msra.mxu0 %v14027_v43 }
 0x218   : >> { %2006 = vrot.lane.b32.xlu1 %v14011_v18, %s12992_s21 }
 0x21a   : >> { %1781 = vrot.lane.b32.xlu0 %v14027_v43, %s12991_s23  ;;  %11424 = vmatmul.mubr.bf16.vlgmr.msra.gmra.mrb[0].mxu0 %v11851_v8 }
 0x21b   : >> { %11427 = vmatprep.mubr.bf16.mxu0 %v11852_v11 }
 0x21c   : >> { %1783 = vrot.lane.b32.xlu1 %v14035_v17, %s12991_s23  ;;  %s12998_s23 = smov 102  }
 0x21e   : >> { %2211 = vrot.lane.b32.xlu0 %v13825_v14, %s12993_s24 }
 0x220   : >> { %2213 = vrot.lane.b32.xlu1 %v13841_v2, %s12993_s24 }
 0x222   : >> { %2008 = vrot.lane.b32.xlu0 %v14027_v43, %s12992_s21  ;;  %11428 = vmatmul.mubr.bf16.gmra.mrb[4].mxu0 %v11853_v33  ;;  %v11859_v33 = vld [vmem:[%s17053_s3 + $0x88] sm:$0xff]  }
 0x223   : >> { %11431 = vmatprep.mubr.bf16.mxu0 %v11854_v25 }
 0x224   : >> { %2217 = vrot.lane.b32.xlu1 %v13875_v55, %s12993_s24 }
 0x226   : >> { %2215 = vrot.lane.b32.xlu0 %v13859_v38, %s12993_s24 }
 0x228   : >> { %2221 = vrot.lane.b32.xlu1 %v13909_v10, %s12993_s24 }
 0x22a   : >> { %2219 = vrot.lane.b32.xlu0 %v13893_v0, %s12993_s24  ;;  %11432 = vmatmul.mubr.bf16.gmra.mrb[8].mxu0 %v11855_v7  ;;  %v11860_v7 = vld [vmem:[%s17053_s3 + $0x90] sm:$0xff]  }
 0x22b   : >> { %11435 = vmatprep.mubr.bf16.mxu0 %v11856_v12 }
 0x22c   : >> { %2225 = vrot.lane.b32.xlu1 %v13943_v21, %s12993_s24 }
 0x22e   : >> { %2223 = vrot.lane.b32.xlu0 %v13927_v48, %s12993_s24 }
 0x230   : >> { %2229 = vrot.lane.b32.xlu1 %v13977_v59, %s12993_s24 }
 0x232   : >> { %2227 = vrot.lane.b32.xlu0 %v13961_v27, %s12993_s24  ;;  %11436 = vmatmul.mubr.bf16.gmra.mrb[12].mxu0 %v11857_v13 }
 0x233   : >> { %11455 = vmatprep.mubr.bf16.mxu0 %v11858_v24 }
 0x234   : >> { %2233 = vrot.lane.b32.xlu1 %v14011_v18, %s12993_s24 }
 0x236   : >> { %2231 = vrot.lane.b32.xlu0 %v13995_v26, %s12993_s24 }
 0x238   : >> { %2436 = vrot.lane.b32.xlu1 %v13807_v56, %s12994_s17 }
 0x23a   : >> { %2235 = vrot.lane.b32.xlu0 %v14027_v43, %s12993_s24 }
 0x23c   : >> { %2010 = vrot.lane.b32.xlu1 %v14035_v17, %s12992_s21  ;;  %s12995_s21 = smov 104  }
 0x23e   : >> { %2434 = vrot.lane.b32.xlu0 %v13793_v5, %s12994_s17 }
 0x240   : >> { %2440 = vrot.lane.b32.xlu1 %v13841_v2, %s12994_s17 }
 0x242   : >> { %2438 = vrot.lane.b32.xlu0 %v13825_v14, %s12994_s17 }
 0x244   : >> { %2444 = vrot.lane.b32.xlu1 %v13875_v55, %s12994_s17 }
 0x246   : >> { %2442 = vrot.lane.b32.xlu0 %v13859_v38, %s12994_s17 }
 0x248   : >> { %2448 = vrot.lane.b32.xlu1 %v13909_v10, %s12994_s17 }
 0x24a   : >> { %2446 = vrot.lane.b32.xlu0 %v13893_v0, %s12994_s17 }
 0x24c   : >> { %2452 = vrot.lane.b32.xlu1 %v13943_v21, %s12994_s17 }
 0x24e   : >> { %2450 = vrot.lane.b32.xlu0 %v13927_v48, %s12994_s17 }
 0x250   : >> { %v1754_v34 = vpop.permute.xlu0 %1753  ;;  %2456 = vrot.lane.b32.xlu1 %v13977_v59, %s12994_s17 }
 0x252   : >> { %v1756_v3 = vpop.permute.xlu1 %1755  ;;  %2454 = vrot.lane.b32.xlu0 %v13961_v27, %s12994_s17 }
 0x253   : >> { %v1786_v36 = vsel %vm1785_vm2, %v1754_v34, %v1756_v3 }
 0x254   : >> { %v14126_v23 = vpop.permute.xlu0 %1980  ;;  %11439 = vmatprep.subr.bf16.mxu0 %v1786_v36  ;;  %2460 = vrot.lane.b32.xlu1 %v14011_v18, %s12994_s17 }
 0x255   : >> { %11440 = vmatpush3.bf16.msra.mxu0 %v1786_v36  ;;  %v11861_v36 = vld [vmem:[%s17053_s3 + $0x98] sm:$0xff]  }
 0x256   : >> { %v14130_v40 = vpop.permute.xlu1 %1982  ;;  %2458 = vrot.lane.b32.xlu0 %v13995_v26, %s12994_s17 }
 0x257   : >> { %v2013_v25 = vsel %vm2012_vm3, %v14126_v23, %v14130_v40  ;;  %v11862_v40 = vld [vmem:[%s17053_s3 + $0xa0] sm:$0xff]  }
 0x258   : >> { %v14134_v41 = vpop.permute.xlu0 %2207  ;;  %2663 = vrot.lane.b32.xlu1 %v13807_v56, %s12995_s21 }
 0x25a   : >> { %v14138_v46 = vpop.permute.xlu1 %2209  ;;  %2462 = vrot.lane.b32.xlu0 %v14027_v43, %s12994_s17 }
 0x25c   : >> { %v1758_v20 = vpop.permute.xlu0 %1757  ;;  %2237 = vrot.lane.b32.xlu1 %v14035_v17, %s12993_s24  ;;  %s12996_s24 = smov 103  }
 0x25e   : >> { %v1760_v1 = vpop.permute.xlu1 %1759  ;;  %2661 = vrot.lane.b32.xlu0 %v13793_v5, %s12995_s21 }
 0x25f   : >> { %v1787_v50 = vsel %vm1785_vm2, %v1758_v20, %v1760_v1 }
 0x260   : >> { %v14147_v51 = vpop.permute.xlu0 %1984  ;;  %11441 = vmatprep.subr.bf16.mxu0 %v1787_v50  ;;  %2667 = vrot.lane.b32.xlu1 %v13841_v2, %s12995_s21 }
 0x261   : >> { %11442 = vmatpush3.bf16.msra.mxu0 %v1787_v50 }
 0x262   : >> { %v14151_v53 = vpop.permute.xlu1 %1986  ;;  %2665 = vrot.lane.b32.xlu0 %v13825_v14, %s12995_s21 }
 0x263   : >> { %v2014_v24 = vsel %vm2012_vm3, %v14147_v51, %v14151_v53 }
 0x264   : >> { %v1762_v61 = vpop.permute.xlu0 %1761  ;;  %2671 = vrot.lane.b32.xlu1 %v13875_v55, %s12995_s21 }
 0x266   : >> { %v1764_v28 = vpop.permute.xlu1 %1763  ;;  %2669 = vrot.lane.b32.xlu0 %v13859_v38, %s12995_s21 }
 0x267   : >> { %v1788_v16 = vsel %vm1785_vm2, %v1762_v61, %v1764_v28  ;;  %v11863_v61 = vld [vmem:[%s17053_s3 + $0xa8] sm:$0xff]  }
 0x268   : >> { %v14160_v52 = vpop.permute.xlu0 %1988  ;;  %11443 = vmatprep.subr.bf16.mxu0 %v1788_v16  ;;  %2675 = vrot.lane.b32.xlu1 %v13909_v10, %s12995_s21 }
 0x269   : >> { %11444 = vmatpush3.bf16.msra.mxu0 %v1788_v16  ;;  %v11864_v16 = vld [vmem:[%s17053_s3 + $0xb0] sm:$0xff]  }
 0x26a   : >> { %v14164_v35 = vpop.permute.xlu1 %1990  ;;  %2673 = vrot.lane.b32.xlu0 %v13893_v0, %s12995_s21 }
 0x26b   : >> { %v2015_v23 = vsel %vm2012_vm3, %v14160_v52, %v14164_v35 }
 0x26c   : >> { %v1766_v54 = vpop.permute.xlu0 %1765  ;;  %2679 = vrot.lane.b32.xlu1 %v13943_v21, %s12995_s21 }
 0x26e   : >> { %v1768_v29 = vpop.permute.xlu1 %1767  ;;  %2677 = vrot.lane.b32.xlu0 %v13927_v48, %s12995_s21 }
 0x26f   : >> { %v1789_v49 = vsel %vm1785_vm2, %v1766_v54, %v1768_v29  ;;  %v11865_v29 = vld [vmem:[%s17053_s3 + $0xb8] sm:$0xff]  }
 0x270   : >> { %v14173_v58 = vpop.permute.xlu0 %1992  ;;  %11445 = vmatprep.subr.bf16.mxu0 %v1789_v49  ;;  %2683 = vrot.lane.b32.xlu1 %v13977_v59, %s12995_s21 }
 0x271   : >> { %11446 = vmatpush3.bf16.msra.mxu0 %v1789_v49 }
 0x272   : >> { %v14177_v22 = vpop.permute.xlu1 %1994  ;;  %2681 = vrot.lane.b32.xlu0 %v13961_v27, %s12995_s21 }
 0x273   : >> { %v2016_v50 = vsel %vm2012_vm3, %v14173_v58, %v14177_v22  ;;  %v11866_v58 = vld [vmem:[%s17053_s3 + $0xc0] sm:$0xff]  }
 0x274   : >> { %v1770_v31 = vpop.permute.xlu0 %1769  ;;  %2687 = vrot.lane.b32.xlu1 %v14011_v18, %s12995_s21 }
 0x276   : >> { %v1772_v6 = vpop.permute.xlu1 %1771  ;;  %2685 = vrot.lane.b32.xlu0 %v13995_v26, %s12995_s21 }
 0x277   : >> { %v1790_v9 = vsel %vm1785_vm2, %v1770_v31, %v1772_v6 }
 0x278   : >> { %v14186_v63 = vpop.permute.xlu0 %1996  ;;  %11447 = vmatprep.subr.bf16.mxu0 %v1790_v9  ;;  %2890 = vrot.lane.b32.xlu1 %v13807_v56, %s12996_s24 }
 0x279   : >> { %11448 = vmatpush3.bf16.msra.mxu0 %v1790_v9  ;;  %v11867_v9 = vld [vmem:[%s17053_s3 + $0xc8] sm:$0xff]  }
 0x27a   : >> { %v14190_v62 = vpop.permute.xlu1 %1998  ;;  %2689 = vrot.lane.b32.xlu0 %v14027_v43, %s12995_s21 }
 0x27b   : >> { %v2017_v28 = vsel %vm2012_vm3, %v14186_v63, %v14190_v62  ;;  %v2240_v63 = vsel %vm2239_vm4, %v14134_v41, %v14138_v46  ;;  %v11868_v62 = vld [vmem:[%s17053_s3 + $0xd0] sm:$0xff]  }
 0x27c   : >> { %v1774_v39 = vpop.permute.xlu0 %1773  ;;  %2464 = vrot.lane.b32.xlu1 %v14035_v17, %s12994_s17 }
 0x27e   : >> { %v1776_v47 = vpop.permute.xlu1 %1775  ;;  %2888 = vrot.lane.b32.xlu0 %v13793_v5, %s12996_s24 }
 0x27f   : >> { %v1791_v15 = vsel %vm1785_vm2, %v1774_v39, %v1776_v47  ;;  %v11869_v47 = vld [vmem:[%s17053_s3 + $0xd8] sm:$0xff]  }
 0x280   : >> { %v14199_v42 = vpop.permute.xlu0 %2000  ;;  %11449 = vmatprep.subr.bf16.mxu0 %v1791_v15  ;;  %2894 = vrot.lane.b32.xlu1 %v13841_v2, %s12996_s24 }
 0x281   : >> { %11450 = vmatpush3.bf16.msra.mxu0 %v1791_v15 }
 0x282   : >> { %v14203_v19 = vpop.permute.xlu1 %2002  ;;  %2892 = vrot.lane.b32.xlu0 %v13825_v14, %s12996_s24 }
 0x283   : >> { %v2018_v35 = vsel %vm2012_vm3, %v14199_v42, %v14203_v19  ;;  %v11870_v42 = vld [vmem:[%s17053_s3 + $0xe0] sm:$0xff]  }
 0x284   : >> { %v1778_v32 = vpop.permute.xlu0 %1777  ;;  %2898 = vrot.lane.b32.xlu1 %v13875_v55, %s12996_s24 }
 0x286   : >> { %v1780_v57 = vpop.permute.xlu1 %1779  ;;  %2896 = vrot.lane.b32.xlu0 %v13859_v38, %s12996_s24 }
 0x287   : >> { %v1792_v44 = vsel %vm1785_vm2, %v1778_v32, %v1780_v57 }
 0x288   : >> { %v14212_v4 = vpop.permute.xlu0 %2004  ;;  %11451 = vmatprep.subr.bf16.mxu0 %v1792_v44  ;;  %2902 = vrot.lane.b32.xlu1 %v13909_v10, %s12996_s24 }
 0x289   : >> { %11452 = vmatpush3.bf16.msra.mxu0 %v1792_v44  ;;  %v11871_v44 = vld [vmem:[%s17053_s3 + $0xe8] sm:$0xff]  }
 0x28a   : >> { %v14216_v45 = vpop.permute.xlu1 %2006  ;;  %2900 = vrot.lane.b32.xlu0 %v13893_v0, %s12996_s24 }
 0x28b   : >> { %v2019_v49 = vsel %vm2012_vm3, %v14212_v4, %v14216_v45  ;;  %v11872_v45 = vld [vmem:[%s17053_s3 + $0xf0] sm:$0xff]  }
 0x28c   : >> { %v1782_v37 = vpop.permute.xlu0 %1781  ;;  %2906 = vrot.lane.b32.xlu1 %v13943_v21, %s12996_s24 }
 0x28e   : >> { %2904 = vrot.lane.b32.xlu0 %v13927_v48, %s12996_s24  ;;  %v1784_v60 = vpop.permute.xlu1 %1783 }
 0x28f   : >> { %v1793_v8 = vsel %vm1785_vm2, %v1782_v37, %v1784_v60 }
 0x290   : >> { %v14225_v11 = vpop.permute.xlu0 %2211  ;;  %2910 = vrot.lane.b32.xlu1 %v13977_v59, %s12996_s24  ;;  %11453 = vmatprep.subr.bf16.mxu0 %v1793_v8 }
 0x291   : >> { %11454 = vmatpush3.bf16.msra.mxu0 %v1793_v8 }
 0x292   : >> { %2908 = vrot.lane.b32.xlu0 %v13961_v27, %s12996_s24  ;;  %11471 = vmatprep.subr.bf16.mxu0 %v2013_v25  ;;  %v14240_v12 = vpop.permute.xlu1 %2213 }
 0x293   : >> { %v2241_v41 = vsel %vm2239_vm4, %v14225_v11, %v14240_v12 }
 0x294   : >> { %v14242_v13 = vpop.permute.xlu0 %2008  ;;  %2914 = vrot.lane.b32.xlu1 %v14011_v18, %s12996_s24  ;;  %11456 = vmatmul.mubr.bf16.vlgmr.msra.gmra.mrb[0].mxu0 %v11859_v33 }
 0x295   : >> { %11472 = vmatpush3.bf16.msra.mxu0 %v2013_v25  ;;  %11459 = vmatprep.mubr.bf16.mxu0 %v11860_v7  ;;  %v11874_v25 = vld [vmem:[%s17053_s3 + $0x100] sm:$0xff]  }
 0x296   : >> { %2912 = vrot.lane.b32.xlu0 %v13995_v26, %s12996_s24  ;;  %11473 = vmatprep.subr.bf16.mxu0 %v2014_v24  ;;  %v14251_v34 = vpop.permute.xlu1 %2217 }
 0x298   : >> { %v14253_v3 = vpop.permute.xlu0 %2215  ;;  %1399 = vrot.lane.b32.xlu1 %v13807_v56, %s12997_s16 }
 0x299   : >> { %11474 = vmatpush3.bf16.msra.mxu0 %v2014_v24  ;;  %v2242_v15 = vsel %vm2239_vm4, %v14253_v3, %v14251_v34 }
 0x29a   : >> { %2916 = vrot.lane.b32.xlu0 %v14027_v43, %s12996_s24  ;;  %11475 = vmatprep.subr.bf16.mxu0 %v2015_v23  ;;  %v14268_v20 = vpop.permute.xlu1 %2221 }
 0x29c   : >> { %v14270_v1 = vpop.permute.xlu0 %2219  ;;  %2691 = vrot.lane.b32.xlu1 %v14035_v17, %s12995_s21  ;;  %11460 = vmatmul.mubr.bf16.gmra.mrb[4].mxu0 %v11861_v36  ;;  %v11876_v36 = vld [vmem:[%s17053_s3 + $0x110] sm:$0xff]  }
 0x29d   : >> { %11476 = vmatpush3.bf16.msra.mxu0 %v2015_v23  ;;  %11463 = vmatprep.mubr.bf16.mxu0 %v11862_v40  ;;  %v2243_v32 = vsel %vm2239_vm4, %v14270_v1, %v14268_v20 }
 0x29e   : >> { %1397 = vrot.lane.b32.xlu0 %v13793_v5, %s12997_s16  ;;  %11477 = vmatprep.subr.bf16.mxu0 %v2016_v50  ;;  %v14279_v51 = vpop.permute.xlu1 %2225 }
 0x2a0   : >> { %v14281_v53 = vpop.permute.xlu0 %2223  ;;  %3117 = vrot.lane.b32.xlu1 %v13807_v56, %s12998_s23 }
 0x2a1   : >> { %11478 = vmatpush3.bf16.msra.mxu0 %v2016_v50  ;;  %v2244_v4 = vsel %vm2239_vm4, %v14281_v53, %v14279_v51  ;;  %v11878_v51 = vld [vmem:[%s17053_s3 + $0x120] sm:$0xff]  }
 0x2a2   : >> { %3115 = vrot.lane.b32.xlu0 %v13793_v5, %s12998_s23  ;;  %11479 = vmatprep.subr.bf16.mxu0 %v2017_v28  ;;  %v14296_v52 = vpop.permute.xlu1 %2229 }
 0x2a4   : >> { %v14298_v56 = vpop.permute.xlu0 %2227  ;;  %1403 = vrot.lane.b32.xlu1 %v13841_v2, %s12997_s16  ;;  %11464 = vmatmul.mubr.bf16.gmra.mrb[8].mxu0 %v11863_v61 }
 0x2a5   : >> { %11480 = vmatpush3.bf16.msra.mxu0 %v2017_v28  ;;  %11467 = vmatprep.mubr.bf16.mxu0 %v11864_v16  ;;  %v2245_v8 = vsel %vm2239_vm4, %v14298_v56, %v14296_v52  ;;  %v17315_v16 = vld [vmem:[#allocation40_spill] sm:$0xff]  ;;  %v17316_v56 = vld [vmem:[#allocation41_spill] sm:$0xff] }
 0x2a6   : >> { %1401 = vrot.lane.b32.xlu0 %v13825_v14, %s12997_s16  ;;  %11481 = vmatprep.subr.bf16.mxu0 %v2018_v35  ;;  %v14307_v5 = vpop.permute.xlu1 %2233 }
 0x2a8   : >> { %v14309_v54 = vpop.permute.xlu0 %2231  ;;  %3121 = vrot.lane.b32.xlu1 %v13841_v2, %s12998_s23 }
 0x2a9   : >> { %11482 = vmatpush3.bf16.msra.mxu0 %v2018_v35  ;;  %v2246_v33 = vsel %vm2239_vm4, %v14309_v54, %v14307_v5  ;;  %v11880_v5 = vld [vmem:[%s17053_s3 + $0x130] sm:$0xff]   ;;  %v17317_v54 = vld [vmem:[#allocation42_spill] sm:$0xff] }
 0x2aa   : >> { %3119 = vrot.lane.b32.xlu0 %v13825_v14, %s12998_s23  ;;  %11483 = vmatprep.subr.bf16.mxu0 %v2019_v49  ;;  %v14324_v22 = vpop.permute.xlu1 %2436 }
 0x2ac   : >> { %v14326_v2 = vpop.permute.xlu0 %2235  ;;  %1407 = vrot.lane.b32.xlu1 %v13875_v55, %s12997_s16  ;;  %11468 = vmatmul.mubr.bf16.gmra.mrb[12].mxu0 %v11865_v29 }
 0x2ad   : >> { %11484 = vmatpush3.bf16.msra.mxu0 %v2019_v49  ;;  %11487 = vmatprep.mubr.bf16.mxu0 %v11866_v58  ;;  %v17318_v58 = vld [vmem:[#allocation43_spill] sm:$0xff] }
 0x2ae   : >> { %1405 = vrot.lane.b32.xlu0 %v13859_v38, %s12997_s16  ;;  %v2011_v31 = vpop.permute.xlu1 %2010 }
 0x2af   : >> { %v2020_v6 = vsel %vm2012_vm3, %v14242_v13, %v2011_v31 }
 0x2b0   : >> { %v14334_v14 = vpop.permute.xlu0 %2434  ;;  %3125 = vrot.lane.b32.xlu1 %v13875_v55, %s12998_s23  ;;  %11485 = vmatprep.subr.bf16.mxu0 %v2020_v6 }
 0x2b1   : >> { %11486 = vmatpush3.bf16.msra.mxu0 %v2020_v6  ;;  %v2467_v3 = vsel %vm2466_vm5, %v14334_v14, %v14324_v22  ;;  %v17320_v14 = vld [vmem:[#allocation45_spill] sm:$0xff] }
 0x2b2   : >> { %3123 = vrot.lane.b32.xlu0 %v13859_v38, %s12998_s23  ;;  %11503 = vmatprep.subr.bf16.mxu0 %v2240_v63  ;;  %v14349_v39 = vpop.permute.xlu1 %2440 }
 0x2b4   : >> { %v14351_v55 = vpop.permute.xlu0 %2438  ;;  %1411 = vrot.lane.b32.xlu1 %v13909_v10, %s12997_s16  ;;  %11488 = vmatmul.mubr.bf16.vlgmr.msra.gmra.mrb[0].mxu0 %v11867_v9  ;;  %v11881_v9 = vld [vmem:[%s17053_s3 + $0x138] sm:$0xff]  }
 0x2b5   : >> { %11504 = vmatpush3.bf16.msra.mxu0 %v2240_v63  ;;  %11491 = vmatprep.mubr.bf16.mxu0 %v11868_v62  ;;  %v2468_v20 = vsel %vm2466_vm5, %v14351_v55, %v14349_v39  ;;  %v11882_v62 = vld [vmem:[%s17053_s3 + $0x140] sm:$0xff]  }
 0x2b6   : >> { %1409 = vrot.lane.b32.xlu0 %v13893_v0, %s12997_s16  ;;  %11505 = vmatprep.subr.bf16.mxu0 %v2241_v41  ;;  %v14360_v38 = vpop.permute.xlu1 %2444  ;;  %v17321_v39 = vld [vmem:[#allocation46_spill] sm:$0xff] }
 0x2b8   : >> { %v14362_v46 = vpop.permute.xlu0 %2442  ;;  %3129 = vrot.lane.b32.xlu1 %v13909_v10, %s12998_s23 }
 0x2b9   : >> { %11506 = vmatpush3.bf16.msra.mxu0 %v2241_v41  ;;  %v2469_v50 = vsel %vm2466_vm5, %v14362_v46, %v14360_v38  ;;  %v17322_v38 = vld [vmem:[#allocation47_spill] sm:$0xff]  ;;  %v17323_v46 = vld [vmem:[#allocation48_spill] sm:$0xff] }
 0x2ba   : >> { %3127 = vrot.lane.b32.xlu0 %v13893_v0, %s12998_s23  ;;  %11507 = vmatprep.subr.bf16.mxu0 %v2242_v15  ;;  %v14377_v19 = vpop.permute.xlu1 %2448 }
 0x2bc   : >> { %v14379_v10 = vpop.permute.xlu0 %2446  ;;  %2918 = vrot.lane.b32.xlu1 %v14035_v17, %s12996_s24  ;;  %11492 = vmatmul.mubr.bf16.gmra.mrb[4].mxu0 %v11869_v47 }
 0x2bd   : >> { %11508 = vmatpush3.bf16.msra.mxu0 %v2242_v15  ;;  %11495 = vmatprep.mubr.bf16.mxu0 %v11870_v42  ;;  %v2470_v28 = vsel %vm2466_vm5, %v14379_v10, %v14377_v19  ;;  %v17324_v19 = vld [vmem:[#allocation49_spill] sm:$0xff]  ;;  %v11883_v10 = vld [vmem:[%s17053_s3 + $0x148] sm:$0xff]  }
 0x2be   : >> { %1413 = vrot.lane.b32.xlu0 %v13927_v48, %s12997_s16  ;;  %11509 = vmatprep.subr.bf16.mxu0 %v2243_v32  ;;  %v14388_v0 = vpop.permute.xlu1 %2452 }
 0x2c0   : >> { %v14390_v57 = vpop.permute.xlu0 %2450  ;;  %1415 = vrot.lane.b32.xlu1 %v13943_v21, %s12997_s16 }
 0x2c1   : >> { %11510 = vmatpush3.bf16.msra.mxu0 %v2243_v32  ;;  %v2471_v35 = vsel %vm2466_vm5, %v14390_v57, %v14388_v0  ;;  %v11884_v0 = vld [vmem:[%s17053_s3 + $0x150] sm:$0xff]   ;;  %v17325_v57 = vld [vmem:[#allocation50_spill] sm:$0xff] }
 0x2c2   : >> { %3131 = vrot.lane.b32.xlu0 %v13927_v48, %s12998_s23  ;;  %11511 = vmatprep.subr.bf16.mxu0 %v2244_v4  ;;  %v14405_v37 = vpop.permute.xlu1 %2456 }
 0x2c4   : >> { %v14407_v60 = vpop.permute.xlu0 %2454  ;;  %3133 = vrot.lane.b32.xlu1 %v13943_v21, %s12998_s23  ;;  %11496 = vmatmul.mubr.bf16.gmra.mrb[8].mxu0 %v11871_v44  ;;  %v11873_v21 = vld [vmem:[%s17053_s3 + $0xf8] sm:$0xff]  }
 0x2c5   : >> { %11512 = vmatpush3.bf16.msra.mxu0 %v2244_v4  ;;  %11499 = vmatprep.mubr.bf16.mxu0 %v11872_v45  ;;  %v2472_v22 = vsel %vm2466_vm5, %v14407_v60, %v14405_v37  ;;  %v17326_v45 = vld [vmem:[#allocation51_spill] sm:$0xff]  ;;  %v17327_v60 = vld [vmem:[#allocation52_spill] sm:$0xff] }
 0x2c6   : >> { %1417 = vrot.lane.b32.xlu0 %v13961_v27, %s12997_s16  ;;  %11513 = vmatprep.subr.bf16.mxu0 %v2245_v8  ;;  %v14416_v48 = vpop.permute.xlu1 %2460 }
 0x2c8   : >> { %v14418_v11 = vpop.permute.xlu0 %2458  ;;  %1419 = vrot.lane.b32.xlu1 %v13977_v59, %s12997_s16 }
 0x2c9   : >> { %11514 = vmatpush3.bf16.msra.mxu0 %v2245_v8  ;;  %v2473_v63 = vsel %vm2466_vm5, %v14418_v11, %v14416_v48  ;;  %v17328_v11 = vld [vmem:[#allocation53_spill] sm:$0xff] }
 0x2ca   : >> { %3135 = vrot.lane.b32.xlu0 %v13961_v27, %s12998_s23  ;;  %11515 = vmatprep.subr.bf16.mxu0 %v2246_v33  ;;  %v14433_v7 = vpop.permute.xlu1 %2663  ;;  %v11906_v27 = vld [vmem:[%s17053_s3 + $0x40] sm:$0xff]  }
 0x2cb   : >> { %11391 = vmatprep.mubr.bf16.mxu1 %v11906_v27  ;;  %v17330_v27 = vld [vmem:[#allocation55_spill] sm:$0xff] }
 0x2cc   : >> { %v14435_v12 = vpop.permute.xlu0 %2462  ;;  %3137 = vrot.lane.b32.xlu1 %v13977_v59, %s12998_s23  ;;  %11500 = vmatmul.mubr.bf16.gmra.mrb[12].mxu0 %v11873_v21  ;;  %v11875_v59 = vld [vmem:[%s17053_s3 + $0x108] sm:$0xff]   ;;  %v11885_v21 = vld [vmem:[%s17053_s3 + $0x158] sm:$0xff]  }
 0x2cd   : >> { %11516 = vmatpush3.bf16.msra.mxu0 %v2246_v33  ;;  %11519 = vmatprep.mubr.bf16.mxu0 %v11874_v25  ;;  %v11886_v25 = vld [vmem:[%s17053_s3 + $0x160] sm:$0xff]  }
 0x2ce   : >> { %1421 = vrot.lane.b32.xlu0 %v13995_v26, %s12997_s16  ;;  %v2238_v13 = vpop.permute.xlu1 %2237 }
 0x2cf   : >> { %v2247_v24 = vsel %vm2239_vm4, %v14326_v2, %v2238_v13  ;;  %v17319_v2 = vld [vmem:[#allocation44_spill] sm:$0xff] }
 0x2d0   : >> { %v14446_v34 = vpop.permute.xlu0 %2661  ;;  %1423 = vrot.lane.b32.xlu1 %v14011_v18, %s12997_s16  ;;  %11517 = vmatprep.subr.bf16.mxu0 %v2247_v24 }
 0x2d1   : >> { %11518 = vmatpush3.bf16.msra.mxu0 %v2247_v24  ;;  %v2694_v32 = vsel %vm2693_vm6, %v14446_v34, %v14433_v7  ;;  %v17329_v7 = vld [vmem:[#allocation54_spill] sm:$0xff] }
 0x2d2   : >> { %3139 = vrot.lane.b32.xlu0 %v13995_v26, %s12998_s23  ;;  %11535 = vmatprep.subr.bf16.mxu0 %v2467_v3  ;;  %v14461_v23 = vpop.permute.xlu1 %2667 }
 0x2d4   : >> { %v14463_v40 = vpop.permute.xlu0 %2665  ;;  %3141 = vrot.lane.b32.xlu1 %v14011_v18, %s12998_s23  ;;  %11520 = vmatmul.mubr.bf16.vlgmr.msra.gmra.mrb[0].mxu0 %v11875_v59  ;;  %v11877_v18 = vld [vmem:[%s17053_s3 + $0x118] sm:$0xff]  }
 0x2d5   : >> { %11536 = vmatpush3.bf16.msra.mxu0 %v2467_v3  ;;  %11523 = vmatprep.mubr.bf16.mxu0 %v11876_v36  ;;  %v2695_v37 = vsel %vm2693_vm6, %v14463_v40, %v14461_v23  ;;  %v11887_v3 = vld [vmem:[%s17053_s3 + $0x168] sm:$0xff]   ;;  %v11888_v23 = vld [vmem:[%s17053_s3 + $0x170] sm:$0xff]  }
 0x2d6   : >> { %1425 = vrot.lane.b32.xlu0 %v14027_v43, %s12997_s16  ;;  %11537 = vmatprep.subr.bf16.mxu0 %v2468_v20  ;;  %v14472_v26 = vpop.permute.xlu1 %2671 }
 0x2d8   : >> { %v14474_v1 = vpop.permute.xlu0 %2669  ;;  %1427 = vrot.lane.b32.xlu1 %v14035_v17, %s12997_s16  ;;  %s17331_s16 = sshll.u32 %s12988_s18, 7  ;;  %s395_s18 = sadd.s32 1, %s12988_s18  }
 0x2d9   : >> { %11538 = vmatpush3.bf16.msra.mxu0 %v2468_v20  ;;  %v2696_v33 = vsel %vm2693_vm6, %v14474_v1, %v14472_v26  ;;  %s14765_s17 = scalar_lea.vmem [#allocation2], %s17331_s16  ;;  %p392_p11 = scmp.ge.s32.totalorder %s395_s18, 4  }
 0x2da   : >> { %3143 = vrot.lane.b32.xlu0 %v14027_v43, %s12998_s23  ;;  %11539 = vmatprep.subr.bf16.mxu0 %v2469_v50  ;;  %v14489_v53 = vpop.permute.xlu1 %2675  ;;  %v11927_v30 = vld [vmem:[%s17055_s5 + $0x108] ss:$16 sps:$4 sm:$0xff] (%p392_p11)   ;;  %vm9536_vm11 = vcmask (%p392_p11), 1043456   ;;  %s11182_s28 = sshll.u32 (%p392_p11), %s13072_s13, 6  ;;  %s17334_s14 = scalar_lea.vmem (%p392_p11), [#allocation3], %s13113_s27 }
 0x2db   : > { %s9565_s18 = sshll.u32 (%p392_p11), %s17334_s14, 4  ;;  %s17002_s21 = scalar_lea.hbm (%p392_p11), %s17059_s9, %s11182_s28  ;;  %s17004_s18 = int_to_ptr.vmem [resolvable:$true] %s9565_s18 }
 0x2dc   : >> { %v14491_v61 = vpop.permute.xlu0 %2673  ;;  %3145 = vrot.lane.b32.xlu1 %v14035_v17, %s12998_s23  ;;  %11524 = vmatmul.mubr.bf16.gmra.mrb[4].mxu0 %v11877_v18  ;;  %v11879_v17 = vld [vmem:[%s17053_s3 + $0x128] sm:$0xff]   ;;  %s17335_s16 = smov (%p392_p11), %s17334_s14  ;;  %s12918_s23 = scalar_lea.vmem (%p392_p11), %s17004_s18, 64 }
 0x2dd   : >> { %11540 = vmatpush3.bf16.msra.mxu0 %v2469_v50  ;;  %11527 = vmatprep.mubr.bf16.mxu0 %v11878_v51  ;;  %v2697_v24 = vsel %vm2693_vm6, %v14491_v61, %v14489_v53  ;;  %v11889_v50 = vld [vmem:[%s17053_s3 + $0x178] sm:$0xff]   ;;  %v11890_v53 = vld [vmem:[%s17053_s3 + $0x180] sm:$0xff]   ;;  %p12919_p12 = scmp.ne.s32.totalorder (%p392_p11), %s17004_s18, %s12918_s23  ;;  %s13000_s24 = smov (%p392_p11), [#allocation3]  }
 0x2de   : >> { %3279 = vperm.xlu0 %11848, %v17315_v16   ;;  %11541 = vmatprep.subr.bf16.mxu0 %v2470_v28  ;;  %v14499_v52 = vpop.permute.xlu1 %2679  ;;  %s12922_s26 = sshll.u32 (%p392_p11), %s13000_s24, 4  ;;  %s12923_s26 = int_to_ptr.vmem [resolvable:$false] %s12922_s26 }
 0x2df   : > { %p12920_p13 = pnand (%p392_p11), %p12919_p12, %p13089_p5  ;;  %s12924_s25 = scalar_lea.vmem (%p392_p11), %s12923_s26, 128 }
 0x2e0   : >> { %v14501_v43 = vpop.permute.xlu0 %2677  ;;  %3284 = vperm.xlu1 %11849, %v17316_v56   ;;  %v11891_v56 = vld [vmem:[%s17053_s3 + $0x188] sm:$0xff]   ;;  %p12925_p1 = scmp.lt.s32.totalorder (%p392_p11), %s17004_s18, %s12923_s26  ;;  %p12926_p2 = scmp.lt.s32.totalorder (%p392_p11), %s12924_s25, %s12918_s23 }
 0x2e1   : >> { %11542 = vmatpush3.bf16.msra.mxu0 %v2470_v28  ;;  %v2698_v36 = vsel %vm2693_vm6, %v14501_v43, %v14499_v52  ;;  %p12921_p0 = pneg (%p392_p11), %p12920_p13 }
 0x2e2   : >> { %3289 = vperm.xlu0 %11848, %v17317_v54   ;;  %11543 = vmatprep.subr.bf16.mxu0 %v2471_v35  ;;  %v14514_v29 = vpop.permute.xlu1 %2683  ;;  %p12927_p3 = por (%p392_p11), %p12926_p2, %p12925_p1 }
 0x2e4   : >> { %v14516_v49 = vpop.permute.xlu0 %2681  ;;  %3294 = vperm.xlu1 %11849, %v17318_v58   ;;  %11528 = vmatmul.mubr.bf16.gmra.mrb[8].mxu0 %v11879_v17  ;;  %p12928_p4 = pnand (%p392_p11), %p12927_p3, %p12921_p0 }
 0x2e5   : >> { %11544 = vmatpush3.bf16.msra.mxu0 %v2471_v35  ;;  %11531 = vmatprep.mubr.bf16.mxu0 %v11880_v5  ;;  %v2699_v26 = vsel %vm2693_vm6, %v14516_v49, %v14514_v29  ;;  %v11892_v5 = vld [vmem:[%s17053_s3 + $0x190] sm:$0xff]  }
 0x2e6   : >> { %3299 = vperm.xlu0 %11848, %v17319_v2   ;;  %11545 = vmatprep.subr.bf16.mxu0 %v2472_v22  ;;  %v14523_v31 = vpop.permute.xlu1 %2687  ;;  %v11893_v2 = vld [vmem:[%s17053_s3 + $0x198] sm:$0xff]  }
 0x2e8   : >> { %v14525_v6 = vpop.permute.xlu0 %2685  ;;  %3304 = vperm.xlu1 %11849, %v17320_v14   ;;  %v11894_v14 = vld [vmem:[%s17053_s3 + $0x1a0] sm:$0xff]  }
 0x2e9   : >> { %11546 = vmatpush3.bf16.msra.mxu0 %v2472_v22  ;;  %v2700_v51 = vsel %vm2693_vm6, %v14525_v6, %v14523_v31 }
 0x2ea   : >> { %3309 = vperm.xlu0 %11848, %v17321_v39   ;;  %11547 = vmatprep.subr.bf16.mxu0 %v2473_v63  ;;  %v14538_v55 = vpop.permute.xlu1 %2890 }
 0x2ec   : >> { %v14540_v41 = vpop.permute.xlu0 %2689  ;;  %3314 = vperm.xlu1 %11849, %v17322_v38   ;;  %11532 = vmatmul.mubr.bf16.gmra.mrb[12].mxu0 %v11881_v9 }
 0x2ed   : >> { %11548 = vmatpush3.bf16.msra.mxu0 %v2473_v63  ;;  %11551 = vmatprep.mubr.bf16.mxu0 %v11882_v62 }
 0x2ee   : >> { %3319 = vperm.xlu0 %11848, %v17323_v46   ;;  %v2465_v47 = vpop.permute.xlu1 %2464 }
 0x2ef   : >> { %v2474_v15 = vsel %vm2466_vm5, %v14435_v12, %v2465_v47  ;;  %v11896_v47 = vld [vmem:[%s17053_s3 + $0x1b0] sm:$0xff]  }
 0x2f0   : >> { %v14546_v42 = vpop.permute.xlu0 %2888  ;;  %3324 = vperm.xlu1 %11849, %v17324_v19   ;;  %11549 = vmatprep.subr.bf16.mxu0 %v2474_v15 }
 0x2f1   : >> { %11550 = vmatpush3.bf16.msra.mxu0 %v2474_v15  ;;  %v2921_v35 = vsel %vm2920_vm8, %v14546_v42, %v14538_v55 }
 0x2f2   : >> { %3329 = vperm.xlu0 %11848, %v17325_v57   ;;  %11567 = vmatprep.subr.bf16.mxu0 %v2694_v32  ;;  %v14559_v44 = vpop.permute.xlu1 %2894 }
 0x2f4   : >> { %v14561_v4 = vpop.permute.xlu0 %2892  ;;  %3334 = vperm.xlu1 %11849, %v17326_v45   ;;  %11552 = vmatmul.mubr.bf16.vlgmr.msra.gmra.mrb[0].mxu0 %v11883_v10 }
 0x2f5   : >> { %11568 = vmatpush3.bf16.msra.mxu0 %v2694_v32  ;;  %11555 = vmatprep.mubr.bf16.mxu0 %v11884_v0  ;;  %v2922_v49 = vsel %vm2920_vm8, %v14561_v4, %v14559_v44  ;;  %v11897_v0 = vld [vmem:[%s17053_s3 + $0x1b8] sm:$0xff]   ;;  %v11898_v4 = vld [vmem:[%s17053_s3 + $0x1c0] sm:$0xff]  }
 0x2f6   : >> { %3339 = vperm.xlu0 %11848, %v17327_v60   ;;  %11569 = vmatprep.subr.bf16.mxu0 %v2695_v37  ;;  %v14568_v8 = vpop.permute.xlu1 %2898 }
 0x2f8   : >> { %v14570_v48 = vpop.permute.xlu0 %2896  ;;  %3344 = vperm.xlu1 %11849, %v17328_v11   ;;  %v11899_v11 = vld [vmem:[%s17053_s3 + $0x1c8] sm:$0xff]  }
 0x2f9   : >> { %11570 = vmatpush3.bf16.msra.mxu0 %v2695_v37  ;;  %v2923_v6 = vsel %vm2920_vm8, %v14570_v48, %v14568_v8 }
 0x2fa   : >> { %3349 = vperm.xlu0 %11848, %v17329_v7   ;;  %11571 = vmatprep.subr.bf16.mxu0 %v2696_v33  ;;  %v14583_v12 = vpop.permute.xlu1 %2902 }
 0x2fc   : >> { %v14585_v13 = vpop.permute.xlu0 %2900  ;;  %3354 = vperm.xlu1 %11849, %v17330_v27   ;;  %11556 = vmatmul.mubr.bf16.gmra.mrb[4].mxu0 %v11885_v21 }
 0x2fd   : >> { %11572 = vmatpush3.bf16.msra.mxu0 %v2696_v33  ;;  %11559 = vmatprep.mubr.bf16.mxu0 %v11886_v25  ;;  %v2924_v62 = vsel %vm2920_vm8, %v14585_v13, %v14583_v12  ;;  %v11900_v25 = vld [vmem:[%s17053_s3 + $0x1d0] sm:$0xff]  }
 0x2fe   : >> { %11573 = vmatprep.subr.bf16.mxu0 %v2697_v24  ;;  %v14591_v34 = vpop.permute.xlu1 %2906 }
 0x300   : >> { %v14593_v59 = vpop.permute.xlu0 %2904 }
 0x301   : >> { %11574 = vmatpush3.bf16.msra.mxu0 %v2697_v24  ;;  %v2925_v46 = vsel %vm2920_vm8, %v14593_v59, %v14591_v34  ;;  %v11901_v34 = vld [vmem:[%s17053_s3 + $0x1d8] sm:$0xff]  }
 0x302   : >> { %11575 = vmatprep.subr.bf16.mxu0 %v2698_v36  ;;  %v14604_v40 = vpop.permute.xlu1 %2910 }
 0x304   : >> { %v14606_v20 = vpop.permute.xlu0 %2908  ;;  %11560 = vmatmul.mubr.bf16.gmra.mrb[8].mxu0 %v11887_v3 }
 0x305   : >> { %11576 = vmatpush3.bf16.msra.mxu0 %v2698_v36  ;;  %11563 = vmatprep.mubr.bf16.mxu0 %v11888_v23  ;;  %v2926_v19 = vsel %vm2920_vm8, %v14606_v20, %v14604_v40  ;;  %v11902_v36 = vld [vmem:[%s17053_s3 + $0x1e0] sm:$0xff]  }
 0x306   : >> { %11577 = vmatprep.subr.bf16.mxu0 %v2699_v26  ;;  %v14611_v1 = vpop.permute.xlu1 %2914 }
 0x308   : >> { %v14613_v18 = vpop.permute.xlu0 %2912 }
 0x309   : >> { %11578 = vmatpush3.bf16.msra.mxu0 %v2699_v26  ;;  %v2927_v44 = vsel %vm2920_vm8, %v14613_v18, %v14611_v1  ;;  %v11903_v18 = vld [vmem:[%s17053_s3 + $0x1e8] sm:$0xff]  }
 0x30a   : >> { %11579 = vmatprep.subr.bf16.mxu0 %v2700_v51  ;;  %v1400_v61 = vpop.permute.xlu1 %1399 }
 0x30c   : >> { %v14624_v28 = vpop.permute.xlu0 %2916  ;;  %11564 = vmatmul.mubr.bf16.gmra.mrb[12].mxu0 %v11889_v50 }
 0x30d   : >> { %11580 = vmatpush3.bf16.msra.mxu0 %v2700_v51  ;;  %11583 = vmatprep.mubr.bf16.mxu0 %v11890_v53  ;;  %v11904_v53 = vld [vmem:[%s17053_s3 + $0x1f0] sm:$0xff]  }
 0x30e   : >> { %v2692_v16 = vpop.permute.xlu1 %2691 }
 0x30f   : >> { %v2701_v52 = vsel %vm2693_vm6, %v14540_v41, %v2692_v16  ;;  %v11895_v41 = vld [vmem:[%s17053_s3 + $0x1a8] sm:$0xff]  }
 0x310   : >> { %v1398_v43 = vpop.permute.xlu0 %1397  ;;  %11581 = vmatprep.subr.bf16.mxu0 %v2701_v52 }
 0x311   : >> { %11582 = vmatpush3.bf16.msra.mxu0 %v2701_v52  ;;  %v1430_v17 = vsel %vm1429_vm7, %v1398_v43, %v1400_v61 }
 0x312   : >> { %11375 = vmatprep.subr.bf16.mxu1 %v1430_v17  ;;  %11599 = vmatprep.subr.bf16.mxu0 %v2921_v35  ;;  %v14638_v54 = vpop.permute.xlu1 %3117 }
 0x313   : >> { %11376 = vmatpush3.bf16.msra.mxu1 %v1430_v17 }
 0x314   : >> { %v14640_v29 = vpop.permute.xlu0 %3115  ;;  %11584 = vmatmul.mubr.bf16.vlgmr.msra.gmra.mrb[0].mxu0 %v11891_v56  ;;  %v11905_v56 = vld [vmem:[%s17053_s3 + $0x1f8] sm:$0xff]  }
 0x315   : >> { %11600 = vmatpush3.bf16.msra.mxu0 %v2921_v35  ;;  %11587 = vmatprep.mubr.bf16.mxu0 %v11892_v5  ;;  %v3148_v21 = vsel %vm3147_vm9, %v14640_v29, %v14638_v54  ;;  %v11908_v5 = vld [vmem:[%s17053_s3 + $0x200] sm:$0xff]   ;;  %v11907_v29 = vld [vmem:[%s17053_s3 + $0x48] sm:$0xff]  }
 0x316   : >> { %11601 = vmatprep.subr.bf16.mxu0 %v2922_v49  ;;  %v1404_v58 = vpop.permute.xlu1 %1403 }
 0x318   : >> { %v1402_v22 = vpop.permute.xlu0 %1401 }
 0x319   : >> { %11602 = vmatpush3.bf16.msra.mxu0 %v2922_v49  ;;  %v1431_v31 = vsel %vm1429_vm7, %v1402_v22, %v1404_v58  ;;  %v11910_v49 = vld [vmem:[%s17053_s3 + $0x50] sm:$0xff]  }
 0x31a   : >> { %11377 = vmatprep.subr.bf16.mxu1 %v1431_v31  ;;  %11603 = vmatprep.subr.bf16.mxu0 %v2923_v6  ;;  %v3122_v9 = vpop.permute.xlu1 %3121 }
 0x31b   : >> { %11378 = vmatpush3.bf16.msra.mxu1 %v1431_v31  ;;  %v11909_v31 = vld [vmem:[%s17053_s3 + $0x208] sm:$0xff]  }
 0x31c   : >> { %v3120_v63 = vpop.permute.xlu0 %3119  ;;  %11588 = vmatmul.mubr.bf16.gmra.mrb[4].mxu0 %v11893_v2 }
 0x31d   : >> { %11604 = vmatpush3.bf16.msra.mxu0 %v2923_v6  ;;  %11591 = vmatprep.mubr.bf16.mxu0 %v11894_v14  ;;  %v3149_v13 = vsel %vm3147_vm9, %v3120_v63, %v3122_v9  ;;  %v11912_v6 = vld [vmem:[%s17053_s3 + $0x210] sm:$0xff]   ;;  %v11911_v14 = vld [vmem:[%s17053_s3 + $0x58] sm:$0xff]   ;;  %v11914_v9 = vld [vmem:[%s17053_s3 + $0x60] sm:$0xff]  }
 0x31e   : >> { %11605 = vmatprep.subr.bf16.mxu0 %v2924_v62  ;;  %v1408_v39 = vpop.permute.xlu1 %1407  ;;  %v11913_v63 = vld [vmem:[%s17053_s3 + $0x218] sm:$0xff]  }
 0x320   : >> { %v1406_v55 = vpop.permute.xlu0 %1405 }
 0x321   : >> { %11606 = vmatpush3.bf16.msra.mxu0 %v2924_v62  ;;  %v1432_v38 = vsel %vm1429_vm7, %v1406_v55, %v1408_v39  ;;  %v11916_v62 = vld [vmem:[%s17053_s3 + $0x220] sm:$0xff]   ;;  %v11915_v39 = vld [vmem:[%s17053_s3 + $0x68] sm:$0xff]   ;;  %v11918_v55 = vld [vmem:[%s17053_s3 + $0x70] sm:$0xff]  }
 0x322   : >> { %11379 = vmatprep.subr.bf16.mxu1 %v1432_v38  ;;  %11607 = vmatprep.subr.bf16.mxu0 %v2925_v46  ;;  %v3126_v15 = vpop.permute.xlu1 %3125 }
 0x323   : >> { %11380 = vmatpush3.bf16.msra.mxu1 %v1432_v38  ;;  %v11920_v38 = vld [vmem:[%s17053_s3 + $0x230] sm:$0xff]  }
 0x324   : >> { %v3124_v42 = vpop.permute.xlu0 %3123  ;;  %11592 = vmatmul.mubr.bf16.gmra.mrb[8].mxu0 %v11895_v41  ;;  %v11917_v41 = vld [vmem:[%s17053_s3 + $0x228] sm:$0xff]  }
 0x325   : >> { %11608 = vmatpush3.bf16.msra.mxu0 %v2925_v46  ;;  %11595 = vmatprep.mubr.bf16.mxu0 %v11896_v47  ;;  %v3150_v59 = vsel %vm3147_vm9, %v3124_v42, %v3126_v15  ;;  %v11919_v46 = vld [vmem:[%s17053_s3 + $0x78] sm:$0xff]  }
 0x326   : >> { %11609 = vmatprep.subr.bf16.mxu0 %v2926_v19  ;;  %v1412_v10 = vpop.permute.xlu1 %1411  ;;  %v11921_v47 = vld [vmem:[%s17053_s3 + $0x238] sm:$0xff]  }
 0x328   : >> { %v1410_v32 = vpop.permute.xlu0 %1409 }
 0x329   : >> { %11610 = vmatpush3.bf16.msra.mxu0 %v2926_v19  ;;  %v1433_v57 = vsel %vm1429_vm7, %v1410_v32, %v1412_v10 }
 0x32a   : >> { %11381 = vmatprep.subr.bf16.mxu1 %v1433_v57  ;;  %11611 = vmatprep.subr.bf16.mxu0 %v2927_v44  ;;  %v3130_v45 = vpop.permute.xlu1 %3129 }
 0x32b   : >> { %11382 = vmatpush3.bf16.msra.mxu1 %v1433_v57 }
 0x32c   : >> { %v3128_v37 = vpop.permute.xlu0 %3127  ;;  %11596 = vmatmul.mubr.bf16.gmra.mrb[12].mxu0 %v11897_v0 }
 0x32d   : >> { %11612 = vmatpush3.bf16.msra.mxu0 %v2927_v44  ;;  %11615 = vmatprep.mubr.bf16.mxu0 %v11898_v4  ;;  %v3151_v20 = vsel %vm3147_vm9, %v3128_v37, %v3130_v45 }
 0x32e   : >> { %v2919_v60 = vpop.permute.xlu1 %2918 }
 0x32f   : >> { %v2928_v8 = vsel %vm2920_vm8, %v14624_v28, %v2919_v60 }
 0x330   : >> { %v1414_v48 = vpop.permute.xlu0 %1413  ;;  %11613 = vmatprep.subr.bf16.mxu0 %v2928_v8 }
 0x331   : >> { %11614 = vmatpush3.bf16.msra.mxu0 %v2928_v8 }
 0x332   : >> { %11631 = vmatprep.subr.bf16.mxu0 %v3148_v21  ;;  %v1416_v33 = vpop.permute.xlu1 %1415 }
 0x333   : >> { %v1434_v7 = vsel %vm1429_vm7, %v1414_v48, %v1416_v33 }
 0x334   : >> { %v3132_v12 = vpop.permute.xlu0 %3131  ;;  %11383 = vmatprep.subr.bf16.mxu1 %v1434_v7  ;;  %11616 = vmatmul.mubr.bf16.vlgmr.msra.gmra.mrb[0].mxu0 %v11899_v11 }
 0x335   : >> { %11384 = vmatpush3.bf16.msra.mxu1 %v1434_v7  ;;  %11632 = vmatpush3.bf16.msra.mxu0 %v3148_v21 }
 0x336   : >> { %11633 = vmatprep.subr.bf16.mxu0 %v3149_v13  ;;  %v3134_v27 = vpop.permute.xlu1 %3133  ;;  %11619 = vmatprep.mubr.bf16.mxu0 %v11900_v25 }
 0x337   : >> { %v3152_v50 = vsel %vm3147_vm9, %v3132_v12, %v3134_v27 }
 0x338   : >> { %v1418_v24 = vpop.permute.xlu0 %1417 }
 0x339   : >> { %11634 = vmatpush3.bf16.msra.mxu0 %v3149_v13 }
 0x33a   : >> { %11635 = vmatprep.subr.bf16.mxu0 %v3150_v59  ;;  %v1420_v3 = vpop.permute.xlu1 %1419 }
 0x33b   : >> { %v1435_v23 = vsel %vm1429_vm7, %v1418_v24, %v1420_v3 }
 0x33c   : >> { %v3136_v40 = vpop.permute.xlu0 %3135  ;;  %11385 = vmatprep.subr.bf16.mxu1 %v1435_v23  ;;  %11620 = vmatmul.mubr.bf16.gmra.mrb[4].mxu0 %v11901_v34 }
 0x33d   : >> { %11386 = vmatpush3.bf16.msra.mxu1 %v1435_v23  ;;  %11636 = vmatpush3.bf16.msra.mxu0 %v3150_v59 }
 0x33e   : >> { %11637 = vmatprep.subr.bf16.mxu0 %v3151_v20  ;;  %v3138_v26 = vpop.permute.xlu1 %3137  ;;  %11623 = vmatprep.mubr.bf16.mxu0 %v11902_v36 }
 0x33f   : >> { %v3153_v16 = vsel %vm3147_vm9, %v3136_v40, %v3138_v26 }
 0x340   : >> { %v1422_v1 = vpop.permute.xlu0 %1421 }
 0x341   : >> { %11638 = vmatpush3.bf16.msra.mxu0 %v3151_v20 }
 0x342   : >> { %11639 = vmatprep.subr.bf16.mxu0 %v3152_v50  ;;  %v1424_v51 = vpop.permute.xlu1 %1423 }
 0x343   : >> { %v1436_v61 = vsel %vm1429_vm7, %v1422_v1, %v1424_v51 }
 0x344   : >> { %v3140_v28 = vpop.permute.xlu0 %3139  ;;  %11387 = vmatprep.subr.bf16.mxu1 %v1436_v61  ;;  %11624 = vmatmul.mubr.bf16.gmra.mrb[8].mxu0 %v11903_v18 }
 0x345   : >> { %11388 = vmatpush3.bf16.msra.mxu1 %v1436_v61  ;;  %11640 = vmatpush3.bf16.msra.mxu0 %v3152_v50 }
 0x346   : >> { %11641 = vmatprep.subr.bf16.mxu0 %v3153_v16  ;;  %v3142_v52 = vpop.permute.xlu1 %3141  ;;  %11627 = vmatprep.mubr.bf16.mxu0 %v11904_v53 }
 0x347   : >> { %v3154_v17 = vsel %vm3147_vm9, %v3140_v28, %v3142_v52 }
 0x348   : >> { %v1426_v43 = vpop.permute.xlu0 %1425 }
 0x349   : >> { %11642 = vmatpush3.bf16.msra.mxu0 %v3153_v16 }
 0x34a   : >> { %11643 = vmatprep.subr.bf16.mxu0 %v3154_v17  ;;  %v1428_v35 = vpop.permute.xlu1 %1427 }
 0x34b   : >> { %v1437_v54 = vsel %vm1429_vm7, %v1426_v43, %v1428_v35 }
 0x34c   : >> { %11389 = vmatprep.subr.bf16.mxu1 %v1437_v54  ;;  %11628 = vmatmul.mubr.bf16.gmra.mrb[12].mxu0 %v11905_v56  ;;  %v3144_v58 = vpop.permute.xlu0 %3143 }
 0x34d   : >> { %11390 = vmatpush3.bf16.msra.mxu1 %v1437_v54  ;;  %11644 = vmatpush3.bf16.msra.mxu0 %v3154_v17 }
 0x34e   : >> { %v3146_v22 = vpop.permute.xlu1 %3145  ;;  %11647 = vmatprep.mubr.bf16.mxu0 %v11908_v5 }
 0x34f   : >> { %v3155_v2 = vsel %vm3147_vm9, %v3144_v58, %v3146_v22 }
 0x350   : >> { %11645 = vmatprep.subr.bf16.mxu0 %v3155_v2  ;;  %11392 = vmatmul.mubr.bf16.vlgmr.msra.gmra.mrb[128].mxu1 %v11907_v29 }
 0x351   : >> { %11646 = vmatpush3.bf16.msra.mxu0 %v3155_v2  ;;  %11395 = vmatprep.mubr.bf16.mxu1 %v11910_v49 }
 0x354   : >> { %11648 = vmatmul.mubr.bf16.vlgmr.msra.gmra.mrb[0].mxu0 %v11909_v31 }
 0x355   : >> { %11651 = vmatprep.mubr.bf16.mxu0 %v11912_v6 }
 0x358   : >> { %11396 = vmatmul.mubr.bf16.gmra.mrb[132].mxu1 %v11911_v14 }
 0x359   : >> { %11399 = vmatprep.mubr.bf16.mxu1 %v11914_v9 }
 0x35c   : >> { %11652 = vmatmul.mubr.bf16.gmra.mrb[4].mxu0 %v11913_v63 }
 0x35d   : >> { %11655 = vmatprep.mubr.bf16.mxu0 %v11916_v62  ;;  %v3280_v15 = vpop.permute.xlu0 %3279 }
 0x35f   : >> { %v3285_v42 = vpop.permute.xlu1 %3284 }
 0x360   : >> { %11400 = vmatmul.mubr.bf16.gmra.mrb[136].mxu1 %v11915_v39 }
 0x361   : >> { %11403 = vmatprep.mubr.bf16.mxu1 %v11918_v55  ;;  %v3290_v19 = vpop.permute.xlu0 %3289 }
 0x363   : >> { %v3295_v10 = vpop.permute.xlu1 %3294 }
 0x364   : >> { %11656 = vmatmul.mubr.bf16.gmra.mrb[8].mxu0 %v11917_v41 }
 0x365   : >> { %11659 = vmatprep.mubr.bf16.mxu0 %v11920_v38  ;;  %v3300_v32 = vpop.permute.xlu0 %3299 }
 0x367   : >> { %v3305_v44 = vpop.permute.xlu1 %3304 }
 0x368   : >> { %11404 = vmatmul.mubr.bf16.gmra.mrb[140].mxu1 %v11919_v46 }
 0x369   : >> { %v3310_v48 = vpop.permute.xlu0 %3309 }
 0x36b   : >> { %v3315_v12 = vpop.permute.xlu1 %3314 }
 0x36c   : >> { %11660 = vmatmul.mubr.bf16.gmra.mrb[12].mxu0 %v11921_v47 }
 0x36d   : >> { %v3320_v1 = vpop.permute.xlu0 %3319 }
 0x36f   : >> { %v3325_v61 = vpop.permute.xlu1 %3324 }
 0x371   : >> { %v3330_v58 = vpop.permute.xlu0 %3329 }
 0x373   : >> { %v3335_v9 = vpop.permute.xlu1 %3334 }
 0x423   : >> { %v11393_v0 = vpop.f32.mrb[128].mxu1 }
 0x424   : >> { %v1480_v57 = vpop.f32.mrb[129].mxu1 }
 0x425   : >> { %v11394_v4 = vpop.f32.mrb[130].mxu1 }
 0x426   : >> { %v1483_v45 = vpop.f32.mrb[131].mxu1 }
 0x427   : >> { %v11649_v37 = vpop.f32.mrb[0].mxu0 }
 0x428   : >> { %v11663_v60 = vadd.f32 %v11649_v37, %v11393_v0  ;;  %v3198_v8 = vpop.f32.mrb[1].mxu0 }
 0x429   : >> { %v11664_v11 = vadd.f32 %v3198_v8, %v1480_v57  ;;  %v11650_v21 = vpop.f32.mrb[2].mxu0 }
 0x42a   : >> { %v3359_v33 = vadd.f32 %v11663_v60, %v3290_v19  ;;  %v11665_v25 = vadd.f32 %v11650_v21, %v11394_v4  ;;  %v3201_v7 = vpop.f32.mrb[3].mxu0  ;;  %v3345_v4 = vpop.permute.xlu1 %3344 }
 0x42b   : >> { %v3357_v13 = vadd.f32 %v11664_v11, %v3280_v15  ;;  %v11666_v27 = vadd.f32 %v3201_v7, %v1483_v45  ;;  %v11397_v24 = vpop.f32.mrb[132].mxu1 }
 0x42c   : >> { %v3375_v34 = vmax.f32 %v3359_v33, 0.0  ;;  %v3360_v59 = vadd.f32 %v11665_v25, %v3295_v10  ;;  %v1496_v3 = vpop.f32.mrb[133].mxu1 }
 0x42d   : >> { %v3373_v36 = vmax.f32 %v3357_v13, 0.0  ;;  %v3358_v23 = vadd.f32 %v11666_v27, %v3285_v42  ;;  %v11398_v40 = vpop.f32.mrb[134].mxu1  ;;  %v3340_v42 = vpop.permute.xlu0 %3339 }
 0x42e   : >> { %3393 = vst [vmem:[%s14765_s17 + $0x10] sm:$0xff] %v3375_v34  ;;  %v3376_v20 = vmax.f32 %v3360_v59, 0.0  ;;  %v1499_v26 = vpop.f32.mrb[135].mxu1  ;;  %v3355_v59 = vpop.permute.xlu1 %3354 }
 0x42f   : >> { %3391 = vst [vmem:[%s14765_s17] sm:$0xff] %v3373_v36  ;;  %v3374_v18 = vmax.f32 %v3358_v23, 0.0  ;;  %v11653_v50 = vpop.f32.mrb[4].mxu0 }
 0x430   : >> { %3394 = vst [vmem:[%s14765_s17 + $0x18] sm:$0xff] %v3376_v20  ;;  %v11667_v51 = vadd.f32 %v11653_v50, %v11397_v24  ;;  %v3214_v53 = vpop.f32.mrb[5].mxu0  ;;  %v11922_v50 = vld [vmem:[%s17055_s5 + $0x104] ss:$16 sps:$4 sm:$0xff] (%p392_p11)  }
 0x431   : >> { %3392 = vst [vmem:[%s14765_s17 + $0x8] sm:$0xff] %v3374_v18  ;;  %v11668_v28 = vadd.f32 %v3214_v53, %v1496_v3  ;;  %v11654_v16 = vpop.f32.mrb[6].mxu0  ;;  %v3350_v7 = vpop.permute.xlu0 %3349  ;;  %v12999_v53 = vmov (%p392_p11), 0   ;;  %3649 = vmatprep.subr.bf16.mxu0 (%p392_p11), %v11922_v50  ;;  %v12005_v50 = vld [vmem:[%s17055_s5 + $0xac] ss:$16 sps:$4 sm:$0xff] (%p392_p11)  }
 0x432   : >> { %v3363_v52 = vadd.f32 %v11667_v51, %v3310_v48  ;;  %v11669_v43 = vadd.f32 %v11654_v16, %v11398_v40  ;;  %v3217_v56 = vpop.f32.mrb[7].mxu0  ;;  %v11924_v51 = vld [vmem:[%s17055_s5 + $0x10c] ss:$16 sps:$4 sm:$0xff] (%p392_p11)   ;;  %3681 = vmatprep.mubr.bf16.mxu0 (%p392_p11), %v12999_v53  ;;  %3722 = vmatprep.mubr.bf16.mxu1 (%p392_p11), %v12999_v53 }
 0x433   : >> { %v3361_v17 = vadd.f32 %v11668_v28, %v3300_v32  ;;  %v11670_v35 = vadd.f32 %v3217_v56, %v1499_v26  ;;  %v11401_v5 = vpop.f32.mrb[136].mxu1  ;;  %3690 = vmatprep.subr.bf16.mxu1 (%p392_p11), %v11924_v51  ;;  %v11928_v28 = vld [vmem:[%s17055_s5 + $0x124] ss:$16 sps:$4 sm:$0xff] (%p392_p11)   ;;  %v11930_v16 = vld [vmem:[%s17055_s5 + $0x12c] ss:$16 sps:$4 sm:$0xff] (%p392_p11)  }
 0x434   : >> { %v3379_v54 = vmax.f32 %v3363_v52, 0.0  ;;  %v3364_v29 = vadd.f32 %v11669_v43, %v3315_v12  ;;  %v1512_v49 = vpop.f32.mrb[137].mxu1  ;;  %3691 = vmatpush1.bf16.msra.mxu1 (%p392_p11), %v11927_v30  ;;  %v11932_v52 = vld [vmem:[%s17055_s5 + $0x120] ss:$16 sps:$4 sm:$0xff] (%p392_p11)   ;;  %v11933_v43 = vld [vmem:[%s17055_s5 + $0x128] ss:$16 sps:$4 sm:$0xff] (%p392_p11)  }
 0x435   : >> { %v3377_v22 = vmax.f32 %v3361_v17, 0.0  ;;  %v3362_v2 = vadd.f32 %v11670_v35, %v3305_v44  ;;  %v11402_v31 = vpop.f32.mrb[138].mxu1  ;;  %3692 = vmatprep.subr.bf16.mxu1 (%p392_p11), %v11930_v16  ;;  %v11934_v56 = vld [vmem:[%s17055_s5 + $0x144] ss:$16 sps:$4 sm:$0xff] (%p392_p11)   ;;  %v11936_v17 = vld [vmem:[%s17055_s5 + $0x14c] ss:$16 sps:$4 sm:$0xff] (%p392_p11)  }
 0x436   : >> { %3397 = vst [vmem:[%s14765_s17 + $0x30] sm:$0xff] %v3379_v54  ;;  %v3380_v6 = vmax.f32 %v3364_v29, 0.0  ;;  %v1515_v14 = vpop.f32.mrb[139].mxu1  ;;  %v11938_v35 = vld [vmem:[%s17055_s5 + $0x140] ss:$16 sps:$4 sm:$0xff] (%p392_p11)  }
 0x437   : >> { %3395 = vst [vmem:[%s14765_s17 + $0x20] sm:$0xff] %v3377_v22  ;;  %v3378_v63 = vmax.f32 %v3362_v2, 0.0  ;;  %v11657_v62 = vpop.f32.mrb[8].mxu0  ;;  %v11940_v54 = vld [vmem:[%s17055_s5 + $0x164] ss:$16 sps:$4 sm:$0xff] (%p392_p11)  }
 0x438   : >> { %3398 = vst [vmem:[%s14765_s17 + $0x38] sm:$0xff] %v3380_v6  ;;  %v11671_v39 = vadd.f32 %v11657_v62, %v11401_v5  ;;  %v3230_v55 = vpop.f32.mrb[9].mxu0  ;;  %v11939_v5 = vld [vmem:[%s17055_s5 + $0x148] ss:$16 sps:$4 sm:$0xff] (%p392_p11)   ;;  %3693 = vmatpush1.bf16.msra.mxu1 (%p392_p11), %v11933_v43  ;;  %v11942_v29 = vld [vmem:[%s17055_s5 + $0x16c] ss:$16 sps:$4 sm:$0xff] (%p392_p11)  }
 0x439   : >> { %3396 = vst [vmem:[%s14765_s17 + $0x28] sm:$0xff] %v3378_v63  ;;  %v11672_v41 = vadd.f32 %v3230_v55, %v1512_v49  ;;  %v11658_v38 = vpop.f32.mrb[10].mxu0  ;;  %3694 = vmatprep.subr.bf16.mxu1 (%p392_p11), %v11936_v17  ;;  %v11944_v49 = vld [vmem:[%s17055_s5 + $0x160] ss:$16 sps:$4 sm:$0xff] (%p392_p11)   ;;  %v11946_v22 = vld [vmem:[%s17055_s5 + $0x184] ss:$16 sps:$4 sm:$0xff] (%p392_p11)  }
 0x43a   : >> { %v3367_v46 = vadd.f32 %v11671_v39, %v3330_v58  ;;  %v11673_v47 = vadd.f32 %v11658_v38, %v11402_v31  ;;  %v3233_v15 = vpop.f32.mrb[11].mxu0  ;;  %v11945_v58 = vld [vmem:[%s17055_s5 + $0x168] ss:$16 sps:$4 sm:$0xff] (%p392_p11)   ;;  %v11948_v2 = vld [vmem:[%s17055_s5 + $0x18c] ss:$16 sps:$4 sm:$0xff] (%p392_p11)  }
 0x43b   : >> { %v3365_v19 = vadd.f32 %v11672_v41, %v3320_v1  ;;  %v11674_v10 = vadd.f32 %v3233_v15, %v1515_v14  ;;  %v11405_v32 = vpop.f32.mrb[140].mxu1  ;;  %v11950_v31 = vld [vmem:[%s17055_s5 + $0x180] ss:$16 sps:$4 sm:$0xff] (%p392_p11)   ;;  %v11951_v6 = vld [vmem:[%s17055_s5 + $0x188] ss:$16 sps:$4 sm:$0xff] (%p392_p11)  }
 0x43c   : >> { %v3383_v0 = vmax.f32 %v3367_v46, 0.0  ;;  %v3368_v57 = vadd.f32 %v11673_v47, %v3335_v9  ;;  %v1528_v44 = vpop.f32.mrb[141].mxu1  ;;  %3695 = vmatpush1.bf16.msra.mxu1 (%p392_p11), %v11939_v5  ;;  %v11952_v14 = vld [vmem:[%s17055_s5 + $0x1a4] ss:$16 sps:$4 sm:$0xff] (%p392_p11)   ;;  %v11954_v9 = vld [vmem:[%s17055_s5 + $0x1ac] ss:$16 sps:$4 sm:$0xff] (%p392_p11)  }
 0x43d   : >> { %v3381_v45 = vmax.f32 %v3365_v19, 0.0  ;;  %v3366_v37 = vadd.f32 %v11674_v10, %v3325_v61  ;;  %v11406_v60 = vpop.f32.mrb[142].mxu1  ;;  %v11926_v61 = vld [vmem:[%s17055_s5 + $0x100] ss:$16 sps:$4 sm:$0xff] (%p392_p11)   ;;  %3696 = vmatprep.subr.bf16.mxu1 (%p392_p11), %v11942_v29  ;;  %v11957_v62 = vld [vmem:[%s17055_s5 + $0x1a8] ss:$16 sps:$4 sm:$0xff] (%p392_p11)  }
 0x43e   : >> { %3401 = vst [vmem:[%s14765_s17 + $0x50] sm:$0xff] %v3383_v0  ;;  %v3384_v8 = vmax.f32 %v3368_v57, 0.0  ;;  %v1531_v48 = vpop.f32.mrb[143].mxu1  ;;  %3650 = vmatpush1.bf16.msra.mxu0 (%p392_p11), %v11926_v61  ;;  %v11956_v63 = vld [vmem:[%s17055_s5 + $0x1a0] ss:$16 sps:$4 sm:$0xff] (%p392_p11)  }
 0x43f   : >> { %3399 = vst [vmem:[%s14765_s17 + $0x40] sm:$0xff] %v3381_v45  ;;  %v3382_v11 = vmax.f32 %v3366_v37, 0.0  ;;  %v11661_v21 = vpop.f32.mrb[12].mxu0  ;;  %3651 = vmatprep.subr.bf16.mxu0 (%p392_p11), %v11928_v28  ;;  %v11958_v39 = vld [vmem:[%s17055_s5 + $0x1c4] ss:$16 sps:$4 sm:$0xff] (%p392_p11)  }
 0x440   : >> { %3402 = vst [vmem:[%s14765_s17 + $0x58] sm:$0xff] %v3384_v8  ;;  %v11675_v33 = vadd.f32 %v11661_v21, %v11405_v32  ;;  %v3246_v25 = vpop.f32.mrb[13].mxu0  ;;  %3697 = vmatpush1.bf16.msra.mxu1 (%p392_p11), %v11945_v58  ;;  %v11960_v55 = vld [vmem:[%s17055_s5 + $0x1cc] ss:$16 sps:$4 sm:$0xff] (%p392_p11)   ;;  %v11962_v47 = vld [vmem:[%s17055_s5 + $0x1c0] ss:$16 sps:$4 sm:$0xff] (%p392_p11)  }
 0x441   : >> { %3400 = vst [vmem:[%s14765_s17 + $0x48] sm:$0xff] %v3382_v11  ;;  %v11676_v12 = vadd.f32 %v3246_v25, %v1528_v44  ;;  %v11662_v13 = vpop.f32.mrb[14].mxu0  ;;  %3698 = vmatprep.subr.bf16.mxu1 (%p392_p11), %v11948_v2  ;;  %v11963_v15 = vld [vmem:[%s17055_s5 + $0x1c8] ss:$16 sps:$4 sm:$0xff] (%p392_p11)   ;;  %v11964_v10 = vld [vmem:[%s17055_s5 + $0x1e4] ss:$16 sps:$4 sm:$0xff] (%p392_p11)  }
 0x442   : >> { %v3371_v27 = vadd.f32 %v11675_v33, %v3350_v7  ;;  %v11677_v24 = vadd.f32 %v11662_v13, %v11406_v60  ;;  %v3249_v34 = vpop.f32.mrb[15].mxu0  ;;  %3652 = vmatpush1.bf16.msra.mxu0 (%p392_p11), %v11932_v52  ;;  %v11966_v32 = vld [vmem:[%s17055_s5 + $0x1ec] ss:$16 sps:$4 sm:$0xff] (%p392_p11)   ;;  %v11968_v57 = vld [vmem:[%s17055_s5 + $0x1e0] ss:$16 sps:$4 sm:$0xff] (%p392_p11)  }
 0x443   : >> { %v3369_v3 = vadd.f32 %v11676_v12, %v3340_v42  ;;  %v11678_v36 = vadd.f32 %v3249_v34, %v1531_v48  ;;  %394 = sbr.rel (!%p392_p11) target bundleno = 48 (0x30), region = 146  ;;  %3653 = vmatprep.subr.bf16.mxu0 (%p392_p11), %v11934_v56  ;;  %v11972_v45 = vld [vmem:[%s17055_s5 + $0x4] ss:$16 sps:$4 sm:$0xff] (%p392_p11)   ;;  %v11975_v37 = vld [vmem:[%s17055_s5 + $0xc] ss:$16 sps:$4 sm:$0xff] (%p392_p11)  }
 0x444   : >> { %v3387_v23 = vmax.f32 %v3371_v27, 0.0  ;;  %v3372_v40 = vadd.f32 %v11677_v24, %v3355_v59  ;;  %3699 = vmatpush1.bf16.msra.mxu1 (%p392_p11), %v11951_v6  ;;  %v11970_v8 = vld [vmem:[%s17055_s5] ss:$16 sps:$4 sm:$0xff] (%p392_p11)   ;;  %v11973_v48 = vld [vmem:[%s17055_s5 + $0x8] ss:$16 sps:$4 sm:$0xff] (%p392_p11)  }
 0x445   : >> { %v3385_v20 = vmax.f32 %v3369_v3, 0.0  ;;  %v3370_v26 = vadd.f32 %v11678_v36, %v3345_v4  ;;  %3700 = vmatprep.subr.bf16.mxu1 (%p392_p11), %v11954_v9  ;;  %v11969_v4 = vld [vmem:[%s17055_s5 + $0x1e8] ss:$16 sps:$4 sm:$0xff] (%p392_p11)   ;;  %v11978_v11 = vld [vmem:[%s17055_s5 + $0x24] ss:$16 sps:$4 sm:$0xff] (%p392_p11)  }
 0x446   : >> { %3405 = vst [vmem:[%s14765_s17 + $0x70] sm:$0xff] %v3387_v23  ;;  %v3388_v1 = vmax.f32 %v3372_v40, 0.0  ;;  %3654 = vmatpush1.bf16.msra.mxu0 (%p392_p11), %v11938_v35  ;;  %v11981_v21 = vld [vmem:[%s17055_s5 + $0x2c] ss:$16 sps:$4 sm:$0xff] (%p392_p11)   ;;  %v11976_v33 = vld [vmem:[%s17055_s5 + $0x20] ss:$16 sps:$4 sm:$0xff] (%p392_p11)  }
 0x447   : >> { %3403 = vst [vmem:[%s14765_s17 + $0x60] sm:$0xff] %v3385_v20  ;;  %v3386_v18 = vmax.f32 %v3370_v26, 0.0  ;;  %3655 = vmatprep.subr.bf16.mxu0 (%p392_p11), %v11940_v54  ;;  %v11979_v25 = vld [vmem:[%s17055_s5 + $0x28] ss:$16 sps:$4 sm:$0xff] (%p392_p11)   ;;  %v11984_v7 = vld [vmem:[%s17055_s5 + $0x44] ss:$16 sps:$4 sm:$0xff] (%p392_p11)  }
 0x448   : >> { %3406 = vst [vmem:[%s14765_s17 + $0x78] sm:$0xff] %v3388_v1  ;;  %3701 = vmatpush1.bf16.msra.mxu1 (%p392_p11), %v11957_v62  ;;  %v11987_v12 = vld [vmem:[%s17055_s5 + $0x4c] ss:$16 sps:$4 sm:$0xff] (%p392_p11)   ;;  %v11982_v13 = vld [vmem:[%s17055_s5 + $0x40] ss:$16 sps:$4 sm:$0xff] (%p392_p11)  }
 0x449   : >> { %3404 = vst [vmem:[%s14765_s17 + $0x68] sm:$0xff] %v3386_v18  ;;  %3702 = vmatprep.subr.bf16.mxu1 (%p392_p11), %v11960_v55  ;;  %v11985_v27 = vld [vmem:[%s17055_s5 + $0x48] ss:$16 sps:$4 sm:$0xff] (%p392_p11)   ;;  %v11990_v24 = vld [vmem:[%s17055_s5 + $0x64] ss:$16 sps:$4 sm:$0xff] (%p392_p11)   ;;  %s17336_s17 = sand.u32 (%p392_p11), 1, %s12976_s10  }
 0x44a   : > { %3656 = vmatpush1.bf16.msra.mxu0 %v11944_v49  ;;  %v11993_v34 = vld [vmem:[%s17055_s5 + $0x6c] ss:$16 sps:$4 sm:$0xff]   ;;  %v11988_v59 = vld [vmem:[%s17055_s5 + $0x60] ss:$16 sps:$4 sm:$0xff]   ;;  %v11991_v3 = vld [vmem:[%s17055_s5 + $0x68] ss:$16 sps:$4 sm:$0xff]  }
 0x44b   : > { %3657 = vmatprep.subr.bf16.mxu0 %v11946_v22  ;;  %v11996_v36 = vld [vmem:[%s17055_s5 + $0x84] ss:$16 sps:$4 sm:$0xff]   ;;  %v11999_v23 = vld [vmem:[%s17055_s5 + $0x8c] ss:$16 sps:$4 sm:$0xff]   ;;  %v11994_v40 = vld [vmem:[%s17055_s5 + $0x80] ss:$16 sps:$4 sm:$0xff]  }
 0x44c   : > { %3703 = vmatpush1.bf16.msra.mxu1 %v11963_v15  ;;  %v11997_v26 = vld [vmem:[%s17055_s5 + $0x88] ss:$16 sps:$4 sm:$0xff]   ;;  %v12002_v18 = vld [vmem:[%s17055_s5 + $0xa4] ss:$16 sps:$4 sm:$0xff]   ;;  %v12000_v51 = vld [vmem:[%s17055_s5 + $0xa0] ss:$16 sps:$4 sm:$0xff]  }
 0x44d   : > { %3704 = vmatprep.subr.bf16.mxu1 %v11966_v32  ;;  %v12003_v30 = vld [vmem:[%s17055_s5 + $0xa8] ss:$16 sps:$4 sm:$0xff]   ;;  %v12008_v16 = vld [vmem:[%s17055_s5 + $0xc4] ss:$16 sps:$4 sm:$0xff]   ;;  %v12011_v52 = vld [vmem:[%s17055_s5 + $0xcc] ss:$16 sps:$4 sm:$0xff]  }
 0x44e   : > { %3658 = vmatpush1.bf16.msra.mxu0 %v11950_v31  ;;  %v12006_v43 = vld [vmem:[%s17055_s5 + $0xc0] ss:$16 sps:$4 sm:$0xff]   ;;  %v12009_v17 = vld [vmem:[%s17055_s5 + $0xc8] ss:$16 sps:$4 sm:$0xff]   ;;  %v12014_v5 = vld [vmem:[%s17055_s5 + $0xe4] ss:$16 sps:$4 sm:$0xff]  }
 0x44f   : > { %3659 = vmatprep.subr.bf16.mxu0 %v11952_v14  ;;  %v12017_v54 = vld [vmem:[%s17055_s5 + $0xec] ss:$16 sps:$4 sm:$0xff]   ;;  %v12012_v49 = vld [vmem:[%s17055_s5 + $0xe0] ss:$16 sps:$4 sm:$0xff]   ;;  %v12015_v58 = vld [vmem:[%s17055_s5 + $0xe8] ss:$16 sps:$4 sm:$0xff]  }
 0x450   : > { %v3448_v41 = vld [vmem:[#allocation2 + $0x1] ss:$128 sm:$0x1]  ;;  %3705 = vmatpush1.bf16.msra.mxu1 %v11969_v4  ;;  %v3407_v20 = vld [vmem:[#allocation2] ss:$128 sm:$0x1] }
 0x451   : > { %v3449_v38 = vld [vmem:[#allocation2 + $0x1] ss:$128 sm:$0x2]  ;;  %3932 = vmatprep.subr.bf16.mxu1 %v11975_v37  ;;  %v3408_v1 = vld [vmem:[#allocation2] ss:$128 sm:$0x2] }
 0x452   : > { %v3451_v46 = vld [vmem:[#allocation2 + $0x1] ss:$128 sm:$0x4]  ;;  %v3450_v42 = vor.u32 %v3449_v38, %v3448_v41  ;;  %3660 = vmatpush1.bf16.msra.mxu0 %v11956_v63  ;;  %v3409_v61 = vor.u32 %v3408_v1, %v3407_v20  ;;  %v3410_v28 = vld [vmem:[#allocation2] ss:$128 sm:$0x4] }
 0x453   : > { %v3453_v19 = vld [vmem:[#allocation2 + $0x1] ss:$128 sm:$0x8]  ;;  %3661 = vmatprep.subr.bf16.mxu0 %v11958_v39  ;;  %v3412_v35 = vld [vmem:[#allocation2] ss:$128 sm:$0x8] }
 0x454   : > { %v3452_v0 = vor.u32 %v3451_v46, %v3450_v42  ;;  %v3411_v56 = vor.u32 %v3410_v28, %v3409_v61  ;;  %v12020_v22 = vld [vmem:[%s17055_s5 + $0x204] ss:$16 sps:$4 sm:$0xff]   ;;  %v12023_v2 = vld [vmem:[%s17055_s5 + $0x20c] ss:$16 sps:$4 sm:$0xff]   ;;  %v12018_v6 = vld [vmem:[%s17055_s5 + $0x200] ss:$16 sps:$4 sm:$0xff]  }
 0x455   : > { %v12021_v14 = vld [vmem:[%s17055_s5 + $0x208] ss:$16 sps:$4 sm:$0xff]   ;;  %v12026_v9 = vld [vmem:[%s17055_s5 + $0x224] ss:$16 sps:$4 sm:$0xff]   ;;  %v12029_v63 = vld [vmem:[%s17055_s5 + $0x22c] ss:$16 sps:$4 sm:$0xff]  }
 0x456   : > { %v3454_v44 = vor.u32 %v3453_v19, %v3452_v0  ;;  %3662 = vmatpush1.bf16.msra.mxu0 %v11962_v47  ;;  %v3413_v29 = vor.u32 %v3412_v35, %v3411_v56  ;;  %v12024_v62 = vld [vmem:[%s17055_s5 + $0x220] ss:$16 sps:$4 sm:$0xff]   ;;  %v12027_v39 = vld [vmem:[%s17055_s5 + $0x228] ss:$16 sps:$4 sm:$0xff]   ;;  %v12032_v55 = vld [vmem:[%s17055_s5 + $0x244] ss:$16 sps:$4 sm:$0xff]  }
 0x457   : > { %3663 = vmatprep.subr.bf16.mxu0 %v11964_v10  ;;  %v12035_v41 = vld [vmem:[%s17055_s5 + $0x24c] ss:$16 sps:$4 sm:$0xff]   ;;  %v12030_v38 = vld [vmem:[%s17055_s5 + $0x240] ss:$16 sps:$4 sm:$0xff]   ;;  %v12033_v46 = vld [vmem:[%s17055_s5 + $0x248] ss:$16 sps:$4 sm:$0xff]  }
 0x458   : > { %v3455_v60 = vpack.c.bf16 %v3454_v44, %v3454_v44  ;;  %v3414_v31 = vpack.c.bf16 %v3413_v29, %v3413_v29  ;;  %v12038_v47 = vld [vmem:[%s17055_s5 + $0x264] ss:$16 sps:$4 sm:$0xff]   ;;  %v12041_v15 = vld [vmem:[%s17055_s5 + $0x26c] ss:$16 sps:$4 sm:$0xff]   ;;  %v12036_v42 = vld [vmem:[%s17055_s5 + $0x260] ss:$16 sps:$4 sm:$0xff]  }
 0x459   : > { %v12039_v19 = vld [vmem:[%s17055_s5 + $0x268] ss:$16 sps:$4 sm:$0xff]   ;;  %v12044_v10 = vld [vmem:[%s17055_s5 + $0x284] ss:$16 sps:$4 sm:$0xff]   ;;  %v12047_v32 = vld [vmem:[%s17055_s5 + $0x28c] ss:$16 sps:$4 sm:$0xff]  }
 0x45a   : > { %3664 = vmatpush1.bf16.msra.mxu0 %v11968_v57  ;;  %3723 = vmatmul.mubr.bf16.vlgmr.msra.gmra.mrb[0].mxu1 %v3455_v60  ;;  %v12042_v0 = vld [vmem:[%s17055_s5 + $0x280] ss:$16 sps:$4 sm:$0xff]   ;;  %v12045_v57 = vld [vmem:[%s17055_s5 + $0x288] ss:$16 sps:$4 sm:$0xff]   ;;  %v12050_v4 = vld [vmem:[%s17055_s5 + $0x2a4] ss:$16 sps:$4 sm:$0xff]  }
 0x45b   : > { %3891 = vmatprep.subr.bf16.mxu0 %v11972_v45  ;;  %3933 = vmatpush1.bf16.msra.mxu1 %v11973_v48  ;;  %v3974_v44 = vld [vmem:[#allocation2 + $0x2] ss:$128 sm:$0x1]  ;;  %v12053_v37 = vld [vmem:[%s17055_s5 + $0x2ac] ss:$16 sps:$4 sm:$0xff]   ;;  %s9552_s13 = scalar_lea.sflag [#allocation4], %s17336_s17 }
 0x45c   : > { %3934 = vmatprep.subr.bf16.mxu1 %v11981_v21  ;;  %3964 = vmatprep.mubr.bf16.mxu1 %v12999_v53  ;;  %v3975_v45 = vld [vmem:[#allocation2 + $0x2] ss:$128 sm:$0x2]  ;;  %v12074_v1 = vld [vmem:[%s17055_s5 + $0x324] ss:$16 sps:$4 sm:$0xff]  }
 0x45d   : > { %3682 = vmatmul.mubr.bf16.vlgmr.msra.gmra.mrb[0].mxu0 %v3455_v60  ;;  %v12048_v60 = vld [vmem:[%s17055_s5 + $0x2a0] ss:$16 sps:$4 sm:$0xff]   ;;  %v3976_v48 = vor.u32 %v3975_v45, %v3974_v44  ;;  %v12080_v61 = vld [vmem:[%s17055_s5 + $0x344] ss:$16 sps:$4 sm:$0xff]   ;;  %v12093_v29 = vld [vmem:[%s17055_s5 + $0x388] ss:$16 sps:$4 sm:$0xff]  }
 0x45e   : > { %3892 = vmatpush1.bf16.msra.mxu0 %v11970_v8  ;;  %3923 = vmatprep.mubr.bf16.mxu0 %v12999_v53  ;;  %v12051_v8 = vld [vmem:[%s17055_s5 + $0x2a8] ss:$16 sps:$4 sm:$0xff]   ;;  %v3977_v21 = vld [vmem:[#allocation2 + $0x2] ss:$128 sm:$0x4] }
 0x45f   : > { %3893 = vmatprep.subr.bf16.mxu0 %v11978_v11  ;;  %3935 = vmatpush1.bf16.msra.mxu1 %v11979_v25  ;;  %v12056_v11 = vld [vmem:[%s17055_s5 + $0x2c4] ss:$16 sps:$4 sm:$0xff]   ;;  %v12054_v25 = vld [vmem:[%s17055_s5 + $0x2c0] ss:$16 sps:$4 sm:$0xff]   ;;  %v12117_v44 = vld [vmem:[%s17055_s5 + $0x408] ss:$16 sps:$4 sm:$0xff]  }
 0x460   : > { %3936 = vmatprep.subr.bf16.mxu1 %v11987_v12  ;;  %v3978_v12 = vor.u32 %v3977_v21, %v3976_v48  ;;  %v12066_v20 = vld [vmem:[%s17055_s5 + $0x300] ss:$16 sps:$4 sm:$0xff]   ;;  %v12092_v35 = vld [vmem:[%s17055_s5 + $0x384] ss:$16 sps:$4 sm:$0xff]   ;;  %v12125_v45 = vld [vmem:[%s17055_s5 + $0x42c] ss:$16 sps:$4 sm:$0xff]  }
 0x461   : > { %v12078_v28 = vld [vmem:[%s17055_s5 + $0x340] ss:$16 sps:$4 sm:$0xff]   ;;  %v12131_v48 = vld [vmem:[%s17055_s5 + $0x44c] ss:$16 sps:$4 sm:$0xff]   ;;  %v12129_v21 = vld [vmem:[%s17055_s5 + $0x448] ss:$16 sps:$4 sm:$0xff]  }
 0x462   : > { %3894 = vmatpush1.bf16.msra.mxu0 %v11976_v33  ;;  %v12059_v33 = vld [vmem:[%s17055_s5 + $0x2cc] ss:$16 sps:$4 sm:$0xff]   ;;  %v12084_v56 = vld [vmem:[%s17055_s5 + $0x360] ss:$16 sps:$4 sm:$0xff]  }
 0x463   : > { %3895 = vmatprep.subr.bf16.mxu0 %v11984_v7  ;;  %3937 = vmatpush1.bf16.msra.mxu1 %v11985_v27  ;;  %v12057_v7 = vld [vmem:[%s17055_s5 + $0x2c8] ss:$16 sps:$4 sm:$0xff]   ;;  %v3979_v27 = vld [vmem:[#allocation2 + $0x2] ss:$128 sm:$0x8] }
 0x464   : > { %3938 = vmatprep.subr.bf16.mxu1 %v11993_v34  ;;  %v12060_v34 = vld [vmem:[%s17055_s5 + $0x2e0] ss:$16 sps:$4 sm:$0xff]  }
 0x466   : > { %3896 = vmatpush1.bf16.msra.mxu0 %v11982_v13  ;;  %v12062_v13 = vld [vmem:[%s17055_s5 + $0x2e4] ss:$16 sps:$4 sm:$0xff]  }
 0x467   : > { %3897 = vmatprep.subr.bf16.mxu0 %v11990_v24  ;;  %3939 = vmatpush1.bf16.msra.mxu1 %v11991_v3  ;;  %v12065_v24 = vld [vmem:[%s17055_s5 + $0x2ec] ss:$16 sps:$4 sm:$0xff]   ;;  %v12063_v3 = vld [vmem:[%s17055_s5 + $0x2e8] ss:$16 sps:$4 sm:$0xff]  }
 0x468   : > { %3940 = vmatprep.subr.bf16.mxu1 %v11999_v23  ;;  %v12071_v23 = vld [vmem:[%s17055_s5 + $0x30c] ss:$16 sps:$4 sm:$0xff]  }
 0x46a   : > { %3898 = vmatpush1.bf16.msra.mxu0 %v11988_v59  ;;  %v3980_v59 = vor.u32 %v3979_v27, %v3978_v12  ;;  %v12135_v12 = vld [vmem:[%s17055_s5 + $0x468] ss:$16 sps:$4 sm:$0xff]   ;;  %v12143_v27 = vld [vmem:[%s17055_s5 + $0x48c] ss:$16 sps:$4 sm:$0xff]  }
 0x46b   : > { %3899 = vmatprep.subr.bf16.mxu0 %v11996_v36  ;;  %3941 = vmatpush1.bf16.msra.mxu1 %v11997_v26  ;;  %v12068_v36 = vld [vmem:[%s17055_s5 + $0x304] ss:$16 sps:$4 sm:$0xff]   ;;  %v12069_v26 = vld [vmem:[%s17055_s5 + $0x308] ss:$16 sps:$4 sm:$0xff]  }
 0x46c   : > { %3942 = vmatprep.subr.bf16.mxu1 %v12005_v50  ;;  %v12072_v50 = vld [vmem:[%s17055_s5 + $0x320] ss:$16 sps:$4 sm:$0xff]  }
 0x46e   : > { %3900 = vmatpush1.bf16.msra.mxu0 %v11994_v40  ;;  %v3981_v40 = vpack.c.bf16 %v3980_v59, %v3980_v59  ;;  %v12141_v59 = vld [vmem:[%s17055_s5 + $0x488] ss:$16 sps:$4 sm:$0xff]  }
 0x46f   : > { %3901 = vmatprep.subr.bf16.mxu0 %v12002_v18  ;;  %3943 = vmatpush1.bf16.msra.mxu1 %v12003_v30  ;;  %v12077_v18 = vld [vmem:[%s17055_s5 + $0x32c] ss:$16 sps:$4 sm:$0xff]  }
 0x470   : > { %3944 = vmatprep.subr.bf16.mxu1 %v12011_v52  ;;  %v12083_v30 = vld [vmem:[%s17055_s5 + $0x34c] ss:$16 sps:$4 sm:$0xff]   ;;  %v12086_v52 = vld [vmem:[%s17055_s5 + $0x364] ss:$16 sps:$4 sm:$0xff]  }
 0x472   : > { %3902 = vmatpush1.bf16.msra.mxu0 %v12000_v51  ;;  %v12075_v51 = vld [vmem:[%s17055_s5 + $0x328] ss:$16 sps:$4 sm:$0xff]  }
 0x473   : > { %3903 = vmatprep.subr.bf16.mxu0 %v12008_v16  ;;  %3945 = vmatpush1.bf16.msra.mxu1 %v12009_v17  ;;  %v12081_v16 = vld [vmem:[%s17055_s5 + $0x348] ss:$16 sps:$4 sm:$0xff]  }
 0x474   : > { %3946 = vmatprep.subr.bf16.mxu1 %v12017_v54  ;;  %v12087_v17 = vld [vmem:[%s17055_s5 + $0x368] ss:$16 sps:$4 sm:$0xff]   ;;  %v12090_v54 = vld [vmem:[%s17055_s5 + $0x380] ss:$16 sps:$4 sm:$0xff]  }
 0x476   : > { %3904 = vmatpush1.bf16.msra.mxu0 %v12006_v43  ;;  %v12089_v43 = vld [vmem:[%s17055_s5 + $0x36c] ss:$16 sps:$4 sm:$0xff]  }
 0x477   : > { %3905 = vmatprep.subr.bf16.mxu0 %v12014_v5  ;;  %3947 = vmatpush1.bf16.msra.mxu1 %v12015_v58  ;;  %v12095_v5 = vld [vmem:[%s17055_s5 + $0x38c] ss:$16 sps:$4 sm:$0xff]   ;;  %v4263_v58 = vld [vmem:[#allocation2 + $0x3] ss:$128 sm:$0x2] }
 0x478   : > { %4216 = vmatprep.subr.bf16.mxu1 %v12023_v2  ;;  %v12101_v2 = vld [vmem:[%s17055_s5 + $0x3ac] ss:$16 sps:$4 sm:$0xff]  }
 0x47a   : > { %3906 = vmatpush1.bf16.msra.mxu0 %v12012_v49  ;;  %3965 = vmatmul.mubr.bf16.vlgmr.msra.gmra.mrb[4].mxu1 %v3414_v31  ;;  %v4262_v49 = vld [vmem:[#allocation2 + $0x3] ss:$128 sm:$0x1] }
 0x47b   : > { %4175 = vmatprep.subr.bf16.mxu0 %v12020_v22  ;;  %4217 = vmatpush1.bf16.msra.mxu1 %v12021_v14  ;;  %v12098_v22 = vld [vmem:[%s17055_s5 + $0x3a4] ss:$16 sps:$4 sm:$0xff]   ;;  %v4264_v14 = vor.u32 %v4263_v58, %v4262_v49  ;;  %v12165_v49 = vld [vmem:[%s17055_s5 + $0x508] ss:$16 sps:$4 sm:$0xff]  }
 0x47c   : > { %4218 = vmatprep.subr.bf16.mxu1 %v12029_v63  ;;  %4248 = vmatprep.mubr.bf16.mxu1 %v12999_v53  ;;  %v12104_v63 = vld [vmem:[%s17055_s5 + $0x3c4] ss:$16 sps:$4 sm:$0xff]  }
 0x47d   : > { %3924 = vmatmul.mubr.bf16.vlgmr.msra.gmra.mrb[4].mxu0 %v3414_v31  ;;  %v12096_v31 = vld [vmem:[%s17055_s5 + $0x3a0] ss:$16 sps:$4 sm:$0xff]   ;;  %v12170_v58 = vld [vmem:[%s17055_s5 + $0x524] ss:$16 sps:$4 sm:$0xff]  }
 0x47e   : > { %4176 = vmatpush1.bf16.msra.mxu0 %v12018_v6  ;;  %4207 = vmatprep.mubr.bf16.mxu0 %v12999_v53  ;;  %v12099_v6 = vld [vmem:[%s17055_s5 + $0x3a8] ss:$16 sps:$4 sm:$0xff]  }
 0x47f   : > { %4177 = vmatprep.subr.bf16.mxu0 %v12026_v9  ;;  %4219 = vmatpush1.bf16.msra.mxu1 %v12027_v39  ;;  %v4265_v9 = vld [vmem:[#allocation2 + $0x3] ss:$128 sm:$0x4] }
 0x480   : > { %4220 = vmatprep.subr.bf16.mxu1 %v12035_v41  ;;  %v12102_v39 = vld [vmem:[%s17055_s5 + $0x3c0] ss:$16 sps:$4 sm:$0xff]   ;;  %v4266_v41 = vor.u32 %v4265_v9, %v4264_v14  ;;  %v12179_v14 = vld [vmem:[%s17055_s5 + $0x54c] ss:$16 sps:$4 sm:$0xff]  }
 0x481   : > { %v12174_v9 = vld [vmem:[%s17055_s5 + $0x540] ss:$16 sps:$4 sm:$0xff]  }
 0x482   : > { %4178 = vmatpush1.bf16.msra.mxu0 %v12024_v62  ;;  %v12107_v62 = vld [vmem:[%s17055_s5 + $0x3cc] ss:$16 sps:$4 sm:$0xff]  }
 0x483   : > { %4179 = vmatprep.subr.bf16.mxu0 %v12032_v55  ;;  %4221 = vmatpush1.bf16.msra.mxu1 %v12033_v46  ;;  %v12105_v55 = vld [vmem:[%s17055_s5 + $0x3c8] ss:$16 sps:$4 sm:$0xff]   ;;  %v12110_v46 = vld [vmem:[%s17055_s5 + $0x3e4] ss:$16 sps:$4 sm:$0xff]  }
 0x484   : > { %4222 = vmatprep.subr.bf16.mxu1 %v12041_v15  ;;  %v12108_v15 = vld [vmem:[%s17055_s5 + $0x3e0] ss:$16 sps:$4 sm:$0xff]  }
 0x486   : > { %4180 = vmatpush1.bf16.msra.mxu0 %v12030_v38  ;;  %v4267_v38 = vld [vmem:[#allocation2 + $0x3] ss:$128 sm:$0x8] }
 0x487   : > { %4181 = vmatprep.subr.bf16.mxu0 %v12038_v47  ;;  %4223 = vmatpush1.bf16.msra.mxu1 %v12039_v19  ;;  %v12113_v47 = vld [vmem:[%s17055_s5 + $0x3ec] ss:$16 sps:$4 sm:$0xff]   ;;  %v12111_v19 = vld [vmem:[%s17055_s5 + $0x3e8] ss:$16 sps:$4 sm:$0xff]  }
 0x488   : > { %4224 = vmatprep.subr.bf16.mxu1 %v12047_v32  ;;  %v12119_v32 = vld [vmem:[%s17055_s5 + $0x40c] ss:$16 sps:$4 sm:$0xff]  }
 0x48a   : > { %4182 = vmatpush1.bf16.msra.mxu0 %v12036_v42  ;;  %v4268_v42 = vor.u32 %v4267_v38, %v4266_v41  ;;  %v12183_v41 = vld [vmem:[%s17055_s5 + $0x568] ss:$16 sps:$4 sm:$0xff]   ;;  %v12188_v38 = vld [vmem:[%s17055_s5 + $0x584] ss:$16 sps:$4 sm:$0xff]  }
 0x48b   : > { %4183 = vmatprep.subr.bf16.mxu0 %v12044_v10  ;;  %4225 = vmatpush1.bf16.msra.mxu1 %v12045_v57  ;;  %v12116_v10 = vld [vmem:[%s17055_s5 + $0x404] ss:$16 sps:$4 sm:$0xff]   ;;  %v12114_v57 = vld [vmem:[%s17055_s5 + $0x400] ss:$16 sps:$4 sm:$0xff]  }
 0x48c   : > { %4226 = vmatprep.subr.bf16.mxu1 %v12053_v37  ;;  %v12120_v37 = vld [vmem:[%s17055_s5 + $0x420] ss:$16 sps:$4 sm:$0xff]  }
 0x48e   : > { %4184 = vmatpush1.bf16.msra.mxu0 %v12042_v0  ;;  %v4269_v0 = vpack.c.bf16 %v4268_v42, %v4268_v42  ;;  %v4838_v42 = vld [vmem:[#allocation2 + $0x5] ss:$128 sm:$0x1] }
 0x48f   : > { %4185 = vmatprep.subr.bf16.mxu0 %v12050_v4  ;;  %4227 = vmatpush1.bf16.msra.mxu1 %v12051_v8  ;;  %v12122_v4 = vld [vmem:[%s17055_s5 + $0x424] ss:$16 sps:$4 sm:$0xff]  }
 0x490   : > { %4228 = vmatprep.subr.bf16.mxu1 %v12059_v33  ;;  %v12128_v8 = vld [vmem:[%s17055_s5 + $0x444] ss:$16 sps:$4 sm:$0xff]  }
 0x491   : > { %v12134_v33 = vld [vmem:[%s17055_s5 + $0x464] ss:$16 sps:$4 sm:$0xff]  }
 0x492   : > { %4186 = vmatpush1.bf16.msra.mxu0 %v12048_v60  ;;  %v12123_v60 = vld [vmem:[%s17055_s5 + $0x428] ss:$16 sps:$4 sm:$0xff]  }
 0x493   : > { %4187 = vmatprep.subr.bf16.mxu0 %v12056_v11  ;;  %4229 = vmatpush1.bf16.msra.mxu1 %v12057_v7  ;;  %v12126_v11 = vld [vmem:[%s17055_s5 + $0x440] ss:$16 sps:$4 sm:$0xff]  }
 0x494   : > { %4230 = vmatprep.subr.bf16.mxu1 %v12065_v24  ;;  %v12132_v7 = vld [vmem:[%s17055_s5 + $0x460] ss:$16 sps:$4 sm:$0xff]  }
 0x495   : > { %v12138_v24 = vld [vmem:[%s17055_s5 + $0x480] ss:$16 sps:$4 sm:$0xff]  }
 0x496   : > { %4188 = vmatpush1.bf16.msra.mxu0 %v12054_v25  ;;  %v12137_v25 = vld [vmem:[%s17055_s5 + $0x46c] ss:$16 sps:$4 sm:$0xff]  }
 0x497   : > { %4189 = vmatprep.subr.bf16.mxu0 %v12062_v13  ;;  %4231 = vmatpush1.bf16.msra.mxu1 %v12063_v3  ;;  %v12140_v13 = vld [vmem:[%s17055_s5 + $0x484] ss:$16 sps:$4 sm:$0xff]  }
 0x498   : > { %4504 = vmatprep.subr.bf16.mxu1 %v12071_v23  ;;  %v4551_v3 = vld [vmem:[#allocation2 + $0x4] ss:$128 sm:$0x2]  ;;  %v12149_v23 = vld [vmem:[%s17055_s5 + $0x4ac] ss:$16 sps:$4 sm:$0xff]  }
 0x49a   : > { %4190 = vmatpush1.bf16.msra.mxu0 %v12060_v34  ;;  %4249 = vmatmul.mubr.bf16.vlgmr.msra.gmra.mrb[8].mxu1 %v3981_v40  ;;  %v4550_v34 = vld [vmem:[#allocation2 + $0x4] ss:$128 sm:$0x1] }
 0x49b   : > { %4463 = vmatprep.subr.bf16.mxu0 %v12068_v36  ;;  %4505 = vmatpush1.bf16.msra.mxu1 %v12069_v26  ;;  %v12146_v36 = vld [vmem:[%s17055_s5 + $0x4a4] ss:$16 sps:$4 sm:$0xff]   ;;  %v12147_v26 = vld [vmem:[%s17055_s5 + $0x4a8] ss:$16 sps:$4 sm:$0xff]  }
 0x49c   : > { %4506 = vmatprep.subr.bf16.mxu1 %v12077_v18  ;;  %4536 = vmatprep.mubr.bf16.mxu1 %v12999_v53  ;;  %v12152_v18 = vld [vmem:[%s17055_s5 + $0x4c4] ss:$16 sps:$4 sm:$0xff]  }
 0x49d   : > { %4208 = vmatmul.mubr.bf16.vlgmr.msra.gmra.mrb[8].mxu0 %v3981_v40  ;;  %v12144_v40 = vld [vmem:[%s17055_s5 + $0x4a0] ss:$16 sps:$4 sm:$0xff]  }
 0x49e   : > { %4464 = vmatpush1.bf16.msra.mxu0 %v12066_v20  ;;  %4495 = vmatprep.mubr.bf16.mxu0 %v12999_v53  ;;  %v4552_v20 = vor.u32 %v4551_v3, %v4550_v34  ;;  %v12210_v34 = vld [vmem:[%s17055_s5 + $0x600] ss:$16 sps:$4 sm:$0xff]   ;;  %v12218_v3 = vld [vmem:[%s17055_s5 + $0x624] ss:$16 sps:$4 sm:$0xff]  }
 0x49f   : > { %4465 = vmatprep.subr.bf16.mxu0 %v12074_v1  ;;  %4507 = vmatpush1.bf16.msra.mxu1 %v12075_v51  ;;  %v4553_v1 = vld [vmem:[#allocation2 + $0x4] ss:$128 sm:$0x4]  ;;  %v12150_v51 = vld [vmem:[%s17055_s5 + $0x4c0] ss:$16 sps:$4 sm:$0xff]  }
 0x4a0   : > { %4508 = vmatprep.subr.bf16.mxu1 %v12083_v30  ;;  %v12153_v30 = vld [vmem:[%s17055_s5 + $0x4c8] ss:$16 sps:$4 sm:$0xff]  }
 0x4a2   : > { %4466 = vmatpush1.bf16.msra.mxu0 %v12072_v50  ;;  %v12155_v50 = vld [vmem:[%s17055_s5 + $0x4cc] ss:$16 sps:$4 sm:$0xff]  }
 0x4a3   : > { %4467 = vmatprep.subr.bf16.mxu0 %v12080_v61  ;;  %4509 = vmatpush1.bf16.msra.mxu1 %v12081_v16  ;;  %v4554_v61 = vor.u32 %v4553_v1, %v4552_v20  ;;  %v12158_v16 = vld [vmem:[%s17055_s5 + $0x4e4] ss:$16 sps:$4 sm:$0xff]   ;;  %v12222_v1 = vld [vmem:[%s17055_s5 + $0x640] ss:$16 sps:$4 sm:$0xff]  }
 0x4a4   : > { %4510 = vmatprep.subr.bf16.mxu1 %v12089_v43  ;;  %v12224_v20 = vld [vmem:[%s17055_s5 + $0x644] ss:$16 sps:$4 sm:$0xff]  }
 0x4a6   : > { %4468 = vmatpush1.bf16.msra.mxu0 %v12078_v28  ;;  %v4555_v28 = vld [vmem:[#allocation2 + $0x4] ss:$128 sm:$0x8] }
 0x4a7   : > { %4469 = vmatprep.subr.bf16.mxu0 %v12086_v52  ;;  %4511 = vmatpush1.bf16.msra.mxu1 %v12087_v17  ;;  %v12161_v52 = vld [vmem:[%s17055_s5 + $0x4ec] ss:$16 sps:$4 sm:$0xff]   ;;  %v4556_v43 = vor.u32 %v4555_v28, %v4554_v61  ;;  %v12159_v17 = vld [vmem:[%s17055_s5 + $0x4e8] ss:$16 sps:$4 sm:$0xff]   ;;  %v12228_v61 = vld [vmem:[%s17055_s5 + $0x660] ss:$16 sps:$4 sm:$0xff]  }
 0x4a8   : > { %4512 = vmatprep.subr.bf16.mxu1 %v12095_v5  ;;  %v12167_v5 = vld [vmem:[%s17055_s5 + $0x50c] ss:$16 sps:$4 sm:$0xff]   ;;  %v12236_v28 = vld [vmem:[%s17055_s5 + $0x684] ss:$16 sps:$4 sm:$0xff]  }
 0x4aa   : > { %4470 = vmatpush1.bf16.msra.mxu0 %v12084_v56  ;;  %v12156_v56 = vld [vmem:[%s17055_s5 + $0x4e0] ss:$16 sps:$4 sm:$0xff]  }
 0x4ab   : > { %4471 = vmatprep.subr.bf16.mxu0 %v12092_v35  ;;  %4513 = vmatpush1.bf16.msra.mxu1 %v12093_v29  ;;  %v12164_v35 = vld [vmem:[%s17055_s5 + $0x504] ss:$16 sps:$4 sm:$0xff]   ;;  %v12162_v29 = vld [vmem:[%s17055_s5 + $0x500] ss:$16 sps:$4 sm:$0xff]  }
 0x4ac   : > { %4514 = vmatprep.subr.bf16.mxu1 %v12101_v2  ;;  %v12168_v2 = vld [vmem:[%s17055_s5 + $0x520] ss:$16 sps:$4 sm:$0xff]  }
 0x4ae   : > { %4472 = vmatpush1.bf16.msra.mxu0 %v12090_v54  ;;  %v4557_v54 = vpack.c.bf16 %v4556_v43, %v4556_v43  ;;  %v12237_v43 = vld [vmem:[%s17055_s5 + $0x688] ss:$16 sps:$4 sm:$0xff]  }
 0x4af   : > { %4473 = vmatprep.subr.bf16.mxu0 %v12098_v22  ;;  %4515 = vmatpush1.bf16.msra.mxu1 %v12099_v6  ;;  %v12173_v22 = vld [vmem:[%s17055_s5 + $0x52c] ss:$16 sps:$4 sm:$0xff]   ;;  %v12176_v6 = vld [vmem:[%s17055_s5 + $0x544] ss:$16 sps:$4 sm:$0xff]  }
 0x4b0   : > { %4516 = vmatprep.subr.bf16.mxu1 %v12107_v62  ;;  %v12182_v62 = vld [vmem:[%s17055_s5 + $0x564] ss:$16 sps:$4 sm:$0xff]  }
 0x4b2   : > { %4474 = vmatpush1.bf16.msra.mxu0 %v12096_v31  ;;  %v12171_v31 = vld [vmem:[%s17055_s5 + $0x528] ss:$16 sps:$4 sm:$0xff]  }
 0x4b3   : > { %4475 = vmatprep.subr.bf16.mxu0 %v12104_v63  ;;  %4517 = vmatpush1.bf16.msra.mxu1 %v12105_v55  ;;  %v12177_v63 = vld [vmem:[%s17055_s5 + $0x548] ss:$16 sps:$4 sm:$0xff]   ;;  %v12180_v55 = vld [vmem:[%s17055_s5 + $0x560] ss:$16 sps:$4 sm:$0xff]  }
 0x4b4   : > { %4518 = vmatprep.subr.bf16.mxu1 %v12113_v47  ;;  %v12186_v47 = vld [vmem:[%s17055_s5 + $0x580] ss:$16 sps:$4 sm:$0xff]  }
 0x4b6   : > { %4476 = vmatpush1.bf16.msra.mxu0 %v12102_v39  ;;  %v12185_v39 = vld [vmem:[%s17055_s5 + $0x56c] ss:$16 sps:$4 sm:$0xff]  }
 0x4b7   : > { %4477 = vmatprep.subr.bf16.mxu0 %v12110_v46  ;;  %4519 = vmatpush1.bf16.msra.mxu1 %v12111_v19  ;;  %v12191_v46 = vld [vmem:[%s17055_s5 + $0x58c] ss:$16 sps:$4 sm:$0xff]   ;;  %v12194_v19 = vld [vmem:[%s17055_s5 + $0x5a4] ss:$16 sps:$4 sm:$0xff]  }
 0x4b8   : > { %4792 = vmatprep.subr.bf16.mxu1 %v12119_v32  ;;  %v12197_v32 = vld [vmem:[%s17055_s5 + $0x5ac] ss:$16 sps:$4 sm:$0xff]  }
 0x4ba   : > { %4478 = vmatpush1.bf16.msra.mxu0 %v12108_v15  ;;  %4537 = vmatmul.mubr.bf16.vlgmr.msra.gmra.mrb[12].mxu1 %v4269_v0  ;;  %v12189_v15 = vld [vmem:[%s17055_s5 + $0x588] ss:$16 sps:$4 sm:$0xff]  }
 0x4bb   : > { %4751 = vmatprep.subr.bf16.mxu0 %v12116_v10  ;;  %4793 = vmatpush1.bf16.msra.mxu1 %v12117_v44  ;;  %v4839_v10 = vld [vmem:[#allocation2 + $0x5] ss:$128 sm:$0x2] }
 0x4bc   : > { %4794 = vmatprep.subr.bf16.mxu1 %v12125_v45  ;;  %4824 = vmatprep.mubr.bf16.mxu1 %v12999_v53  ;;  %v4840_v44 = vor.u32 %v4839_v10, %v4838_v42  ;;  %v4841_v45 = vld [vmem:[#allocation2 + $0x5] ss:$128 sm:$0x4]  ;;  %v12261_v42 = vld [vmem:[%s17055_s5 + $0x708] ss:$16 sps:$4 sm:$0xff]  }
 0x4bd   : > { %4496 = vmatmul.mubr.bf16.vlgmr.msra.gmra.mrb[12].mxu0 %v4269_v0  ;;  %v12192_v0 = vld [vmem:[%s17055_s5 + $0x5a0] ss:$16 sps:$4 sm:$0xff]   ;;  %v12269_v10 = vld [vmem:[%s17055_s5 + $0x72c] ss:$16 sps:$4 sm:$0xff]  }
 0x4be   : > { %4752 = vmatpush1.bf16.msra.mxu0 %v12114_v57  ;;  %4783 = vmatprep.mubr.bf16.mxu0 %v12999_v53  ;;  %v12195_v57 = vld [vmem:[%s17055_s5 + $0x5a8] ss:$16 sps:$4 sm:$0xff]  }
 0x4bf   : > { %4753 = vmatprep.subr.bf16.mxu0 %v12122_v4  ;;  %4795 = vmatpush1.bf16.msra.mxu1 %v12123_v60  ;;  %v12200_v4 = vld [vmem:[%s17055_s5 + $0x5c4] ss:$16 sps:$4 sm:$0xff]   ;;  %v12198_v60 = vld [vmem:[%s17055_s5 + $0x5c0] ss:$16 sps:$4 sm:$0xff]  }
 0x4c0   : > { %4796 = vmatprep.subr.bf16.mxu1 %v12131_v48  ;;  %v4842_v48 = vor.u32 %v4841_v45, %v4840_v44  ;;  %v12275_v44 = vld [vmem:[%s17055_s5 + $0x74c] ss:$16 sps:$4 sm:$0xff]   ;;  %v12273_v45 = vld [vmem:[%s17055_s5 + $0x748] ss:$16 sps:$4 sm:$0xff]  }
 0x4c2   : > { %4754 = vmatpush1.bf16.msra.mxu0 %v12120_v37  ;;  %v12203_v37 = vld [vmem:[%s17055_s5 + $0x5cc] ss:$16 sps:$4 sm:$0xff]  }
 0x4c3   : > { %4755 = vmatprep.subr.bf16.mxu0 %v12128_v8  ;;  %4797 = vmatpush1.bf16.msra.mxu1 %v12129_v21  ;;  %v12201_v8 = vld [vmem:[%s17055_s5 + $0x5c8] ss:$16 sps:$4 sm:$0xff]   ;;  %v4843_v21 = vld [vmem:[#allocation2 + $0x5] ss:$128 sm:$0x8] }
 0x4c4   : > { %4798 = vmatprep.subr.bf16.mxu1 %v12137_v25  ;;  %v12204_v25 = vld [vmem:[%s17055_s5 + $0x5e0] ss:$16 sps:$4 sm:$0xff]  }
 0x4c6   : > { %4756 = vmatpush1.bf16.msra.mxu0 %v12126_v11  ;;  %v12206_v11 = vld [vmem:[%s17055_s5 + $0x5e4] ss:$16 sps:$4 sm:$0xff]  }
 0x4c7   : > { %4757 = vmatprep.subr.bf16.mxu0 %v12134_v33  ;;  %4799 = vmatpush1.bf16.msra.mxu1 %v12135_v12  ;;  %v12209_v33 = vld [vmem:[%s17055_s5 + $0x5ec] ss:$16 sps:$4 sm:$0xff]   ;;  %v4844_v12 = vor.u32 %v4843_v21, %v4842_v48  ;;  %v12279_v48 = vld [vmem:[%s17055_s5 + $0x768] ss:$16 sps:$4 sm:$0xff]  }
 0x4c8   : > { %4800 = vmatprep.subr.bf16.mxu1 %v12143_v27  ;;  %v12215_v27 = vld [vmem:[%s17055_s5 + $0x60c] ss:$16 sps:$4 sm:$0xff]  }
 0x4c9   : > { %v12287_v21 = vld [vmem:[%s17055_s5 + $0x78c] ss:$16 sps:$4 sm:$0xff]  }
 0x4ca   : > { %4758 = vmatpush1.bf16.msra.mxu0 %v12132_v7  ;;  %v12207_v7 = vld [vmem:[%s17055_s5 + $0x5e8] ss:$16 sps:$4 sm:$0xff]  }
 0x4cb   : > { %4759 = vmatprep.subr.bf16.mxu0 %v12140_v13  ;;  %4801 = vmatpush1.bf16.msra.mxu1 %v12141_v59  ;;  %v12212_v13 = vld [vmem:[%s17055_s5 + $0x604] ss:$16 sps:$4 sm:$0xff]   ;;  %v12213_v59 = vld [vmem:[%s17055_s5 + $0x608] ss:$16 sps:$4 sm:$0xff]  }
 0x4cc   : > { %4802 = vmatprep.subr.bf16.mxu1 %v12149_v23  ;;  %v12216_v23 = vld [vmem:[%s17055_s5 + $0x620] ss:$16 sps:$4 sm:$0xff]  }
 0x4ce   : > { %4760 = vmatpush1.bf16.msra.mxu0 %v12138_v24  ;;  %v4845_v24 = vpack.c.bf16 %v4844_v12, %v4844_v12  ;;  %v5415_v12 = vld [vmem:[#allocation2 + $0x7] ss:$128 sm:$0x2] }
 0x4cf   : > { %4761 = vmatprep.subr.bf16.mxu0 %v12146_v36  ;;  %4803 = vmatpush1.bf16.msra.mxu1 %v12147_v26  ;;  %v12221_v36 = vld [vmem:[%s17055_s5 + $0x62c] ss:$16 sps:$4 sm:$0xff]  }
 0x4d0   : > { %4804 = vmatprep.subr.bf16.mxu1 %v12155_v50  ;;  %v12227_v26 = vld [vmem:[%s17055_s5 + $0x64c] ss:$16 sps:$4 sm:$0xff]   ;;  %v12230_v50 = vld [vmem:[%s17055_s5 + $0x664] ss:$16 sps:$4 sm:$0xff]  }
 0x4d2   : > { %4762 = vmatpush1.bf16.msra.mxu0 %v12144_v40  ;;  %v12219_v40 = vld [vmem:[%s17055_s5 + $0x628] ss:$16 sps:$4 sm:$0xff]  }
 0x4d3   : > { %4763 = vmatprep.subr.bf16.mxu0 %v12152_v18  ;;  %4805 = vmatpush1.bf16.msra.mxu1 %v12153_v30  ;;  %v12225_v18 = vld [vmem:[%s17055_s5 + $0x648] ss:$16 sps:$4 sm:$0xff]  }
 0x4d4   : > { %4806 = vmatprep.subr.bf16.mxu1 %v12161_v52  ;;  %v12231_v30 = vld [vmem:[%s17055_s5 + $0x668] ss:$16 sps:$4 sm:$0xff]   ;;  %v12234_v52 = vld [vmem:[%s17055_s5 + $0x680] ss:$16 sps:$4 sm:$0xff]  }
 0x4d6   : > { %4764 = vmatpush1.bf16.msra.mxu0 %v12150_v51  ;;  %v12233_v51 = vld [vmem:[%s17055_s5 + $0x66c] ss:$16 sps:$4 sm:$0xff]  }
 0x4d7   : > { %4765 = vmatprep.subr.bf16.mxu0 %v12158_v16  ;;  %4807 = vmatpush1.bf16.msra.mxu1 %v12159_v17  ;;  %v12239_v16 = vld [vmem:[%s17055_s5 + $0x68c] ss:$16 sps:$4 sm:$0xff]   ;;  %v5127_v17 = vld [vmem:[#allocation2 + $0x6] ss:$128 sm:$0x2] }
 0x4d8   : > { %5080 = vmatprep.subr.bf16.mxu1 %v12167_v5  ;;  %v12245_v5 = vld [vmem:[%s17055_s5 + $0x6ac] ss:$16 sps:$4 sm:$0xff]  }
 0x4da   : > { %4766 = vmatpush1.bf16.msra.mxu0 %v12156_v56  ;;  %4825 = vmatmul.mubr.bf16.vlgmr.msra.gmra.mrb[16].mxu1 %v4557_v54  ;;  %v5126_v56 = vld [vmem:[#allocation2 + $0x6] ss:$128 sm:$0x1] }
 0x4db   : > { %5039 = vmatprep.subr.bf16.mxu0 %v12164_v35  ;;  %5081 = vmatpush1.bf16.msra.mxu1 %v12165_v49  ;;  %v12242_v35 = vld [vmem:[%s17055_s5 + $0x6a4] ss:$16 sps:$4 sm:$0xff]   ;;  %v5128_v49 = vor.u32 %v5127_v17, %v5126_v56  ;;  %v12305_v56 = vld [vmem:[%s17055_s5 + $0x7ec] ss:$16 sps:$4 sm:$0xff]  }
 0x4dc   : > { %5082 = vmatprep.subr.bf16.mxu1 %v12173_v22  ;;  %5112 = vmatprep.mubr.bf16.mxu1 %v12999_v53  ;;  %v12248_v22 = vld [vmem:[%s17055_s5 + $0x6c4] ss:$16 sps:$4 sm:$0xff]  }
 0x4dd   : > { %4784 = vmatmul.mubr.bf16.vlgmr.msra.gmra.mrb[16].mxu0 %v4557_v54  ;;  %v12240_v54 = vld [vmem:[%s17055_s5 + $0x6a0] ss:$16 sps:$4 sm:$0xff]  }
 0x4de   : > { %5040 = vmatpush1.bf16.msra.mxu0 %v12162_v29  ;;  %5071 = vmatprep.mubr.bf16.mxu0 %v12999_v53  ;;  %v12243_v29 = vld [vmem:[%s17055_s5 + $0x6a8] ss:$16 sps:$4 sm:$0xff]  }
 0x4df   : > { %5041 = vmatprep.subr.bf16.mxu0 %v12170_v58  ;;  %5083 = vmatpush1.bf16.msra.mxu1 %v12171_v31  ;;  %v5129_v58 = vld [vmem:[#allocation2 + $0x6] ss:$128 sm:$0x4]  ;;  %v12246_v31 = vld [vmem:[%s17055_s5 + $0x6c0] ss:$16 sps:$4 sm:$0xff]  }
 0x4e0   : > { %5084 = vmatprep.subr.bf16.mxu1 %v12179_v14  ;;  %v5130_v14 = vor.u32 %v5129_v58, %v5128_v49  ;;  %v12306_v58 = vld [vmem:[%s17055_s5 + $0x800] ss:$16 sps:$4 sm:$0xff]  }
 0x4e2   : > { %5042 = vmatpush1.bf16.msra.mxu0 %v12168_v2  ;;  %v12251_v2 = vld [vmem:[%s17055_s5 + $0x6cc] ss:$16 sps:$4 sm:$0xff]  }
 0x4e3   : > { %5043 = vmatprep.subr.bf16.mxu0 %v12176_v6  ;;  %5085 = vmatpush1.bf16.msra.mxu1 %v12177_v63  ;;  %v12249_v6 = vld [vmem:[%s17055_s5 + $0x6c8] ss:$16 sps:$4 sm:$0xff]   ;;  %v12254_v63 = vld [vmem:[%s17055_s5 + $0x6e4] ss:$16 sps:$4 sm:$0xff]  }
 0x4e4   : > { %5086 = vmatprep.subr.bf16.mxu1 %v12185_v39  ;;  %v12252_v39 = vld [vmem:[%s17055_s5 + $0x6e0] ss:$16 sps:$4 sm:$0xff]  }
 0x4e6   : > { %5044 = vmatpush1.bf16.msra.mxu0 %v12174_v9  ;;  %v5131_v9 = vld [vmem:[#allocation2 + $0x6] ss:$128 sm:$0x8] }
 0x4e7   : > { %5045 = vmatprep.subr.bf16.mxu0 %v12182_v62  ;;  %5087 = vmatpush1.bf16.msra.mxu1 %v12183_v41  ;;  %v12257_v62 = vld [vmem:[%s17055_s5 + $0x6ec] ss:$16 sps:$4 sm:$0xff]   ;;  %v12255_v41 = vld [vmem:[%s17055_s5 + $0x6e8] ss:$16 sps:$4 sm:$0xff]  }
 0x4e8   : > { %5088 = vmatprep.subr.bf16.mxu1 %v12191_v46  ;;  %v12263_v46 = vld [vmem:[%s17055_s5 + $0x70c] ss:$16 sps:$4 sm:$0xff]  }
 0x4ea   : > { %5046 = vmatpush1.bf16.msra.mxu0 %v12180_v55  ;;  %v5132_v55 = vor.u32 %v5131_v9, %v5130_v14  ;;  %v12315_v14 = vld [vmem:[%s17055_s5 + $0x828] ss:$16 sps:$4 sm:$0xff]   ;;  %v12320_v9 = vld [vmem:[%s17055_s5 + $0x844] ss:$16 sps:$4 sm:$0xff]  }
 0x4eb   : > { %5047 = vmatprep.subr.bf16.mxu0 %v12188_v38  ;;  %5089 = vmatpush1.bf16.msra.mxu1 %v12189_v15  ;;  %v12260_v38 = vld [vmem:[%s17055_s5 + $0x704] ss:$16 sps:$4 sm:$0xff]   ;;  %v12258_v15 = vld [vmem:[%s17055_s5 + $0x700] ss:$16 sps:$4 sm:$0xff]  }
 0x4ec   : > { %5090 = vmatprep.subr.bf16.mxu1 %v12197_v32  ;;  %v12264_v32 = vld [vmem:[%s17055_s5 + $0x720] ss:$16 sps:$4 sm:$0xff]  }
 0x4ee   : > { %5048 = vmatpush1.bf16.msra.mxu0 %v12186_v47  ;;  %v5133_v47 = vpack.c.bf16 %v5132_v55, %v5132_v55  ;;  %v12326_v55 = vld [vmem:[%s17055_s5 + $0x864] ss:$16 sps:$4 sm:$0xff]  }
 0x4ef   : > { %5049 = vmatprep.subr.bf16.mxu0 %v12194_v19  ;;  %5091 = vmatpush1.bf16.msra.mxu1 %v12195_v57  ;;  %v12266_v19 = vld [vmem:[%s17055_s5 + $0x724] ss:$16 sps:$4 sm:$0xff]  }
 0x4f0   : > { %5092 = vmatprep.subr.bf16.mxu1 %v12203_v37  ;;  %v12272_v57 = vld [vmem:[%s17055_s5 + $0x744] ss:$16 sps:$4 sm:$0xff]  }
 0x4f1   : > { %v12278_v37 = vld [vmem:[%s17055_s5 + $0x764] ss:$16 sps:$4 sm:$0xff]  }
 0x4f2   : > { %5050 = vmatpush1.bf16.msra.mxu0 %v12192_v0  ;;  %v12267_v0 = vld [vmem:[%s17055_s5 + $0x728] ss:$16 sps:$4 sm:$0xff]  }
 0x4f3   : > { %5051 = vmatprep.subr.bf16.mxu0 %v12200_v4  ;;  %5093 = vmatpush1.bf16.msra.mxu1 %v12201_v8  ;;  %v12270_v4 = vld [vmem:[%s17055_s5 + $0x740] ss:$16 sps:$4 sm:$0xff]  }
 0x4f4   : > { %5094 = vmatprep.subr.bf16.mxu1 %v12209_v33  ;;  %v12276_v8 = vld [vmem:[%s17055_s5 + $0x760] ss:$16 sps:$4 sm:$0xff]  }
 0x4f5   : > { %v12282_v33 = vld [vmem:[%s17055_s5 + $0x780] ss:$16 sps:$4 sm:$0xff]  }
 0x4f6   : > { %5052 = vmatpush1.bf16.msra.mxu0 %v12198_v60  ;;  %v12281_v60 = vld [vmem:[%s17055_s5 + $0x76c] ss:$16 sps:$4 sm:$0xff]  }
 0x4f7   : > { %5053 = vmatprep.subr.bf16.mxu0 %v12206_v11  ;;  %5095 = vmatpush1.bf16.msra.mxu1 %v12207_v7  ;;  %v12284_v11 = vld [vmem:[%s17055_s5 + $0x784] ss:$16 sps:$4 sm:$0xff]   ;;  %v12285_v7 = vld [vmem:[%s17055_s5 + $0x788] ss:$16 sps:$4 sm:$0xff]  }
 0x4f8   : > { %5368 = vmatprep.subr.bf16.mxu1 %v12215_v27  ;;  %v12293_v27 = vld [vmem:[%s17055_s5 + $0x7ac] ss:$16 sps:$4 sm:$0xff]  }
 0x4fa   : > { %5054 = vmatpush1.bf16.msra.mxu0 %v12204_v25  ;;  %5113 = vmatmul.mubr.bf16.vlgmr.msra.gmra.mrb[20].mxu1 %v4845_v24  ;;  %v5414_v25 = vld [vmem:[#allocation2 + $0x7] ss:$128 sm:$0x1] }
 0x4fb   : > { %5327 = vmatprep.subr.bf16.mxu0 %v12212_v13  ;;  %5369 = vmatpush1.bf16.msra.mxu1 %v12213_v59  ;;  %v12290_v13 = vld [vmem:[%s17055_s5 + $0x7a4] ss:$16 sps:$4 sm:$0xff]   ;;  %v12291_v59 = vld [vmem:[%s17055_s5 + $0x7a8] ss:$16 sps:$4 sm:$0xff]  }
 0x4fc   : > { %5370 = vmatprep.subr.bf16.mxu1 %v12221_v36  ;;  %5400 = vmatprep.mubr.bf16.mxu1 %v12999_v53  ;;  %v12296_v36 = vld [vmem:[%s17055_s5 + $0x7c4] ss:$16 sps:$4 sm:$0xff]  }
 0x4fd   : > { %5072 = vmatmul.mubr.bf16.vlgmr.msra.gmra.mrb[20].mxu0 %v4845_v24  ;;  %v12288_v24 = vld [vmem:[%s17055_s5 + $0x7a0] ss:$16 sps:$4 sm:$0xff]  }
 0x4fe   : > { %5328 = vmatpush1.bf16.msra.mxu0 %v12210_v34  ;;  %5359 = vmatprep.mubr.bf16.mxu0 %v12999_v53  ;;  %v5416_v34 = vor.u32 %v5415_v12, %v5414_v25 }
 0x4ff   : > { %5329 = vmatprep.subr.bf16.mxu0 %v12218_v3  ;;  %5371 = vmatpush1.bf16.msra.mxu1 %v12219_v40  ;;  %v5417_v3 = vld [vmem:[#allocation2 + $0x7] ss:$128 sm:$0x4] }
 0x500   : > { %5372 = vmatprep.subr.bf16.mxu1 %v12227_v26  ;;  %v12294_v26 = vld [vmem:[%s17055_s5 + $0x7c0] ss:$16 sps:$4 sm:$0xff]  }
 0x502   : > { %5330 = vmatpush1.bf16.msra.mxu0 %v12216_v23  ;;  %v12299_v23 = vld [vmem:[%s17055_s5 + $0x7cc] ss:$16 sps:$4 sm:$0xff]  }
 0x503   : > { %5331 = vmatprep.subr.bf16.mxu0 %v12224_v20  ;;  %5373 = vmatpush1.bf16.msra.mxu1 %v12225_v18 }
 0x504   : > { %5374 = vmatprep.subr.bf16.mxu1 %v12233_v51  ;;  %v12302_v51 = vld [vmem:[%s17055_s5 + $0x7e4] ss:$16 sps:$4 sm:$0xff]  }
 0x506   : > { %5332 = vmatpush1.bf16.msra.mxu0 %v12222_v1  ;;  %v12297_v1 = vld [vmem:[%s17055_s5 + $0x7c8] ss:$16 sps:$4 sm:$0xff]  }
 0x507   : > { %5333 = vmatprep.subr.bf16.mxu0 %v12230_v50  ;;  %5375 = vmatpush1.bf16.msra.mxu1 %v12231_v30 }
 0x508   : > { %5376 = vmatprep.subr.bf16.mxu1 %v12239_v16  ;;  %v5419_v16 = vld [vmem:[#allocation2 + $0x7] ss:$128 sm:$0x8] }
 0x50a   : > { %5334 = vmatpush1.bf16.msra.mxu0 %v12228_v61  ;;  %v5418_v61 = vor.u32 %v5417_v3, %v5416_v34 }
 0x50b   : > { %5335 = vmatprep.subr.bf16.mxu0 %v12236_v28  ;;  %5377 = vmatpush1.bf16.msra.mxu1 %v12237_v43 }
 0x50c   : > { %5378 = vmatprep.subr.bf16.mxu1 %v12245_v5  ;;  %v5420_v17 = vor.u32 %v5419_v16, %v5418_v61  ;;  %v12303_v5 = vld [vmem:[%s17055_s5 + $0x7e8] ss:$16 sps:$4 sm:$0xff]   ;;  %v12359_v61 = vld [vmem:[%s17055_s5 + $0x90c] ss:$16 sps:$4 sm:$0xff]  }
 0x50d   : > { %v12357_v16 = vld [vmem:[%s17055_s5 + $0x908] ss:$16 sps:$4 sm:$0xff]  }
 0x50e   : > { %5336 = vmatpush1.bf16.msra.mxu0 %v12234_v52  ;;  %v5421_v49 = vpack.c.bf16 %v5420_v17, %v5420_v17  ;;  %v12363_v17 = vld [vmem:[%s17055_s5 + $0x928] ss:$16 sps:$4 sm:$0xff]  }
 0x50f   : > { %5337 = vmatprep.subr.bf16.mxu0 %v12242_v35  ;;  %5379 = vmatpush1.bf16.msra.mxu1 %v12243_v29  ;;  %v12300_v35 = vld [vmem:[%s17055_s5 + $0x7e0] ss:$16 sps:$4 sm:$0xff]   ;;  %v12311_v29 = vld [vmem:[%s17055_s5 + $0x80c] ss:$16 sps:$4 sm:$0xff]  }
 0x510   : > { %5380 = vmatprep.subr.bf16.mxu1 %v12251_v2  ;;  %v12314_v2 = vld [vmem:[%s17055_s5 + $0x824] ss:$16 sps:$4 sm:$0xff]  }
 0x512   : > { %5338 = vmatpush1.bf16.msra.mxu0 %v12240_v54  ;;  %v12308_v54 = vld [vmem:[%s17055_s5 + $0x804] ss:$16 sps:$4 sm:$0xff]  }
 0x513   : > { %5339 = vmatprep.subr.bf16.mxu0 %v12248_v22  ;;  %5381 = vmatpush1.bf16.msra.mxu1 %v12249_v6  ;;  %v12309_v22 = vld [vmem:[%s17055_s5 + $0x808] ss:$16 sps:$4 sm:$0xff]   ;;  %v12312_v6 = vld [vmem:[%s17055_s5 + $0x820] ss:$16 sps:$4 sm:$0xff]  }
 0x514   : > { %5382 = vmatprep.subr.bf16.mxu1 %v12257_v62  ;;  %v12318_v62 = vld [vmem:[%s17055_s5 + $0x840] ss:$16 sps:$4 sm:$0xff]  }
 0x516   : > { %5340 = vmatpush1.bf16.msra.mxu0 %v12246_v31  ;;  %v12317_v31 = vld [vmem:[%s17055_s5 + $0x82c] ss:$16 sps:$4 sm:$0xff]  }
 0x517   : > { %5341 = vmatprep.subr.bf16.mxu0 %v12254_v63  ;;  %5383 = vmatpush1.bf16.msra.mxu1 %v12255_v41  ;;  %v12323_v63 = vld [vmem:[%s17055_s5 + $0x84c] ss:$16 sps:$4 sm:$0xff]  }
 0x518   : > { %5656 = vmatprep.subr.bf16.mxu1 %v12263_v46  ;;  %v12329_v41 = vld [vmem:[%s17055_s5 + $0x86c] ss:$16 sps:$4 sm:$0xff]   ;;  %v12327_v46 = vld [vmem:[%s17055_s5 + $0x868] ss:$16 sps:$4 sm:$0xff]  }
 0x51a   : > { %5342 = vmatpush1.bf16.msra.mxu0 %v12252_v39  ;;  %5401 = vmatmul.mubr.bf16.vlgmr.msra.gmra.mrb[24].mxu1 %v5133_v47  ;;  %v12321_v39 = vld [vmem:[%s17055_s5 + $0x848] ss:$16 sps:$4 sm:$0xff]  }
 0x51b   : > { %5615 = vmatprep.subr.bf16.mxu0 %v12260_v38  ;;  %5657 = vmatpush1.bf16.msra.mxu1 %v12261_v42  ;;  %v12324_v38 = vld [vmem:[%s17055_s5 + $0x860] ss:$16 sps:$4 sm:$0xff]  }
 0x51c   : > { %5658 = vmatprep.subr.bf16.mxu1 %v12269_v10  ;;  %5688 = vmatprep.mubr.bf16.mxu1 %v12999_v53  ;;  %v12330_v42 = vld [vmem:[%s17055_s5 + $0x880] ss:$16 sps:$4 sm:$0xff]   ;;  %v5702_v10 = vld [vmem:[#allocation2 + $0x8] ss:$128 sm:$0x1] }
 0x51d   : > { %5360 = vmatmul.mubr.bf16.vlgmr.msra.gmra.mrb[24].mxu0 %v5133_v47  ;;  %v12332_v47 = vld [vmem:[%s17055_s5 + $0x884] ss:$16 sps:$4 sm:$0xff]  }
 0x51e   : > { %5616 = vmatpush1.bf16.msra.mxu0 %v12258_v15  ;;  %5647 = vmatprep.mubr.bf16.mxu0 %v12999_v53  ;;  %v12335_v15 = vld [vmem:[%s17055_s5 + $0x88c] ss:$16 sps:$4 sm:$0xff]  }
 0x51f   : > { %5617 = vmatprep.subr.bf16.mxu0 %v12266_v19  ;;  %5659 = vmatpush1.bf16.msra.mxu1 %v12267_v0  ;;  %v12333_v19 = vld [vmem:[%s17055_s5 + $0x888] ss:$16 sps:$4 sm:$0xff]   ;;  %v12338_v0 = vld [vmem:[%s17055_s5 + $0x8a4] ss:$16 sps:$4 sm:$0xff]  }
 0x520   : > { %5660 = vmatprep.subr.bf16.mxu1 %v12275_v44  ;;  %v12336_v44 = vld [vmem:[%s17055_s5 + $0x8a0] ss:$16 sps:$4 sm:$0xff]  }
 0x522   : > { %5618 = vmatpush1.bf16.msra.mxu0 %v12264_v32  ;;  %v5703_v32 = vld [vmem:[#allocation2 + $0x8] ss:$128 sm:$0x2] }
 0x523   : > { %5619 = vmatprep.subr.bf16.mxu0 %v12272_v57  ;;  %5661 = vmatpush1.bf16.msra.mxu1 %v12273_v45  ;;  %v12341_v57 = vld [vmem:[%s17055_s5 + $0x8ac] ss:$16 sps:$4 sm:$0xff]   ;;  %v5704_v45 = vor.u32 %v5703_v32, %v5702_v10  ;;  %v12390_v32 = vld [vmem:[%s17055_s5 + $0x9c0] ss:$16 sps:$4 sm:$0xff]  }
 0x524   : > { %5662 = vmatprep.subr.bf16.mxu1 %v12281_v60  ;;  %v5705_v60 = vld [vmem:[#allocation2 + $0x8] ss:$128 sm:$0x4] }
 0x526   : > { %5620 = vmatpush1.bf16.msra.mxu0 %v12270_v4  ;;  %v12339_v4 = vld [vmem:[%s17055_s5 + $0x8a8] ss:$16 sps:$4 sm:$0xff]  }
 0x527   : > { %5621 = vmatprep.subr.bf16.mxu0 %v12278_v37  ;;  %5663 = vmatpush1.bf16.msra.mxu1 %v12279_v48  ;;  %v12344_v37 = vld [vmem:[%s17055_s5 + $0x8c4] ss:$16 sps:$4 sm:$0xff]  }
 0x528   : > { %5664 = vmatprep.subr.bf16.mxu1 %v12287_v21  ;;  %v12342_v21 = vld [vmem:[%s17055_s5 + $0x8c0] ss:$16 sps:$4 sm:$0xff]  }
 0x52a   : > { %5622 = vmatpush1.bf16.msra.mxu0 %v12276_v8  ;;  %v12347_v8 = vld [vmem:[%s17055_s5 + $0x8cc] ss:$16 sps:$4 sm:$0xff]  }
 0x52b   : > { %5623 = vmatprep.subr.bf16.mxu0 %v12284_v11  ;;  %5665 = vmatpush1.bf16.msra.mxu1 %v12285_v7 }
 0x52c   : > { %5666 = vmatprep.subr.bf16.mxu1 %v12293_v27  ;;  %v5706_v27 = vor.u32 %v5705_v60, %v5704_v45 }
 0x52d   : > { %v15554_v20 = vpop.f32.mrb[0].mxu1 }
 0x52e   : > { %5624 = vmatpush1.bf16.msra.mxu0 %v12282_v33  ;;  %v15564_v50 = vpop.f32.mrb[1].mxu1  ;;  %v12345_v33 = vld [vmem:[%s17055_s5 + $0x8c8] ss:$16 sps:$4 sm:$0xff]  }
 0x52f   : > { %5625 = vmatprep.subr.bf16.mxu0 %v12290_v13  ;;  %v3728_v28 = vpop.f32.mrb[2].mxu1  ;;  %5667 = vmatpush1.bf16.msra.mxu1 %v12291_v59 }
 0x530   : > { %v15552_v40 = vpop.f32.mrb[0].mxu0  ;;  %v3729_v43 = vpop.f32.mrb[3].mxu1  ;;  %5668 = vmatprep.subr.bf16.mxu1 %v12299_v23  ;;  %v12350_v23 = vld [vmem:[%s17055_s5 + $0x8e4] ss:$16 sps:$4 sm:$0xff]   ;;  %v12354_v28 = vld [vmem:[%s17055_s5 + $0x900] ss:$16 sps:$4 sm:$0xff]  }
 0x531   : > { %v15562_v18 = vpop.f32.mrb[1].mxu0  ;;  %v12365_v43 = vld [vmem:[%s17055_s5 + $0x92c] ss:$16 sps:$4 sm:$0xff]  }
 0x532   : > { %v3687_v30 = vpop.f32.mrb[2].mxu0  ;;  %5626 = vmatpush1.bf16.msra.mxu0 %v12288_v24  ;;  %v5707_v24 = vld [vmem:[#allocation2 + $0x8] ss:$128 sm:$0x8] }
 0x533   : > { %v3688_v52 = vpop.f32.mrb[3].mxu0  ;;  %5627 = vmatprep.subr.bf16.mxu0 %v12296_v36  ;;  %5669 = vmatpush1.bf16.msra.mxu1 %v12297_v1  ;;  %v12348_v1 = vld [vmem:[%s17055_s5 + $0x8e0] ss:$16 sps:$4 sm:$0xff]  }
 0x534   : > { %5670 = vmatprep.subr.bf16.mxu1 %v12305_v56  ;;  %v12362_v52 = vld [vmem:[%s17055_s5 + $0x924] ss:$16 sps:$4 sm:$0xff]   ;;  %v12360_v56 = vld [vmem:[%s17055_s5 + $0x920] ss:$16 sps:$4 sm:$0xff]  }
 0x536   : > { %5628 = vmatpush1.bf16.msra.mxu0 %v12294_v26  ;;  %v12353_v26 = vld [vmem:[%s17055_s5 + $0x8ec] ss:$16 sps:$4 sm:$0xff]  }
 0x537   : > { %5629 = vmatprep.subr.bf16.mxu0 %v12302_v51  ;;  %5671 = vmatpush1.bf16.msra.mxu1 %v12303_v5  ;;  %v12356_v51 = vld [vmem:[%s17055_s5 + $0x904] ss:$16 sps:$4 sm:$0xff]   ;;  %v12371_v5 = vld [vmem:[%s17055_s5 + $0x94c] ss:$16 sps:$4 sm:$0xff]  }
 0x538   : > { %5944 = vmatprep.subr.bf16.mxu1 %v12311_v29  ;;  %v12369_v29 = vld [vmem:[%s17055_s5 + $0x948] ss:$16 sps:$4 sm:$0xff]  }
 0x53a   : > { %5630 = vmatpush1.bf16.msra.mxu0 %v12300_v35  ;;  %5689 = vmatmul.mubr.bf16.vlgmr.msra.gmra.mrb[28].mxu1 %v5421_v49  ;;  %v12368_v35 = vld [vmem:[%s17055_s5 + $0x944] ss:$16 sps:$4 sm:$0xff]  }
 0x53b   : > { %5903 = vmatprep.subr.bf16.mxu0 %v12308_v54  ;;  %5945 = vmatpush1.bf16.msra.mxu1 %v12309_v22  ;;  %v12366_v54 = vld [vmem:[%s17055_s5 + $0x940] ss:$16 sps:$4 sm:$0xff]  }
 0x53c   : > { %5946 = vmatprep.subr.bf16.mxu1 %v12317_v31  ;;  %5976 = vmatprep.mubr.bf16.mxu1 %v12999_v53  ;;  %v12372_v22 = vld [vmem:[%s17055_s5 + $0x960] ss:$16 sps:$4 sm:$0xff]   ;;  %v12380_v31 = vld [vmem:[%s17055_s5 + $0x984] ss:$16 sps:$4 sm:$0xff]  }
 0x53d   : > { %5648 = vmatmul.mubr.bf16.vlgmr.msra.gmra.mrb[28].mxu0 %v5421_v49  ;;  %v12374_v49 = vld [vmem:[%s17055_s5 + $0x964] ss:$16 sps:$4 sm:$0xff]  }
 0x53e   : > { %5904 = vmatpush1.bf16.msra.mxu0 %v12306_v58  ;;  %5935 = vmatprep.mubr.bf16.mxu0 %v12999_v53  ;;  %v12377_v58 = vld [vmem:[%s17055_s5 + $0x96c] ss:$16 sps:$4 sm:$0xff]  }
 0x53f   : > { %5905 = vmatprep.subr.bf16.mxu0 %v12314_v2  ;;  %5947 = vmatpush1.bf16.msra.mxu1 %v12315_v14  ;;  %v12375_v2 = vld [vmem:[%s17055_s5 + $0x968] ss:$16 sps:$4 sm:$0xff]   ;;  %v12378_v14 = vld [vmem:[%s17055_s5 + $0x980] ss:$16 sps:$4 sm:$0xff]  }
 0x540   : > { %5948 = vmatprep.subr.bf16.mxu1 %v12323_v63  ;;  %v12381_v63 = vld [vmem:[%s17055_s5 + $0x988] ss:$16 sps:$4 sm:$0xff]  }
 0x542   : > { %5906 = vmatpush1.bf16.msra.mxu0 %v12312_v6  ;;  %v12383_v6 = vld [vmem:[%s17055_s5 + $0x98c] ss:$16 sps:$4 sm:$0xff]  }
 0x543   : > { %5907 = vmatprep.subr.bf16.mxu0 %v12320_v9  ;;  %5949 = vmatpush1.bf16.msra.mxu1 %v12321_v39  ;;  %v5990_v9 = vld [vmem:[#allocation2 + $0x9] ss:$128 sm:$0x1]  ;;  %v12386_v39 = vld [vmem:[%s17055_s5 + $0x9a4] ss:$16 sps:$4 sm:$0xff]  }
 0x544   : > { %5950 = vmatprep.subr.bf16.mxu1 %v12329_v41  ;;  %v12384_v41 = vld [vmem:[%s17055_s5 + $0x9a0] ss:$16 sps:$4 sm:$0xff]  }
 0x546   : > { %5908 = vmatpush1.bf16.msra.mxu0 %v12318_v62  ;;  %v5991_v62 = vld [vmem:[#allocation2 + $0x9] ss:$128 sm:$0x2] }
 0x547   : > { %5909 = vmatprep.subr.bf16.mxu0 %v12326_v55  ;;  %5951 = vmatpush1.bf16.msra.mxu1 %v12327_v46  ;;  %v12389_v55 = vld [vmem:[%s17055_s5 + $0x9ac] ss:$16 sps:$4 sm:$0xff]   ;;  %v12387_v46 = vld [vmem:[%s17055_s5 + $0x9a8] ss:$16 sps:$4 sm:$0xff]  }
 0x548   : > { %5952 = vmatprep.subr.bf16.mxu1 %v12335_v15  ;;  %v12392_v15 = vld [vmem:[%s17055_s5 + $0x9c4] ss:$16 sps:$4 sm:$0xff]  }
 0x54a   : > { %5910 = vmatpush1.bf16.msra.mxu0 %v12324_v38  ;;  %v5992_v38 = vor.u32 %v5991_v62, %v5990_v9  ;;  %v12438_v62 = vld [vmem:[%s17055_s5 + $0xac0] ss:$16 sps:$4 sm:$0xff]  }
 0x54b   : > { %5911 = vmatprep.subr.bf16.mxu0 %v12332_v47  ;;  %5953 = vmatpush1.bf16.msra.mxu1 %v12333_v19  ;;  %v5993_v47 = vld [vmem:[#allocation2 + $0x9] ss:$128 sm:$0x4] }
 0x54c   : > { %5954 = vmatprep.subr.bf16.mxu1 %v12341_v57  ;;  %v5994_v60 = vor.u32 %v5993_v47, %v5992_v38 }
 0x54d   : > { %v3966_v11 = vpop.f32.mrb[4].mxu1 }
 0x54e   : > { %5912 = vmatpush1.bf16.msra.mxu0 %v12330_v42  ;;  %v15668_v7 = vadd.f32 %v3966_v11, %v15554_v20  ;;  %v3968_v13 = vpop.f32.mrb[5].mxu1  ;;  %v12395_v42 = vld [vmem:[%s17055_s5 + $0x9cc] ss:$16 sps:$4 sm:$0xff]  }
 0x54f   : > { %5913 = vmatprep.subr.bf16.mxu0 %v12338_v0  ;;  %v15674_v59 = vadd.f32 %v3968_v13, %v15564_v50  ;;  %v3970_v36 = vpop.f32.mrb[6].mxu1  ;;  %5955 = vmatpush1.bf16.msra.mxu1 %v12339_v4  ;;  %v5708_v50 = vor.u32 %v5707_v24, %v5706_v27  ;;  %v12393_v0 = vld [vmem:[%s17055_s5 + $0x9c8] ss:$16 sps:$4 sm:$0xff]   ;;  %v12396_v13 = vld [vmem:[%s17055_s5 + $0x9e0] ss:$16 sps:$4 sm:$0xff]  }
 0x550   : > { %v3925_v48 = vpop.f32.mrb[4].mxu0  ;;  %v3971_v20 = vpop.f32.mrb[7].mxu1  ;;  %5956 = vmatprep.subr.bf16.mxu1 %v12347_v8  ;;  %v12399_v24 = vld [vmem:[%s17055_s5 + $0x9e8] ss:$16 sps:$4 sm:$0xff]   ;;  %v12402_v36 = vld [vmem:[%s17055_s5 + $0xa00] ss:$16 sps:$4 sm:$0xff]  }
 0x551   : > { %v15665_v25 = vadd.f32 %v3925_v48, %v15552_v40  ;;  %v3927_v12 = vpop.f32.mrb[5].mxu0  ;;  %v5709_v30 = vpack.c.bf16 %v5708_v50, %v5708_v50  ;;  %v12413_v20 = vld [vmem:[%s17055_s5 + $0xa2c] ss:$16 sps:$4 sm:$0xff]  }
 0x552   : > { %v15671_v34 = vadd.f32 %v3927_v12, %v15562_v18  ;;  %v3929_v3 = vpop.f32.mrb[6].mxu0  ;;  %5914 = vmatpush1.bf16.msra.mxu0 %v12336_v44  ;;  %v12351_v18 = vld [vmem:[%s17055_s5 + $0x8e8] ss:$16 sps:$4 sm:$0xff]   ;;  %v12401_v12 = vld [vmem:[%s17055_s5 + $0x9ec] ss:$16 sps:$4 sm:$0xff]  }
 0x553   : > { %v3930_v40 = vpop.f32.mrb[7].mxu0  ;;  %5915 = vmatprep.subr.bf16.mxu0 %v12344_v37  ;;  %5957 = vmatpush1.bf16.msra.mxu1 %v12345_v33  ;;  %v12398_v37 = vld [vmem:[%s17055_s5 + $0x9e4] ss:$16 sps:$4 sm:$0xff]   ;;  %v5995_v33 = vld [vmem:[#allocation2 + $0x9] ss:$128 sm:$0x8] }
 0x554   : > { %5958 = vmatprep.subr.bf16.mxu1 %v12353_v26  ;;  %v5996_v27 = vor.u32 %v5995_v33, %v5994_v60  ;;  %v12410_v40 = vld [vmem:[%s17055_s5 + $0xa24] ss:$16 sps:$4 sm:$0xff]   ;;  %v12408_v26 = vld [vmem:[%s17055_s5 + $0xa20] ss:$16 sps:$4 sm:$0xff]   ;;  %v12419_v50 = vld [vmem:[%s17055_s5 + $0xa4c] ss:$16 sps:$4 sm:$0xff]  }
 0x555   : > { %v12447_v60 = vld [vmem:[%s17055_s5 + $0xae8] ss:$16 sps:$4 sm:$0xff]  }
 0x556   : > { %5916 = vmatpush1.bf16.msra.mxu0 %v12342_v21  ;;  %v5997_v3 = vpack.c.bf16 %v5996_v27, %v5996_v27  ;;  %v12464_v27 = vld [vmem:[%s17055_s5 + $0xb44] ss:$16 sps:$4 sm:$0xff]  }
 0x557   : > { %5917 = vmatprep.subr.bf16.mxu0 %v12350_v23  ;;  %5959 = vmatpush1.bf16.msra.mxu1 %v12351_v18  ;;  %v12405_v23 = vld [vmem:[%s17055_s5 + $0xa08] ss:$16 sps:$4 sm:$0xff]   ;;  %v12416_v18 = vld [vmem:[%s17055_s5 + $0xa44] ss:$16 sps:$4 sm:$0xff]  }
 0x558   : > { %6232 = vmatprep.subr.bf16.mxu1 %v12359_v61  ;;  %v12417_v61 = vld [vmem:[%s17055_s5 + $0xa48] ss:$16 sps:$4 sm:$0xff]  }
 0x55a   : > { %5918 = vmatpush1.bf16.msra.mxu0 %v12348_v1  ;;  %5977 = vmatmul.mubr.bf16.vlgmr.msra.gmra.mrb[32].mxu1 %v5709_v30  ;;  %v12411_v1 = vld [vmem:[%s17055_s5 + $0xa28] ss:$16 sps:$4 sm:$0xff]  }
 0x55b   : > { %6191 = vmatprep.subr.bf16.mxu0 %v12356_v51  ;;  %6233 = vmatpush1.bf16.msra.mxu1 %v12357_v16  ;;  %v12414_v51 = vld [vmem:[%s17055_s5 + $0xa40] ss:$16 sps:$4 sm:$0xff]  }
 0x55c   : > { %6234 = vmatprep.subr.bf16.mxu1 %v12365_v43  ;;  %6264 = vmatprep.mubr.bf16.mxu1 %v12999_v53  ;;  %v12420_v16 = vld [vmem:[%s17055_s5 + $0xa60] ss:$16 sps:$4 sm:$0xff]   ;;  %v12428_v43 = vld [vmem:[%s17055_s5 + $0xa84] ss:$16 sps:$4 sm:$0xff]  }
 0x55d   : > { %5936 = vmatmul.mubr.bf16.vlgmr.msra.gmra.mrb[32].mxu0 %v5709_v30  ;;  %v12422_v30 = vld [vmem:[%s17055_s5 + $0xa64] ss:$16 sps:$4 sm:$0xff]  }
 0x55e   : > { %6192 = vmatpush1.bf16.msra.mxu0 %v12354_v28  ;;  %6223 = vmatprep.mubr.bf16.mxu0 %v12999_v53  ;;  %v12425_v28 = vld [vmem:[%s17055_s5 + $0xa6c] ss:$16 sps:$4 sm:$0xff]  }
 0x55f   : > { %6193 = vmatprep.subr.bf16.mxu0 %v12362_v52  ;;  %6235 = vmatpush1.bf16.msra.mxu1 %v12363_v17  ;;  %v12423_v52 = vld [vmem:[%s17055_s5 + $0xa68] ss:$16 sps:$4 sm:$0xff]   ;;  %v12426_v17 = vld [vmem:[%s17055_s5 + $0xa80] ss:$16 sps:$4 sm:$0xff]  }
 0x560   : > { %6236 = vmatprep.subr.bf16.mxu1 %v12371_v5  ;;  %v12429_v5 = vld [vmem:[%s17055_s5 + $0xa88] ss:$16 sps:$4 sm:$0xff]  }
 0x562   : > { %6194 = vmatpush1.bf16.msra.mxu0 %v12360_v56  ;;  %v12431_v56 = vld [vmem:[%s17055_s5 + $0xa8c] ss:$16 sps:$4 sm:$0xff]  }
 0x563   : > { %6195 = vmatprep.subr.bf16.mxu0 %v12368_v35  ;;  %6237 = vmatpush1.bf16.msra.mxu1 %v12369_v29  ;;  %v6278_v35 = vld [vmem:[#allocation2 + $0xa] ss:$128 sm:$0x1]  ;;  %v12434_v29 = vld [vmem:[%s17055_s5 + $0xaa4] ss:$16 sps:$4 sm:$0xff]  }
 0x564   : > { %6238 = vmatprep.subr.bf16.mxu1 %v12377_v58  ;;  %v12432_v58 = vld [vmem:[%s17055_s5 + $0xaa0] ss:$16 sps:$4 sm:$0xff]  }
 0x566   : > { %6196 = vmatpush1.bf16.msra.mxu0 %v12366_v54  ;;  %v6279_v54 = vld [vmem:[#allocation2 + $0xa] ss:$128 sm:$0x2] }
 0x567   : > { %6197 = vmatprep.subr.bf16.mxu0 %v12374_v49  ;;  %6239 = vmatpush1.bf16.msra.mxu1 %v12375_v2  ;;  %v12437_v49 = vld [vmem:[%s17055_s5 + $0xaac] ss:$16 sps:$4 sm:$0xff]   ;;  %v6281_v2 = vld [vmem:[#allocation2 + $0xa] ss:$128 sm:$0x4] }
 0x568   : > { %6240 = vmatprep.subr.bf16.mxu1 %v12383_v6  ;;  %v12440_v6 = vld [vmem:[%s17055_s5 + $0xac4] ss:$16 sps:$4 sm:$0xff]  }
 0x56a   : > { %6198 = vmatpush1.bf16.msra.mxu0 %v12372_v22  ;;  %v12435_v22 = vld [vmem:[%s17055_s5 + $0xaa8] ss:$16 sps:$4 sm:$0xff]  }
 0x56b   : > { %6199 = vmatprep.subr.bf16.mxu0 %v12380_v31  ;;  %6241 = vmatpush1.bf16.msra.mxu1 %v12381_v63  ;;  %v6280_v31 = vor.u32 %v6279_v54, %v6278_v35  ;;  %v12486_v54 = vld [vmem:[%s17055_s5 + $0xbc0] ss:$16 sps:$4 sm:$0xff]  }
 0x56c   : > { %6242 = vmatprep.subr.bf16.mxu1 %v12389_v55  ;;  %v6283_v55 = vld [vmem:[#allocation2 + $0xa] ss:$128 sm:$0x8] }
 0x56d   : > { %v4250_v10 = vpop.f32.mrb[8].mxu1 }
 0x56e   : > { %6200 = vmatpush1.bf16.msra.mxu0 %v12378_v14  ;;  %v15778_v44 = vadd.f32 %v4250_v10, %v15668_v7  ;;  %v4252_v45 = vpop.f32.mrb[9].mxu1  ;;  %v12443_v14 = vld [vmem:[%s17055_s5 + $0xacc] ss:$16 sps:$4 sm:$0xff]  }
 0x56f   : > { %6201 = vmatprep.subr.bf16.mxu0 %v12386_v39  ;;  %v15787_v48 = vadd.f32 %v4252_v45, %v15674_v59  ;;  %v4254_v21 = vpop.f32.mrb[10].mxu1  ;;  %6243 = vmatpush1.bf16.msra.mxu1 %v12387_v46  ;;  %v12407_v59 = vld [vmem:[%s17055_s5 + $0xa0c] ss:$16 sps:$4 sm:$0xff]   ;;  %v12441_v39 = vld [vmem:[%s17055_s5 + $0xac8] ss:$16 sps:$4 sm:$0xff]  }
 0x570   : > { %v4209_v19 = vpop.f32.mrb[8].mxu0  ;;  %v4255_v7 = vpop.f32.mrb[11].mxu1  ;;  %6244 = vmatprep.subr.bf16.mxu1 %v12395_v42  ;;  %v12453_v21 = vld [vmem:[%s17055_s5 + $0xb08] ss:$16 sps:$4 sm:$0xff]  }
 0x571   : > { %v15775_v57 = vadd.f32 %v4209_v19, %v15665_v25  ;;  %v4211_v4 = vpop.f32.mrb[9].mxu0  ;;  %v12461_v7 = vld [vmem:[%s17055_s5 + $0xb2c] ss:$16 sps:$4 sm:$0xff]  }
 0x572   : > { %v15784_v8 = vadd.f32 %v4211_v4, %v15671_v34  ;;  %v4213_v11 = vpop.f32.mrb[10].mxu0  ;;  %6202 = vmatpush1.bf16.msra.mxu0 %v12384_v41  ;;  %v12404_v34 = vld [vmem:[%s17055_s5 + $0xa04] ss:$16 sps:$4 sm:$0xff]  }
 0x573   : > { %v4214_v25 = vpop.f32.mrb[11].mxu0  ;;  %6203 = vmatprep.subr.bf16.mxu0 %v12392_v15  ;;  %6245 = vmatpush1.bf16.msra.mxu1 %v12393_v0  ;;  %v6282_v15 = vor.u32 %v6281_v2, %v6280_v31  ;;  %v12450_v11 = vld [vmem:[%s17055_s5 + $0xb00] ss:$16 sps:$4 sm:$0xff]  }
 0x574   : > { %6246 = vmatprep.subr.bf16.mxu1 %v12401_v12  ;;  %v12458_v25 = vld [vmem:[%s17055_s5 + $0xb24] ss:$16 sps:$4 sm:$0xff]   ;;  %v12456_v12 = vld [vmem:[%s17055_s5 + $0xb20] ss:$16 sps:$4 sm:$0xff]  }
 0x575   : > { %v6284_v45 = vor.u32 %v6283_v55, %v6282_v15  ;;  %v12495_v15 = vld [vmem:[%s17055_s5 + $0xbe8] ss:$16 sps:$4 sm:$0xff]  }
 0x576   : > { %6204 = vmatpush1.bf16.msra.mxu0 %v12390_v32 }
 0x577   : > { %6205 = vmatprep.subr.bf16.mxu0 %v12398_v37  ;;  %6247 = vmatpush1.bf16.msra.mxu1 %v12399_v24  ;;  %v12444_v37 = vld [vmem:[%s17055_s5 + $0xae0] ss:$16 sps:$4 sm:$0xff]   ;;  %v6285_v33 = vpack.c.bf16 %v6284_v45, %v6284_v45  ;;  %v12467_v24 = vld [vmem:[%s17055_s5 + $0xb4c] ss:$16 sps:$4 sm:$0xff]   ;;  %v12507_v45 = vld [vmem:[%s17055_s5 + $0xc28] ss:$16 sps:$4 sm:$0xff]  }
 0x578   : > { %6520 = vmatprep.subr.bf16.mxu1 %v12407_v59  ;;  %v12465_v59 = vld [vmem:[%s17055_s5 + $0xb48] ss:$16 sps:$4 sm:$0xff]  }
 0x57a   : > { %6206 = vmatpush1.bf16.msra.mxu0 %v12396_v13  ;;  %6265 = vmatmul.mubr.bf16.vlgmr.msra.gmra.mrb[36].mxu1 %v5997_v3  ;;  %v12459_v13 = vld [vmem:[%s17055_s5 + $0xb28] ss:$16 sps:$4 sm:$0xff]  }
 0x57b   : > { %6479 = vmatprep.subr.bf16.mxu0 %v12404_v34  ;;  %6521 = vmatpush1.bf16.msra.mxu1 %v12405_v23  ;;  %v12462_v34 = vld [vmem:[%s17055_s5 + $0xb40] ss:$16 sps:$4 sm:$0xff]  }
 0x57c   : > { %6522 = vmatprep.subr.bf16.mxu1 %v12413_v20  ;;  %6552 = vmatprep.mubr.bf16.mxu1 %v12999_v53  ;;  %v12468_v23 = vld [vmem:[%s17055_s5 + $0xb60] ss:$16 sps:$4 sm:$0xff]   ;;  %v12476_v20 = vld [vmem:[%s17055_s5 + $0xb84] ss:$16 sps:$4 sm:$0xff]  }
 0x57d   : > { %6224 = vmatmul.mubr.bf16.vlgmr.msra.gmra.mrb[36].mxu0 %v5997_v3  ;;  %v12470_v3 = vld [vmem:[%s17055_s5 + $0xb64] ss:$16 sps:$4 sm:$0xff]  }
 0x57e   : > { %6480 = vmatpush1.bf16.msra.mxu0 %v12402_v36  ;;  %6511 = vmatprep.mubr.bf16.mxu0 %v12999_v53  ;;  %v12473_v36 = vld [vmem:[%s17055_s5 + $0xb6c] ss:$16 sps:$4 sm:$0xff]  }
 0x57f   : > { %6481 = vmatprep.subr.bf16.mxu0 %v12410_v40  ;;  %6523 = vmatpush1.bf16.msra.mxu1 %v12411_v1  ;;  %v12471_v40 = vld [vmem:[%s17055_s5 + $0xb68] ss:$16 sps:$4 sm:$0xff]   ;;  %v12474_v1 = vld [vmem:[%s17055_s5 + $0xb80] ss:$16 sps:$4 sm:$0xff]  }
 0x580   : > { %6524 = vmatprep.subr.bf16.mxu1 %v12419_v50  ;;  %v12477_v50 = vld [vmem:[%s17055_s5 + $0xb88] ss:$16 sps:$4 sm:$0xff]  }
 0x582   : > { %6482 = vmatpush1.bf16.msra.mxu0 %v12408_v26  ;;  %v12479_v26 = vld [vmem:[%s17055_s5 + $0xb8c] ss:$16 sps:$4 sm:$0xff]  }
 0x583   : > { %6483 = vmatprep.subr.bf16.mxu0 %v12416_v18  ;;  %6525 = vmatpush1.bf16.msra.mxu1 %v12417_v61  ;;  %v6566_v18 = vld [vmem:[#allocation2 + $0xb] ss:$128 sm:$0x1]  ;;  %v12482_v61 = vld [vmem:[%s17055_s5 + $0xba4] ss:$16 sps:$4 sm:$0xff]  }
 0x584   : > { %6526 = vmatprep.subr.bf16.mxu1 %v12425_v28  ;;  %v12480_v28 = vld [vmem:[%s17055_s5 + $0xba0] ss:$16 sps:$4 sm:$0xff]  }
 0x586   : > { %6484 = vmatpush1.bf16.msra.mxu0 %v12414_v51  ;;  %v6567_v51 = vld [vmem:[#allocation2 + $0xb] ss:$128 sm:$0x2] }
 0x587   : > { %6485 = vmatprep.subr.bf16.mxu0 %v12422_v30  ;;  %6527 = vmatpush1.bf16.msra.mxu1 %v12423_v52  ;;  %v12485_v30 = vld [vmem:[%s17055_s5 + $0xbac] ss:$16 sps:$4 sm:$0xff]   ;;  %v6569_v52 = vld [vmem:[#allocation2 + $0xb] ss:$128 sm:$0x4] }
 0x588   : > { %6528 = vmatprep.subr.bf16.mxu1 %v12431_v56  ;;  %v12488_v56 = vld [vmem:[%s17055_s5 + $0xbc4] ss:$16 sps:$4 sm:$0xff]  }
 0x58a   : > { %6486 = vmatpush1.bf16.msra.mxu0 %v12420_v16  ;;  %v12483_v16 = vld [vmem:[%s17055_s5 + $0xba8] ss:$16 sps:$4 sm:$0xff]  }
 0x58b   : > { %6487 = vmatprep.subr.bf16.mxu0 %v12428_v43  ;;  %6529 = vmatpush1.bf16.msra.mxu1 %v12429_v5  ;;  %v6568_v43 = vor.u32 %v6567_v51, %v6566_v18  ;;  %v12534_v51 = vld [vmem:[%s17055_s5 + $0xcc0] ss:$16 sps:$4 sm:$0xff]  }
 0x58c   : > { %6530 = vmatprep.subr.bf16.mxu1 %v12437_v49  ;;  %v6571_v49 = vld [vmem:[#allocation2 + $0xb] ss:$128 sm:$0x8] }
 0x58d   : > { %v4538_v63 = vpop.f32.mrb[12].mxu1 }
 0x58e   : > { %6488 = vmatpush1.bf16.msra.mxu0 %v12426_v17  ;;  %v15888_v38 = vadd.f32 %v4538_v63, %v15778_v44  ;;  %v4540_v47 = vpop.f32.mrb[13].mxu1  ;;  %v12449_v44 = vld [vmem:[%s17055_s5 + $0xaec] ss:$16 sps:$4 sm:$0xff]  }
 0x58f   : > { %6489 = vmatprep.subr.bf16.mxu0 %v12434_v29  ;;  %v15894_v19 = vadd.f32 %v4540_v47, %v15787_v48  ;;  %v4542_v32 = vpop.f32.mrb[14].mxu1  ;;  %6531 = vmatpush1.bf16.msra.mxu1 %v12435_v22  ;;  %v12455_v48 = vld [vmem:[%s17055_s5 + $0xb0c] ss:$16 sps:$4 sm:$0xff]   ;;  %v12489_v29 = vld [vmem:[%s17055_s5 + $0xbc8] ss:$16 sps:$4 sm:$0xff]  }
 0x590   : > { %v4497_v9 = vpop.f32.mrb[12].mxu0  ;;  %v4543_v4 = vpop.f32.mrb[15].mxu1  ;;  %6532 = vmatprep.subr.bf16.mxu1 %v12443_v14  ;;  %v12491_v17 = vld [vmem:[%s17055_s5 + $0xbcc] ss:$16 sps:$4 sm:$0xff]   ;;  %v12492_v47 = vld [vmem:[%s17055_s5 + $0xbe0] ss:$16 sps:$4 sm:$0xff]  }
 0x591   : > { %v15885_v41 = vadd.f32 %v4497_v9, %v15775_v57  ;;  %v4499_v46 = vpop.f32.mrb[13].mxu0  ;;  %v12446_v57 = vld [vmem:[%s17055_s5 + $0xae4] ss:$16 sps:$4 sm:$0xff]   ;;  %v12501_v32 = vld [vmem:[%s17055_s5 + $0xc08] ss:$16 sps:$4 sm:$0xff]  }
 0x592   : > { %v15891_v42 = vadd.f32 %v4499_v46, %v15784_v8  ;;  %v4501_v10 = vpop.f32.mrb[14].mxu0  ;;  %6490 = vmatpush1.bf16.msra.mxu0 %v12432_v58  ;;  %v12452_v8 = vld [vmem:[%s17055_s5 + $0xb04] ss:$16 sps:$4 sm:$0xff]  }
 0x593   : > { %v4502_v0 = vpop.f32.mrb[15].mxu0  ;;  %6491 = vmatprep.subr.bf16.mxu0 %v12440_v6  ;;  %6533 = vmatpush1.bf16.msra.mxu1 %v12441_v39  ;;  %v6570_v6 = vor.u32 %v6569_v52, %v6568_v43  ;;  %v12498_v10 = vld [vmem:[%s17055_s5 + $0xc00] ss:$16 sps:$4 sm:$0xff]   ;;  %v12506_v4 = vld [vmem:[%s17055_s5 + $0xc24] ss:$16 sps:$4 sm:$0xff]  }
 0x594   : > { %6534 = vmatprep.subr.bf16.mxu1 %v12449_v44  ;;  %v12504_v44 = vld [vmem:[%s17055_s5 + $0xc20] ss:$16 sps:$4 sm:$0xff]  }
 0x595   : > { %v6572_v46 = vor.u32 %v6571_v49, %v6570_v6  ;;  %v12543_v6 = vld [vmem:[%s17055_s5 + $0xce8] ss:$16 sps:$4 sm:$0xff]  }
 0x596   : > { %6492 = vmatpush1.bf16.msra.mxu0 %v12438_v62 }
 0x597   : > { %6493 = vmatprep.subr.bf16.mxu0 %v12446_v57  ;;  %6535 = vmatpush1.bf16.msra.mxu1 %v12447_v60  ;;  %v6573_v0 = vpack.c.bf16 %v6572_v46, %v6572_v46  ;;  %v12509_v57 = vld [vmem:[%s17055_s5 + $0xc2c] ss:$16 sps:$4 sm:$0xff]   ;;  %v12555_v46 = vld [vmem:[%s17055_s5 + $0xd28] ss:$16 sps:$4 sm:$0xff]  }
 0x598   : > { %6808 = vmatprep.subr.bf16.mxu1 %v12455_v48  ;;  %v12515_v60 = vld [vmem:[%s17055_s5 + $0xc4c] ss:$16 sps:$4 sm:$0xff]   ;;  %v12513_v48 = vld [vmem:[%s17055_s5 + $0xc48] ss:$16 sps:$4 sm:$0xff]  }
 0x59a   : > { %6494 = vmatpush1.bf16.msra.mxu0 %v12444_v37  ;;  %6553 = vmatmul.mubr.bf16.vlgmr.msra.gmra.mrb[40].mxu1 %v6285_v33  ;;  %v12512_v37 = vld [vmem:[%s17055_s5 + $0xc44] ss:$16 sps:$4 sm:$0xff]  }
 0x59b   : > { %6767 = vmatprep.subr.bf16.mxu0 %v12452_v8  ;;  %6809 = vmatpush1.bf16.msra.mxu1 %v12453_v21  ;;  %v12510_v8 = vld [vmem:[%s17055_s5 + $0xc40] ss:$16 sps:$4 sm:$0xff]   ;;  %v12521_v21 = vld [vmem:[%s17055_s5 + $0xc6c] ss:$16 sps:$4 sm:$0xff]  }
 0x59c   : > { %6810 = vmatprep.subr.bf16.mxu1 %v12461_v7  ;;  %6840 = vmatprep.mubr.bf16.mxu1 %v12999_v53  ;;  %v12524_v7 = vld [vmem:[%s17055_s5 + $0xc84] ss:$16 sps:$4 sm:$0xff]  }
 0x59d   : > { %6512 = vmatmul.mubr.bf16.vlgmr.msra.gmra.mrb[40].mxu0 %v6285_v33  ;;  %v12516_v33 = vld [vmem:[%s17055_s5 + $0xc60] ss:$16 sps:$4 sm:$0xff]  }
 0x59e   : > { %6768 = vmatpush1.bf16.msra.mxu0 %v12450_v11  ;;  %6799 = vmatprep.mubr.bf16.mxu0 %v12999_v53  ;;  %v12518_v11 = vld [vmem:[%s17055_s5 + $0xc64] ss:$16 sps:$4 sm:$0xff]  }
 0x59f   : > { %6769 = vmatprep.subr.bf16.mxu0 %v12458_v25  ;;  %6811 = vmatpush1.bf16.msra.mxu1 %v12459_v13  ;;  %v12519_v25 = vld [vmem:[%s17055_s5 + $0xc68] ss:$16 sps:$4 sm:$0xff]   ;;  %v12522_v13 = vld [vmem:[%s17055_s5 + $0xc80] ss:$16 sps:$4 sm:$0xff]  }
 0x5a0   : > { %6812 = vmatprep.subr.bf16.mxu1 %v12467_v24  ;;  %v12525_v24 = vld [vmem:[%s17055_s5 + $0xc88] ss:$16 sps:$4 sm:$0xff]  }
 0x5a2   : > { %6770 = vmatpush1.bf16.msra.mxu0 %v12456_v12  ;;  %v12527_v12 = vld [vmem:[%s17055_s5 + $0xc8c] ss:$16 sps:$4 sm:$0xff]  }
 0x5a3   : > { %6771 = vmatprep.subr.bf16.mxu0 %v12464_v27  ;;  %6813 = vmatpush1.bf16.msra.mxu1 %v12465_v59  ;;  %v6854_v27 = vld [vmem:[#allocation2 + $0xc] ss:$128 sm:$0x1]  ;;  %v12530_v59 = vld [vmem:[%s17055_s5 + $0xca4] ss:$16 sps:$4 sm:$0xff]  }
 0x5a4   : > { %6814 = vmatprep.subr.bf16.mxu1 %v12473_v36  ;;  %v12528_v36 = vld [vmem:[%s17055_s5 + $0xca0] ss:$16 sps:$4 sm:$0xff]  }
 0x5a6   : > { %6772 = vmatpush1.bf16.msra.mxu0 %v12462_v34  ;;  %v6855_v34 = vld [vmem:[#allocation2 + $0xc] ss:$128 sm:$0x2] }
 0x5a7   : > { %6773 = vmatprep.subr.bf16.mxu0 %v12470_v3  ;;  %6815 = vmatpush1.bf16.msra.mxu1 %v12471_v40  ;;  %v12533_v3 = vld [vmem:[%s17055_s5 + $0xcac] ss:$16 sps:$4 sm:$0xff]  }
 0x5a8   : > { %6816 = vmatprep.subr.bf16.mxu1 %v12479_v26  ;;  %v6857_v40 = vld [vmem:[#allocation2 + $0xc] ss:$128 sm:$0x4]  ;;  %v12536_v26 = vld [vmem:[%s17055_s5 + $0xcc4] ss:$16 sps:$4 sm:$0xff]  }
 0x5aa   : > { %6774 = vmatpush1.bf16.msra.mxu0 %v12468_v23  ;;  %v12531_v23 = vld [vmem:[%s17055_s5 + $0xca8] ss:$16 sps:$4 sm:$0xff]  }
 0x5ab   : > { %6775 = vmatprep.subr.bf16.mxu0 %v12476_v20  ;;  %6817 = vmatpush1.bf16.msra.mxu1 %v12477_v50  ;;  %v6856_v20 = vor.u32 %v6855_v34, %v6854_v27  ;;  %v12582_v34 = vld [vmem:[%s17055_s5 + $0xdc0] ss:$16 sps:$4 sm:$0xff]  }
 0x5ac   : > { %6818 = vmatprep.subr.bf16.mxu1 %v12485_v30  ;;  %v6859_v30 = vld [vmem:[#allocation2 + $0xc] ss:$128 sm:$0x8] }
 0x5ad   : > { %v4826_v5 = vpop.f32.mrb[16].mxu1 }
 0x5ae   : > { %6776 = vmatpush1.bf16.msra.mxu0 %v12474_v1  ;;  %v15998_v22 = vadd.f32 %v4826_v5, %v15888_v38  ;;  %v4828_v31 = vpop.f32.mrb[17].mxu1  ;;  %v12497_v38 = vld [vmem:[%s17055_s5 + $0xbec] ss:$16 sps:$4 sm:$0xff]  }
 0x5af   : > { %6777 = vmatprep.subr.bf16.mxu0 %v12482_v61  ;;  %v16004_v9 = vadd.f32 %v4828_v31, %v15894_v19  ;;  %v4830_v62 = vpop.f32.mrb[18].mxu1  ;;  %6819 = vmatpush1.bf16.msra.mxu1 %v12483_v16  ;;  %v12503_v19 = vld [vmem:[%s17055_s5 + $0xc0c] ss:$16 sps:$4 sm:$0xff]   ;;  %v12537_v61 = vld [vmem:[%s17055_s5 + $0xcc8] ss:$16 sps:$4 sm:$0xff]  }
 0x5b0   : > { %v4785_v35 = vpop.f32.mrb[16].mxu0  ;;  %v4831_v55 = vpop.f32.mrb[19].mxu1  ;;  %6820 = vmatprep.subr.bf16.mxu1 %v12491_v17  ;;  %v12539_v1 = vld [vmem:[%s17055_s5 + $0xccc] ss:$16 sps:$4 sm:$0xff]   ;;  %v12540_v31 = vld [vmem:[%s17055_s5 + $0xce0] ss:$16 sps:$4 sm:$0xff]  }
 0x5b1   : > { %v15995_v58 = vadd.f32 %v4785_v35, %v15885_v41  ;;  %v4787_v2 = vpop.f32.mrb[17].mxu0  ;;  %v12494_v41 = vld [vmem:[%s17055_s5 + $0xbe4] ss:$16 sps:$4 sm:$0xff]   ;;  %v12549_v62 = vld [vmem:[%s17055_s5 + $0xd08] ss:$16 sps:$4 sm:$0xff]  }
 0x5b2   : > { %v16001_v14 = vadd.f32 %v4787_v2, %v15891_v42  ;;  %v4789_v63 = vpop.f32.mrb[18].mxu0  ;;  %6778 = vmatpush1.bf16.msra.mxu0 %v12480_v28  ;;  %v12500_v42 = vld [vmem:[%s17055_s5 + $0xc04] ss:$16 sps:$4 sm:$0xff]  }
 0x5b3   : > { %v4790_v39 = vpop.f32.mrb[19].mxu0  ;;  %6779 = vmatprep.subr.bf16.mxu0 %v12488_v56  ;;  %6821 = vmatpush1.bf16.msra.mxu1 %v12489_v29  ;;  %v6858_v56 = vor.u32 %v6857_v40, %v6856_v20  ;;  %v12546_v63 = vld [vmem:[%s17055_s5 + $0xd00] ss:$16 sps:$4 sm:$0xff]   ;;  %v12554_v55 = vld [vmem:[%s17055_s5 + $0xd24] ss:$16 sps:$4 sm:$0xff]  }
 0x5b4   : > { %6822 = vmatprep.subr.bf16.mxu1 %v12497_v38  ;;  %v12552_v38 = vld [vmem:[%s17055_s5 + $0xd20] ss:$16 sps:$4 sm:$0xff]  }
 0x5b5   : > { %v6860_v2 = vor.u32 %v6859_v30, %v6858_v56  ;;  %v12591_v56 = vld [vmem:[%s17055_s5 + $0xde8] ss:$16 sps:$4 sm:$0xff]  }
 0x5b6   : > { %6780 = vmatpush1.bf16.msra.mxu0 %v12486_v54 }
 0x5b7   : > { %6781 = vmatprep.subr.bf16.mxu0 %v12494_v41  ;;  %6823 = vmatpush1.bf16.msra.mxu1 %v12495_v15  ;;  %v6861_v39 = vpack.c.bf16 %v6860_v2, %v6860_v2  ;;  %v12557_v41 = vld [vmem:[%s17055_s5 + $0xd2c] ss:$16 sps:$4 sm:$0xff]   ;;  %v12603_v2 = vld [vmem:[%s17055_s5 + $0xe28] ss:$16 sps:$4 sm:$0xff]  }
 0x5b8   : > { %7096 = vmatprep.subr.bf16.mxu1 %v12503_v19  ;;  %v12563_v15 = vld [vmem:[%s17055_s5 + $0xd4c] ss:$16 sps:$4 sm:$0xff]   ;;  %v12561_v19 = vld [vmem:[%s17055_s5 + $0xd48] ss:$16 sps:$4 sm:$0xff]  }
 0x5ba   : > { %6782 = vmatpush1.bf16.msra.mxu0 %v12492_v47  ;;  %6841 = vmatmul.mubr.bf16.vlgmr.msra.gmra.mrb[44].mxu1 %v6573_v0  ;;  %v12560_v47 = vld [vmem:[%s17055_s5 + $0xd44] ss:$16 sps:$4 sm:$0xff]  }
 0x5bb   : > { %7055 = vmatprep.subr.bf16.mxu0 %v12500_v42  ;;  %7097 = vmatpush1.bf16.msra.mxu1 %v12501_v32  ;;  %v12558_v42 = vld [vmem:[%s17055_s5 + $0xd40] ss:$16 sps:$4 sm:$0xff]   ;;  %v12569_v32 = vld [vmem:[%s17055_s5 + $0xd6c] ss:$16 sps:$4 sm:$0xff]  }
 0x5bc   : > { %7098 = vmatprep.subr.bf16.mxu1 %v12509_v57  ;;  %7128 = vmatprep.mubr.bf16.mxu1 %v12999_v53  ;;  %v12572_v57 = vld [vmem:[%s17055_s5 + $0xd84] ss:$16 sps:$4 sm:$0xff]  }
 0x5bd   : > { %6800 = vmatmul.mubr.bf16.vlgmr.msra.gmra.mrb[44].mxu0 %v6573_v0  ;;  %v12564_v0 = vld [vmem:[%s17055_s5 + $0xd60] ss:$16 sps:$4 sm:$0xff]  }
 0x5be   : > { %7056 = vmatpush1.bf16.msra.mxu0 %v12498_v10  ;;  %7087 = vmatprep.mubr.bf16.mxu0 %v12999_v53  ;;  %v12566_v10 = vld [vmem:[%s17055_s5 + $0xd64] ss:$16 sps:$4 sm:$0xff]  }
 0x5bf   : > { %7057 = vmatprep.subr.bf16.mxu0 %v12506_v4  ;;  %7099 = vmatpush1.bf16.msra.mxu1 %v12507_v45  ;;  %v12567_v4 = vld [vmem:[%s17055_s5 + $0xd68] ss:$16 sps:$4 sm:$0xff]   ;;  %v12570_v45 = vld [vmem:[%s17055_s5 + $0xd80] ss:$16 sps:$4 sm:$0xff]  }
 0x5c0   : > { %7100 = vmatprep.subr.bf16.mxu1 %v12515_v60  ;;  %v12573_v60 = vld [vmem:[%s17055_s5 + $0xd88] ss:$16 sps:$4 sm:$0xff]  }
 0x5c2   : > { %7058 = vmatpush1.bf16.msra.mxu0 %v12504_v44  ;;  %v12575_v44 = vld [vmem:[%s17055_s5 + $0xd8c] ss:$16 sps:$4 sm:$0xff]  }
 0x5c3   : > { %7059 = vmatprep.subr.bf16.mxu0 %v12512_v37  ;;  %7101 = vmatpush1.bf16.msra.mxu1 %v12513_v48  ;;  %v7142_v37 = vld [vmem:[#allocation2 + $0xd] ss:$128 sm:$0x1]  ;;  %v12578_v48 = vld [vmem:[%s17055_s5 + $0xda4] ss:$16 sps:$4 sm:$0xff]  }
 0x5c4   : > { %7102 = vmatprep.subr.bf16.mxu1 %v12521_v21  ;;  %v12576_v21 = vld [vmem:[%s17055_s5 + $0xda0] ss:$16 sps:$4 sm:$0xff]  }
 0x5c6   : > { %7060 = vmatpush1.bf16.msra.mxu0 %v12510_v8  ;;  %v7143_v8 = vld [vmem:[#allocation2 + $0xd] ss:$128 sm:$0x2] }
 0x5c7   : > { %7061 = vmatprep.subr.bf16.mxu0 %v12518_v11  ;;  %7103 = vmatpush1.bf16.msra.mxu1 %v12519_v25  ;;  %v12581_v11 = vld [vmem:[%s17055_s5 + $0xdac] ss:$16 sps:$4 sm:$0xff]  }
 0x5c8   : > { %7104 = vmatprep.subr.bf16.mxu1 %v12527_v12  ;;  %v7145_v25 = vld [vmem:[#allocation2 + $0xd] ss:$128 sm:$0x4]  ;;  %v12584_v12 = vld [vmem:[%s17055_s5 + $0xdc4] ss:$16 sps:$4 sm:$0xff]  }
 0x5ca   : > { %7062 = vmatpush1.bf16.msra.mxu0 %v12516_v33  ;;  %v12579_v33 = vld [vmem:[%s17055_s5 + $0xda8] ss:$16 sps:$4 sm:$0xff]  }
 0x5cb   : > { %7063 = vmatprep.subr.bf16.mxu0 %v12524_v7  ;;  %7105 = vmatpush1.bf16.msra.mxu1 %v12525_v24  ;;  %v7144_v7 = vor.u32 %v7143_v8, %v7142_v37  ;;  %v12630_v8 = vld [vmem:[%s17055_s5 + $0xec0] ss:$16 sps:$4 sm:$0xff]  }
 0x5cc   : > { %7106 = vmatprep.subr.bf16.mxu1 %v12533_v3  ;;  %v7147_v3 = vld [vmem:[#allocation2 + $0xd] ss:$128 sm:$0x8] }
 0x5cd   : > { %v5114_v50 = vpop.f32.mrb[20].mxu1 }
 0x5ce   : > { %7064 = vmatpush1.bf16.msra.mxu0 %v12522_v13  ;;  %v16108_v16 = vadd.f32 %v5114_v50, %v15998_v22  ;;  %v5116_v43 = vpop.f32.mrb[21].mxu1  ;;  %v12545_v22 = vld [vmem:[%s17055_s5 + $0xcec] ss:$16 sps:$4 sm:$0xff]  }
 0x5cf   : > { %7065 = vmatprep.subr.bf16.mxu0 %v12530_v59  ;;  %v16114_v35 = vadd.f32 %v5116_v43, %v16004_v9  ;;  %v5118_v54 = vpop.f32.mrb[22].mxu1  ;;  %7107 = vmatpush1.bf16.msra.mxu1 %v12531_v23  ;;  %v12551_v9 = vld [vmem:[%s17055_s5 + $0xd0c] ss:$16 sps:$4 sm:$0xff]   ;;  %v12585_v59 = vld [vmem:[%s17055_s5 + $0xdc8] ss:$16 sps:$4 sm:$0xff]  }
 0x5d0   : > { %v5073_v18 = vpop.f32.mrb[20].mxu0  ;;  %v5119_v49 = vpop.f32.mrb[23].mxu1  ;;  %7108 = vmatprep.subr.bf16.mxu1 %v12539_v1  ;;  %v12587_v13 = vld [vmem:[%s17055_s5 + $0xdcc] ss:$16 sps:$4 sm:$0xff]   ;;  %v12588_v43 = vld [vmem:[%s17055_s5 + $0xde0] ss:$16 sps:$4 sm:$0xff]  }
 0x5d1   : > { %v16105_v28 = vadd.f32 %v5073_v18, %v15995_v58  ;;  %v5075_v52 = vpop.f32.mrb[21].mxu0  ;;  %v12542_v58 = vld [vmem:[%s17055_s5 + $0xce4] ss:$16 sps:$4 sm:$0xff]   ;;  %v12597_v54 = vld [vmem:[%s17055_s5 + $0xe08] ss:$16 sps:$4 sm:$0xff]  }
 0x5d2   : > { %v16111_v17 = vadd.f32 %v5075_v52, %v16001_v14  ;;  %v5077_v5 = vpop.f32.mrb[22].mxu0  ;;  %7066 = vmatpush1.bf16.msra.mxu0 %v12528_v36  ;;  %v12548_v14 = vld [vmem:[%s17055_s5 + $0xd04] ss:$16 sps:$4 sm:$0xff]  }
 0x5d3   : > { %v5078_v29 = vpop.f32.mrb[23].mxu0  ;;  %7067 = vmatprep.subr.bf16.mxu0 %v12536_v26  ;;  %7109 = vmatpush1.bf16.msra.mxu1 %v12537_v61  ;;  %v7146_v26 = vor.u32 %v7145_v25, %v7144_v7  ;;  %v12594_v5 = vld [vmem:[%s17055_s5 + $0xe00] ss:$16 sps:$4 sm:$0xff]   ;;  %v12602_v49 = vld [vmem:[%s17055_s5 + $0xe24] ss:$16 sps:$4 sm:$0xff]  }
 0x5d4   : > { %7110 = vmatprep.subr.bf16.mxu1 %v12545_v22  ;;  %v12600_v22 = vld [vmem:[%s17055_s5 + $0xe20] ss:$16 sps:$4 sm:$0xff]  }
 0x5d5   : > { %v7148_v52 = vor.u32 %v7147_v3, %v7146_v26  ;;  %v12639_v26 = vld [vmem:[%s17055_s5 + $0xee8] ss:$16 sps:$4 sm:$0xff]  }
 0x5d6   : > { %7068 = vmatpush1.bf16.msra.mxu0 %v12534_v51 }
 0x5d7   : > { %7069 = vmatprep.subr.bf16.mxu0 %v12542_v58  ;;  %7111 = vmatpush1.bf16.msra.mxu1 %v12543_v6  ;;  %v7149_v29 = vpack.c.bf16 %v7148_v52, %v7148_v52  ;;  %v12605_v58 = vld [vmem:[%s17055_s5 + $0xe2c] ss:$16 sps:$4 sm:$0xff]   ;;  %v12651_v52 = vld [vmem:[%s17055_s5 + $0xf28] ss:$16 sps:$4 sm:$0xff]  }
 0x5d8   : > { %7384 = vmatprep.subr.bf16.mxu1 %v12551_v9  ;;  %v12611_v6 = vld [vmem:[%s17055_s5 + $0xe4c] ss:$16 sps:$4 sm:$0xff]   ;;  %v12609_v9 = vld [vmem:[%s17055_s5 + $0xe48] ss:$16 sps:$4 sm:$0xff]  }
 0x5da   : > { %7070 = vmatpush1.bf16.msra.mxu0 %v12540_v31  ;;  %7129 = vmatmul.mubr.bf16.vlgmr.msra.gmra.mrb[48].mxu1 %v6861_v39  ;;  %v12608_v31 = vld [vmem:[%s17055_s5 + $0xe44] ss:$16 sps:$4 sm:$0xff]  }
 0x5db   : > { %7343 = vmatprep.subr.bf16.mxu0 %v12548_v14  ;;  %7385 = vmatpush1.bf16.msra.mxu1 %v12549_v62  ;;  %v12606_v14 = vld [vmem:[%s17055_s5 + $0xe40] ss:$16 sps:$4 sm:$0xff]   ;;  %v12617_v62 = vld [vmem:[%s17055_s5 + $0xe6c] ss:$16 sps:$4 sm:$0xff]  }
 0x5dc   : > { %7386 = vmatprep.subr.bf16.mxu1 %v12557_v41  ;;  %7416 = vmatprep.mubr.bf16.mxu1 %v12999_v53  ;;  %v12620_v41 = vld [vmem:[%s17055_s5 + $0xe84] ss:$16 sps:$4 sm:$0xff]  }
 0x5dd   : > { %7088 = vmatmul.mubr.bf16.vlgmr.msra.gmra.mrb[48].mxu0 %v6861_v39  ;;  %v12612_v39 = vld [vmem:[%s17055_s5 + $0xe60] ss:$16 sps:$4 sm:$0xff]  }
 0x5de   : > { %7344 = vmatpush1.bf16.msra.mxu0 %v12546_v63  ;;  %7375 = vmatprep.mubr.bf16.mxu0 %v12999_v53  ;;  %v12614_v63 = vld [vmem:[%s17055_s5 + $0xe64] ss:$16 sps:$4 sm:$0xff]  }
 0x5df   : > { %7345 = vmatprep.subr.bf16.mxu0 %v12554_v55  ;;  %7387 = vmatpush1.bf16.msra.mxu1 %v12555_v46  ;;  %v12615_v55 = vld [vmem:[%s17055_s5 + $0xe68] ss:$16 sps:$4 sm:$0xff]   ;;  %v12618_v46 = vld [vmem:[%s17055_s5 + $0xe80] ss:$16 sps:$4 sm:$0xff]  }
 0x5e0   : > { %7388 = vmatprep.subr.bf16.mxu1 %v12563_v15  ;;  %v7430_v15 = vld [vmem:[#allocation2 + $0xe] ss:$128 sm:$0x1] }
 0x5e2   : > { %7346 = vmatpush1.bf16.msra.mxu0 %v12552_v38  ;;  %v12623_v38 = vld [vmem:[%s17055_s5 + $0xe8c] ss:$16 sps:$4 sm:$0xff]  }
 0x5e3   : > { %7347 = vmatprep.subr.bf16.mxu0 %v12560_v47  ;;  %7389 = vmatpush1.bf16.msra.mxu1 %v12561_v19  ;;  %v12621_v47 = vld [vmem:[%s17055_s5 + $0xe88] ss:$16 sps:$4 sm:$0xff]   ;;  %v12626_v19 = vld [vmem:[%s17055_s5 + $0xea4] ss:$16 sps:$4 sm:$0xff]  }
 0x5e4   : > { %7390 = vmatprep.subr.bf16.mxu1 %v12569_v32  ;;  %v12624_v32 = vld [vmem:[%s17055_s5 + $0xea0] ss:$16 sps:$4 sm:$0xff]  }
 0x5e6   : > { %7348 = vmatpush1.bf16.msra.mxu0 %v12558_v42  ;;  %v7431_v42 = vld [vmem:[#allocation2 + $0xe] ss:$128 sm:$0x2] }
 0x5e7   : > { %7349 = vmatprep.subr.bf16.mxu0 %v12566_v10  ;;  %7391 = vmatpush1.bf16.msra.mxu1 %v12567_v4  ;;  %v12629_v10 = vld [vmem:[%s17055_s5 + $0xeac] ss:$16 sps:$4 sm:$0xff]  }
 0x5e8   : > { %7392 = vmatprep.subr.bf16.mxu1 %v12575_v44  ;;  %v7433_v4 = vld [vmem:[#allocation2 + $0xe] ss:$128 sm:$0x4]  ;;  %v12632_v44 = vld [vmem:[%s17055_s5 + $0xec4] ss:$16 sps:$4 sm:$0xff]  }
 0x5ea   : > { %7350 = vmatpush1.bf16.msra.mxu0 %v12564_v0  ;;  %v12627_v0 = vld [vmem:[%s17055_s5 + $0xea8] ss:$16 sps:$4 sm:$0xff]  }
 0x5eb   : > { %7351 = vmatprep.subr.bf16.mxu0 %v12572_v57  ;;  %7393 = vmatpush1.bf16.msra.mxu1 %v12573_v60  ;;  %v7432_v57 = vor.u32 %v7431_v42, %v7430_v15 }
 0x5ec   : > { %7394 = vmatprep.subr.bf16.mxu1 %v12581_v11 }
 0x5ed   : > { %v5402_v24 = vpop.f32.mrb[24].mxu1  ;;  %v7434_v7 = vor.u32 %v7433_v4, %v7432_v57  ;;  %v12681_v4 = vld [vmem:[%s17055_s5 + $0xfc8] ss:$16 sps:$4 sm:$0xff]  }
 0x5ee   : > { %7352 = vmatpush1.bf16.msra.mxu0 %v12570_v45  ;;  %v16218_v23 = vadd.f32 %v5402_v24, %v16108_v16  ;;  %v5404_v20 = vpop.f32.mrb[25].mxu1  ;;  %v12593_v16 = vld [vmem:[%s17055_s5 + $0xdec] ss:$16 sps:$4 sm:$0xff]  }
 0x5ef   : > { %7353 = vmatprep.subr.bf16.mxu0 %v12578_v48  ;;  %v16224_v18 = vadd.f32 %v5404_v20, %v16114_v35  ;;  %v5406_v51 = vpop.f32.mrb[26].mxu1  ;;  %7395 = vmatpush1.bf16.msra.mxu1 %v12579_v33  ;;  %v12599_v35 = vld [vmem:[%s17055_s5 + $0xe0c] ss:$16 sps:$4 sm:$0xff]   ;;  %v12633_v48 = vld [vmem:[%s17055_s5 + $0xec8] ss:$16 sps:$4 sm:$0xff]  }
 0x5f0   : > { %v5361_v27 = vpop.f32.mrb[24].mxu0  ;;  %v5407_v30 = vpop.f32.mrb[27].mxu1  ;;  %7396 = vmatprep.subr.bf16.mxu1 %v12587_v13  ;;  %v12635_v45 = vld [vmem:[%s17055_s5 + $0xecc] ss:$16 sps:$4 sm:$0xff]   ;;  %v12636_v20 = vld [vmem:[%s17055_s5 + $0xee0] ss:$16 sps:$4 sm:$0xff]  }
 0x5f1   : > { %v16215_v36 = vadd.f32 %v5361_v27, %v16105_v28  ;;  %v5363_v40 = vpop.f32.mrb[25].mxu0  ;;  %v12590_v28 = vld [vmem:[%s17055_s5 + $0xde4] ss:$16 sps:$4 sm:$0xff]   ;;  %v12642_v51 = vld [vmem:[%s17055_s5 + $0xf00] ss:$16 sps:$4 sm:$0xff]  }
 0x5f2   : > { %v16221_v1 = vadd.f32 %v5363_v40, %v16111_v17  ;;  %v5365_v50 = vpop.f32.mrb[26].mxu0  ;;  %7354 = vmatpush1.bf16.msra.mxu0 %v12576_v21  ;;  %v12596_v17 = vld [vmem:[%s17055_s5 + $0xe04] ss:$16 sps:$4 sm:$0xff]  }
 0x5f3   : > { %v5366_v61 = vpop.f32.mrb[27].mxu0  ;;  %7355 = vmatprep.subr.bf16.mxu0 %v12584_v12  ;;  %7397 = vmatpush1.bf16.msra.mxu1 %v12585_v59  ;;  %v12650_v30 = vld [vmem:[%s17055_s5 + $0xf24] ss:$16 sps:$4 sm:$0xff]  }
 0x5f4   : > { %7398 = vmatprep.subr.bf16.mxu1 %v12593_v16  ;;  %v12645_v61 = vld [vmem:[%s17055_s5 + $0xf08] ss:$16 sps:$4 sm:$0xff]   ;;  %v12648_v16 = vld [vmem:[%s17055_s5 + $0xf20] ss:$16 sps:$4 sm:$0xff]  }
 0x5f6   : > { %7356 = vmatpush1.bf16.msra.mxu0 %v12582_v34  ;;  %v7435_v34 = vld [vmem:[#allocation2 + $0xe] ss:$128 sm:$0x8] }
 0x5f7   : > { %7357 = vmatprep.subr.bf16.mxu0 %v12590_v28  ;;  %7399 = vmatpush1.bf16.msra.mxu1 %v12591_v56  ;;  %v7436_v40 = vor.u32 %v7435_v34, %v7434_v7  ;;  %v12653_v28 = vld [vmem:[%s17055_s5 + $0xf2c] ss:$16 sps:$4 sm:$0xff]   ;;  %v12684_v7 = vld [vmem:[%s17055_s5 + $0xfe0] ss:$16 sps:$4 sm:$0xff]  }
 0x5f8   : > { %7672 = vmatprep.subr.bf16.mxu1 %v12599_v35  ;;  %v12659_v56 = vld [vmem:[%s17055_s5 + $0xf4c] ss:$16 sps:$4 sm:$0xff]   ;;  %v12657_v35 = vld [vmem:[%s17055_s5 + $0xf48] ss:$16 sps:$4 sm:$0xff]   ;;  %v12690_v34 = vld [vmem:[%s17055_s5 + $0x1000] ss:$16 sps:$4 sm:$0xff]  }
 0x5f9   : > { %v7437_v50 = vpack.c.bf16 %v7436_v40, %v7436_v40  ;;  %v12699_v40 = vld [vmem:[%s17055_s5 + $0x1028] ss:$16 sps:$4 sm:$0xff]  }
 0x5fa   : > { %7358 = vmatpush1.bf16.msra.mxu0 %v12588_v43  ;;  %7417 = vmatmul.mubr.bf16.vlgmr.msra.gmra.mrb[52].mxu1 %v7149_v29  ;;  %v12656_v43 = vld [vmem:[%s17055_s5 + $0xf44] ss:$16 sps:$4 sm:$0xff]  }
 0x5fb   : > { %7631 = vmatprep.subr.bf16.mxu0 %v12596_v17  ;;  %7673 = vmatpush1.bf16.msra.mxu1 %v12597_v54  ;;  %v12654_v17 = vld [vmem:[%s17055_s5 + $0xf40] ss:$16 sps:$4 sm:$0xff]   ;;  %v12665_v54 = vld [vmem:[%s17055_s5 + $0xf6c] ss:$16 sps:$4 sm:$0xff]  }
 0x5fc   : > { %7674 = vmatprep.subr.bf16.mxu1 %v12605_v58  ;;  %7704 = vmatprep.mubr.bf16.mxu1 %v12999_v53  ;;  %v12668_v58 = vld [vmem:[%s17055_s5 + $0xf84] ss:$16 sps:$4 sm:$0xff]  }
 0x5fd   : > { %7376 = vmatmul.mubr.bf16.vlgmr.msra.gmra.mrb[52].mxu0 %v7149_v29  ;;  %v12660_v29 = vld [vmem:[%s17055_s5 + $0xf60] ss:$16 sps:$4 sm:$0xff]  }
 0x5fe   : > { %7632 = vmatpush1.bf16.msra.mxu0 %v12594_v5  ;;  %7663 = vmatprep.mubr.bf16.mxu0 %v12999_v53  ;;  %v12662_v5 = vld [vmem:[%s17055_s5 + $0xf64] ss:$16 sps:$4 sm:$0xff]  }
 0x5ff   : > { %7633 = vmatprep.subr.bf16.mxu0 %v12602_v49  ;;  %7675 = vmatpush1.bf16.msra.mxu1 %v12603_v2  ;;  %v12663_v49 = vld [vmem:[%s17055_s5 + $0xf68] ss:$16 sps:$4 sm:$0xff]   ;;  %v12666_v2 = vld [vmem:[%s17055_s5 + $0xf80] ss:$16 sps:$4 sm:$0xff]  }
 0x600   : > { %7676 = vmatprep.subr.bf16.mxu1 %v12611_v6  ;;  %v7718_v6 = vld [vmem:[#allocation2 + $0xf] ss:$128 sm:$0x1] }
 0x602   : > { %7634 = vmatpush1.bf16.msra.mxu0 %v12600_v22  ;;  %v12671_v22 = vld [vmem:[%s17055_s5 + $0xf8c] ss:$16 sps:$4 sm:$0xff]  }
 0x603   : > { %7635 = vmatprep.subr.bf16.mxu0 %v12608_v31  ;;  %7677 = vmatpush1.bf16.msra.mxu1 %v12609_v9  ;;  %v12669_v31 = vld [vmem:[%s17055_s5 + $0xf88] ss:$16 sps:$4 sm:$0xff]   ;;  %v12674_v9 = vld [vmem:[%s17055_s5 + $0xfa4] ss:$16 sps:$4 sm:$0xff]  }
 0x604   : > { %7678 = vmatprep.subr.bf16.mxu1 %v12617_v62  ;;  %v12672_v62 = vld [vmem:[%s17055_s5 + $0xfa0] ss:$16 sps:$4 sm:$0xff]  }
 0x606   : > { %7636 = vmatpush1.bf16.msra.mxu0 %v12606_v14  ;;  %v7719_v14 = vld [vmem:[#allocation2 + $0xf] ss:$128 sm:$0x2] }
 0x607   : > { %7637 = vmatprep.subr.bf16.mxu0 %v12614_v63  ;;  %7679 = vmatpush1.bf16.msra.mxu1 %v12615_v55  ;;  %v12677_v63 = vld [vmem:[%s17055_s5 + $0xfac] ss:$16 sps:$4 sm:$0xff]   ;;  %v12675_v55 = vld [vmem:[%s17055_s5 + $0xfa8] ss:$16 sps:$4 sm:$0xff]  }
 0x608   : > { %7680 = vmatprep.subr.bf16.mxu1 %v12623_v38  ;;  %v12680_v38 = vld [vmem:[%s17055_s5 + $0xfc4] ss:$16 sps:$4 sm:$0xff]  }
 0x60a   : > { %7638 = vmatpush1.bf16.msra.mxu0 %v12612_v39  ;;  %v7720_v39 = vor.u32 %v7719_v14, %v7718_v6 }
 0x60b   : > { %7639 = vmatprep.subr.bf16.mxu0 %v12620_v41  ;;  %7681 = vmatpush1.bf16.msra.mxu1 %v12621_v47  ;;  %v7721_v41 = vld [vmem:[#allocation2 + $0xf] ss:$128 sm:$0x4] }
 0x60c   : > { %7682 = vmatprep.subr.bf16.mxu1 %v12629_v10  ;;  %v7722_v57 = vor.u32 %v7721_v41, %v7720_v39  ;;  %v12726_v39 = vld [vmem:[%s17055_s5 + $0x10c0] ss:$16 sps:$4 sm:$0xff]  }
 0x60d   : > { %v5690_v60 = vpop.f32.mrb[28].mxu1 }
 0x60e   : > { %7640 = vmatpush1.bf16.msra.mxu0 %v12618_v46  ;;  %v16328_v21 = vadd.f32 %v5690_v60, %v16218_v23  ;;  %v5692_v25 = vpop.f32.mrb[29].mxu1  ;;  %v12641_v23 = vld [vmem:[%s17055_s5 + $0xeec] ss:$16 sps:$4 sm:$0xff]  }
 0x60f   : > { %7641 = vmatprep.subr.bf16.mxu0 %v12626_v19  ;;  %v16334_v13 = vadd.f32 %v5692_v25, %v16224_v18  ;;  %v5694_v24 = vpop.f32.mrb[30].mxu1  ;;  %7683 = vmatpush1.bf16.msra.mxu1 %v12627_v0  ;;  %v12647_v18 = vld [vmem:[%s17055_s5 + $0xf0c] ss:$16 sps:$4 sm:$0xff]   ;;  %v12678_v0 = vld [vmem:[%s17055_s5 + $0xfc0] ss:$16 sps:$4 sm:$0xff]  }
 0x610   : > { %v5649_v37 = vpop.f32.mrb[28].mxu0  ;;  %v5695_v3 = vpop.f32.mrb[31].mxu1  ;;  %7684 = vmatprep.subr.bf16.mxu1 %v12635_v45  ;;  %v12683_v46 = vld [vmem:[%s17055_s5 + $0xfcc] ss:$16 sps:$4 sm:$0xff]  }
 0x611   : > { %v16325_v11 = vadd.f32 %v5649_v37, %v16215_v36  ;;  %v5651_v33 = vpop.f32.mrb[29].mxu0  ;;  %v12638_v36 = vld [vmem:[%s17055_s5 + $0xee4] ss:$16 sps:$4 sm:$0xff]  }
 0x612   : > { %v16331_v12 = vadd.f32 %v5651_v33, %v16221_v1  ;;  %v5653_v27 = vpop.f32.mrb[30].mxu0  ;;  %7642 = vmatpush1.bf16.msra.mxu0 %v12624_v32  ;;  %v12644_v1 = vld [vmem:[%s17055_s5 + $0xf04] ss:$16 sps:$4 sm:$0xff]   ;;  %v12689_v33 = vld [vmem:[%s17055_s5 + $0xfec] ss:$16 sps:$4 sm:$0xff]  }
 0x613   : > { %v5654_v59 = vpop.f32.mrb[31].mxu0  ;;  %7643 = vmatprep.subr.bf16.mxu0 %v12632_v44  ;;  %7685 = vmatpush1.bf16.msra.mxu1 %v12633_v48  ;;  %v12695_v27 = vld [vmem:[%s17055_s5 + $0x100c] ss:$16 sps:$4 sm:$0xff]   ;;  %v12698_v3 = vld [vmem:[%s17055_s5 + $0x1024] ss:$16 sps:$4 sm:$0xff]  }
 0x614   : > { %7686 = vmatprep.subr.bf16.mxu1 %v12641_v23  ;;  %v12693_v59 = vld [vmem:[%s17055_s5 + $0x1008] ss:$16 sps:$4 sm:$0xff]   ;;  %v12696_v23 = vld [vmem:[%s17055_s5 + $0x1020] ss:$16 sps:$4 sm:$0xff]  }
 0x616   : > { %7644 = vmatpush1.bf16.msra.mxu0 %v12630_v8  ;;  %v7723_v8 = vld [vmem:[#allocation2 + $0xf] ss:$128 sm:$0x8] }
 0x617   : > { %7645 = vmatprep.subr.bf16.mxu0 %v12638_v36  ;;  %7687 = vmatpush1.bf16.msra.mxu1 %v12639_v26  ;;  %v7724_v25 = vor.u32 %v7723_v8, %v7722_v57  ;;  %v12701_v36 = vld [vmem:[%s17055_s5 + $0x102c] ss:$16 sps:$4 sm:$0xff]   ;;  %v12732_v57 = vld [vmem:[%s17055_s5 + $0x10e0] ss:$16 sps:$4 sm:$0xff]  }
 0x618   : > { %7960 = vmatprep.subr.bf16.mxu1 %v12647_v18  ;;  %v12707_v26 = vld [vmem:[%s17055_s5 + $0x104c] ss:$16 sps:$4 sm:$0xff]   ;;  %v12705_v18 = vld [vmem:[%s17055_s5 + $0x1048] ss:$16 sps:$4 sm:$0xff]   ;;  %v12738_v8 = vld [vmem:[%s17055_s5 + $0x1100] ss:$16 sps:$4 sm:$0xff]  }
 0x619   : > { %v7725_v24 = vpack.c.bf16 %v7724_v25, %v7724_v25  ;;  %v12747_v25 = vld [vmem:[%s17055_s5 + $0x1128] ss:$16 sps:$4 sm:$0xff]  }
 0x61a   : > { %7646 = vmatpush1.bf16.msra.mxu0 %v12636_v20  ;;  %7705 = vmatmul.mubr.bf16.vlgmr.msra.gmra.mrb[56].mxu1 %v7437_v50  ;;  %v12704_v20 = vld [vmem:[%s17055_s5 + $0x1044] ss:$16 sps:$4 sm:$0xff]  }
 0x61b   : > { %7919 = vmatprep.subr.bf16.mxu0 %v12644_v1  ;;  %7961 = vmatpush1.bf16.msra.mxu1 %v12645_v61  ;;  %v12702_v1 = vld [vmem:[%s17055_s5 + $0x1040] ss:$16 sps:$4 sm:$0xff]  }
 0x61c   : > { %7962 = vmatprep.subr.bf16.mxu1 %v12653_v28  ;;  %7992 = vmatprep.mubr.bf16.mxu1 %v12999_v53  ;;  %v12708_v61 = vld [vmem:[%s17055_s5 + $0x1060] ss:$16 sps:$4 sm:$0xff]   ;;  %v12716_v28 = vld [vmem:[%s17055_s5 + $0x1084] ss:$16 sps:$4 sm:$0xff]  }
 0x61d   : > { %7664 = vmatmul.mubr.bf16.vlgmr.msra.gmra.mrb[56].mxu0 %v7437_v50  ;;  %v12710_v50 = vld [vmem:[%s17055_s5 + $0x1064] ss:$16 sps:$4 sm:$0xff]  }
 0x61e   : > { %7920 = vmatpush1.bf16.msra.mxu0 %v12642_v51  ;;  %7951 = vmatprep.mubr.bf16.mxu0 %v12999_v53  ;;  %v12713_v51 = vld [vmem:[%s17055_s5 + $0x106c] ss:$16 sps:$4 sm:$0xff]  }
 0x61f   : > { %7921 = vmatprep.subr.bf16.mxu0 %v12650_v30  ;;  %7963 = vmatpush1.bf16.msra.mxu1 %v12651_v52  ;;  %v12711_v30 = vld [vmem:[%s17055_s5 + $0x1068] ss:$16 sps:$4 sm:$0xff]   ;;  %v12714_v52 = vld [vmem:[%s17055_s5 + $0x1080] ss:$16 sps:$4 sm:$0xff]  }
 0x620   : > { %7964 = vmatprep.subr.bf16.mxu1 %v12659_v56  ;;  %v8006_v56 = vld [vmem:[#allocation2 + $0x10] ss:$128 sm:$0x1] }
 0x622   : > { %7922 = vmatpush1.bf16.msra.mxu0 %v12648_v16  ;;  %v12719_v16 = vld [vmem:[%s17055_s5 + $0x108c] ss:$16 sps:$4 sm:$0xff]  }
 0x623   : > { %7923 = vmatprep.subr.bf16.mxu0 %v12656_v43  ;;  %7965 = vmatpush1.bf16.msra.mxu1 %v12657_v35  ;;  %v12717_v43 = vld [vmem:[%s17055_s5 + $0x1088] ss:$16 sps:$4 sm:$0xff]   ;;  %v12722_v35 = vld [vmem:[%s17055_s5 + $0x10a4] ss:$16 sps:$4 sm:$0xff]  }
 0x624   : > { %7966 = vmatprep.subr.bf16.mxu1 %v12665_v54  ;;  %v12720_v54 = vld [vmem:[%s17055_s5 + $0x10a0] ss:$16 sps:$4 sm:$0xff]  }
 0x626   : > { %7924 = vmatpush1.bf16.msra.mxu0 %v12654_v17  ;;  %v8007_v17 = vld [vmem:[#allocation2 + $0x10] ss:$128 sm:$0x2] }
 0x627   : > { %7925 = vmatprep.subr.bf16.mxu0 %v12662_v5  ;;  %7967 = vmatpush1.bf16.msra.mxu1 %v12663_v49  ;;  %v12725_v5 = vld [vmem:[%s17055_s5 + $0x10ac] ss:$16 sps:$4 sm:$0xff]   ;;  %v12723_v49 = vld [vmem:[%s17055_s5 + $0x10a8] ss:$16 sps:$4 sm:$0xff]  }
 0x628   : > { %7968 = vmatprep.subr.bf16.mxu1 %v12671_v22  ;;  %v12728_v22 = vld [vmem:[%s17055_s5 + $0x10c4] ss:$16 sps:$4 sm:$0xff]  }
 0x62a   : > { %7926 = vmatpush1.bf16.msra.mxu0 %v12660_v29  ;;  %v8008_v29 = vor.u32 %v8007_v17, %v8006_v56 }
 0x62b   : > { %7927 = vmatprep.subr.bf16.mxu0 %v12668_v58  ;;  %7969 = vmatpush1.bf16.msra.mxu1 %v12669_v31  ;;  %v8009_v58 = vld [vmem:[#allocation2 + $0x10] ss:$128 sm:$0x4] }
 0x62c   : > { %7970 = vmatprep.subr.bf16.mxu1 %v12677_v63  ;;  %v8010_v41 = vor.u32 %v8009_v58, %v8008_v29  ;;  %v12774_v29 = vld [vmem:[%s17055_s5 + $0x11c0] ss:$16 sps:$4 sm:$0xff]  }
 0x62d   : > { %v5978_v15 = vpop.f32.mrb[32].mxu1 }
 0x62e   : > { %7928 = vmatpush1.bf16.msra.mxu0 %v12666_v2  ;;  %v16432_v19 = vadd.f32 %v5978_v15, %v16328_v21  ;;  %v5980_v32 = vpop.f32.mrb[33].mxu1  ;;  %v12686_v21 = vld [vmem:[%s17055_s5 + $0xfe4] ss:$16 sps:$4 sm:$0xff]   ;;  %v12731_v2 = vld [vmem:[%s17055_s5 + $0x10cc] ss:$16 sps:$4 sm:$0xff]  }
 0x62f   : > { %7929 = vmatprep.subr.bf16.mxu0 %v12674_v9  ;;  %v16444_v45 = vadd.f32 %v5980_v32, %v16334_v13  ;;  %v5982_v60 = vpop.f32.mrb[34].mxu1  ;;  %7971 = vmatpush1.bf16.msra.mxu1 %v12675_v55  ;;  %v12692_v13 = vld [vmem:[%s17055_s5 + $0x1004] ss:$16 sps:$4 sm:$0xff]   ;;  %v12729_v55 = vld [vmem:[%s17055_s5 + $0x10c8] ss:$16 sps:$4 sm:$0xff]  }
 0x630   : > { %v5937_v47 = vpop.f32.mrb[32].mxu0  ;;  %7972 = vmatprep.subr.bf16.mxu1 %v12683_v46  ;;  %v12734_v32 = vld [vmem:[%s17055_s5 + $0x10e4] ss:$16 sps:$4 sm:$0xff]  }
 0x631   : > { %v16429_v42 = vadd.f32 %v5937_v47, %v16325_v11  ;;  %v5939_v10 = vpop.f32.mrb[33].mxu0  ;;  %v5983_v11 = vpop.f32.mrb[35].mxu1 }
 0x632   : > { %v16441_v44 = vadd.f32 %v5939_v10, %v16331_v12  ;;  %v5941_v37 = vpop.f32.mrb[34].mxu0  ;;  %7930 = vmatpush1.bf16.msra.mxu0 %v12672_v62  ;;  %v12687_v12 = vld [vmem:[%s17055_s5 + $0xfe8] ss:$16 sps:$4 sm:$0xff]   ;;  %v12746_v11 = vld [vmem:[%s17055_s5 + $0x1124] ss:$16 sps:$4 sm:$0xff]  }
 0x633   : > { %v5942_v48 = vpop.f32.mrb[35].mxu0  ;;  %7931 = vmatprep.subr.bf16.mxu0 %v12680_v38  ;;  %7973 = vmatpush1.bf16.msra.mxu1 %v12681_v4  ;;  %v12743_v37 = vld [vmem:[%s17055_s5 + $0x110c] ss:$16 sps:$4 sm:$0xff]  }
 0x634   : > { %7974 = vmatprep.subr.bf16.mxu1 %v12689_v33  ;;  %v12741_v48 = vld [vmem:[%s17055_s5 + $0x1108] ss:$16 sps:$4 sm:$0xff]   ;;  %v12744_v33 = vld [vmem:[%s17055_s5 + $0x1120] ss:$16 sps:$4 sm:$0xff]  }
 0x636   : > { %7932 = vmatpush1.bf16.msra.mxu0 %v12678_v0  ;;  %v12737_v0 = vld [vmem:[%s17055_s5 + $0x10ec] ss:$16 sps:$4 sm:$0xff]  }
 0x637   : > { %7933 = vmatprep.subr.bf16.mxu0 %v12686_v21  ;;  %7975 = vmatpush1.bf16.msra.mxu1 %v12687_v12  ;;  %v12749_v21 = vld [vmem:[%s17055_s5 + $0x112c] ss:$16 sps:$4 sm:$0xff]  }
 0x638   : > { %8248 = vmatprep.subr.bf16.mxu1 %v12695_v27  ;;  %v12755_v12 = vld [vmem:[%s17055_s5 + $0x114c] ss:$16 sps:$4 sm:$0xff]   ;;  %v12753_v27 = vld [vmem:[%s17055_s5 + $0x1148] ss:$16 sps:$4 sm:$0xff]  }
 0x63a   : > { %7934 = vmatpush1.bf16.msra.mxu0 %v12684_v7  ;;  %7993 = vmatmul.mubr.bf16.vlgmr.msra.gmra.mrb[60].mxu1 %v7725_v24  ;;  %v12752_v7 = vld [vmem:[%s17055_s5 + $0x1144] ss:$16 sps:$4 sm:$0xff]  }
 0x63b   : > { %8207 = vmatprep.subr.bf16.mxu0 %v12692_v13  ;;  %8249 = vmatpush1.bf16.msra.mxu1 %v12693_v59  ;;  %v12750_v13 = vld [vmem:[%s17055_s5 + $0x1140] ss:$16 sps:$4 sm:$0xff]  }
 0x63c   : > { %8250 = vmatprep.subr.bf16.mxu1 %v12701_v36  ;;  %8280 = vmatprep.mubr.bf16.mxu1 %v12999_v53  ;;  %v12756_v59 = vld [vmem:[%s17055_s5 + $0x1160] ss:$16 sps:$4 sm:$0xff]   ;;  %v12764_v36 = vld [vmem:[%s17055_s5 + $0x1184] ss:$16 sps:$4 sm:$0xff]  }
 0x63d   : > { %7952 = vmatmul.mubr.bf16.vlgmr.msra.gmra.mrb[60].mxu0 %v7725_v24  ;;  %v12758_v24 = vld [vmem:[%s17055_s5 + $0x1164] ss:$16 sps:$4 sm:$0xff]  }
 0x63e   : > { %8208 = vmatpush1.bf16.msra.mxu0 %v12690_v34  ;;  %8239 = vmatprep.mubr.bf16.mxu0 %v12999_v53  ;;  %v12761_v34 = vld [vmem:[%s17055_s5 + $0x116c] ss:$16 sps:$4 sm:$0xff]  }
 0x63f   : > { %8209 = vmatprep.subr.bf16.mxu0 %v12698_v3  ;;  %8251 = vmatpush1.bf16.msra.mxu1 %v12699_v40  ;;  %v12759_v3 = vld [vmem:[%s17055_s5 + $0x1168] ss:$16 sps:$4 sm:$0xff]   ;;  %v12762_v40 = vld [vmem:[%s17055_s5 + $0x1180] ss:$16 sps:$4 sm:$0xff]  }
 0x640   : > { %8252 = vmatprep.subr.bf16.mxu1 %v12707_v26  ;;  %v8294_v26 = vld [vmem:[#allocation2 + $0x11] ss:$128 sm:$0x1] }
 0x642   : > { %8210 = vmatpush1.bf16.msra.mxu0 %v12696_v23  ;;  %v12767_v23 = vld [vmem:[%s17055_s5 + $0x118c] ss:$16 sps:$4 sm:$0xff]  }
 0x643   : > { %8211 = vmatprep.subr.bf16.mxu0 %v12704_v20  ;;  %8253 = vmatpush1.bf16.msra.mxu1 %v12705_v18  ;;  %v12765_v20 = vld [vmem:[%s17055_s5 + $0x1188] ss:$16 sps:$4 sm:$0xff]   ;;  %v12770_v18 = vld [vmem:[%s17055_s5 + $0x11a4] ss:$16 sps:$4 sm:$0xff]  }
 0x644   : > { %8254 = vmatprep.subr.bf16.mxu1 %v12713_v51  ;;  %v12768_v51 = vld [vmem:[%s17055_s5 + $0x11a0] ss:$16 sps:$4 sm:$0xff]  }
 0x646   : > { %8212 = vmatpush1.bf16.msra.mxu0 %v12702_v1  ;;  %v8295_v1 = vld [vmem:[#allocation2 + $0x11] ss:$128 sm:$0x2] }
 0x647   : > { %8213 = vmatprep.subr.bf16.mxu0 %v12710_v50  ;;  %8255 = vmatpush1.bf16.msra.mxu1 %v12711_v30  ;;  %v12773_v50 = vld [vmem:[%s17055_s5 + $0x11ac] ss:$16 sps:$4 sm:$0xff]   ;;  %v12771_v30 = vld [vmem:[%s17055_s5 + $0x11a8] ss:$16 sps:$4 sm:$0xff]  }
 0x648   : > { %8256 = vmatprep.subr.bf16.mxu1 %v12719_v16  ;;  %v12776_v16 = vld [vmem:[%s17055_s5 + $0x11c4] ss:$16 sps:$4 sm:$0xff]  }
 0x64a   : > { %8214 = vmatpush1.bf16.msra.mxu0 %v12708_v61  ;;  %v8296_v61 = vor.u32 %v8295_v1, %v8294_v26 }
 0x64b   : > { %8215 = vmatprep.subr.bf16.mxu0 %v12716_v28  ;;  %8257 = vmatpush1.bf16.msra.mxu1 %v12717_v43  ;;  %v8297_v28 = vld [vmem:[#allocation2 + $0x11] ss:$128 sm:$0x4] }
 0x64c   : > { %8258 = vmatprep.subr.bf16.mxu1 %v12725_v5  ;;  %v8298_v58 = vor.u32 %v8297_v28, %v8296_v61  ;;  %v12822_v61 = vld [vmem:[%s17055_s5 + $0x12c0] ss:$16 sps:$4 sm:$0xff]  }
 0x64d   : > { %v6266_v6 = vpop.f32.mrb[36].mxu1 }
 0x64e   : > { %8216 = vmatpush1.bf16.msra.mxu0 %v12714_v52  ;;  %v16542_v9 = vadd.f32 %v6266_v6, %v16432_v19  ;;  %v6268_v62 = vpop.f32.mrb[37].mxu1  ;;  %v12779_v52 = vld [vmem:[%s17055_s5 + $0x11cc] ss:$16 sps:$4 sm:$0xff]  }
 0x64f   : > { %8217 = vmatprep.subr.bf16.mxu0 %v12722_v35  ;;  %v16554_v46 = vadd.f32 %v6268_v62, %v16444_v45  ;;  %v6270_v15 = vpop.f32.mrb[38].mxu1  ;;  %8259 = vmatpush1.bf16.msra.mxu1 %v12723_v49  ;;  %v12740_v45 = vld [vmem:[%s17055_s5 + $0x1104] ss:$16 sps:$4 sm:$0xff]   ;;  %v12777_v49 = vld [vmem:[%s17055_s5 + $0x11c8] ss:$16 sps:$4 sm:$0xff]  }
 0x650   : > { %v6225_v31 = vpop.f32.mrb[36].mxu0  ;;  %v6271_v10 = vpop.f32.mrb[39].mxu1  ;;  %8260 = vmatprep.subr.bf16.mxu1 %v12731_v2  ;;  %v12782_v62 = vld [vmem:[%s17055_s5 + $0x11e4] ss:$16 sps:$4 sm:$0xff]  }
 0x651   : > { %v16539_v14 = vadd.f32 %v6225_v31, %v16429_v42  ;;  %v6227_v63 = vpop.f32.mrb[37].mxu0  ;;  %v8011_v42 = vld [vmem:[#allocation2 + $0x10] ss:$128 sm:$0x8]  ;;  %v12794_v10 = vld [vmem:[%s17055_s5 + $0x1224] ss:$16 sps:$4 sm:$0xff]  }
 0x652   : > { %v16551_v38 = vadd.f32 %v6227_v63, %v16441_v44  ;;  %v6229_v47 = vpop.f32.mrb[38].mxu0  ;;  %8218 = vmatpush1.bf16.msra.mxu0 %v12720_v54  ;;  %v8012_v4 = vor.u32 %v8011_v42, %v8010_v41  ;;  %v12735_v44 = vld [vmem:[%s17055_s5 + $0x10e8] ss:$16 sps:$4 sm:$0xff]   ;;  %v12780_v41 = vld [vmem:[%s17055_s5 + $0x11e0] ss:$16 sps:$4 sm:$0xff]  }
 0x653   : > { %v6230_v19 = vpop.f32.mrb[39].mxu0  ;;  %8219 = vmatprep.subr.bf16.mxu0 %v12728_v22  ;;  %8261 = vmatpush1.bf16.msra.mxu1 %v12729_v55  ;;  %v12791_v47 = vld [vmem:[%s17055_s5 + $0x120c] ss:$16 sps:$4 sm:$0xff]   ;;  %v12786_v42 = vld [vmem:[%s17055_s5 + $0x1200] ss:$16 sps:$4 sm:$0xff]  }
 0x654   : > { %8262 = vmatprep.subr.bf16.mxu1 %v12737_v0  ;;  %v8013_v60 = vpack.c.bf16 %v8012_v4, %v8012_v4  ;;  %v12789_v19 = vld [vmem:[%s17055_s5 + $0x1208] ss:$16 sps:$4 sm:$0xff]   ;;  %v12792_v0 = vld [vmem:[%s17055_s5 + $0x1220] ss:$16 sps:$4 sm:$0xff]  }
 0x655   : > { %v12795_v4 = vld [vmem:[%s17055_s5 + $0x1228] ss:$16 sps:$4 sm:$0xff]  }
 0x656   : > { %8220 = vmatpush1.bf16.msra.mxu0 %v12726_v39  ;;  %v12785_v39 = vld [vmem:[%s17055_s5 + $0x11ec] ss:$16 sps:$4 sm:$0xff]  }
 0x657   : > { %8221 = vmatprep.subr.bf16.mxu0 %v12734_v32  ;;  %8263 = vmatpush1.bf16.msra.mxu1 %v12735_v44  ;;  %v12797_v32 = vld [vmem:[%s17055_s5 + $0x122c] ss:$16 sps:$4 sm:$0xff]  }
 0x658   : > { %8536 = vmatprep.subr.bf16.mxu1 %v12743_v37  ;;  %v12803_v44 = vld [vmem:[%s17055_s5 + $0x124c] ss:$16 sps:$4 sm:$0xff]   ;;  %v12801_v37 = vld [vmem:[%s17055_s5 + $0x1248] ss:$16 sps:$4 sm:$0xff]  }
 0x65a   : > { %8222 = vmatpush1.bf16.msra.mxu0 %v12732_v57  ;;  %8281 = vmatmul.mubr.bf16.vlgmr.msra.gmra.mrb[64].mxu1 %v8013_v60  ;;  %v12800_v57 = vld [vmem:[%s17055_s5 + $0x1244] ss:$16 sps:$4 sm:$0xff]  }
 0x65b   : > { %8495 = vmatprep.subr.bf16.mxu0 %v12740_v45  ;;  %8537 = vmatpush1.bf16.msra.mxu1 %v12741_v48  ;;  %v12798_v45 = vld [vmem:[%s17055_s5 + $0x1240] ss:$16 sps:$4 sm:$0xff]  }
 0x65c   : > { %8538 = vmatprep.subr.bf16.mxu1 %v12749_v21  ;;  %8568 = vmatprep.mubr.bf16.mxu1 %v12999_v53  ;;  %v12804_v48 = vld [vmem:[%s17055_s5 + $0x1260] ss:$16 sps:$4 sm:$0xff]   ;;  %v12812_v21 = vld [vmem:[%s17055_s5 + $0x1284] ss:$16 sps:$4 sm:$0xff]  }
 0x65d   : > { %8240 = vmatmul.mubr.bf16.vlgmr.msra.gmra.mrb[64].mxu0 %v8013_v60  ;;  %v12806_v60 = vld [vmem:[%s17055_s5 + $0x1264] ss:$16 sps:$4 sm:$0xff]  }
 0x65e   : > { %8496 = vmatpush1.bf16.msra.mxu0 %v12738_v8  ;;  %8527 = vmatprep.mubr.bf16.mxu0 %v12999_v53  ;;  %v12809_v8 = vld [vmem:[%s17055_s5 + $0x126c] ss:$16 sps:$4 sm:$0xff]  }
 0x65f   : > { %8497 = vmatprep.subr.bf16.mxu0 %v12746_v11  ;;  %8539 = vmatpush1.bf16.msra.mxu1 %v12747_v25  ;;  %v12807_v11 = vld [vmem:[%s17055_s5 + $0x1268] ss:$16 sps:$4 sm:$0xff]   ;;  %v12810_v25 = vld [vmem:[%s17055_s5 + $0x1280] ss:$16 sps:$4 sm:$0xff]  }
 0x660   : > { %8540 = vmatprep.subr.bf16.mxu1 %v12755_v12  ;;  %v8582_v12 = vld [vmem:[#allocation2 + $0x12] ss:$128 sm:$0x1] }
 0x662   : > { %8498 = vmatpush1.bf16.msra.mxu0 %v12744_v33  ;;  %v12815_v33 = vld [vmem:[%s17055_s5 + $0x128c] ss:$16 sps:$4 sm:$0xff]  }
 0x663   : > { %8499 = vmatprep.subr.bf16.mxu0 %v12752_v7  ;;  %8541 = vmatpush1.bf16.msra.mxu1 %v12753_v27  ;;  %v12813_v7 = vld [vmem:[%s17055_s5 + $0x1288] ss:$16 sps:$4 sm:$0xff]   ;;  %v12818_v27 = vld [vmem:[%s17055_s5 + $0x12a4] ss:$16 sps:$4 sm:$0xff]  }
 0x664   : > { %8542 = vmatprep.subr.bf16.mxu1 %v12761_v34  ;;  %v12816_v34 = vld [vmem:[%s17055_s5 + $0x12a0] ss:$16 sps:$4 sm:$0xff]  }
 0x666   : > { %8500 = vmatpush1.bf16.msra.mxu0 %v12750_v13  ;;  %v8583_v13 = vld [vmem:[#allocation2 + $0x12] ss:$128 sm:$0x2] }
 0x667   : > { %8501 = vmatprep.subr.bf16.mxu0 %v12758_v24  ;;  %8543 = vmatpush1.bf16.msra.mxu1 %v12759_v3  ;;  %v12821_v24 = vld [vmem:[%s17055_s5 + $0x12ac] ss:$16 sps:$4 sm:$0xff]   ;;  %v12819_v3 = vld [vmem:[%s17055_s5 + $0x12a8] ss:$16 sps:$4 sm:$0xff]  }
 0x668   : > { %8544 = vmatprep.subr.bf16.mxu1 %v12767_v23  ;;  %v12824_v23 = vld [vmem:[%s17055_s5 + $0x12c4] ss:$16 sps:$4 sm:$0xff]  }
 0x66a   : > { %8502 = vmatpush1.bf16.msra.mxu0 %v12756_v59  ;;  %v8584_v59 = vor.u32 %v8583_v13, %v8582_v12 }
 0x66b   : > { %8503 = vmatprep.subr.bf16.mxu0 %v12764_v36  ;;  %8545 = vmatpush1.bf16.msra.mxu1 %v12765_v20  ;;  %v8585_v36 = vld [vmem:[#allocation2 + $0x12] ss:$128 sm:$0x4] }
 0x66c   : > { %8546 = vmatprep.subr.bf16.mxu1 %v12773_v50  ;;  %v8586_v28 = vor.u32 %v8585_v36, %v8584_v59  ;;  %v12873_v59 = vld [vmem:[%s17055_s5 + $0x13c8] ss:$16 sps:$4 sm:$0xff]  }
 0x66d   : > { %v6554_v56 = vpop.f32.mrb[40].mxu1 }
 0x66e   : > { %8504 = vmatpush1.bf16.msra.mxu0 %v12762_v40  ;;  %v16652_v35 = vadd.f32 %v6554_v56, %v16542_v9  ;;  %v6556_v54 = vpop.f32.mrb[41].mxu1  ;;  %v12827_v40 = vld [vmem:[%s17055_s5 + $0x12cc] ss:$16 sps:$4 sm:$0xff]  }
 0x66f   : > { %8505 = vmatprep.subr.bf16.mxu0 %v12770_v18  ;;  %v16664_v2 = vadd.f32 %v6556_v54, %v16554_v46  ;;  %v6558_v6 = vpop.f32.mrb[42].mxu1  ;;  %8547 = vmatpush1.bf16.msra.mxu1 %v12771_v30  ;;  %v12788_v46 = vld [vmem:[%s17055_s5 + $0x1204] ss:$16 sps:$4 sm:$0xff]   ;;  %v12825_v30 = vld [vmem:[%s17055_s5 + $0x12c8] ss:$16 sps:$4 sm:$0xff]  }
 0x670   : > { %v6513_v43 = vpop.f32.mrb[40].mxu0  ;;  %v6559_v63 = vpop.f32.mrb[43].mxu1  ;;  %8548 = vmatprep.subr.bf16.mxu1 %v12779_v52  ;;  %v12830_v54 = vld [vmem:[%s17055_s5 + $0x12e4] ss:$16 sps:$4 sm:$0xff]  }
 0x671   : > { %v16649_v17 = vadd.f32 %v6513_v43, %v16539_v14  ;;  %v6515_v5 = vpop.f32.mrb[41].mxu0  ;;  %v8299_v14 = vld [vmem:[#allocation2 + $0x11] ss:$128 sm:$0x8]  ;;  %v12842_v63 = vld [vmem:[%s17055_s5 + $0x1324] ss:$16 sps:$4 sm:$0xff]  }
 0x672   : > { %v16661_v22 = vadd.f32 %v6515_v5, %v16551_v38  ;;  %v6517_v31 = vpop.f32.mrb[42].mxu0  ;;  %8506 = vmatpush1.bf16.msra.mxu0 %v12768_v51  ;;  %v8300_v55 = vor.u32 %v8299_v14, %v8298_v58  ;;  %v12783_v38 = vld [vmem:[%s17055_s5 + $0x11e8] ss:$16 sps:$4 sm:$0xff]   ;;  %v12828_v58 = vld [vmem:[%s17055_s5 + $0x12e0] ss:$16 sps:$4 sm:$0xff]  }
 0x673   : > { %v6518_v9 = vpop.f32.mrb[43].mxu0  ;;  %8507 = vmatprep.subr.bf16.mxu0 %v12776_v16  ;;  %8549 = vmatpush1.bf16.msra.mxu1 %v12777_v49  ;;  %v12839_v31 = vld [vmem:[%s17055_s5 + $0x130c] ss:$16 sps:$4 sm:$0xff]   ;;  %v12834_v14 = vld [vmem:[%s17055_s5 + $0x1300] ss:$16 sps:$4 sm:$0xff]  }
 0x674   : > { %8550 = vmatprep.subr.bf16.mxu1 %v12785_v39  ;;  %v8301_v15 = vpack.c.bf16 %v8300_v55, %v8300_v55  ;;  %v12837_v9 = vld [vmem:[%s17055_s5 + $0x1308] ss:$16 sps:$4 sm:$0xff]   ;;  %v12840_v39 = vld [vmem:[%s17055_s5 + $0x1320] ss:$16 sps:$4 sm:$0xff]  }
 0x675   : > { %v12843_v55 = vld [vmem:[%s17055_s5 + $0x1328] ss:$16 sps:$4 sm:$0xff]  }
 0x676   : > { %8508 = vmatpush1.bf16.msra.mxu0 %v12774_v29  ;;  %v12833_v29 = vld [vmem:[%s17055_s5 + $0x12ec] ss:$16 sps:$4 sm:$0xff]  }
 0x677   : > { %8509 = vmatprep.subr.bf16.mxu0 %v12782_v62  ;;  %8551 = vmatpush1.bf16.msra.mxu1 %v12783_v38  ;;  %v12845_v62 = vld [vmem:[%s17055_s5 + $0x132c] ss:$16 sps:$4 sm:$0xff]  }
 0x678   : > { %8824 = vmatprep.subr.bf16.mxu1 %v12791_v47  ;;  %v12851_v38 = vld [vmem:[%s17055_s5 + $0x134c] ss:$16 sps:$4 sm:$0xff]   ;;  %v12849_v47 = vld [vmem:[%s17055_s5 + $0x1348] ss:$16 sps:$4 sm:$0xff]  }
 0x67a   : > { %8510 = vmatpush1.bf16.msra.mxu0 %v12780_v41  ;;  %8569 = vmatmul.mubr.bf16.vlgmr.msra.gmra.mrb[68].mxu1 %v8301_v15  ;;  %v12848_v41 = vld [vmem:[%s17055_s5 + $0x1344] ss:$16 sps:$4 sm:$0xff]  }
 0x67b   : > { %8783 = vmatprep.subr.bf16.mxu0 %v12788_v46  ;;  %8825 = vmatpush1.bf16.msra.mxu1 %v12789_v19  ;;  %v12846_v46 = vld [vmem:[%s17055_s5 + $0x1340] ss:$16 sps:$4 sm:$0xff]   ;;  %v12855_v19 = vld [vmem:[%s17055_s5 + $0x1368] ss:$16 sps:$4 sm:$0xff]  }
 0x67c   : > { %8826 = vmatprep.subr.bf16.mxu1 %v12797_v32  ;;  %8856 = vmatprep.mubr.bf16.mxu1 %v12999_v53  ;;  %v12863_v32 = vld [vmem:[%s17055_s5 + $0x138c] ss:$16 sps:$4 sm:$0xff]  }
 0x67d   : > { %8528 = vmatmul.mubr.bf16.vlgmr.msra.gmra.mrb[68].mxu0 %v8301_v15  ;;  %v12854_v15 = vld [vmem:[%s17055_s5 + $0x1364] ss:$16 sps:$4 sm:$0xff]  }
 0x67e   : > { %8784 = vmatpush1.bf16.msra.mxu0 %v12786_v42  ;;  %8815 = vmatprep.mubr.bf16.mxu0 %v12999_v53  ;;  %v12852_v42 = vld [vmem:[%s17055_s5 + $0x1360] ss:$16 sps:$4 sm:$0xff]  }
 0x67f   : > { %8785 = vmatprep.subr.bf16.mxu0 %v12794_v10  ;;  %8827 = vmatpush1.bf16.msra.mxu1 %v12795_v4  ;;  %v12860_v10 = vld [vmem:[%s17055_s5 + $0x1384] ss:$16 sps:$4 sm:$0xff]   ;;  %v12861_v4 = vld [vmem:[%s17055_s5 + $0x1388] ss:$16 sps:$4 sm:$0xff]  }
 0x680   : > { %8828 = vmatprep.subr.bf16.mxu1 %v12803_v44  ;;  %v8871_v44 = vld [vmem:[#allocation2 + $0x13] ss:$128 sm:$0x2] }
 0x682   : > { %8786 = vmatpush1.bf16.msra.mxu0 %v12792_v0  ;;  %v12858_v0 = vld [vmem:[%s17055_s5 + $0x1380] ss:$16 sps:$4 sm:$0xff]  }
 0x683   : > { %8787 = vmatprep.subr.bf16.mxu0 %v12800_v57  ;;  %8829 = vmatpush1.bf16.msra.mxu1 %v12801_v37  ;;  %v8870_v57 = vld [vmem:[#allocation2 + $0x13] ss:$128 sm:$0x1]  ;;  %v12869_v37 = vld [vmem:[%s17055_s5 + $0x13ac] ss:$16 sps:$4 sm:$0xff]  }
 0x684   : > { %8830 = vmatprep.subr.bf16.mxu1 %v12809_v8  ;;  %v8872_v8 = vor.u32 %v8871_v44, %v8870_v57  ;;  %v12890_v57 = vld [vmem:[%s17057_s7 + $0x50] sm:$0xff]  }
 0x685   : > { %v12891_v44 = vld [vmem:[%s17057_s7 + $0xd0] sm:$0xff]  }
 0x686   : > { %8788 = vmatpush1.bf16.msra.mxu0 %v12798_v45  ;;  %v12866_v45 = vld [vmem:[%s17055_s5 + $0x13a4] ss:$16 sps:$4 sm:$0xff]  }
 0x687   : > { %8789 = vmatprep.subr.bf16.mxu0 %v12806_v60  ;;  %8831 = vmatpush1.bf16.msra.mxu1 %v12807_v11  ;;  %v12864_v60 = vld [vmem:[%s17055_s5 + $0x13a0] ss:$16 sps:$4 sm:$0xff]  }
 0x688   : > { %8832 = vmatprep.subr.bf16.mxu1 %v12815_v33  ;;  %v8873_v11 = vld [vmem:[#allocation2 + $0x13] ss:$128 sm:$0x4]  ;;  %v12875_v33 = vld [vmem:[%s17055_s5 + $0x13cc] ss:$16 sps:$4 sm:$0xff]  }
 0x68a   : > { %8790 = vmatpush1.bf16.msra.mxu0 %v12804_v48  ;;  %v12867_v48 = vld [vmem:[%s17055_s5 + $0x13a8] ss:$16 sps:$4 sm:$0xff]  }
 0x68b   : > { %8791 = vmatprep.subr.bf16.mxu0 %v12812_v21  ;;  %8833 = vmatpush1.bf16.msra.mxu1 %v12813_v7  ;;  %v12872_v21 = vld [vmem:[%s17055_s5 + $0x13c4] ss:$16 sps:$4 sm:$0xff]  }
 0x68c   : > { %8834 = vmatprep.subr.bf16.mxu1 %v12821_v24 }
 0x68d   : > { %v6842_v26 = vpop.f32.mrb[44].mxu1 }
 0x68e   : > { %8792 = vmatpush1.bf16.msra.mxu0 %v12810_v25  ;;  %v16762_v18 = vadd.f32 %v6842_v26, %v16652_v35  ;;  %v6844_v51 = vpop.f32.mrb[45].mxu1  ;;  %v8875_v26 = vld [vmem:[#allocation2 + $0x13] ss:$128 sm:$0x8] }
 0x68f   : > { %8793 = vmatprep.subr.bf16.mxu0 %v12818_v27  ;;  %v16774_v52 = vadd.f32 %v6844_v51, %v16664_v2  ;;  %v6846_v56 = vpop.f32.mrb[46].mxu1  ;;  %8835 = vmatpush1.bf16.msra.mxu1 %v12819_v3  ;;  %v12836_v2 = vld [vmem:[%s17055_s5 + $0x1304] ss:$16 sps:$4 sm:$0xff]   ;;  %v8874_v3 = vor.u32 %v8873_v11, %v8872_v8  ;;  %v12881_v51 = vld [vmem:[%s17055_s5 + $0x13ec] ss:$16 sps:$4 sm:$0xff]  }
 0x690   : > { %v6801_v20 = vpop.f32.mrb[44].mxu0  ;;  %v6847_v5 = vpop.f32.mrb[47].mxu1  ;;  %8836 = vmatprep.subr.bf16.mxu1 %v12827_v40  ;;  %v12895_v8 = vld [vmem:[%s17057_s7 + $0xd8] sm:$0xff]  }
 0x691   : > { %v16759_v1 = vadd.f32 %v6801_v20, %v16649_v17  ;;  %v6803_v50 = vpop.f32.mrb[45].mxu0  ;;  %v8587_v17 = vld [vmem:[#allocation2 + $0x12] ss:$128 sm:$0x8]  ;;  %v12897_v11 = vld [vmem:[%s17057_s7 + $0x98] sm:$0xff]  }
 0x692   : > { %v16771_v16 = vadd.f32 %v6803_v50, %v16661_v22  ;;  %v6805_v43 = vpop.f32.mrb[46].mxu0  ;;  %8794 = vmatpush1.bf16.msra.mxu0 %v12816_v34  ;;  %v8588_v49 = vor.u32 %v8587_v17, %v8586_v28  ;;  %v12831_v22 = vld [vmem:[%s17055_s5 + $0x12e8] ss:$16 sps:$4 sm:$0xff]   ;;  %v12870_v34 = vld [vmem:[%s17055_s5 + $0x13c0] ss:$16 sps:$4 sm:$0xff]  }
 0x693   : > { %v6806_v35 = vpop.f32.mrb[47].mxu0  ;;  %8795 = vmatprep.subr.bf16.mxu0 %v12824_v23  ;;  %8837 = vmatpush1.bf16.msra.mxu1 %v12825_v30  ;;  %v12878_v50 = vld [vmem:[%s17055_s5 + $0x13e4] ss:$16 sps:$4 sm:$0xff]   ;;  %v12876_v30 = vld [vmem:[%s17055_s5 + $0x13e0] ss:$16 sps:$4 sm:$0xff]  }
 0x694   : > { %8838 = vmatprep.subr.bf16.mxu1 %v12833_v29  ;;  %v8589_v6 = vpack.c.bf16 %v8588_v49, %v8588_v49  ;;  %v12879_v28 = vld [vmem:[%s17055_s5 + $0x13e8] ss:$16 sps:$4 sm:$0xff]  }
 0x696   : > { %8796 = vmatpush1.bf16.msra.mxu0 %v12822_v61  ;;  %v8876_v61 = vor.u32 %v8875_v26, %v8874_v3  ;;  %v12907_v26 = vld [vmem:[%s17057_s7 + $0xf0] sm:$0xff]  }
 0x697   : > { %8797 = vmatprep.subr.bf16.mxu0 %v12830_v54  ;;  %8839 = vmatpush1.bf16.msra.mxu1 %v12831_v22 }
 0x698   : > { %9112 = vmatprep.subr.bf16.mxu1 %v12839_v31 }
 0x69a   : > { %8798 = vmatpush1.bf16.msra.mxu0 %v12828_v58  ;;  %8857 = vmatmul.mubr.bf16.vlgmr.msra.gmra.mrb[72].mxu1 %v8589_v6 }
 0x69b   : > { %9071 = vmatprep.subr.bf16.mxu0 %v12836_v2  ;;  %9113 = vmatpush1.bf16.msra.mxu1 %v12837_v9 }
 0x69c   : > { %9114 = vmatprep.subr.bf16.mxu1 %v12845_v62  ;;  %9144 = vmatprep.mubr.bf16.mxu1 %v12999_v53 }
 0x69d   : > { %8816 = vmatmul.mubr.bf16.vlgmr.msra.gmra.mrb[72].mxu0 %v8589_v6 }
 0x69e   : > { %9072 = vmatpush1.bf16.msra.mxu0 %v12834_v14  ;;  %9103 = vmatprep.mubr.bf16.mxu0 %v12999_v53  ;;  %v12857_v53 = vld [vmem:[%s17055_s5 + $0x136c] ss:$16 sps:$4 sm:$0xff]  }
 0x69f   : > { %9073 = vmatprep.subr.bf16.mxu0 %v12842_v63  ;;  %9115 = vmatpush1.bf16.msra.mxu1 %v12843_v55 }
 0x6a0   : > { %9116 = vmatprep.subr.bf16.mxu1 %v12851_v38 }
 0x6a2   : > { %9074 = vmatpush1.bf16.msra.mxu0 %v12840_v39 }
 0x6a3   : > { %9075 = vmatprep.subr.bf16.mxu0 %v12848_v41  ;;  %9117 = vmatpush1.bf16.msra.mxu1 %v12849_v47 }
 0x6a4   : > { %9118 = vmatprep.subr.bf16.mxu1 %v12857_v53  ;;  %v12883_v53 = vld [vmem:[%s17057_s7 + $0xc0] sm:$0xff]  }
 0x6a6   : > { %9076 = vmatpush1.bf16.msra.mxu0 %v12846_v46 }
 0x6a7   : > { %9077 = vmatprep.subr.bf16.mxu0 %v12854_v15  ;;  %9119 = vmatpush1.bf16.msra.mxu1 %v12855_v19  ;;  %v12882_v15 = vld [vmem:[%s17057_s7 + $0x40] sm:$0xff]  }
 0x6a8   : > { %9120 = vmatprep.subr.bf16.mxu1 %v12863_v32  ;;  %v12885_v19 = vld [vmem:[%s17057_s7 + $0x80] sm:$0xff]   ;;  %v12887_v32 = vld [vmem:[%s17057_s7 + $0xc8] sm:$0xff]  }
 0x6aa   : > { %9078 = vmatpush1.bf16.msra.mxu0 %v12852_v42  ;;  %v12884_v42 = vld [vmem:[%s17057_s7] sm:$0xff]  }
 0x6ab   : > { %9079 = vmatprep.subr.bf16.mxu0 %v12860_v10  ;;  %9121 = vmatpush1.bf16.msra.mxu1 %v12861_v4  ;;  %v12886_v10 = vld [vmem:[%s17057_s7 + $0x48] sm:$0xff]  }
 0x6ac   : > { %9122 = vmatprep.subr.bf16.mxu1 %v12869_v37  ;;  %v12889_v4 = vld [vmem:[%s17057_s7 + $0x88] sm:$0xff]   ;;  %v12893_v37 = vld [vmem:[%s17057_s7 + $0x90] sm:$0xff]  }
 0x6ad   : > { %v7130_v7 = vpop.f32.mrb[48].mxu1 }
 0x6ae   : > { %9080 = vmatpush1.bf16.msra.mxu0 %v12858_v0  ;;  %v7139_v13 = vadd.f32 %v7130_v7, %v16762_v18  ;;  %v7132_v24 = vpop.f32.mrb[49].mxu1  ;;  %v12888_v0 = vld [vmem:[%s17057_s7 + $0x8] sm:$0xff]   ;;  %v12901_v7 = vld [vmem:[%s17057_s7 + $0xa0] sm:$0xff]  }
 0x6af   : > { %9081 = vmatprep.subr.bf16.mxu0 %v12866_v45  ;;  %v7140_v23 = vadd.f32 %v7132_v24, %v16774_v52  ;;  %v7134_v20 = vpop.f32.mrb[50].mxu1  ;;  %9123 = vmatpush1.bf16.msra.mxu1 %v12867_v48  ;;  %v12892_v45 = vld [vmem:[%s17057_s7 + $0x10] sm:$0xff]   ;;  %v12896_v48 = vld [vmem:[%s17057_s7 + $0x18] sm:$0xff]   ;;  %v12905_v24 = vld [vmem:[%s17057_s7 + $0xa8] sm:$0xff]  }
 0x6b0   : > { %v7089_v25 = vpop.f32.mrb[48].mxu0  ;;  %v7135_v18 = vpop.f32.mrb[51].mxu1  ;;  %9124 = vmatprep.subr.bf16.mxu1 %v12875_v33  ;;  %v12899_v33 = vld [vmem:[%s17057_s7 + $0xe0] sm:$0xff]   ;;  %v12906_v20 = vld [vmem:[%s17057_s7 + $0x70] sm:$0xff]  }
 0x6b1   : > { %v7137_v12 = vadd.f32 %v7089_v25, %v16759_v1  ;;  %v7091_v27 = vpop.f32.mrb[49].mxu0  ;;  %v12900_v25 = vld [vmem:[%s17057_s7 + $0x20] sm:$0xff]  }
 0x6b2   : > { %v7138_v36 = vadd.f32 %v7091_v27, %v16771_v16  ;;  %v7093_v40 = vpop.f32.mrb[50].mxu0  ;;  %9082 = vmatpush1.bf16.msra.mxu0 %v12864_v60  ;;  %v8877_v16 = vpack.c.bf16 %v8876_v61, %v8876_v61  ;;  %v12894_v60 = vld [vmem:[%s17057_s7 + $0x58] sm:$0xff]   ;;  %v12904_v27 = vld [vmem:[%s17057_s7 + $0x28] sm:$0xff]   ;;  %v12908_v61 = vld [vmem:[%s17057_s7 + $0x30] sm:$0xff]  }
 0x6b3   : > { %v7094_v1 = vpop.f32.mrb[51].mxu0  ;;  %9083 = vmatprep.subr.bf16.mxu0 %v12872_v21  ;;  %9125 = vmatpush1.bf16.msra.mxu1 %v12873_v59  ;;  %v12898_v21 = vld [vmem:[%s17057_s7 + $0x60] sm:$0xff]  }
 0x6b4   : > { %9126 = vmatprep.subr.bf16.mxu1 %v12881_v51 }
 0x6b6   : > { %9084 = vmatpush1.bf16.msra.mxu0 %v12870_v34 }
 0x6b7   : > { %9085 = vmatprep.subr.bf16.mxu0 %v12878_v50  ;;  %9127 = vmatpush1.bf16.msra.mxu1 %v12879_v28 }
 0x6b8   : > { %11353 = vmatprep.subr.bf16.mxu1 %v12883_v53 }
 0x6ba   : > { %9086 = vmatpush1.bf16.msra.mxu0 %v12876_v30  ;;  %9145 = vmatmul.mubr.bf16.vlgmr.msra.gmra.mrb[76].mxu1 %v8877_v16  ;;  %v12909_v30 = vld [vmem:[%s17057_s7 + $0xb0] sm:$0xff]  }
 0x6bb   : > { %11331 = vmatprep.subr.bf16.mxu0 %v12882_v15  ;;  %11354 = vmatpush3.bf16.msra.mxu1 %v12885_v19 }
 0x6bc   : > { %11355 = vmatprep.subr.bf16.mxu1 %v12887_v32 }
 0x6bd   : > { %9104 = vmatmul.mubr.bf16.vlgmr.msra.gmra.mrb[76].mxu0 %v8877_v16 }
 0x6be   : > { %11332 = vmatpush3.bf16.msra.mxu0 %v12884_v42 }
 0x6bf   : > { %11333 = vmatprep.subr.bf16.mxu0 %v12886_v10  ;;  %11356 = vmatpush3.bf16.msra.mxu1 %v12889_v4 }
 0x6c0   : > { %11357 = vmatprep.subr.bf16.mxu1 %v12891_v44 }
 0x6c2   : > { %11334 = vmatpush3.bf16.msra.mxu0 %v12888_v0 }
 0x6c3   : > { %11335 = vmatprep.subr.bf16.mxu0 %v12890_v57  ;;  %11358 = vmatpush3.bf16.msra.mxu1 %v12893_v37 }
 0x6c4   : > { %11359 = vmatprep.subr.bf16.mxu1 %v12895_v8 }
 0x6c6   : > { %11336 = vmatpush3.bf16.msra.mxu0 %v12892_v45 }
 0x6c7   : > { %11337 = vmatprep.subr.bf16.mxu0 %v12894_v60  ;;  %11360 = vmatpush3.bf16.msra.mxu1 %v12897_v11 }
 0x6c8   : > { %11361 = vmatprep.subr.bf16.mxu1 %v12899_v33 }
 0x6ca   : > { %11338 = vmatpush3.bf16.msra.mxu0 %v12896_v48 }
 0x6cb   : > { %11339 = vmatprep.subr.bf16.mxu0 %v12898_v21  ;;  %11362 = vmatpush3.bf16.msra.mxu1 %v12901_v7  ;;  %v17332_v21 = vlaneseq }
 0x6cd   : > { %v7418_v43 = vpop.f32.mrb[52].mxu1  ;;  %v9160_v33 = vshrl.u32 %v17332_v21, 7 }
 0x6ce   : > { %v7427_v17 = vadd.f32 %v7418_v43, %v7139_v13  ;;  %v7420_v5 = vpop.f32.mrb[53].mxu1  ;;  %v12903_v13 = vld [vmem:[%s17057_s7 + $0xe8] sm:$0xff]   ;;  %11340 = vmatpush3.bf16.msra.mxu0 %v12900_v25  ;;  %v12911_v43 = vld [vmem:[%s17057_s7 + $0xf8] sm:$0xff]  }
 0x6cf   : > { %v7428_v29 = vadd.f32 %v7420_v5, %v7140_v23  ;;  %v7422_v58 = vpop.f32.mrb[54].mxu1  ;;  %11363 = vmatprep.subr.bf16.mxu1 %v12903_v13  ;;  %v9161_v25 = vsub.s32 0, %v9160_v33  ;;  %v9169_v7 = vsub.s32 2, %v9160_v33  ;;  %v9165_v13 = vsub.s32 1, %v9160_v33 }
 0x6d0   : > { %v7377_v52 = vpop.f32.mrb[52].mxu0  ;;  %v7423_v2 = vpop.f32.mrb[55].mxu1  ;;  %11364 = vmatpush3.bf16.msra.mxu1 %v12905_v24 }
 0x6d1   : > { %v7425_v56 = vadd.f32 %v7377_v52, %v7137_v12  ;;  %v7379_v35 = vpop.f32.mrb[53].mxu0  ;;  %v12902_v12 = vld [vmem:[%s17057_s7 + $0x68] sm:$0xff]   ;;  %11365 = vmatprep.subr.bf16.mxu1 %v12907_v26  ;;  %v12910_v52 = vld [vmem:[%s17057_s7 + $0x78] sm:$0xff]  }
 0x6d2   : > { %v7426_v54 = vadd.f32 %v7379_v35, %v7138_v36  ;;  %v7381_v49 = vpop.f32.mrb[54].mxu0  ;;  %11341 = vmatprep.subr.bf16.mxu0 %v12902_v12  ;;  %v9157_v12 = vld [vmem:[%s17056_s6] sm:$0xf] }
 0x6d3   : > { %v7382_v22 = vpop.f32.mrb[55].mxu0  ;;  %11342 = vmatpush3.bf16.msra.mxu0 %v12904_v27  ;;  %v9173_v27 = vsub.s32 3, %v9160_v33  ;;  %v9162_v24 = vrot.slane %v9157_v12, %v9161_v25 }
 0x6d4   : > { %11343 = vmatprep.subr.bf16.mxu0 %v12906_v20  ;;  %11366 = vmatpush3.bf16.msra.mxu1 %v12909_v30 }
 0x6d5   : > { %11367 = vmatprep.subr.bf16.mxu1 %v12911_v43 }
 0x6d7   : > { %11344 = vmatpush3.bf16.msra.mxu0 %v12908_v61 }
 0x6d8   : > { %11345 = vmatprep.subr.bf16.mxu0 %v12910_v52 }
 0x6ed   : > { %v7706_v6 = vpop.f32.mrb[56].mxu1 }
 0x6ee   : > { %v7715_v9 = vadd.f32 %v7706_v6, %v7427_v17  ;;  %v7708_v62 = vpop.f32.mrb[57].mxu1  ;;  %v12913_v17 = vld [vmem:[%s17057_s7 + $0xb8] sm:$0xff]  }
 0x6ef   : > { %v7716_v55 = vadd.f32 %v7708_v62, %v7428_v29  ;;  %v7710_v38 = vpop.f32.mrb[58].mxu1  ;;  %11368 = vmatpush3.bf16.msra.mxu1 %v12913_v17 }
 0x6f0   : > { %v7665_v31 = vpop.f32.mrb[56].mxu0  ;;  %v7711_v47 = vpop.f32.mrb[59].mxu1 }
 0x6f1   : > { %v7713_v14 = vadd.f32 %v7665_v31, %v7425_v56  ;;  %v7667_v63 = vpop.f32.mrb[57].mxu0  ;;  %v12912_v56 = vld [vmem:[%s17057_s7 + $0x38] sm:$0xff]  }
 0x6f2   : > { %v7714_v39 = vadd.f32 %v7667_v63, %v7426_v54  ;;  %v7669_v41 = vpop.f32.mrb[58].mxu0  ;;  %11346 = vmatpush3.bf16.msra.mxu0 %v12912_v56 }
 0x6f3   : > { %v7670_v46 = vpop.f32.mrb[59].mxu0 }
 0x70d   : > { %v7994_v59 = vpop.f32.mrb[60].mxu1 }
 0x70e   : > { %v8003_v36 = vadd.f32 %v7994_v59, %v7715_v9  ;;  %v7996_v40 = vpop.f32.mrb[61].mxu1 }
 0x70f   : > { %v8004_v18 = vadd.f32 %v7996_v40, %v7716_v55  ;;  %v7998_v51 = vpop.f32.mrb[62].mxu1 }
 0x710   : > { %v7953_v34 = vpop.f32.mrb[60].mxu0  ;;  %v7999_v16 = vpop.f32.mrb[63].mxu1 }
 0x711   : > { %v8001_v3 = vadd.f32 %v7953_v34, %v7713_v14  ;;  %v7955_v23 = vpop.f32.mrb[61].mxu0  ;;  %v9170_v34 = vrot.slane %v9157_v12, %v9169_v7 }
 0x712   : > { %v8002_v1 = vadd.f32 %v7955_v23, %v7714_v39  ;;  %v7957_v50 = vpop.f32.mrb[62].mxu0  ;;  %v9174_v23 = vrot.slane %v9157_v12, %v9173_v27 }
 0x713   : > { %v7958_v28 = vpop.f32.mrb[63].mxu0 }
 0x72d   : > { %v8282_v5 = vpop.f32.mrb[64].mxu1 }
 0x72e   : > { %v8291_v29 = vadd.f32 %v8282_v5, %v8003_v36  ;;  %v8284_v58 = vpop.f32.mrb[65].mxu1  ;;  %v9166_v36 = vrot.slane %v9157_v12, %v9165_v13 }
 0x72f   : > { %v8292_v2 = vadd.f32 %v8284_v58, %v8004_v18  ;;  %v8286_v6 = vpop.f32.mrb[66].mxu1 }
 0x730   : > { %v8241_v35 = vpop.f32.mrb[64].mxu0  ;;  %v8287_v9 = vpop.f32.mrb[67].mxu1  ;;  %v11148_v6 = vld [vmem:[%s17058_s8] ss:$0 sm:$0xff] }
 0x731   : > { %v8289_v54 = vadd.f32 %v8241_v35, %v8001_v3  ;;  %v8243_v49 = vpop.f32.mrb[65].mxu0 }
 0x732   : > { %v8290_v22 = vadd.f32 %v8243_v49, %v8002_v1  ;;  %v8245_v31 = vpop.f32.mrb[66].mxu0 }
 0x733   : > { %v8246_v14 = vpop.f32.mrb[67].mxu0 }
 0x74d   : > { %v8570_v62 = vpop.f32.mrb[68].mxu1 }
 0x74e   : > { %v8579_v55 = vadd.f32 %v8570_v62, %v8291_v29  ;;  %v8572_v38 = vpop.f32.mrb[69].mxu1 }
 0x74f   : > { %v8580_v47 = vadd.f32 %v8572_v38, %v8292_v2  ;;  %v8574_v53 = vpop.f32.mrb[70].mxu1 }
 0x750   : > { %v8529_v63 = vpop.f32.mrb[68].mxu0  ;;  %v8575_v19 = vpop.f32.mrb[71].mxu1 }
 0x751   : > { %v8577_v39 = vadd.f32 %v8529_v63, %v8289_v54  ;;  %v8531_v41 = vpop.f32.mrb[69].mxu0 }
 0x752   : > { %v8578_v46 = vadd.f32 %v8531_v41, %v8290_v22  ;;  %v8533_v15 = vpop.f32.mrb[70].mxu0 }
 0x753   : > { %v8534_v42 = vpop.f32.mrb[71].mxu0 }
 0x76d   : > { %v8858_v32 = vpop.f32.mrb[72].mxu1 }
 0x76e   : > { %v8867_v4 = vadd.f32 %v8858_v32, %v8579_v55  ;;  %v8860_v44 = vpop.f32.mrb[73].mxu1 }
 0x76f   : > { %v8868_v37 = vadd.f32 %v8860_v44, %v8580_v47  ;;  %v8862_v8 = vpop.f32.mrb[74].mxu1  ;;  %v17333_v47 = vld [vmem:[#allocation29_spill] sm:$0xff] }
 0x770   : > { %v8817_v10 = vpop.f32.mrb[72].mxu0  ;;  %v8863_v11 = vpop.f32.mrb[75].mxu1  ;;  %vm9534_vm10 = vcmp.lt.s32.totalorder %v17333_v47, 10 }
 0x771   : > { %v8865_v0 = vadd.f32 %v8817_v10, %v8577_v39  ;;  %v8819_v57 = vpop.f32.mrb[73].mxu0 }
 0x772   : > { %v8866_v45 = vadd.f32 %v8819_v57, %v8578_v46  ;;  %v8821_v60 = vpop.f32.mrb[74].mxu0 }
 0x773   : > { %v8822_v48 = vpop.f32.mrb[75].mxu0 }
 0x78d   : > { %v9146_v3 = vpop.f32.mrb[76].mxu1 }
 0x78e   : > { %v9155_v20 = vadd.f32 %v9146_v3, %v8867_v4  ;;  %v9148_v1 = vpop.f32.mrb[77].mxu1 }
 0x78f   : > { %v9156_v50 = vadd.f32 %v9148_v1, %v8868_v37  ;;  %v9150_v61 = vpop.f32.mrb[78].mxu1 }
 0x790   : > { %v9105_v59 = vpop.f32.mrb[76].mxu0  ;;  %v9181_v28 = vadd.f32 %v9170_v34, %v9155_v20  ;;  %v9151_v52 = vpop.f32.mrb[79].mxu1 }
 0x791   : > { %v9153_v40 = vadd.f32 %v9105_v59, %v8865_v0  ;;  %v9107_v26 = vpop.f32.mrb[77].mxu0  ;;  %v9182_v56 = vadd.f32 %v9174_v23, %v9156_v50 }
 0x792   : > { %v9154_v18 = vadd.f32 %v9107_v26, %v8866_v45  ;;  %v9109_v51 = vpop.f32.mrb[78].mxu0  ;;  %v9185_v35 = vmax.f32 %v9181_v28, 0.0 }
 0x793   : > { %v9179_v30 = vadd.f32 %v9162_v24, %v9153_v40  ;;  %v9110_v16 = vpop.f32.mrb[79].mxu0  ;;  %v9186_v54 = vmax.f32 %v9182_v56, 0.0 }
 0x794   : > { %v9180_v43 = vadd.f32 %v9166_v36, %v9154_v18  ;;  %v9189_v22 = vpack.c.bf16 %v9185_v35, %v9185_v35 }
 0x795   : > { %v9183_v17 = vmax.f32 %v9179_v30, 0.0  ;;  %v9190_v49 = vpack.c.bf16 %v9186_v54, %v9186_v54 }
 0x796   : > { %v9184_v5 = vmax.f32 %v9180_v43, 0.0 }
 0x797   : > { %v9187_v58 = vpack.c.bf16 %v9183_v17, %v9183_v17  ;;  %9526 = vmatprep.mubr.bf16.mxu1 %v9190_v49 }
 0x798   : > { %v9188_v29 = vpack.c.bf16 %v9184_v5, %v9184_v5  ;;  %9527 = vmatmul.mubr.bf16.vlgmr.msra.gmra.mrb[80].mxu1 %v9189_v22 }
 0x79a   : > { %9486 = vmatprep.mubr.bf16.mxu0 %v9188_v29 }
 0x79b   : > { %9487 = vmatmul.mubr.bf16.vlgmr.msra.gmra.mrb[80].mxu0 %v9187_v58 }
 0x86b   : > { %v11369_v31 = vpop.f32.mrb[80].mxu1 }
 0x86c   : > { %v11370_v9 = vpop.f32.mrb[81].mxu1 }
 0x86d   : > { %v11371_v62 = vadd.f32 %v11370_v9, %v11369_v31  ;;  %v11372_v55 = vpop.f32.mrb[82].mxu1 }
 0x86e   : > { %v11347_v2 = vpop.f32.mrb[80].mxu0  ;;  %v11373_v38 = vpop.f32.mrb[83].mxu1 }
 0x86f   : > { %v11348_v14 = vpop.f32.mrb[81].mxu0 }
 0x870   : > { %v11349_v63 = vadd.f32 %v11348_v14, %v11347_v2  ;;  %v11350_v39 = vpop.f32.mrb[82].mxu0 }
 0x871   : > { %v11351_v41 = vpop.f32.mrb[83].mxu0 }
 0x872   : > { %v9489_v46 = vadd.f32 %v11349_v63, %v11148_v6 }
 0x874   : > { %v9529_v15 = vadd.f32 %v11371_v62, %v9489_v46 }
 0x876   : > { %v9535_v53 = vsel %vm9534_vm10, %v9529_v15, -inf }
 0x877   : > { %v9537_v42 = vsel %vm9536_vm11, %v9535_v53, -inf }
 0x878   : > { %9538 = vmax.xlane.f32.xlu0 %v9537_v42 }
 0x905   : > { %v9539_v19 = vpop.xlane.xlu0 %9538 }
 0x906   : > { %v9540_v10 = vsub.f32 %v9535_v53, %v9539_v19 }
 0x908   : > { %v9541_v32 = vmul.f32 1.442695, %v9540_v10 }
 0x90a   : > { %12914 = vpow2.f32 %v9541_v32 }
 0x914   : > { %v12915_v0 = vpop.eup %12914 }
 0x915   : > { %v9543_v4 = vsel %vm9536_vm11, %v12915_v0, 0.0 }
 0x916   : > { %9544 = vadd.xlane.f32.xlu0 %v9543_v4 }
 0x9a3   : > { %v9545_v57 = vpop.xlane.xlu0 %9544 }
 0x9a4   : > { %12916 = vlog2.f32 %v9545_v57 }
 0x9ae   : > { %v12917_v44 = vpop.eup %12916 }
 0x9af   : > { %v9547_v45 = vmul.f32 0.6931472, %v12917_v44 }
 0x9b1   : > { %v9548_v37 = vsub.f32 %v9540_v10, %v9547_v45 }
 0x9b3   : > { %v9549_v60 = vsel %vm9534_vm10, %v9548_v37, 0.0 }
 0x9b4   : > { %9550 = vst [vmem:[%s17335_s16] sm:$0xf] %v9549_v60 }
 0x9b5   : > { %12931 = shalt.err (!%p12928_p4)
}
 0x9b6   : > { %s12932_s27 = scalar_lea.hbm %s17002_s21, 64  ;;  %s12936_s22 = scalar_lea.hbm %s17059_s9, 128 }
 0x9b7   : > { %p12933_p7 = scmp.ne.s32.totalorder %s17002_s21, %s12932_s27  ;;  %p12937_p10 = scmp.lt.u32.totalorder %s17002_s21, %s17059_s9 }
 0x9b8   : > { %p12938_p11 = scmp.lt.u32.totalorder %s12936_s22, %s12932_s27  ;;  %p12940_p13 = scmp.lt.u32.totalorder %s12932_s27, %s17002_s21 }
 0x9b9   : > { %p12934_p8 = pnand %p12933_p7, %p13089_p5 }
 0x9ba   : > { %p12939_p12 = por %p12938_p11, %p12937_p10 }
 0x9bb   : > { %p12935_p9 = pneg %p12934_p8 }
 0x9bc   : > { %p12941_p0 = por %p12940_p13, %p12939_p12 }
 0x9be   : > { %p12942_p1 = pnand %p12941_p0, %p12935_p9 }
 0x9c0   : > { %12945 = shalt.err (!%p12942_p1)
}
 0x9c1   : > { %11791 = dma.vmem_to_hbm [thread:$0]  (%p13089_p5), %s17004_s18, 64, %s17002_s21, %s9552_s13  }
 0x9c2 PF: > { %p11797_p2 = scmp.ge.s32.totalorder %s12984_s12, 2  ;;  %s9577_s17 = sand.u32 1, %s12972_s30  }
 0x9c3   : > { %s9578_s23 = scalar_lea.sflag [#allocation4], %s9577_s17 }
 0x9c4   : > { %p11794_p3 = pnand %p11797_p2, %p13093_p6 }
 0x9c6   : > { %12967 = dma.done.wait (!%p11794_p3), %s9578_s23, 64  }
 0x9c7   : > { %12969 = vsyncadd (!%p11794_p3), %s9578_s23, 4294967232  ;;  %s17337_s24 = sld [smem:[#allocation6_spill]]  ;;  %p19_p4 = scmp.ge.s32.totalorder %s13076_s15, 4  }
 0x9c8   : > { %s17338_s30 = smov %s12976_s10  ;;  %s17339_s10 = smov %s12980_s11 }
 0x9c9   : > { %s17341_s12 = smov %s13076_s15  ;;  %21 = sbr.rel (!%p19_p4) target bundleno = 3 (0x3), region = 157 }
 0x9cd   : > { %s17340_s11 = smov %s17337_s24 }
 0x9d0   :  { %9583 = vsyncpa [#allocation4], 1 }
 0x9d1   :  { %9585 = vsyncpa [#allocation4 + $0x1], 1 }

</bundles_post_ra>
